<compile_context>
chip_gen: v6e
topology: v6e:2x2x1
jax: 0.10.0
libtpu: 0.0.40
codegen_flags: <defaults>
</compile_context>

<pallas_src>
import functools

import numpy as np
import jax
import jax.numpy as jnp
from jax.experimental import pallas as pl
from jax.experimental.pallas import tpu as pltpu

EPS = 1e-5
CHANNELS = 128      # Trans_gd hard-codes in_channel=128 in TransM
HEADS = 4
DIM_HEAD = 32
MLP_DIM = 128
DEPTH = 2


# --------------------------------------------------------------------------- #
# In-kernel helpers (traced inside the Pallas kernel)
# --------------------------------------------------------------------------- #
def _layernorm(x, g, b):
    mu = jnp.mean(x, axis=-1, keepdims=True)
    var = jnp.mean(jnp.square(x - mu), axis=-1, keepdims=True)
    return (x - mu) * jax.lax.rsqrt(var + EPS) * g + b


def _instance_norm(x):
    # InstanceNorm2d(affine=False): per (b, c) over the token axis.
    mu = jnp.mean(x, axis=1, keepdims=True)
    var = jnp.mean(jnp.square(x - mu), axis=1, keepdims=True)
    return (x - mu) * jax.lax.rsqrt(var + EPS)


def _batch_norm(x, g, b):
    # BatchNorm2d, training-mode batch statistics: per channel over (B, N).
    mu = jnp.mean(x, axis=(0, 1), keepdims=True)
    var = jnp.mean(jnp.square(x - mu), axis=(0, 1), keepdims=True)
    return (x - mu) * jax.lax.rsqrt(var + EPS) * g + b


def _erf(x):
    # Abramowitz & Stegun 7.1.26 rational approximation (max abs err ~1.5e-7).
    p = 0.3275911
    a1, a2, a3, a4, a5 = 0.254829592, -0.284496736, 1.421413741, -1.453152027, 1.061405429
    s = jnp.where(x >= 0.0, 1.0, -1.0)
    ax = x * s
    t = 1.0 / (1.0 + p * ax)
    poly = ((((a5 * t + a4) * t + a3) * t + a2) * t + a1) * t
    return s * (1.0 - poly * jnp.exp(-ax * ax))


def _gelu(x):
    # erf-GELU (matches torch.nn.GELU default up to ~1e-7)
    return 0.5 * x * (1.0 + _erf(x * 0.7071067811865476))


# --------------------------------------------------------------------------- #
# The single fused kernel
# --------------------------------------------------------------------------- #
def _trans_gd_kernel(
    # data + constants
    x_ref, eye_n_ref, eye_c_ref, mask_ref,
    # TransM (patch embedding + cls token)
    cls_ref, pe_w_ref, pe_b_ref,
    # transformer weights stacked over depth
    ln1g_ref, ln1b_ref, qw_ref, kw_ref, vw_ref, ow_ref, ob_ref,
    ln2g_ref, ln2b_ref, f1w_ref, f1b_ref, f2w_ref, f2b_ref,
    # ResNet_Block (embed_01)
    rw_ref, rb_ref, l1w_ref, l1b_ref, bn1g_ref, bn1b_ref,
    l2w_ref, l2b_ref, bn2g_ref, bn2b_ref,
    # linear_01 + CGNS_Block
    lw_ref, lb_ref, gw0_ref, gw1_ref, gb_ref, gbng_ref, gbnb_ref,
    # output
    o_ref,
    # scratch: (B*S, C) token slab
    t_ref,
    *, B, N, C, S, heads, dim_head, depth, scale):

    f32 = jnp.float32

    # ------------------------------------------------------------------ #
    # TransM: NCHW -> channels-last transpose (trans_b identity matmul),
    # patch_to_embedding, cls-token prepend; written into the VMEM slab.
    # ------------------------------------------------------------------ #
    eye_n = eye_n_ref[...]
    pe_w = pe_w_ref[...]
    pe_b = pe_b_ref[...]
    cls = cls_ref[...]
    for b in range(B):
        # x_nc = (x[b])^T  computed as eye_N @ x[b]^T  (MXU, trans_b style)
        x_nc = jax.lax.dot_general(eye_n, x_ref[b], (((1,), (1,)), ((), ())),
                                   preferred_element_type=f32)            # (N, C)
        emb = jnp.dot(x_nc, pe_w, preferred_element_type=f32) + pe_b      # (N, C)
        t_ref[b * S:b * S + 1, :] = cls
        t_ref[b * S + 1:(b + 1) * S, :] = emb

    t = t_ref[...]                           # (B*S, C) merged token slab
    mask = mask_ref[...]                     # block-diagonal additive mask

    # ------------------------------------------------------------------ #
    # Transformer (DEPTH PreNorm layers, fully unrolled, weights VMEM
    # resident).  Attention runs on the merged slab with the mask, so no
    # per-batch row slicing is needed; the out-projection is accumulated
    # per head (no concat).
    # ------------------------------------------------------------------ #
    for d in range(depth):
        # ---- PreNorm multi-head self-attention ----
        h = _layernorm(t, ln1g_ref[d], ln1b_ref[d])
        q = jnp.dot(h, qw_ref[d], preferred_element_type=f32)             # (BS, C)
        k = jnp.dot(h, kw_ref[d], preferred_element_type=f32)
        v = jnp.dot(h, vw_ref[d], preferred_element_type=f32)
        ow = ow_ref[d]                                                    # (C, C)
        acc = jnp.zeros_like(t)
        for hd in range(heads):
            sl = slice(hd * dim_head, (hd + 1) * dim_head)
            s = jax.lax.dot_general(q[:, sl], k[:, sl],
                                    (((1,), (1,)), ((), ())),
                                    preferred_element_type=f32) * scale   # (BS, BS)
            s = s + mask
            m = jnp.max(s, axis=-1, keepdims=True)
            p = jnp.exp(s - m)
            p = p / jnp.sum(p, axis=-1, keepdims=True)                    # exact softmax
            oh = jnp.dot(p, v[:, sl], preferred_element_type=f32)         # (BS, dh)
            acc = acc + jnp.dot(oh, ow[sl, :], preferred_element_type=f32)
        t = t + acc + ob_ref[d]

        # ---- PreNorm feed-forward ----
        h = _layernorm(t, ln2g_ref[d], ln2b_ref[d])
        h = jnp.dot(h, f1w_ref[d], preferred_element_type=f32) + f1b_ref[d]
        h = _gelu(h)
        h = jnp.dot(h, f2w_ref[d], preferred_element_type=f32) + f2b_ref[d]
        t = t + h

    # drop the cls token of each batch: rows {1..S-1} per batch -> (B*N, C)
    t_ref[...] = t
    x0 = jnp.concatenate(
        [t_ref[b * S + 1:(b + 1) * S, :] for b in range(B)], axis=0)      # (B*N, C)

    # ------------------------------------------------------------------ #
    # ResNet_Block (embed_01)
    # ------------------------------------------------------------------ #
    right = jnp.dot(x0, rw_ref[...], preferred_element_type=f32) + rb_ref[...]
    l = jnp.dot(x0, l1w_ref[...], preferred_element_type=f32) + l1b_ref[...]
    l = _batch_norm(_instance_norm(l.reshape(B, N, C)), bn1g_ref[...], bn1b_ref[...])
    l = jnp.maximum(l, 0.0)
    l = jnp.dot(l.reshape(B * N, C), l2w_ref[...],
                preferred_element_type=f32) + l2b_ref[...]
    l = _batch_norm(_instance_norm(l.reshape(B, N, C)), bn2g_ref[...], bn2b_ref[...])
    res = jnp.maximum(l + right.reshape(B, N, C), 0.0)                    # (B, N, C)

    # ------------------------------------------------------------------ #
    # linear_01 + CGNS_Block + final residual (channels-last graph math).
    # NOTE: BatchNorm below needs the full (B, N) slab -- do not tile /
    # core-split this section over B without a cross-core reduction.
    # ------------------------------------------------------------------ #
    w0 = jnp.sum(res * lw_ref[...], axis=-1) + lb_ref[...]                # (B, N)
    wa = jnp.maximum(jnp.tanh(w0), 0.0)                                   # relu(tanh(w0))
    A = wa[:, :, None] * wa[:, None, :] + eye_n                           # (B, N, N), A + I
    dinv = jax.lax.rsqrt(jnp.sum(A, axis=-1))                             # (1/D_out)**0.5
    g0 = jnp.einsum('bij,bjc->bic', A, res, preferred_element_type=f32)   # A @ x   (A sym)
    g1 = dinv[:, :, None] * jnp.einsum('bij,bjc->bic', A, dinv[:, :, None] * res,
                                       preferred_element_type=f32)        # D A D @ x
    y = (jnp.dot(g0.reshape(B * N, C), gw0_ref[...], preferred_element_type=f32)
         + jnp.dot(g1.reshape(B * N, C), gw1_ref[...], preferred_element_type=f32)
         + gb_ref[...]).reshape(B, N, C)
    y = jnp.maximum(_batch_norm(y, gbng_ref[...], gbnb_ref[...]), 0.0)
    out = y + res                                                         # out_g + out0

    # ------------------------------------------------------------------ #
    # channels-last -> NCHW transpose in-kernel (eye_C matmul) and store
    # ------------------------------------------------------------------ #
    eye_c = eye_c_ref[...]
    for b in range(B):
        o_ref[b, :, :] = jax.lax.dot_general(eye_c, out[b],
                                             (((1,), (1,)), ((), ())),
                                             preferred_element_type=f32)  # (C, N)


# --------------------------------------------------------------------------- #
# Parameters (deterministic, synthetic; all reshapes / stacking done at init)
# --------------------------------------------------------------------------- #
def init_params(key, channels=CHANNELS, depth=DEPTH, heads=HEADS,
                dim_head=DIM_HEAD, mlp_dim=MLP_DIM):
    C = channels
    inner = heads * dim_head
    assert inner == C, "kernel assumes heads*dim_head == channels (as in Trans_gd)"
    keys = iter(jax.random.split(key, 64))

    def rnd(shape, scale=0.05):
        return jax.random.normal(next(keys), shape, jnp.float32) * scale

    zeros = lambda s: jnp.zeros(s, jnp.float32)
    ones = lambda s: jnp.ones(s, jnp.float32)
    stack = lambda fn: jnp.stack([fn() for _ in range(depth)], axis=0)

    return dict(
        # TransM
        cls=rnd((1, C), 1.0),
        pe_w=rnd((C, C)), pe_b=zeros((1, C)),
        # transformer (stacked over depth; qkv pre-split into q/k/v)
        ln1_g=ones((depth, 1, C)), ln1_b=zeros((depth, 1, C)),
        q_w=stack(lambda: rnd((C, inner))),
        k_w=stack(lambda: rnd((C, inner))),
        v_w=stack(lambda: rnd((C, inner))),
        out_w=stack(lambda: rnd((inner, C))), out_b=zeros((depth, 1, C)),
        ln2_g=ones((depth, 1, C)), ln2_b=zeros((depth, 1, C)),
        ff1_w=stack(lambda: rnd((C, mlp_dim))), ff1_b=zeros((depth, 1, mlp_dim)),
        ff2_w=stack(lambda: rnd((mlp_dim, C))), ff2_b=zeros((depth, 1, C)),
        # ResNet_Block (embed_01)
        r_w=rnd((C, C)), r_b=zeros((1, C)),
        l1_w=rnd((C, C)), l1_b=zeros((1, C)),
        bn1_g=ones((1, C)), bn1_b=zeros((1, C)),
        l2_w=rnd((C, C)), l2_b=zeros((1, C)),
        bn2_g=ones((1, C)), bn2_b=zeros((1, C)),
        # linear_01
        lin01_w=rnd((1, C)), lin01_b=zeros((1, 1)),
        # CGNS conv (2C -> C) pre-split into the A-path / L-path halves + BN
        g_w0=rnd((C, C)), g_w1=rnd((C, C)), g_b=zeros((1, C)),
        gbn_g=ones((1, C)), gbn_b=zeros((1, C)),
    )


# --------------------------------------------------------------------------- #
# Forward pass: ONE pallas_call; the wrapper only squeezes/expands the W=1 dim.
# --------------------------------------------------------------------------- #
def _full_spec(shape):
    nd = len(shape)
    return pl.BlockSpec(tuple(int(s) for s in shape), lambda i, nd=nd: (0,) * nd)


def trans_gd_forward(params, x_nchw):
    B, C, N, W = x_nchw.shape                         # (B, C, N, 1)
    assert W == 1 and C == CHANNELS
    S = N + 1
    depth = int(params["q_w"].shape[0])

    x = x_nchw[..., 0]                                # (B, C, N), free reshape

    # constants (folded at trace time; no per-step XLA work)
    eye_n = jnp.asarray(np.eye(N, dtype=np.float32))
    eye_c = jnp.asarray(np.eye(C, dtype=np.float32))
    bid = np.arange(B * S) // S
    mask = jnp.asarray(
        np.where(bid[:, None] == bid[None, :], 0.0, -1e30).astype(np.float32))

    kern = functools.partial(
        _trans_gd_kernel, B=B, N=N, C=C, S=S, heads=HEADS,
        dim_head=DIM_HEAD, depth=depth, scale=DIM_HEAD ** -0.5)

    inputs = (
        x, eye_n, eye_c, mask,
        params["cls"], params["pe_w"], params["pe_b"],
        params["ln1_g"], params["ln1_b"],
        params["q_w"], params["k_w"], params["v_w"],
        params["out_w"], params["out_b"],
        params["ln2_g"], params["ln2_b"],
        params["ff1_w"], params["ff1_b"],
        params["ff2_w"], params["ff2_b"],
        params["r_w"], params["r_b"],
        params["l1_w"], params["l1_b"],
        params["bn1_g"], params["bn1_b"],
        params["l2_w"], params["l2_b"],
        params["bn2_g"], params["bn2_b"],
        params["lin01_w"], params["lin01_b"],
        params["g_w0"], params["g_w1"], params["g_b"],
        params["gbn_g"], params["gbn_b"],
    )

    out_cn = pl.pallas_call(
        kern,
        grid=(1,),
        in_specs=[_full_spec(a.shape) for a in inputs],
        out_specs=pl.BlockSpec((B, C, N), lambda i: (0, 0, 0)),
        out_shape=jax.ShapeDtypeStruct((B, C, N), jnp.float32),
        scratch_shapes=[pltpu.VMEM((B * S, C), jnp.float32)],
    )(*inputs)

    return out_cn[..., None]                          # back to NCHW (B, C, N, 1)


# --------------------------------------------------------------------------- #
if __name__ == "__main__":
    key = jax.random.PRNGKey(0)
    kp, kx = jax.random.split(key)

    B, C, N = 2, CHANNELS, 16      # C must be 128 (hard-coded in Trans_gd), W = 1
    params = init_params(kp)
    x = jax.random.normal(kx, (B, C, N, 1), jnp.float32)

    out = jax.jit(trans_gd_forward)(params, x)
    out = jax.block_until_ready(out)
    assert out.shape == (B, C, N, 1), out.shape
    assert bool(jnp.all(jnp.isfinite(out)))
    print("KERNEL_OK")
</pallas_src>

<mosaic_0001>
module attributes {stable_mosaic.version = 11 : i64} {
  func.func @_trans_gd_kernel(%arg0: i32, %arg1: memref<2x128x16xf32, #tpu.memory_space<vmem>>, %arg2: memref<16x16xf32, #tpu.memory_space<vmem>>, %arg3: memref<128x128xf32, #tpu.memory_space<vmem>>, %arg4: memref<34x34xf32, #tpu.memory_space<vmem>>, %arg5: memref<1x128xf32, #tpu.memory_space<vmem>>, %arg6: memref<128x128xf32, #tpu.memory_space<vmem>>, %arg7: memref<1x128xf32, #tpu.memory_space<vmem>>, %arg8: memref<2x1x128xf32, #tpu.memory_space<vmem>>, %arg9: memref<2x1x128xf32, #tpu.memory_space<vmem>>, %arg10: memref<2x128x128xf32, #tpu.memory_space<vmem>>, %arg11: memref<2x128x128xf32, #tpu.memory_space<vmem>>, %arg12: memref<2x128x128xf32, #tpu.memory_space<vmem>>, %arg13: memref<2x128x128xf32, #tpu.memory_space<vmem>>, %arg14: memref<2x1x128xf32, #tpu.memory_space<vmem>>, %arg15: memref<2x1x128xf32, #tpu.memory_space<vmem>>, %arg16: memref<2x1x128xf32, #tpu.memory_space<vmem>>, %arg17: memref<2x128x128xf32, #tpu.memory_space<vmem>>, %arg18: memref<2x1x128xf32, #tpu.memory_space<vmem>>, %arg19: memref<2x128x128xf32, #tpu.memory_space<vmem>>, %arg20: memref<2x1x128xf32, #tpu.memory_space<vmem>>, %arg21: memref<128x128xf32, #tpu.memory_space<vmem>>, %arg22: memref<1x128xf32, #tpu.memory_space<vmem>>, %arg23: memref<128x128xf32, #tpu.memory_space<vmem>>, %arg24: memref<1x128xf32, #tpu.memory_space<vmem>>, %arg25: memref<1x128xf32, #tpu.memory_space<vmem>>, %arg26: memref<1x128xf32, #tpu.memory_space<vmem>>, %arg27: memref<128x128xf32, #tpu.memory_space<vmem>>, %arg28: memref<1x128xf32, #tpu.memory_space<vmem>>, %arg29: memref<1x128xf32, #tpu.memory_space<vmem>>, %arg30: memref<1x128xf32, #tpu.memory_space<vmem>>, %arg31: memref<1x128xf32, #tpu.memory_space<vmem>>, %arg32: memref<1x1xf32, #tpu.memory_space<vmem>>, %arg33: memref<128x128xf32, #tpu.memory_space<vmem>>, %arg34: memref<128x128xf32, #tpu.memory_space<vmem>>, %arg35: memref<1x128xf32, #tpu.memory_space<vmem>>, %arg36: memref<1x128xf32, #tpu.memory_space<vmem>>, %arg37: memref<1x128xf32, #tpu.memory_space<vmem>>, %arg38: memref<2x128x16xf32, #tpu.memory_space<vmem>>, %arg39: memref<34x128xf32, #tpu.memory_space<vmem>>) attributes {dimension_semantics = [#tpu.dimension_semantics<arbitrary>], iteration_bounds = array<i64: 1>, scalar_prefetch = 0 : i64, scratch_operands = 1 : i64, tpu.core_type = #tpu.core_type<tc>, window_params = [{pipeline_mode = #tpu.pipeline_mode<synchronous>, transform_indices = @transform_0, window_bounds = array<i64: 2, 128, 16>}, {pipeline_mode = #tpu.pipeline_mode<synchronous>, transform_indices = @transform_1, window_bounds = array<i64: 16, 16>}, {pipeline_mode = #tpu.pipeline_mode<synchronous>, transform_indices = @transform_2, window_bounds = array<i64: 128, 128>}, {pipeline_mode = #tpu.pipeline_mode<synchronous>, transform_indices = @transform_3, window_bounds = array<i64: 34, 34>}, {pipeline_mode = #tpu.pipeline_mode<synchronous>, transform_indices = @transform_4, window_bounds = array<i64: 1, 128>}, {pipeline_mode = #tpu.pipeline_mode<synchronous>, transform_indices = @transform_5, window_bounds = array<i64: 128, 128>}, {pipeline_mode = #tpu.pipeline_mode<synchronous>, transform_indices = @transform_6, window_bounds = array<i64: 1, 128>}, {pipeline_mode = #tpu.pipeline_mode<synchronous>, transform_indices = @transform_7, window_bounds = array<i64: 2, 1, 128>}, {pipeline_mode = #tpu.pipeline_mode<synchronous>, transform_indices = @transform_8, window_bounds = array<i64: 2, 1, 128>}, {pipeline_mode = #tpu.pipeline_mode<synchronous>, transform_indices = @transform_9, window_bounds = array<i64: 2, 128, 128>}, {pipeline_mode = #tpu.pipeline_mode<synchronous>, transform_indices = @transform_10, window_bounds = array<i64: 2, 128, 128>}, {pipeline_mode = #tpu.pipeline_mode<synchronous>, transform_indices = @transform_11, window_bounds = array<i64: 2, 128, 128>}, {pipeline_mode = #tpu.pipeline_mode<synchronous>, transform_indices = @transform_12, window_bounds = array<i64: 2, 128, 128>}, {pipeline_mode = #tpu.pipeline_mode<synchronous>, transform_indices = @transform_13, window_bounds = array<i64: 2, 1, 128>}, {pipeline_mode = #tpu.pipeline_mode<synchronous>, transform_indices = @transform_14, window_bounds = array<i64: 2, 1, 128>}, {pipeline_mode = #tpu.pipeline_mode<synchronous>, transform_indices = @transform_15, window_bounds = array<i64: 2, 1, 128>}, {pipeline_mode = #tpu.pipeline_mode<synchronous>, transform_indices = @transform_16, window_bounds = array<i64: 2, 128, 128>}, {pipeline_mode = #tpu.pipeline_mode<synchronous>, transform_indices = @transform_17, window_bounds = array<i64: 2, 1, 128>}, {pipeline_mode = #tpu.pipeline_mode<synchronous>, transform_indices = @transform_18, window_bounds = array<i64: 2, 128, 128>}, {pipeline_mode = #tpu.pipeline_mode<synchronous>, transform_indices = @transform_19, window_bounds = array<i64: 2, 1, 128>}, {pipeline_mode = #tpu.pipeline_mode<synchronous>, transform_indices = @transform_20, window_bounds = array<i64: 128, 128>}, {pipeline_mode = #tpu.pipeline_mode<synchronous>, transform_indices = @transform_21, window_bounds = array<i64: 1, 128>}, {pipeline_mode = #tpu.pipeline_mode<synchronous>, transform_indices = @transform_22, window_bounds = array<i64: 128, 128>}, {pipeline_mode = #tpu.pipeline_mode<synchronous>, transform_indices = @transform_23, window_bounds = array<i64: 1, 128>}, {pipeline_mode = #tpu.pipeline_mode<synchronous>, transform_indices = @transform_24, window_bounds = array<i64: 1, 128>}, {pipeline_mode = #tpu.pipeline_mode<synchronous>, transform_indices = @transform_25, window_bounds = array<i64: 1, 128>}, {pipeline_mode = #tpu.pipeline_mode<synchronous>, transform_indices = @transform_26, window_bounds = array<i64: 128, 128>}, {pipeline_mode = #tpu.pipeline_mode<synchronous>, transform_indices = @transform_27, window_bounds = array<i64: 1, 128>}, {pipeline_mode = #tpu.pipeline_mode<synchronous>, transform_indices = @transform_28, window_bounds = array<i64: 1, 128>}, {pipeline_mode = #tpu.pipeline_mode<synchronous>, transform_indices = @transform_29, window_bounds = array<i64: 1, 128>}, {pipeline_mode = #tpu.pipeline_mode<synchronous>, transform_indices = @transform_30, window_bounds = array<i64: 1, 128>}, {pipeline_mode = #tpu.pipeline_mode<synchronous>, transform_indices = @transform_31, window_bounds = array<i64: 1, 1>}, {pipeline_mode = #tpu.pipeline_mode<synchronous>, transform_indices = @transform_32, window_bounds = array<i64: 128, 128>}, {pipeline_mode = #tpu.pipeline_mode<synchronous>, transform_indices = @transform_33, window_bounds = array<i64: 128, 128>}, {pipeline_mode = #tpu.pipeline_mode<synchronous>, transform_indices = @transform_34, window_bounds = array<i64: 1, 128>}, {pipeline_mode = #tpu.pipeline_mode<synchronous>, transform_indices = @transform_35, window_bounds = array<i64: 1, 128>}, {pipeline_mode = #tpu.pipeline_mode<synchronous>, transform_indices = @transform_36, window_bounds = array<i64: 1, 128>}, {pipeline_mode = #tpu.pipeline_mode<synchronous>, transform_indices = @transform_37, window_bounds = array<i64: 2, 128, 16>}]} {
    %c0 = arith.constant 0 : index
    %c0_0 = arith.constant 0 : index
    %0 = vector.load %arg2[%c0, %c0_0] : memref<16x16xf32, #tpu.memory_space<vmem>>, vector<16x16xf32>
    %c0_1 = arith.constant 0 : index
    %c0_2 = arith.constant 0 : index
    %1 = vector.load %arg6[%c0_1, %c0_2] : memref<128x128xf32, #tpu.memory_space<vmem>>, vector<128x128xf32>
    %c0_3 = arith.constant 0 : index
    %c0_4 = arith.constant 0 : index
    %2 = vector.load %arg7[%c0_3, %c0_4] : memref<1x128xf32, #tpu.memory_space<vmem>>, vector<1x128xf32>
    %c0_5 = arith.constant 0 : index
    %c0_6 = arith.constant 0 : index
    %3 = vector.load %arg5[%c0_5, %c0_6] : memref<1x128xf32, #tpu.memory_space<vmem>>, vector<1x128xf32>
    %c0_7 = arith.constant 0 : index
    %c0_8 = arith.constant 0 : index
    %c0_9 = arith.constant 0 : index
    %4 = vector.load %arg1[%c0_7, %c0_8, %c0_9] : memref<2x128x16xf32, #tpu.memory_space<vmem>>, vector<1x128x16xf32>
    %5 = vector.shape_cast %4 : vector<1x128x16xf32> to vector<128x16xf32>
    %cst = arith.constant dense<0.000000e+00> : vector<16x128xf32>
    %6 = tpu.matmul %0, %5, %cst {dimension_numbers = #tpu.dot_dimension_numbers<[1], [1], [0], [0], [0, 0, 1, 0], [], []>} : vector<16x16xf32>, vector<128x16xf32>, vector<16x128xf32> -> vector<16x128xf32>
    %cst_10 = arith.constant dense<0.000000e+00> : vector<16x128xf32>
    %7 = tpu.matmul %6, %1, %cst_10 {dimension_numbers = #tpu.dot_dimension_numbers<[1], [0], [0], [1], [0, 0, 1, 1], [], []>} : vector<16x128xf32>, vector<128x128xf32>, vector<16x128xf32> -> vector<16x128xf32>
    %8 = vector.broadcast %2 : vector<1x128xf32> to vector<16x128xf32>
    %9 = arith.addf %7, %8 : vector<16x128xf32>
    %c0_11 = arith.constant 0 : index
    %c0_12 = arith.constant 0 : index
    %10 = vector.load %arg39[%c0_11, %c0_12] : memref<34x128xf32, #tpu.memory_space<vmem>>, vector<1x128xf32>
    tpu.vector_store %arg39[%c0_11, %c0_12], %3 {strides = array<i32>} : memref<34x128xf32, #tpu.memory_space<vmem>>, vector<1x128xf32>,
    %c1 = arith.constant 1 : index
    %c0_13 = arith.constant 0 : index
    %11 = vector.load %arg39[%c1, %c0_13] : memref<34x128xf32, #tpu.memory_space<vmem>>, vector<16x128xf32>
    tpu.vector_store %arg39[%c1, %c0_13], %9 {strides = array<i32>} : memref<34x128xf32, #tpu.memory_space<vmem>>, vector<16x128xf32>,
    %c1_14 = arith.constant 1 : index
    %c0_15 = arith.constant 0 : index
    %c0_16 = arith.constant 0 : index
    %12 = vector.load %arg1[%c1_14, %c0_15, %c0_16] : memref<2x128x16xf32, #tpu.memory_space<vmem>>, vector<1x128x16xf32>
    %13 = vector.shape_cast %12 : vector<1x128x16xf32> to vector<128x16xf32>
    %cst_17 = arith.constant dense<0.000000e+00> : vector<16x128xf32>
    %14 = tpu.matmul %0, %13, %cst_17 {dimension_numbers = #tpu.dot_dimension_numbers<[1], [1], [0], [0], [0, 0, 1, 0], [], []>} : vector<16x16xf32>, vector<128x16xf32>, vector<16x128xf32> -> vector<16x128xf32>
    %cst_18 = arith.constant dense<0.000000e+00> : vector<16x128xf32>
    %15 = tpu.matmul %14, %1, %cst_18 {dimension_numbers = #tpu.dot_dimension_numbers<[1], [0], [0], [1], [0, 0, 1, 1], [], []>} : vector<16x128xf32>, vector<128x128xf32>, vector<16x128xf32> -> vector<16x128xf32>
    %16 = vector.broadcast %2 : vector<1x128xf32> to vector<16x128xf32>
    %17 = arith.addf %15, %16 : vector<16x128xf32>
    %c17 = arith.constant 17 : index
    %c0_19 = arith.constant 0 : index
    %18 = vector.load %arg39[%c17, %c0_19] : memref<34x128xf32, #tpu.memory_space<vmem>>, vector<1x128xf32>
    tpu.vector_store %arg39[%c17, %c0_19], %3 {strides = array<i32>} : memref<34x128xf32, #tpu.memory_space<vmem>>, vector<1x128xf32>,
    %c18 = arith.constant 18 : index
    %c0_20 = arith.constant 0 : index
    %19 = vector.load %arg39[%c18, %c0_20] : memref<34x128xf32, #tpu.memory_space<vmem>>, vector<16x128xf32>
    tpu.vector_store %arg39[%c18, %c0_20], %17 {strides = array<i32>} : memref<34x128xf32, #tpu.memory_space<vmem>>, vector<16x128xf32>,
    %c0_21 = arith.constant 0 : index
    %c0_22 = arith.constant 0 : index
    %20 = vector.load %arg39[%c0_21, %c0_22] : memref<34x128xf32, #tpu.memory_space<vmem>>, vector<34x128xf32>
    %c0_23 = arith.constant 0 : index
    %c0_24 = arith.constant 0 : index
    %21 = vector.load %arg4[%c0_23, %c0_24] : memref<34x34xf32, #tpu.memory_space<vmem>>, vector<34x34xf32>
    %c0_25 = arith.constant 0 : index
    %c0_26 = arith.constant 0 : index
    %c0_27 = arith.constant 0 : index
    %22 = vector.load %arg8[%c0_25, %c0_26, %c0_27] : memref<2x1x128xf32, #tpu.memory_space<vmem>>, vector<1x1x128xf32>
    %23 = vector.shape_cast %22 : vector<1x1x128xf32> to vector<1x128xf32>
    %c0_28 = arith.constant 0 : index
    %c0_29 = arith.constant 0 : index
    %c0_30 = arith.constant 0 : index
    %24 = vector.load %arg9[%c0_28, %c0_29, %c0_30] : memref<2x1x128xf32, #tpu.memory_space<vmem>>, vector<1x1x128xf32>
    %25 = vector.shape_cast %24 : vector<1x1x128xf32> to vector<1x128xf32>
    %cst_31 = arith.constant dense<0.000000e+00> : vector<34xf32>
    %26 = vector.multi_reduction <add>, %20, %cst_31 [1] : vector<34x128xf32> to vector<34xf32>
    %27 = vector.shape_cast %26 : vector<34xf32> to vector<34x1xf32>
    %cst_32 = arith.constant 1.280000e+02 : f32
    %28 = vector.broadcast %cst_32 : f32 to vector<34x1xf32>
    %29 = arith.divf %27, %28 : vector<34x1xf32>
    %30 = vector.broadcast %29 : vector<34x1xf32> to vector<34x128xf32>
    %31 = arith.subf %20, %30 : vector<34x128xf32>
    %32 = arith.mulf %31, %31 : vector<34x128xf32>
    %cst_33 = arith.constant dense<0.000000e+00> : vector<34xf32>
    %33 = vector.multi_reduction <add>, %32, %cst_33 [1] : vector<34x128xf32> to vector<34xf32>
    %34 = vector.shape_cast %33 : vector<34xf32> to vector<34x1xf32>
    %cst_34 = arith.constant 1.280000e+02 : f32
    %35 = vector.broadcast %cst_34 : f32 to vector<34x1xf32>
    %36 = arith.divf %34, %35 : vector<34x1xf32>
    %37 = vector.broadcast %29 : vector<34x1xf32> to vector<34x128xf32>
    %38 = arith.subf %20, %37 : vector<34x128xf32>
    %cst_35 = arith.constant 9.99999974E-6 : f32
    %39 = vector.broadcast %cst_35 : f32 to vector<34x1xf32>
    %40 = arith.addf %36, %39 : vector<34x1xf32>
    %41 = math.rsqrt %40 : vector<34x1xf32>
    %42 = vector.broadcast %41 : vector<34x1xf32> to vector<34x128xf32>
    %43 = arith.mulf %38, %42 : vector<34x128xf32>
    %44 = vector.broadcast %23 : vector<1x128xf32> to vector<34x128xf32>
    %45 = arith.mulf %43, %44 : vector<34x128xf32>
    %46 = vector.broadcast %25 : vector<1x128xf32> to vector<34x128xf32>
    %47 = arith.addf %45, %46 : vector<34x128xf32>
    %c0_36 = arith.constant 0 : index
    %c0_37 = arith.constant 0 : index
    %c0_38 = arith.constant 0 : index
    %48 = vector.load %arg10[%c0_36, %c0_37, %c0_38] : memref<2x128x128xf32, #tpu.memory_space<vmem>>, vector<1x128x128xf32>
    %49 = vector.shape_cast %48 : vector<1x128x128xf32> to vector<128x128xf32>
    %cst_39 = arith.constant dense<0.000000e+00> : vector<34x128xf32>
    %50 = tpu.matmul %47, %49, %cst_39 {dimension_numbers = #tpu.dot_dimension_numbers<[1], [0], [0], [1], [0, 0, 1, 1], [], []>} : vector<34x128xf32>, vector<128x128xf32>, vector<34x128xf32> -> vector<34x128xf32>
    %c0_40 = arith.constant 0 : index
    %c0_41 = arith.constant 0 : index
    %c0_42 = arith.constant 0 : index
    %51 = vector.load %arg11[%c0_40, %c0_41, %c0_42] : memref<2x128x128xf32, #tpu.memory_space<vmem>>, vector<1x128x128xf32>
    %52 = vector.shape_cast %51 : vector<1x128x128xf32> to vector<128x128xf32>
    %cst_43 = arith.constant dense<0.000000e+00> : vector<34x128xf32>
    %53 = tpu.matmul %47, %52, %cst_43 {dimension_numbers = #tpu.dot_dimension_numbers<[1], [0], [0], [1], [0, 0, 1, 1], [], []>} : vector<34x128xf32>, vector<128x128xf32>, vector<34x128xf32> -> vector<34x128xf32>
    %c0_44 = arith.constant 0 : index
    %c0_45 = arith.constant 0 : index
    %c0_46 = arith.constant 0 : index
    %54 = vector.load %arg12[%c0_44, %c0_45, %c0_46] : memref<2x128x128xf32, #tpu.memory_space<vmem>>, vector<1x128x128xf32>
    %55 = vector.shape_cast %54 : vector<1x128x128xf32> to vector<128x128xf32>
    %cst_47 = arith.constant dense<0.000000e+00> : vector<34x128xf32>
    %56 = tpu.matmul %47, %55, %cst_47 {dimension_numbers = #tpu.dot_dimension_numbers<[1], [0], [0], [1], [0, 0, 1, 1], [], []>} : vector<34x128xf32>, vector<128x128xf32>, vector<34x128xf32> -> vector<34x128xf32>
    %c0_48 = arith.constant 0 : index
    %c0_49 = arith.constant 0 : index
    %c0_50 = arith.constant 0 : index
    %57 = vector.load %arg13[%c0_48, %c0_49, %c0_50] : memref<2x128x128xf32, #tpu.memory_space<vmem>>, vector<1x128x128xf32>
    %58 = vector.shape_cast %57 : vector<1x128x128xf32> to vector<128x128xf32>
    %cst_51 = arith.constant 0.000000e+00 : f32
    %59 = vector.broadcast %cst_51 : f32 to vector<34x128xf32>
    %60 = vector.extract_strided_slice %50 {offsets = [0, 0], sizes = [34, 32], strides = [1, 1]} : vector<34x128xf32> to vector<34x32xf32>
    %61 = vector.extract_strided_slice %53 {offsets = [0, 0], sizes = [34, 32], strides = [1, 1]} : vector<34x128xf32> to vector<34x32xf32>
    %cst_52 = arith.constant dense<0.000000e+00> : vector<34x34xf32>
    %62 = tpu.matmul %60, %61, %cst_52 {dimension_numbers = #tpu.dot_dimension_numbers<[1], [1], [0], [0], [0, 0, 1, 0], [], []>} : vector<34x32xf32>, vector<34x32xf32>, vector<34x34xf32> -> vector<34x34xf32>
    %cst_53 = arith.constant 0.176776692 : f32
    %63 = vector.broadcast %cst_53 : f32 to vector<34x34xf32>
    %64 = arith.mulf %62, %63 : vector<34x34xf32>
    %65 = arith.addf %64, %21 : vector<34x34xf32>
    %cst_54 = arith.constant dense<0xFF800000> : vector<34xf32>
    %66 = vector.multi_reduction <maximumf>, %65, %cst_54 [1] : vector<34x34xf32> to vector<34xf32>
    %67 = vector.shape_cast %66 : vector<34xf32> to vector<34x1xf32>
    %68 = vector.broadcast %67 : vector<34x1xf32> to vector<34x34xf32>
    %69 = arith.subf %65, %68 : vector<34x34xf32>
    %70 = math.exp %69 : vector<34x34xf32>
    %cst_55 = arith.constant dense<0.000000e+00> : vector<34xf32>
    %71 = vector.multi_reduction <add>, %70, %cst_55 [1] : vector<34x34xf32> to vector<34xf32>
    %72 = vector.shape_cast %71 : vector<34xf32> to vector<34x1xf32>
    %73 = vector.broadcast %72 : vector<34x1xf32> to vector<34x34xf32>
    %74 = arith.divf %70, %73 : vector<34x34xf32>
    %75 = vector.extract_strided_slice %56 {offsets = [0, 0], sizes = [34, 32], strides = [1, 1]} : vector<34x128xf32> to vector<34x32xf32>
    %cst_56 = arith.constant dense<0.000000e+00> : vector<34x32xf32>
    %76 = tpu.matmul %74, %75, %cst_56 {dimension_numbers = #tpu.dot_dimension_numbers<[1], [0], [0], [1], [0, 0, 1, 1], [], []>} : vector<34x34xf32>, vector<34x32xf32>, vector<34x32xf32> -> vector<34x32xf32>
    %77 = vector.extract_strided_slice %58 {offsets = [0, 0], sizes = [32, 128], strides = [1, 1]} : vector<128x128xf32> to vector<32x128xf32>
    %cst_57 = arith.constant dense<0.000000e+00> : vector<34x128xf32>
    %78 = tpu.matmul %76, %77, %cst_57 {dimension_numbers = #tpu.dot_dimension_numbers<[1], [0], [0], [1], [0, 0, 1, 1], [], []>} : vector<34x32xf32>, vector<32x128xf32>, vector<34x128xf32> -> vector<34x128xf32>
    %79 = arith.addf %59, %78 : vector<34x128xf32>
    %80 = vector.extract_strided_slice %50 {offsets = [0, 32], sizes = [34, 32], strides = [1, 1]} : vector<34x128xf32> to vector<34x32xf32>
    %81 = vector.extract_strided_slice %53 {offsets = [0, 32], sizes = [34, 32], strides = [1, 1]} : vector<34x128xf32> to vector<34x32xf32>
    %cst_58 = arith.constant dense<0.000000e+00> : vector<34x34xf32>
    %82 = tpu.matmul %80, %81, %cst_58 {dimension_numbers = #tpu.dot_dimension_numbers<[1], [1], [0], [0], [0, 0, 1, 0], [], []>} : vector<34x32xf32>, vector<34x32xf32>, vector<34x34xf32> -> vector<34x34xf32>
    %cst_59 = arith.constant 0.176776692 : f32
    %83 = vector.broadcast %cst_59 : f32 to vector<34x34xf32>
    %84 = arith.mulf %82, %83 : vector<34x34xf32>
    %85 = arith.addf %84, %21 : vector<34x34xf32>
    %cst_60 = arith.constant dense<0xFF800000> : vector<34xf32>
    %86 = vector.multi_reduction <maximumf>, %85, %cst_60 [1] : vector<34x34xf32> to vector<34xf32>
    %87 = vector.shape_cast %86 : vector<34xf32> to vector<34x1xf32>
    %88 = vector.broadcast %87 : vector<34x1xf32> to vector<34x34xf32>
    %89 = arith.subf %85, %88 : vector<34x34xf32>
    %90 = math.exp %89 : vector<34x34xf32>
    %cst_61 = arith.constant dense<0.000000e+00> : vector<34xf32>
    %91 = vector.multi_reduction <add>, %90, %cst_61 [1] : vector<34x34xf32> to vector<34xf32>
    %92 = vector.shape_cast %91 : vector<34xf32> to vector<34x1xf32>
    %93 = vector.broadcast %92 : vector<34x1xf32> to vector<34x34xf32>
    %94 = arith.divf %90, %93 : vector<34x34xf32>
    %95 = vector.extract_strided_slice %56 {offsets = [0, 32], sizes = [34, 32], strides = [1, 1]} : vector<34x128xf32> to vector<34x32xf32>
    %cst_62 = arith.constant dense<0.000000e+00> : vector<34x32xf32>
    %96 = tpu.matmul %94, %95, %cst_62 {dimension_numbers = #tpu.dot_dimension_numbers<[1], [0], [0], [1], [0, 0, 1, 1], [], []>} : vector<34x34xf32>, vector<34x32xf32>, vector<34x32xf32> -> vector<34x32xf32>
    %97 = vector.extract_strided_slice %58 {offsets = [32, 0], sizes = [32, 128], strides = [1, 1]} : vector<128x128xf32> to vector<32x128xf32>
    %cst_63 = arith.constant dense<0.000000e+00> : vector<34x128xf32>
    %98 = tpu.matmul %96, %97, %cst_63 {dimension_numbers = #tpu.dot_dimension_numbers<[1], [0], [0], [1], [0, 0, 1, 1], [], []>} : vector<34x32xf32>, vector<32x128xf32>, vector<34x128xf32> -> vector<34x128xf32>
    %99 = arith.addf %79, %98 : vector<34x128xf32>
    %100 = vector.extract_strided_slice %50 {offsets = [0, 64], sizes = [34, 32], strides = [1, 1]} : vector<34x128xf32> to vector<34x32xf32>
    %101 = vector.extract_strided_slice %53 {offsets = [0, 64], sizes = [34, 32], strides = [1, 1]} : vector<34x128xf32> to vector<34x32xf32>
    %cst_64 = arith.constant dense<0.000000e+00> : vector<34x34xf32>
    %102 = tpu.matmul %100, %101, %cst_64 {dimension_numbers = #tpu.dot_dimension_numbers<[1], [1], [0], [0], [0, 0, 1, 0], [], []>} : vector<34x32xf32>, vector<34x32xf32>, vector<34x34xf32> -> vector<34x34xf32>
    %cst_65 = arith.constant 0.176776692 : f32
    %103 = vector.broadcast %cst_65 : f32 to vector<34x34xf32>
    %104 = arith.mulf %102, %103 : vector<34x34xf32>
    %105 = arith.addf %104, %21 : vector<34x34xf32>
    %cst_66 = arith.constant dense<0xFF800000> : vector<34xf32>
    %106 = vector.multi_reduction <maximumf>, %105, %cst_66 [1] : vector<34x34xf32> to vector<34xf32>
    %107 = vector.shape_cast %106 : vector<34xf32> to vector<34x1xf32>
    %108 = vector.broadcast %107 : vector<34x1xf32> to vector<34x34xf32>
    %109 = arith.subf %105, %108 : vector<34x34xf32>
    %110 = math.exp %109 : vector<34x34xf32>
    %cst_67 = arith.constant dense<0.000000e+00> : vector<34xf32>
    %111 = vector.multi_reduction <add>, %110, %cst_67 [1] : vector<34x34xf32> to vector<34xf32>
    %112 = vector.shape_cast %111 : vector<34xf32> to vector<34x1xf32>
    %113 = vector.broadcast %112 : vector<34x1xf32> to vector<34x34xf32>
    %114 = arith.divf %110, %113 : vector<34x34xf32>
    %115 = vector.extract_strided_slice %56 {offsets = [0, 64], sizes = [34, 32], strides = [1, 1]} : vector<34x128xf32> to vector<34x32xf32>
    %cst_68 = arith.constant dense<0.000000e+00> : vector<34x32xf32>
    %116 = tpu.matmul %114, %115, %cst_68 {dimension_numbers = #tpu.dot_dimension_numbers<[1], [0], [0], [1], [0, 0, 1, 1], [], []>} : vector<34x34xf32>, vector<34x32xf32>, vector<34x32xf32> -> vector<34x32xf32>
    %117 = vector.extract_strided_slice %58 {offsets = [64, 0], sizes = [32, 128], strides = [1, 1]} : vector<128x128xf32> to vector<32x128xf32>
    %cst_69 = arith.constant dense<0.000000e+00> : vector<34x128xf32>
    %118 = tpu.matmul %116, %117, %cst_69 {dimension_numbers = #tpu.dot_dimension_numbers<[1], [0], [0], [1], [0, 0, 1, 1], [], []>} : vector<34x32xf32>, vector<32x128xf32>, vector<34x128xf32> -> vector<34x128xf32>
    %119 = arith.addf %99, %118 : vector<34x128xf32>
    %120 = vector.extract_strided_slice %50 {offsets = [0, 96], sizes = [34, 32], strides = [1, 1]} : vector<34x128xf32> to vector<34x32xf32>
    %121 = vector.extract_strided_slice %53 {offsets = [0, 96], sizes = [34, 32], strides = [1, 1]} : vector<34x128xf32> to vector<34x32xf32>
    %cst_70 = arith.constant dense<0.000000e+00> : vector<34x34xf32>
    %122 = tpu.matmul %120, %121, %cst_70 {dimension_numbers = #tpu.dot_dimension_numbers<[1], [1], [0], [0], [0, 0, 1, 0], [], []>} : vector<34x32xf32>, vector<34x32xf32>, vector<34x34xf32> -> vector<34x34xf32>
    %cst_71 = arith.constant 0.176776692 : f32
    %123 = vector.broadcast %cst_71 : f32 to vector<34x34xf32>
    %124 = arith.mulf %122, %123 : vector<34x34xf32>
    %125 = arith.addf %124, %21 : vector<34x34xf32>
    %cst_72 = arith.constant dense<0xFF800000> : vector<34xf32>
    %126 = vector.multi_reduction <maximumf>, %125, %cst_72 [1] : vector<34x34xf32> to vector<34xf32>
    %127 = vector.shape_cast %126 : vector<34xf32> to vector<34x1xf32>
    %128 = vector.broadcast %127 : vector<34x1xf32> to vector<34x34xf32>
    %129 = arith.subf %125, %128 : vector<34x34xf32>
    %130 = math.exp %129 : vector<34x34xf32>
    %cst_73 = arith.constant dense<0.000000e+00> : vector<34xf32>
    %131 = vector.multi_reduction <add>, %130, %cst_73 [1] : vector<34x34xf32> to vector<34xf32>
    %132 = vector.shape_cast %131 : vector<34xf32> to vector<34x1xf32>
    %133 = vector.broadcast %132 : vector<34x1xf32> to vector<34x34xf32>
    %134 = arith.divf %130, %133 : vector<34x34xf32>
    %135 = vector.extract_strided_slice %56 {offsets = [0, 96], sizes = [34, 32], strides = [1, 1]} : vector<34x128xf32> to vector<34x32xf32>
    %cst_74 = arith.constant dense<0.000000e+00> : vector<34x32xf32>
    %136 = tpu.matmul %134, %135, %cst_74 {dimension_numbers = #tpu.dot_dimension_numbers<[1], [0], [0], [1], [0, 0, 1, 1], [], []>} : vector<34x34xf32>, vector<34x32xf32>, vector<34x32xf32> -> vector<34x32xf32>
    %137 = vector.extract_strided_slice %58 {offsets = [96, 0], sizes = [32, 128], strides = [1, 1]} : vector<128x128xf32> to vector<32x128xf32>
    %cst_75 = arith.constant dense<0.000000e+00> : vector<34x128xf32>
    %138 = tpu.matmul %136, %137, %cst_75 {dimension_numbers = #tpu.dot_dimension_numbers<[1], [0], [0], [1], [0, 0, 1, 1], [], []>} : vector<34x32xf32>, vector<32x128xf32>, vector<34x128xf32> -> vector<34x128xf32>
    %139 = arith.addf %119, %138 : vector<34x128xf32>
    %140 = arith.addf %20, %139 : vector<34x128xf32>
    %c0_76 = arith.constant 0 : index
    %c0_77 = arith.constant 0 : index
    %c0_78 = arith.constant 0 : index
    %141 = vector.load %arg14[%c0_76, %c0_77, %c0_78] : memref<2x1x128xf32, #tpu.memory_space<vmem>>, vector<1x1x128xf32>
    %142 = vector.shape_cast %141 : vector<1x1x128xf32> to vector<1x128xf32>
    %143 = vector.broadcast %142 : vector<1x128xf32> to vector<34x128xf32>
    %144 = arith.addf %140, %143 : vector<34x128xf32>
    %c0_79 = arith.constant 0 : index
    %c0_80 = arith.constant 0 : index
    %c0_81 = arith.constant 0 : index
    %145 = vector.load %arg15[%c0_79, %c0_80, %c0_81] : memref<2x1x128xf32, #tpu.memory_space<vmem>>, vector<1x1x128xf32>
    %146 = vector.shape_cast %145 : vector<1x1x128xf32> to vector<1x128xf32>
    %c0_82 = arith.constant 0 : index
    %c0_83 = arith.constant 0 : index
    %c0_84 = arith.constant 0 : index
    %147 = vector.load %arg16[%c0_82, %c0_83, %c0_84] : memref<2x1x128xf32, #tpu.memory_space<vmem>>, vector<1x1x128xf32>
    %148 = vector.shape_cast %147 : vector<1x1x128xf32> to vector<1x128xf32>
    %cst_85 = arith.constant dense<0.000000e+00> : vector<34xf32>
    %149 = vector.multi_reduction <add>, %144, %cst_85 [1] : vector<34x128xf32> to vector<34xf32>
    %150 = vector.shape_cast %149 : vector<34xf32> to vector<34x1xf32>
    %cst_86 = arith.constant 1.280000e+02 : f32
    %151 = vector.broadcast %cst_86 : f32 to vector<34x1xf32>
    %152 = arith.divf %150, %151 : vector<34x1xf32>
    %153 = vector.broadcast %152 : vector<34x1xf32> to vector<34x128xf32>
    %154 = arith.subf %144, %153 : vector<34x128xf32>
    %155 = arith.mulf %154, %154 : vector<34x128xf32>
    %cst_87 = arith.constant dense<0.000000e+00> : vector<34xf32>
    %156 = vector.multi_reduction <add>, %155, %cst_87 [1] : vector<34x128xf32> to vector<34xf32>
    %157 = vector.shape_cast %156 : vector<34xf32> to vector<34x1xf32>
    %cst_88 = arith.constant 1.280000e+02 : f32
    %158 = vector.broadcast %cst_88 : f32 to vector<34x1xf32>
    %159 = arith.divf %157, %158 : vector<34x1xf32>
    %160 = vector.broadcast %152 : vector<34x1xf32> to vector<34x128xf32>
    %161 = arith.subf %144, %160 : vector<34x128xf32>
    %cst_89 = arith.constant 9.99999974E-6 : f32
    %162 = vector.broadcast %cst_89 : f32 to vector<34x1xf32>
    %163 = arith.addf %159, %162 : vector<34x1xf32>
    %164 = math.rsqrt %163 : vector<34x1xf32>
    %165 = vector.broadcast %164 : vector<34x1xf32> to vector<34x128xf32>
    %166 = arith.mulf %161, %165 : vector<34x128xf32>
    %167 = vector.broadcast %146 : vector<1x128xf32> to vector<34x128xf32>
    %168 = arith.mulf %166, %167 : vector<34x128xf32>
    %169 = vector.broadcast %148 : vector<1x128xf32> to vector<34x128xf32>
    %170 = arith.addf %168, %169 : vector<34x128xf32>
    %c0_90 = arith.constant 0 : index
    %c0_91 = arith.constant 0 : index
    %c0_92 = arith.constant 0 : index
    %171 = vector.load %arg17[%c0_90, %c0_91, %c0_92] : memref<2x128x128xf32, #tpu.memory_space<vmem>>, vector<1x128x128xf32>
    %172 = vector.shape_cast %171 : vector<1x128x128xf32> to vector<128x128xf32>
    %cst_93 = arith.constant dense<0.000000e+00> : vector<34x128xf32>
    %173 = tpu.matmul %170, %172, %cst_93 {dimension_numbers = #tpu.dot_dimension_numbers<[1], [0], [0], [1], [0, 0, 1, 1], [], []>} : vector<34x128xf32>, vector<128x128xf32>, vector<34x128xf32> -> vector<34x128xf32>
    %c0_94 = arith.constant 0 : index
    %c0_95 = arith.constant 0 : index
    %c0_96 = arith.constant 0 : index
    %174 = vector.load %arg18[%c0_94, %c0_95, %c0_96] : memref<2x1x128xf32, #tpu.memory_space<vmem>>, vector<1x1x128xf32>
    %175 = vector.shape_cast %174 : vector<1x1x128xf32> to vector<1x128xf32>
    %176 = vector.broadcast %175 : vector<1x128xf32> to vector<34x128xf32>
    %177 = arith.addf %173, %176 : vector<34x128xf32>
    %cst_97 = arith.constant 5.000000e-01 : f32
    %178 = vector.broadcast %cst_97 : f32 to vector<34x128xf32>
    %179 = arith.mulf %178, %177 : vector<34x128xf32>
    %cst_98 = arith.constant 0.707106769 : f32
    %180 = vector.broadcast %cst_98 : f32 to vector<34x128xf32>
    %181 = arith.mulf %177, %180 : vector<34x128xf32>
    %cst_99 = arith.constant 0.000000e+00 : f32
    %182 = vector.broadcast %cst_99 : f32 to vector<34x128xf32>
    %183 = arith.cmpf oge, %181, %182 : vector<34x128xf32>
    %cst_100 = arith.constant 1.000000e+00 : f32
    %cst_101 = arith.constant -1.000000e+00 : f32
    %184 = vector.broadcast %cst_100 : f32 to vector<34x128xf32>
    %185 = vector.broadcast %cst_101 : f32 to vector<34x128xf32>
    %186 = arith.select %183, %184, %185 : vector<34x128xi1>, vector<34x128xf32>
    %187 = arith.mulf %181, %186 : vector<34x128xf32>
    %cst_102 = arith.constant 0.327591091 : f32
    %188 = vector.broadcast %cst_102 : f32 to vector<34x128xf32>
    %189 = arith.mulf %188, %187 : vector<34x128xf32>
    %cst_103 = arith.constant 1.000000e+00 : f32
    %190 = vector.broadcast %cst_103 : f32 to vector<34x128xf32>
    %191 = arith.addf %190, %189 : vector<34x128xf32>
    %cst_104 = arith.constant 1.000000e+00 : f32
    %192 = vector.broadcast %cst_104 : f32 to vector<34x128xf32>
    %193 = arith.divf %192, %191 : vector<34x128xf32>
    %cst_105 = arith.constant 1.06140542 : f32
    %194 = vector.broadcast %cst_105 : f32 to vector<34x128xf32>
    %195 = arith.mulf %194, %193 : vector<34x128xf32>
    %cst_106 = arith.constant -1.45315206 : f32
    %196 = vector.broadcast %cst_106 : f32 to vector<34x128xf32>
    %197 = arith.addf %195, %196 : vector<34x128xf32>
    %198 = arith.mulf %197, %193 : vector<34x128xf32>
    %cst_107 = arith.constant 1.42141378 : f32
    %199 = vector.broadcast %cst_107 : f32 to vector<34x128xf32>
    %200 = arith.addf %198, %199 : vector<34x128xf32>
    %201 = arith.mulf %200, %193 : vector<34x128xf32>
    %cst_108 = arith.constant -0.284496725 : f32
    %202 = vector.broadcast %cst_108 : f32 to vector<34x128xf32>
    %203 = arith.addf %201, %202 : vector<34x128xf32>
    %204 = arith.mulf %203, %193 : vector<34x128xf32>
    %cst_109 = arith.constant 0.254829586 : f32
    %205 = vector.broadcast %cst_109 : f32 to vector<34x128xf32>
    %206 = arith.addf %204, %205 : vector<34x128xf32>
    %207 = arith.mulf %206, %193 : vector<34x128xf32>
    %cst_110 = arith.constant 0.000000e+00 : f32
    %208 = vector.broadcast %cst_110 : f32 to vector<34x128xf32>
    %209 = arith.subf %208, %187 : vector<34x128xf32>
    %210 = arith.mulf %209, %187 : vector<34x128xf32>
    %211 = math.exp %210 : vector<34x128xf32>
    %212 = arith.mulf %207, %211 : vector<34x128xf32>
    %cst_111 = arith.constant 1.000000e+00 : f32
    %213 = vector.broadcast %cst_111 : f32 to vector<34x128xf32>
    %214 = arith.subf %213, %212 : vector<34x128xf32>
    %215 = arith.mulf %186, %214 : vector<34x128xf32>
    %cst_112 = arith.constant 1.000000e+00 : f32
    %216 = vector.broadcast %cst_112 : f32 to vector<34x128xf32>
    %217 = arith.addf %216, %215 : vector<34x128xf32>
    %218 = arith.mulf %179, %217 : vector<34x128xf32>
    %c0_113 = arith.constant 0 : index
    %c0_114 = arith.constant 0 : index
    %c0_115 = arith.constant 0 : index
    %219 = vector.load %arg19[%c0_113, %c0_114, %c0_115] : memref<2x128x128xf32, #tpu.memory_space<vmem>>, vector<1x128x128xf32>
    %220 = vector.shape_cast %219 : vector<1x128x128xf32> to vector<128x128xf32>
    %cst_116 = arith.constant dense<0.000000e+00> : vector<34x128xf32>
    %221 = tpu.matmul %218, %220, %cst_116 {dimension_numbers = #tpu.dot_dimension_numbers<[1], [0], [0], [1], [0, 0, 1, 1], [], []>} : vector<34x128xf32>, vector<128x128xf32>, vector<34x128xf32> -> vector<34x128xf32>
    %c0_117 = arith.constant 0 : index
    %c0_118 = arith.constant 0 : index
    %c0_119 = arith.constant 0 : index
    %222 = vector.load %arg20[%c0_117, %c0_118, %c0_119] : memref<2x1x128xf32, #tpu.memory_space<vmem>>, vector<1x1x128xf32>
    %223 = vector.shape_cast %222 : vector<1x1x128xf32> to vector<1x128xf32>
    %224 = vector.broadcast %223 : vector<1x128xf32> to vector<34x128xf32>
    %225 = arith.addf %221, %224 : vector<34x128xf32>
    %226 = arith.addf %144, %225 : vector<34x128xf32>
    %c1_120 = arith.constant 1 : index
    %c0_121 = arith.constant 0 : index
    %c0_122 = arith.constant 0 : index
    %227 = vector.load %arg8[%c1_120, %c0_121, %c0_122] : memref<2x1x128xf32, #tpu.memory_space<vmem>>, vector<1x1x128xf32>
    %228 = vector.shape_cast %227 : vector<1x1x128xf32> to vector<1x128xf32>
    %c1_123 = arith.constant 1 : index
    %c0_124 = arith.constant 0 : index
    %c0_125 = arith.constant 0 : index
    %229 = vector.load %arg9[%c1_123, %c0_124, %c0_125] : memref<2x1x128xf32, #tpu.memory_space<vmem>>, vector<1x1x128xf32>
    %230 = vector.shape_cast %229 : vector<1x1x128xf32> to vector<1x128xf32>
    %cst_126 = arith.constant dense<0.000000e+00> : vector<34xf32>
    %231 = vector.multi_reduction <add>, %226, %cst_126 [1] : vector<34x128xf32> to vector<34xf32>
    %232 = vector.shape_cast %231 : vector<34xf32> to vector<34x1xf32>
    %cst_127 = arith.constant 1.280000e+02 : f32
    %233 = vector.broadcast %cst_127 : f32 to vector<34x1xf32>
    %234 = arith.divf %232, %233 : vector<34x1xf32>
    %235 = vector.broadcast %234 : vector<34x1xf32> to vector<34x128xf32>
    %236 = arith.subf %226, %235 : vector<34x128xf32>
    %237 = arith.mulf %236, %236 : vector<34x128xf32>
    %cst_128 = arith.constant dense<0.000000e+00> : vector<34xf32>
    %238 = vector.multi_reduction <add>, %237, %cst_128 [1] : vector<34x128xf32> to vector<34xf32>
    %239 = vector.shape_cast %238 : vector<34xf32> to vector<34x1xf32>
    %cst_129 = arith.constant 1.280000e+02 : f32
    %240 = vector.broadcast %cst_129 : f32 to vector<34x1xf32>
    %241 = arith.divf %239, %240 : vector<34x1xf32>
    %242 = vector.broadcast %234 : vector<34x1xf32> to vector<34x128xf32>
    %243 = arith.subf %226, %242 : vector<34x128xf32>
    %cst_130 = arith.constant 9.99999974E-6 : f32
    %244 = vector.broadcast %cst_130 : f32 to vector<34x1xf32>
    %245 = arith.addf %241, %244 : vector<34x1xf32>
    %246 = math.rsqrt %245 : vector<34x1xf32>
    %247 = vector.broadcast %246 : vector<34x1xf32> to vector<34x128xf32>
    %248 = arith.mulf %243, %247 : vector<34x128xf32>
    %249 = vector.broadcast %228 : vector<1x128xf32> to vector<34x128xf32>
    %250 = arith.mulf %248, %249 : vector<34x128xf32>
    %251 = vector.broadcast %230 : vector<1x128xf32> to vector<34x128xf32>
    %252 = arith.addf %250, %251 : vector<34x128xf32>
    %c1_131 = arith.constant 1 : index
    %c0_132 = arith.constant 0 : index
    %c0_133 = arith.constant 0 : index
    %253 = vector.load %arg10[%c1_131, %c0_132, %c0_133] : memref<2x128x128xf32, #tpu.memory_space<vmem>>, vector<1x128x128xf32>
    %254 = vector.shape_cast %253 : vector<1x128x128xf32> to vector<128x128xf32>
    %cst_134 = arith.constant dense<0.000000e+00> : vector<34x128xf32>
    %255 = tpu.matmul %252, %254, %cst_134 {dimension_numbers = #tpu.dot_dimension_numbers<[1], [0], [0], [1], [0, 0, 1, 1], [], []>} : vector<34x128xf32>, vector<128x128xf32>, vector<34x128xf32> -> vector<34x128xf32>
    %c1_135 = arith.constant 1 : index
    %c0_136 = arith.constant 0 : index
    %c0_137 = arith.constant 0 : index
    %256 = vector.load %arg11[%c1_135, %c0_136, %c0_137] : memref<2x128x128xf32, #tpu.memory_space<vmem>>, vector<1x128x128xf32>
    %257 = vector.shape_cast %256 : vector<1x128x128xf32> to vector<128x128xf32>
    %cst_138 = arith.constant dense<0.000000e+00> : vector<34x128xf32>
    %258 = tpu.matmul %252, %257, %cst_138 {dimension_numbers = #tpu.dot_dimension_numbers<[1], [0], [0], [1], [0, 0, 1, 1], [], []>} : vector<34x128xf32>, vector<128x128xf32>, vector<34x128xf32> -> vector<34x128xf32>
    %c1_139 = arith.constant 1 : index
    %c0_140 = arith.constant 0 : index
    %c0_141 = arith.constant 0 : index
    %259 = vector.load %arg12[%c1_139, %c0_140, %c0_141] : memref<2x128x128xf32, #tpu.memory_space<vmem>>, vector<1x128x128xf32>
    %260 = vector.shape_cast %259 : vector<1x128x128xf32> to vector<128x128xf32>
    %cst_142 = arith.constant dense<0.000000e+00> : vector<34x128xf32>
    %261 = tpu.matmul %252, %260, %cst_142 {dimension_numbers = #tpu.dot_dimension_numbers<[1], [0], [0], [1], [0, 0, 1, 1], [], []>} : vector<34x128xf32>, vector<128x128xf32>, vector<34x128xf32> -> vector<34x128xf32>
    %c1_143 = arith.constant 1 : index
    %c0_144 = arith.constant 0 : index
    %c0_145 = arith.constant 0 : index
    %262 = vector.load %arg13[%c1_143, %c0_144, %c0_145] : memref<2x128x128xf32, #tpu.memory_space<vmem>>, vector<1x128x128xf32>
    %263 = vector.shape_cast %262 : vector<1x128x128xf32> to vector<128x128xf32>
    %cst_146 = arith.constant 0.000000e+00 : f32
    %264 = vector.broadcast %cst_146 : f32 to vector<34x128xf32>
    %265 = vector.extract_strided_slice %255 {offsets = [0, 0], sizes = [34, 32], strides = [1, 1]} : vector<34x128xf32> to vector<34x32xf32>
    %266 = vector.extract_strided_slice %258 {offsets = [0, 0], sizes = [34, 32], strides = [1, 1]} : vector<34x128xf32> to vector<34x32xf32>
    %cst_147 = arith.constant dense<0.000000e+00> : vector<34x34xf32>
    %267 = tpu.matmul %265, %266, %cst_147 {dimension_numbers = #tpu.dot_dimension_numbers<[1], [1], [0], [0], [0, 0, 1, 0], [], []>} : vector<34x32xf32>, vector<34x32xf32>, vector<34x34xf32> -> vector<34x34xf32>
    %cst_148 = arith.constant 0.176776692 : f32
    %268 = vector.broadcast %cst_148 : f32 to vector<34x34xf32>
    %269 = arith.mulf %267, %268 : vector<34x34xf32>
    %270 = arith.addf %269, %21 : vector<34x34xf32>
    %cst_149 = arith.constant dense<0xFF800000> : vector<34xf32>
    %271 = vector.multi_reduction <maximumf>, %270, %cst_149 [1] : vector<34x34xf32> to vector<34xf32>
    %272 = vector.shape_cast %271 : vector<34xf32> to vector<34x1xf32>
    %273 = vector.broadcast %272 : vector<34x1xf32> to vector<34x34xf32>
    %274 = arith.subf %270, %273 : vector<34x34xf32>
    %275 = math.exp %274 : vector<34x34xf32>
    %cst_150 = arith.constant dense<0.000000e+00> : vector<34xf32>
    %276 = vector.multi_reduction <add>, %275, %cst_150 [1] : vector<34x34xf32> to vector<34xf32>
    %277 = vector.shape_cast %276 : vector<34xf32> to vector<34x1xf32>
    %278 = vector.broadcast %277 : vector<34x1xf32> to vector<34x34xf32>
    %279 = arith.divf %275, %278 : vector<34x34xf32>
    %280 = vector.extract_strided_slice %261 {offsets = [0, 0], sizes = [34, 32], strides = [1, 1]} : vector<34x128xf32> to vector<34x32xf32>
    %cst_151 = arith.constant dense<0.000000e+00> : vector<34x32xf32>
    %281 = tpu.matmul %279, %280, %cst_151 {dimension_numbers = #tpu.dot_dimension_numbers<[1], [0], [0], [1], [0, 0, 1, 1], [], []>} : vector<34x34xf32>, vector<34x32xf32>, vector<34x32xf32> -> vector<34x32xf32>
    %282 = vector.extract_strided_slice %263 {offsets = [0, 0], sizes = [32, 128], strides = [1, 1]} : vector<128x128xf32> to vector<32x128xf32>
    %cst_152 = arith.constant dense<0.000000e+00> : vector<34x128xf32>
    %283 = tpu.matmul %281, %282, %cst_152 {dimension_numbers = #tpu.dot_dimension_numbers<[1], [0], [0], [1], [0, 0, 1, 1], [], []>} : vector<34x32xf32>, vector<32x128xf32>, vector<34x128xf32> -> vector<34x128xf32>
    %284 = arith.addf %264, %283 : vector<34x128xf32>
    %285 = vector.extract_strided_slice %255 {offsets = [0, 32], sizes = [34, 32], strides = [1, 1]} : vector<34x128xf32> to vector<34x32xf32>
    %286 = vector.extract_strided_slice %258 {offsets = [0, 32], sizes = [34, 32], strides = [1, 1]} : vector<34x128xf32> to vector<34x32xf32>
    %cst_153 = arith.constant dense<0.000000e+00> : vector<34x34xf32>
    %287 = tpu.matmul %285, %286, %cst_153 {dimension_numbers = #tpu.dot_dimension_numbers<[1], [1], [0], [0], [0, 0, 1, 0], [], []>} : vector<34x32xf32>, vector<34x32xf32>, vector<34x34xf32> -> vector<34x34xf32>
    %cst_154 = arith.constant 0.176776692 : f32
    %288 = vector.broadcast %cst_154 : f32 to vector<34x34xf32>
    %289 = arith.mulf %287, %288 : vector<34x34xf32>
    %290 = arith.addf %289, %21 : vector<34x34xf32>
    %cst_155 = arith.constant dense<0xFF800000> : vector<34xf32>
    %291 = vector.multi_reduction <maximumf>, %290, %cst_155 [1] : vector<34x34xf32> to vector<34xf32>
    %292 = vector.shape_cast %291 : vector<34xf32> to vector<34x1xf32>
    %293 = vector.broadcast %292 : vector<34x1xf32> to vector<34x34xf32>
    %294 = arith.subf %290, %293 : vector<34x34xf32>
    %295 = math.exp %294 : vector<34x34xf32>
    %cst_156 = arith.constant dense<0.000000e+00> : vector<34xf32>
    %296 = vector.multi_reduction <add>, %295, %cst_156 [1] : vector<34x34xf32> to vector<34xf32>
    %297 = vector.shape_cast %296 : vector<34xf32> to vector<34x1xf32>
    %298 = vector.broadcast %297 : vector<34x1xf32> to vector<34x34xf32>
    %299 = arith.divf %295, %298 : vector<34x34xf32>
    %300 = vector.extract_strided_slice %261 {offsets = [0, 32], sizes = [34, 32], strides = [1, 1]} : vector<34x128xf32> to vector<34x32xf32>
    %cst_157 = arith.constant dense<0.000000e+00> : vector<34x32xf32>
    %301 = tpu.matmul %299, %300, %cst_157 {dimension_numbers = #tpu.dot_dimension_numbers<[1], [0], [0], [1], [0, 0, 1, 1], [], []>} : vector<34x34xf32>, vector<34x32xf32>, vector<34x32xf32> -> vector<34x32xf32>
    %302 = vector.extract_strided_slice %263 {offsets = [32, 0], sizes = [32, 128], strides = [1, 1]} : vector<128x128xf32> to vector<32x128xf32>
    %cst_158 = arith.constant dense<0.000000e+00> : vector<34x128xf32>
    %303 = tpu.matmul %301, %302, %cst_158 {dimension_numbers = #tpu.dot_dimension_numbers<[1], [0], [0], [1], [0, 0, 1, 1], [], []>} : vector<34x32xf32>, vector<32x128xf32>, vector<34x128xf32> -> vector<34x128xf32>
    %304 = arith.addf %284, %303 : vector<34x128xf32>
    %305 = vector.extract_strided_slice %255 {offsets = [0, 64], sizes = [34, 32], strides = [1, 1]} : vector<34x128xf32> to vector<34x32xf32>
    %306 = vector.extract_strided_slice %258 {offsets = [0, 64], sizes = [34, 32], strides = [1, 1]} : vector<34x128xf32> to vector<34x32xf32>
    %cst_159 = arith.constant dense<0.000000e+00> : vector<34x34xf32>
    %307 = tpu.matmul %305, %306, %cst_159 {dimension_numbers = #tpu.dot_dimension_numbers<[1], [1], [0], [0], [0, 0, 1, 0], [], []>} : vector<34x32xf32>, vector<34x32xf32>, vector<34x34xf32> -> vector<34x34xf32>
    %cst_160 = arith.constant 0.176776692 : f32
    %308 = vector.broadcast %cst_160 : f32 to vector<34x34xf32>
    %309 = arith.mulf %307, %308 : vector<34x34xf32>
    %310 = arith.addf %309, %21 : vector<34x34xf32>
    %cst_161 = arith.constant dense<0xFF800000> : vector<34xf32>
    %311 = vector.multi_reduction <maximumf>, %310, %cst_161 [1] : vector<34x34xf32> to vector<34xf32>
    %312 = vector.shape_cast %311 : vector<34xf32> to vector<34x1xf32>
    %313 = vector.broadcast %312 : vector<34x1xf32> to vector<34x34xf32>
    %314 = arith.subf %310, %313 : vector<34x34xf32>
    %315 = math.exp %314 : vector<34x34xf32>
    %cst_162 = arith.constant dense<0.000000e+00> : vector<34xf32>
    %316 = vector.multi_reduction <add>, %315, %cst_162 [1] : vector<34x34xf32> to vector<34xf32>
    %317 = vector.shape_cast %316 : vector<34xf32> to vector<34x1xf32>
    %318 = vector.broadcast %317 : vector<34x1xf32> to vector<34x34xf32>
    %319 = arith.divf %315, %318 : vector<34x34xf32>
    %320 = vector.extract_strided_slice %261 {offsets = [0, 64], sizes = [34, 32], strides = [1, 1]} : vector<34x128xf32> to vector<34x32xf32>
    %cst_163 = arith.constant dense<0.000000e+00> : vector<34x32xf32>
    %321 = tpu.matmul %319, %320, %cst_163 {dimension_numbers = #tpu.dot_dimension_numbers<[1], [0], [0], [1], [0, 0, 1, 1], [], []>} : vector<34x34xf32>, vector<34x32xf32>, vector<34x32xf32> -> vector<34x32xf32>
    %322 = vector.extract_strided_slice %263 {offsets = [64, 0], sizes = [32, 128], strides = [1, 1]} : vector<128x128xf32> to vector<32x128xf32>
    %cst_164 = arith.constant dense<0.000000e+00> : vector<34x128xf32>
    %323 = tpu.matmul %321, %322, %cst_164 {dimension_numbers = #tpu.dot_dimension_numbers<[1], [0], [0], [1], [0, 0, 1, 1], [], []>} : vector<34x32xf32>, vector<32x128xf32>, vector<34x128xf32> -> vector<34x128xf32>
    %324 = arith.addf %304, %323 : vector<34x128xf32>
    %325 = vector.extract_strided_slice %255 {offsets = [0, 96], sizes = [34, 32], strides = [1, 1]} : vector<34x128xf32> to vector<34x32xf32>
    %326 = vector.extract_strided_slice %258 {offsets = [0, 96], sizes = [34, 32], strides = [1, 1]} : vector<34x128xf32> to vector<34x32xf32>
    %cst_165 = arith.constant dense<0.000000e+00> : vector<34x34xf32>
    %327 = tpu.matmul %325, %326, %cst_165 {dimension_numbers = #tpu.dot_dimension_numbers<[1], [1], [0], [0], [0, 0, 1, 0], [], []>} : vector<34x32xf32>, vector<34x32xf32>, vector<34x34xf32> -> vector<34x34xf32>
    %cst_166 = arith.constant 0.176776692 : f32
    %328 = vector.broadcast %cst_166 : f32 to vector<34x34xf32>
    %329 = arith.mulf %327, %328 : vector<34x34xf32>
    %330 = arith.addf %329, %21 : vector<34x34xf32>
    %cst_167 = arith.constant dense<0xFF800000> : vector<34xf32>
    %331 = vector.multi_reduction <maximumf>, %330, %cst_167 [1] : vector<34x34xf32> to vector<34xf32>
    %332 = vector.shape_cast %331 : vector<34xf32> to vector<34x1xf32>
    %333 = vector.broadcast %332 : vector<34x1xf32> to vector<34x34xf32>
    %334 = arith.subf %330, %333 : vector<34x34xf32>
    %335 = math.exp %334 : vector<34x34xf32>
    %cst_168 = arith.constant dense<0.000000e+00> : vector<34xf32>
    %336 = vector.multi_reduction <add>, %335, %cst_168 [1] : vector<34x34xf32> to vector<34xf32>
    %337 = vector.shape_cast %336 : vector<34xf32> to vector<34x1xf32>
    %338 = vector.broadcast %337 : vector<34x1xf32> to vector<34x34xf32>
    %339 = arith.divf %335, %338 : vector<34x34xf32>
    %340 = vector.extract_strided_slice %261 {offsets = [0, 96], sizes = [34, 32], strides = [1, 1]} : vector<34x128xf32> to vector<34x32xf32>
    %cst_169 = arith.constant dense<0.000000e+00> : vector<34x32xf32>
    %341 = tpu.matmul %339, %340, %cst_169 {dimension_numbers = #tpu.dot_dimension_numbers<[1], [0], [0], [1], [0, 0, 1, 1], [], []>} : vector<34x34xf32>, vector<34x32xf32>, vector<34x32xf32> -> vector<34x32xf32>
    %342 = vector.extract_strided_slice %263 {offsets = [96, 0], sizes = [32, 128], strides = [1, 1]} : vector<128x128xf32> to vector<32x128xf32>
    %cst_170 = arith.constant dense<0.000000e+00> : vector<34x128xf32>
    %343 = tpu.matmul %341, %342, %cst_170 {dimension_numbers = #tpu.dot_dimension_numbers<[1], [0], [0], [1], [0, 0, 1, 1], [], []>} : vector<34x32xf32>, vector<32x128xf32>, vector<34x128xf32> -> vector<34x128xf32>
    %344 = arith.addf %324, %343 : vector<34x128xf32>
    %345 = arith.addf %226, %344 : vector<34x128xf32>
    %c1_171 = arith.constant 1 : index
    %c0_172 = arith.constant 0 : index
    %c0_173 = arith.constant 0 : index
    %346 = vector.load %arg14[%c1_171, %c0_172, %c0_173] : memref<2x1x128xf32, #tpu.memory_space<vmem>>, vector<1x1x128xf32>
    %347 = vector.shape_cast %346 : vector<1x1x128xf32> to vector<1x128xf32>
    %348 = vector.broadcast %347 : vector<1x128xf32> to vector<34x128xf32>
    %349 = arith.addf %345, %348 : vector<34x128xf32>
    %c1_174 = arith.constant 1 : index
    %c0_175 = arith.constant 0 : index
    %c0_176 = arith.constant 0 : index
    %350 = vector.load %arg15[%c1_174, %c0_175, %c0_176] : memref<2x1x128xf32, #tpu.memory_space<vmem>>, vector<1x1x128xf32>
    %351 = vector.shape_cast %350 : vector<1x1x128xf32> to vector<1x128xf32>
    %c1_177 = arith.constant 1 : index
    %c0_178 = arith.constant 0 : index
    %c0_179 = arith.constant 0 : index
    %352 = vector.load %arg16[%c1_177, %c0_178, %c0_179] : memref<2x1x128xf32, #tpu.memory_space<vmem>>, vector<1x1x128xf32>
    %353 = vector.shape_cast %352 : vector<1x1x128xf32> to vector<1x128xf32>
    %cst_180 = arith.constant dense<0.000000e+00> : vector<34xf32>
    %354 = vector.multi_reduction <add>, %349, %cst_180 [1] : vector<34x128xf32> to vector<34xf32>
    %355 = vector.shape_cast %354 : vector<34xf32> to vector<34x1xf32>
    %cst_181 = arith.constant 1.280000e+02 : f32
    %356 = vector.broadcast %cst_181 : f32 to vector<34x1xf32>
    %357 = arith.divf %355, %356 : vector<34x1xf32>
    %358 = vector.broadcast %357 : vector<34x1xf32> to vector<34x128xf32>
    %359 = arith.subf %349, %358 : vector<34x128xf32>
    %360 = arith.mulf %359, %359 : vector<34x128xf32>
    %cst_182 = arith.constant dense<0.000000e+00> : vector<34xf32>
    %361 = vector.multi_reduction <add>, %360, %cst_182 [1] : vector<34x128xf32> to vector<34xf32>
    %362 = vector.shape_cast %361 : vector<34xf32> to vector<34x1xf32>
    %cst_183 = arith.constant 1.280000e+02 : f32
    %363 = vector.broadcast %cst_183 : f32 to vector<34x1xf32>
    %364 = arith.divf %362, %363 : vector<34x1xf32>
    %365 = vector.broadcast %357 : vector<34x1xf32> to vector<34x128xf32>
    %366 = arith.subf %349, %365 : vector<34x128xf32>
    %cst_184 = arith.constant 9.99999974E-6 : f32
    %367 = vector.broadcast %cst_184 : f32 to vector<34x1xf32>
    %368 = arith.addf %364, %367 : vector<34x1xf32>
    %369 = math.rsqrt %368 : vector<34x1xf32>
    %370 = vector.broadcast %369 : vector<34x1xf32> to vector<34x128xf32>
    %371 = arith.mulf %366, %370 : vector<34x128xf32>
    %372 = vector.broadcast %351 : vector<1x128xf32> to vector<34x128xf32>
    %373 = arith.mulf %371, %372 : vector<34x128xf32>
    %374 = vector.broadcast %353 : vector<1x128xf32> to vector<34x128xf32>
    %375 = arith.addf %373, %374 : vector<34x128xf32>
    %c1_185 = arith.constant 1 : index
    %c0_186 = arith.constant 0 : index
    %c0_187 = arith.constant 0 : index
    %376 = vector.load %arg17[%c1_185, %c0_186, %c0_187] : memref<2x128x128xf32, #tpu.memory_space<vmem>>, vector<1x128x128xf32>
    %377 = vector.shape_cast %376 : vector<1x128x128xf32> to vector<128x128xf32>
    %cst_188 = arith.constant dense<0.000000e+00> : vector<34x128xf32>
    %378 = tpu.matmul %375, %377, %cst_188 {dimension_numbers = #tpu.dot_dimension_numbers<[1], [0], [0], [1], [0, 0, 1, 1], [], []>} : vector<34x128xf32>, vector<128x128xf32>, vector<34x128xf32> -> vector<34x128xf32>
    %c1_189 = arith.constant 1 : index
    %c0_190 = arith.constant 0 : index
    %c0_191 = arith.constant 0 : index
    %379 = vector.load %arg18[%c1_189, %c0_190, %c0_191] : memref<2x1x128xf32, #tpu.memory_space<vmem>>, vector<1x1x128xf32>
    %380 = vector.shape_cast %379 : vector<1x1x128xf32> to vector<1x128xf32>
    %381 = vector.broadcast %380 : vector<1x128xf32> to vector<34x128xf32>
    %382 = arith.addf %378, %381 : vector<34x128xf32>
    %cst_192 = arith.constant 5.000000e-01 : f32
    %383 = vector.broadcast %cst_192 : f32 to vector<34x128xf32>
    %384 = arith.mulf %383, %382 : vector<34x128xf32>
    %cst_193 = arith.constant 0.707106769 : f32
    %385 = vector.broadcast %cst_193 : f32 to vector<34x128xf32>
    %386 = arith.mulf %382, %385 : vector<34x128xf32>
    %cst_194 = arith.constant 0.000000e+00 : f32
    %387 = vector.broadcast %cst_194 : f32 to vector<34x128xf32>
    %388 = arith.cmpf oge, %386, %387 : vector<34x128xf32>
    %cst_195 = arith.constant 1.000000e+00 : f32
    %cst_196 = arith.constant -1.000000e+00 : f32
    %389 = vector.broadcast %cst_195 : f32 to vector<34x128xf32>
    %390 = vector.broadcast %cst_196 : f32 to vector<34x128xf32>
    %391 = arith.select %388, %389, %390 : vector<34x128xi1>, vector<34x128xf32>
    %392 = arith.mulf %386, %391 : vector<34x128xf32>
    %cst_197 = arith.constant 0.327591091 : f32
    %393 = vector.broadcast %cst_197 : f32 to vector<34x128xf32>
    %394 = arith.mulf %393, %392 : vector<34x128xf32>
    %cst_198 = arith.constant 1.000000e+00 : f32
    %395 = vector.broadcast %cst_198 : f32 to vector<34x128xf32>
    %396 = arith.addf %395, %394 : vector<34x128xf32>
    %cst_199 = arith.constant 1.000000e+00 : f32
    %397 = vector.broadcast %cst_199 : f32 to vector<34x128xf32>
    %398 = arith.divf %397, %396 : vector<34x128xf32>
    %cst_200 = arith.constant 1.06140542 : f32
    %399 = vector.broadcast %cst_200 : f32 to vector<34x128xf32>
    %400 = arith.mulf %399, %398 : vector<34x128xf32>
    %cst_201 = arith.constant -1.45315206 : f32
    %401 = vector.broadcast %cst_201 : f32 to vector<34x128xf32>
    %402 = arith.addf %400, %401 : vector<34x128xf32>
    %403 = arith.mulf %402, %398 : vector<34x128xf32>
    %cst_202 = arith.constant 1.42141378 : f32
    %404 = vector.broadcast %cst_202 : f32 to vector<34x128xf32>
    %405 = arith.addf %403, %404 : vector<34x128xf32>
    %406 = arith.mulf %405, %398 : vector<34x128xf32>
    %cst_203 = arith.constant -0.284496725 : f32
    %407 = vector.broadcast %cst_203 : f32 to vector<34x128xf32>
    %408 = arith.addf %406, %407 : vector<34x128xf32>
    %409 = arith.mulf %408, %398 : vector<34x128xf32>
    %cst_204 = arith.constant 0.254829586 : f32
    %410 = vector.broadcast %cst_204 : f32 to vector<34x128xf32>
    %411 = arith.addf %409, %410 : vector<34x128xf32>
    %412 = arith.mulf %411, %398 : vector<34x128xf32>
    %cst_205 = arith.constant 0.000000e+00 : f32
    %413 = vector.broadcast %cst_205 : f32 to vector<34x128xf32>
    %414 = arith.subf %413, %392 : vector<34x128xf32>
    %415 = arith.mulf %414, %392 : vector<34x128xf32>
    %416 = math.exp %415 : vector<34x128xf32>
    %417 = arith.mulf %412, %416 : vector<34x128xf32>
    %cst_206 = arith.constant 1.000000e+00 : f32
    %418 = vector.broadcast %cst_206 : f32 to vector<34x128xf32>
    %419 = arith.subf %418, %417 : vector<34x128xf32>
    %420 = arith.mulf %391, %419 : vector<34x128xf32>
    %cst_207 = arith.constant 1.000000e+00 : f32
    %421 = vector.broadcast %cst_207 : f32 to vector<34x128xf32>
    %422 = arith.addf %421, %420 : vector<34x128xf32>
    %423 = arith.mulf %384, %422 : vector<34x128xf32>
    %c1_208 = arith.constant 1 : index
    %c0_209 = arith.constant 0 : index
    %c0_210 = arith.constant 0 : index
    %424 = vector.load %arg19[%c1_208, %c0_209, %c0_210] : memref<2x128x128xf32, #tpu.memory_space<vmem>>, vector<1x128x128xf32>
    %425 = vector.shape_cast %424 : vector<1x128x128xf32> to vector<128x128xf32>
    %cst_211 = arith.constant dense<0.000000e+00> : vector<34x128xf32>
    %426 = tpu.matmul %423, %425, %cst_211 {dimension_numbers = #tpu.dot_dimension_numbers<[1], [0], [0], [1], [0, 0, 1, 1], [], []>} : vector<34x128xf32>, vector<128x128xf32>, vector<34x128xf32> -> vector<34x128xf32>
    %c1_212 = arith.constant 1 : index
    %c0_213 = arith.constant 0 : index
    %c0_214 = arith.constant 0 : index
    %427 = vector.load %arg20[%c1_212, %c0_213, %c0_214] : memref<2x1x128xf32, #tpu.memory_space<vmem>>, vector<1x1x128xf32>
    %428 = vector.shape_cast %427 : vector<1x1x128xf32> to vector<1x128xf32>
    %429 = vector.broadcast %428 : vector<1x128xf32> to vector<34x128xf32>
    %430 = arith.addf %426, %429 : vector<34x128xf32>
    %431 = arith.addf %349, %430 : vector<34x128xf32>
    %c0_215 = arith.constant 0 : index
    %c0_216 = arith.constant 0 : index
    %432 = vector.load %arg39[%c0_215, %c0_216] : memref<34x128xf32, #tpu.memory_space<vmem>>, vector<34x128xf32>
    tpu.vector_store %arg39[%c0_215, %c0_216], %431 {strides = array<i32>} : memref<34x128xf32, #tpu.memory_space<vmem>>, vector<34x128xf32>,
    %c1_217 = arith.constant 1 : index
    %c0_218 = arith.constant 0 : index
    %433 = vector.load %arg39[%c1_217, %c0_218] : memref<34x128xf32, #tpu.memory_space<vmem>>, vector<16x128xf32>
    %c18_219 = arith.constant 18 : index
    %c0_220 = arith.constant 0 : index
    %434 = vector.load %arg39[%c18_219, %c0_220] : memref<34x128xf32, #tpu.memory_space<vmem>>, vector<16x128xf32>
    %435 = tpu.concatenate %433, %434 in 0 : vector<16x128xf32>, vector<16x128xf32> -> vector<32x128xf32>
    %c0_221 = arith.constant 0 : index
    %c0_222 = arith.constant 0 : index
    %436 = vector.load %arg21[%c0_221, %c0_222] : memref<128x128xf32, #tpu.memory_space<vmem>>, vector<128x128xf32>
    %cst_223 = arith.constant dense<0.000000e+00> : vector<32x128xf32>
    %437 = tpu.matmul %435, %436, %cst_223 {dimension_numbers = #tpu.dot_dimension_numbers<[1], [0], [0], [1], [0, 0, 1, 1], [], []>} : vector<32x128xf32>, vector<128x128xf32>, vector<32x128xf32> -> vector<32x128xf32>
    %c0_224 = arith.constant 0 : index
    %c0_225 = arith.constant 0 : index
    %438 = vector.load %arg22[%c0_224, %c0_225] : memref<1x128xf32, #tpu.memory_space<vmem>>, vector<1x128xf32>
    %439 = vector.broadcast %438 : vector<1x128xf32> to vector<32x128xf32>
    %440 = arith.addf %437, %439 : vector<32x128xf32>
    %c0_226 = arith.constant 0 : index
    %c0_227 = arith.constant 0 : index
    %441 = vector.load %arg23[%c0_226, %c0_227] : memref<128x128xf32, #tpu.memory_space<vmem>>, vector<128x128xf32>
    %cst_228 = arith.constant dense<0.000000e+00> : vector<32x128xf32>
    %442 = tpu.matmul %435, %441, %cst_228 {dimension_numbers = #tpu.dot_dimension_numbers<[1], [0], [0], [1], [0, 0, 1, 1], [], []>} : vector<32x128xf32>, vector<128x128xf32>, vector<32x128xf32> -> vector<32x128xf32>
    %c0_229 = arith.constant 0 : index
    %c0_230 = arith.constant 0 : index
    %443 = vector.load %arg24[%c0_229, %c0_230] : memref<1x128xf32, #tpu.memory_space<vmem>>, vector<1x128xf32>
    %444 = vector.broadcast %443 : vector<1x128xf32> to vector<32x128xf32>
    %445 = arith.addf %442, %444 : vector<32x128xf32>
    %446 = vector.shape_cast %445 : vector<32x128xf32> to vector<2x16x128xf32>
    %cst_231 = arith.constant dense<0.000000e+00> : vector<2x128xf32>
    %447 = vector.multi_reduction <add>, %446, %cst_231 [1] : vector<2x16x128xf32> to vector<2x128xf32>
    %448 = vector.shape_cast %447 : vector<2x128xf32> to vector<2x1x128xf32>
    %cst_232 = arith.constant 1.600000e+01 : f32
    %449 = vector.broadcast %cst_232 : f32 to vector<2x1x128xf32>
    %450 = arith.divf %448, %449 : vector<2x1x128xf32>
    %451 = vector.broadcast %450 : vector<2x1x128xf32> to vector<2x16x128xf32>
    %452 = arith.subf %446, %451 : vector<2x16x128xf32>
    %453 = arith.mulf %452, %452 : vector<2x16x128xf32>
    %cst_233 = arith.constant dense<0.000000e+00> : vector<2x128xf32>
    %454 = vector.multi_reduction <add>, %453, %cst_233 [1] : vector<2x16x128xf32> to vector<2x128xf32>
    %455 = vector.shape_cast %454 : vector<2x128xf32> to vector<2x1x128xf32>
    %cst_234 = arith.constant 1.600000e+01 : f32
    %456 = vector.broadcast %cst_234 : f32 to vector<2x1x128xf32>
    %457 = arith.divf %455, %456 : vector<2x1x128xf32>
    %458 = vector.broadcast %450 : vector<2x1x128xf32> to vector<2x16x128xf32>
    %459 = arith.subf %446, %458 : vector<2x16x128xf32>
    %cst_235 = arith.constant 9.99999974E-6 : f32
    %460 = vector.broadcast %cst_235 : f32 to vector<2x1x128xf32>
    %461 = arith.addf %457, %460 : vector<2x1x128xf32>
    %462 = math.rsqrt %461 : vector<2x1x128xf32>
    %463 = vector.broadcast %462 : vector<2x1x128xf32> to vector<2x16x128xf32>
    %464 = arith.mulf %459, %463 : vector<2x16x128xf32>
    %c0_236 = arith.constant 0 : index
    %c0_237 = arith.constant 0 : index
    %465 = vector.load %arg25[%c0_236, %c0_237] : memref<1x128xf32, #tpu.memory_space<vmem>>, vector<1x128xf32>
    %c0_238 = arith.constant 0 : index
    %c0_239 = arith.constant 0 : index
    %466 = vector.load %arg26[%c0_238, %c0_239] : memref<1x128xf32, #tpu.memory_space<vmem>>, vector<1x128xf32>
    %cst_240 = arith.constant dense<0.000000e+00> : vector<128xf32>
    %467 = vector.multi_reduction <add>, %464, %cst_240 [0, 1] : vector<2x16x128xf32> to vector<128xf32>
    %468 = vector.shape_cast %467 : vector<128xf32> to vector<1x1x128xf32>
    %cst_241 = arith.constant 3.200000e+01 : f32
    %469 = vector.broadcast %cst_241 : f32 to vector<1x1x128xf32>
    %470 = arith.divf %468, %469 : vector<1x1x128xf32>
    %471 = vector.broadcast %470 : vector<1x1x128xf32> to vector<2x16x128xf32>
    %472 = arith.subf %464, %471 : vector<2x16x128xf32>
    %473 = arith.mulf %472, %472 : vector<2x16x128xf32>
    %cst_242 = arith.constant dense<0.000000e+00> : vector<128xf32>
    %474 = vector.multi_reduction <add>, %473, %cst_242 [0, 1] : vector<2x16x128xf32> to vector<128xf32>
    %475 = vector.shape_cast %474 : vector<128xf32> to vector<1x1x128xf32>
    %cst_243 = arith.constant 3.200000e+01 : f32
    %476 = vector.broadcast %cst_243 : f32 to vector<1x1x128xf32>
    %477 = arith.divf %475, %476 : vector<1x1x128xf32>
    %478 = vector.broadcast %470 : vector<1x1x128xf32> to vector<2x16x128xf32>
    %479 = arith.subf %464, %478 : vector<2x16x128xf32>
    %cst_244 = arith.constant 9.99999974E-6 : f32
    %480 = vector.broadcast %cst_244 : f32 to vector<1x1x128xf32>
    %481 = arith.addf %477, %480 : vector<1x1x128xf32>
    %482 = math.rsqrt %481 : vector<1x1x128xf32>
    %483 = vector.broadcast %482 : vector<1x1x128xf32> to vector<2x16x128xf32>
    %484 = arith.mulf %479, %483 : vector<2x16x128xf32>
    %485 = vector.shape_cast %465 : vector<1x128xf32> to vector<1x1x128xf32>
    %486 = vector.broadcast %485 : vector<1x1x128xf32> to vector<2x16x128xf32>
    %487 = arith.mulf %484, %486 : vector<2x16x128xf32>
    %488 = vector.shape_cast %466 : vector<1x128xf32> to vector<1x1x128xf32>
    %489 = vector.broadcast %488 : vector<1x1x128xf32> to vector<2x16x128xf32>
    %490 = arith.addf %487, %489 : vector<2x16x128xf32>
    %cst_245 = arith.constant 0.000000e+00 : f32
    %491 = vector.broadcast %cst_245 : f32 to vector<2x16x128xf32>
    %492 = arith.maximumf %490, %491 : vector<2x16x128xf32>
    %493 = vector.shape_cast %492 : vector<2x16x128xf32> to vector<32x128xf32>
    %c0_246 = arith.constant 0 : index
    %c0_247 = arith.constant 0 : index
    %494 = vector.load %arg27[%c0_246, %c0_247] : memref<128x128xf32, #tpu.memory_space<vmem>>, vector<128x128xf32>
    %cst_248 = arith.constant dense<0.000000e+00> : vector<32x128xf32>
    %495 = tpu.matmul %493, %494, %cst_248 {dimension_numbers = #tpu.dot_dimension_numbers<[1], [0], [0], [1], [0, 0, 1, 1], [], []>} : vector<32x128xf32>, vector<128x128xf32>, vector<32x128xf32> -> vector<32x128xf32>
    %c0_249 = arith.constant 0 : index
    %c0_250 = arith.constant 0 : index
    %496 = vector.load %arg28[%c0_249, %c0_250] : memref<1x128xf32, #tpu.memory_space<vmem>>, vector<1x128xf32>
    %497 = vector.broadcast %496 : vector<1x128xf32> to vector<32x128xf32>
    %498 = arith.addf %495, %497 : vector<32x128xf32>
    %499 = vector.shape_cast %498 : vector<32x128xf32> to vector<2x16x128xf32>
    %cst_251 = arith.constant dense<0.000000e+00> : vector<2x128xf32>
    %500 = vector.multi_reduction <add>, %499, %cst_251 [1] : vector<2x16x128xf32> to vector<2x128xf32>
    %501 = vector.shape_cast %500 : vector<2x128xf32> to vector<2x1x128xf32>
    %cst_252 = arith.constant 1.600000e+01 : f32
    %502 = vector.broadcast %cst_252 : f32 to vector<2x1x128xf32>
    %503 = arith.divf %501, %502 : vector<2x1x128xf32>
    %504 = vector.broadcast %503 : vector<2x1x128xf32> to vector<2x16x128xf32>
    %505 = arith.subf %499, %504 : vector<2x16x128xf32>
    %506 = arith.mulf %505, %505 : vector<2x16x128xf32>
    %cst_253 = arith.constant dense<0.000000e+00> : vector<2x128xf32>
    %507 = vector.multi_reduction <add>, %506, %cst_253 [1] : vector<2x16x128xf32> to vector<2x128xf32>
    %508 = vector.shape_cast %507 : vector<2x128xf32> to vector<2x1x128xf32>
    %cst_254 = arith.constant 1.600000e+01 : f32
    %509 = vector.broadcast %cst_254 : f32 to vector<2x1x128xf32>
    %510 = arith.divf %508, %509 : vector<2x1x128xf32>
    %511 = vector.broadcast %503 : vector<2x1x128xf32> to vector<2x16x128xf32>
    %512 = arith.subf %499, %511 : vector<2x16x128xf32>
    %cst_255 = arith.constant 9.99999974E-6 : f32
    %513 = vector.broadcast %cst_255 : f32 to vector<2x1x128xf32>
    %514 = arith.addf %510, %513 : vector<2x1x128xf32>
    %515 = math.rsqrt %514 : vector<2x1x128xf32>
    %516 = vector.broadcast %515 : vector<2x1x128xf32> to vector<2x16x128xf32>
    %517 = arith.mulf %512, %516 : vector<2x16x128xf32>
    %c0_256 = arith.constant 0 : index
    %c0_257 = arith.constant 0 : index
    %518 = vector.load %arg29[%c0_256, %c0_257] : memref<1x128xf32, #tpu.memory_space<vmem>>, vector<1x128xf32>
    %c0_258 = arith.constant 0 : index
    %c0_259 = arith.constant 0 : index
    %519 = vector.load %arg30[%c0_258, %c0_259] : memref<1x128xf32, #tpu.memory_space<vmem>>, vector<1x128xf32>
    %cst_260 = arith.constant dense<0.000000e+00> : vector<128xf32>
    %520 = vector.multi_reduction <add>, %517, %cst_260 [0, 1] : vector<2x16x128xf32> to vector<128xf32>
    %521 = vector.shape_cast %520 : vector<128xf32> to vector<1x1x128xf32>
    %cst_261 = arith.constant 3.200000e+01 : f32
    %522 = vector.broadcast %cst_261 : f32 to vector<1x1x128xf32>
    %523 = arith.divf %521, %522 : vector<1x1x128xf32>
    %524 = vector.broadcast %523 : vector<1x1x128xf32> to vector<2x16x128xf32>
    %525 = arith.subf %517, %524 : vector<2x16x128xf32>
    %526 = arith.mulf %525, %525 : vector<2x16x128xf32>
    %cst_262 = arith.constant dense<0.000000e+00> : vector<128xf32>
    %527 = vector.multi_reduction <add>, %526, %cst_262 [0, 1] : vector<2x16x128xf32> to vector<128xf32>
    %528 = vector.shape_cast %527 : vector<128xf32> to vector<1x1x128xf32>
    %cst_263 = arith.constant 3.200000e+01 : f32
    %529 = vector.broadcast %cst_263 : f32 to vector<1x1x128xf32>
    %530 = arith.divf %528, %529 : vector<1x1x128xf32>
    %531 = vector.broadcast %523 : vector<1x1x128xf32> to vector<2x16x128xf32>
    %532 = arith.subf %517, %531 : vector<2x16x128xf32>
    %cst_264 = arith.constant 9.99999974E-6 : f32
    %533 = vector.broadcast %cst_264 : f32 to vector<1x1x128xf32>
    %534 = arith.addf %530, %533 : vector<1x1x128xf32>
    %535 = math.rsqrt %534 : vector<1x1x128xf32>
    %536 = vector.broadcast %535 : vector<1x1x128xf32> to vector<2x16x128xf32>
    %537 = arith.mulf %532, %536 : vector<2x16x128xf32>
    %538 = vector.shape_cast %518 : vector<1x128xf32> to vector<1x1x128xf32>
    %539 = vector.broadcast %538 : vector<1x1x128xf32> to vector<2x16x128xf32>
    %540 = arith.mulf %537, %539 : vector<2x16x128xf32>
    %541 = vector.shape_cast %519 : vector<1x128xf32> to vector<1x1x128xf32>
    %542 = vector.broadcast %541 : vector<1x1x128xf32> to vector<2x16x128xf32>
    %543 = arith.addf %540, %542 : vector<2x16x128xf32>
    %544 = vector.shape_cast %440 : vector<32x128xf32> to vector<2x16x128xf32>
    %545 = arith.addf %543, %544 : vector<2x16x128xf32>
    %cst_265 = arith.constant 0.000000e+00 : f32
    %546 = vector.broadcast %cst_265 : f32 to vector<2x16x128xf32>
    %547 = arith.maximumf %545, %546 : vector<2x16x128xf32>
    %c0_266 = arith.constant 0 : index
    %c0_267 = arith.constant 0 : index
    %548 = vector.load %arg31[%c0_266, %c0_267] : memref<1x128xf32, #tpu.memory_space<vmem>>, vector<1x128xf32>
    %549 = vector.shape_cast %548 : vector<1x128xf32> to vector<1x1x128xf32>
    %550 = vector.broadcast %549 : vector<1x1x128xf32> to vector<2x16x128xf32>
    %551 = arith.mulf %547, %550 : vector<2x16x128xf32>
    %cst_268 = arith.constant dense<0.000000e+00> : vector<2x16xf32>
    %552 = vector.multi_reduction <add>, %551, %cst_268 [2] : vector<2x16x128xf32> to vector<2x16xf32>
    %c0_269 = arith.constant 0 : index
    %c0_270 = arith.constant 0 : index
    %553 = vector.load %arg32[%c0_269, %c0_270] : memref<1x1xf32, #tpu.memory_space<vmem>>, vector<1x1xf32>
    %554 = vector.broadcast %553 : vector<1x1xf32> to vector<2x16xf32>
    %555 = arith.addf %552, %554 : vector<2x16xf32>
    %556 = math.tanh %555 : vector<2x16xf32>
    %cst_271 = arith.constant 0.000000e+00 : f32
    %557 = vector.broadcast %cst_271 : f32 to vector<2x16xf32>
    %558 = arith.maximumf %556, %557 : vector<2x16xf32>
    %559 = vector.shape_cast %558 : vector<2x16xf32> to vector<2x16x1xf32>
    %560 = vector.shape_cast %558 : vector<2x16xf32> to vector<2x1x16xf32>
    %561 = vector.broadcast %559 : vector<2x16x1xf32> to vector<2x16x16xf32>
    %562 = vector.broadcast %560 : vector<2x1x16xf32> to vector<2x16x16xf32>
    %563 = arith.mulf %561, %562 : vector<2x16x16xf32>
    %564 = vector.shape_cast %0 : vector<16x16xf32> to vector<1x16x16xf32>
    %565 = vector.broadcast %564 : vector<1x16x16xf32> to vector<2x16x16xf32>
    %566 = arith.addf %563, %565 : vector<2x16x16xf32>
    %cst_272 = arith.constant dense<0.000000e+00> : vector<2x16xf32>
    %567 = vector.multi_reduction <add>, %566, %cst_272 [2] : vector<2x16x16xf32> to vector<2x16xf32>
    %568 = math.rsqrt %567 : vector<2x16xf32>
    "tpu.trace_start"() <{level = 10 : i32, message = "bij,bjc->bic"}> : () -> ()
    %cst_273 = arith.constant dense<0.000000e+00> : vector<2x16x128xf32>
    %569 = tpu.matmul %566, %547, %cst_273 {dimension_numbers = #tpu.dot_dimension_numbers<[2], [1], [1], [2], [0, 0, 0, 1, 1, 2], [0], [0]>} : vector<2x16x16xf32>, vector<2x16x128xf32>, vector<2x16x128xf32> -> vector<2x16x128xf32>
    "tpu.trace_stop"() : () -> ()
    %570 = vector.shape_cast %568 : vector<2x16xf32> to vector<2x16x1xf32>
    %571 = vector.shape_cast %568 : vector<2x16xf32> to vector<2x16x1xf32>
    %572 = vector.broadcast %571 : vector<2x16x1xf32> to vector<2x16x128xf32>
    %573 = arith.mulf %572, %547 : vector<2x16x128xf32>
    "tpu.trace_start"() <{level = 10 : i32, message = "bij,bjc->bic"}> : () -> ()
    %cst_274 = arith.constant dense<0.000000e+00> : vector<2x16x128xf32>
    %574 = tpu.matmul %566, %573, %cst_274 {dimension_numbers = #tpu.dot_dimension_numbers<[2], [1], [1], [2], [0, 0, 0, 1, 1, 2], [0], [0]>} : vector<2x16x16xf32>, vector<2x16x128xf32>, vector<2x16x128xf32> -> vector<2x16x128xf32>
    "tpu.trace_stop"() : () -> ()
    %575 = vector.broadcast %570 : vector<2x16x1xf32> to vector<2x16x128xf32>
    %576 = arith.mulf %575, %574 : vector<2x16x128xf32>
    %577 = vector.shape_cast %569 : vector<2x16x128xf32> to vector<32x128xf32>
    %c0_275 = arith.constant 0 : index
    %c0_276 = arith.constant 0 : index
    %578 = vector.load %arg33[%c0_275, %c0_276] : memref<128x128xf32, #tpu.memory_space<vmem>>, vector<128x128xf32>
    %cst_277 = arith.constant dense<0.000000e+00> : vector<32x128xf32>
    %579 = tpu.matmul %577, %578, %cst_277 {dimension_numbers = #tpu.dot_dimension_numbers<[1], [0], [0], [1], [0, 0, 1, 1], [], []>} : vector<32x128xf32>, vector<128x128xf32>, vector<32x128xf32> -> vector<32x128xf32>
    %580 = vector.shape_cast %576 : vector<2x16x128xf32> to vector<32x128xf32>
    %c0_278 = arith.constant 0 : index
    %c0_279 = arith.constant 0 : index
    %581 = vector.load %arg34[%c0_278, %c0_279] : memref<128x128xf32, #tpu.memory_space<vmem>>, vector<128x128xf32>
    %cst_280 = arith.constant dense<0.000000e+00> : vector<32x128xf32>
    %582 = tpu.matmul %580, %581, %cst_280 {dimension_numbers = #tpu.dot_dimension_numbers<[1], [0], [0], [1], [0, 0, 1, 1], [], []>} : vector<32x128xf32>, vector<128x128xf32>, vector<32x128xf32> -> vector<32x128xf32>
    %583 = arith.addf %579, %582 : vector<32x128xf32>
    %c0_281 = arith.constant 0 : index
    %c0_282 = arith.constant 0 : index
    %584 = vector.load %arg35[%c0_281, %c0_282] : memref<1x128xf32, #tpu.memory_space<vmem>>, vector<1x128xf32>
    %585 = vector.broadcast %584 : vector<1x128xf32> to vector<32x128xf32>
    %586 = arith.addf %583, %585 : vector<32x128xf32>
    %587 = vector.shape_cast %586 : vector<32x128xf32> to vector<2x16x128xf32>
    %c0_283 = arith.constant 0 : index
    %c0_284 = arith.constant 0 : index
    %588 = vector.load %arg36[%c0_283, %c0_284] : memref<1x128xf32, #tpu.memory_space<vmem>>, vector<1x128xf32>
    %c0_285 = arith.constant 0 : index
    %c0_286 = arith.constant 0 : index
    %589 = vector.load %arg37[%c0_285, %c0_286] : memref<1x128xf32, #tpu.memory_space<vmem>>, vector<1x128xf32>
    %cst_287 = arith.constant dense<0.000000e+00> : vector<128xf32>
    %590 = vector.multi_reduction <add>, %587, %cst_287 [0, 1] : vector<2x16x128xf32> to vector<128xf32>
    %591 = vector.shape_cast %590 : vector<128xf32> to vector<1x1x128xf32>
    %cst_288 = arith.constant 3.200000e+01 : f32
    %592 = vector.broadcast %cst_288 : f32 to vector<1x1x128xf32>
    %593 = arith.divf %591, %592 : vector<1x1x128xf32>
    %594 = vector.broadcast %593 : vector<1x1x128xf32> to vector<2x16x128xf32>
    %595 = arith.subf %587, %594 : vector<2x16x128xf32>
    %596 = arith.mulf %595, %595 : vector<2x16x128xf32>
    %cst_289 = arith.constant dense<0.000000e+00> : vector<128xf32>
    %597 = vector.multi_reduction <add>, %596, %cst_289 [0, 1] : vector<2x16x128xf32> to vector<128xf32>
    %598 = vector.shape_cast %597 : vector<128xf32> to vector<1x1x128xf32>
    %cst_290 = arith.constant 3.200000e+01 : f32
    %599 = vector.broadcast %cst_290 : f32 to vector<1x1x128xf32>
    %600 = arith.divf %598, %599 : vector<1x1x128xf32>
    %601 = vector.broadcast %593 : vector<1x1x128xf32> to vector<2x16x128xf32>
    %602 = arith.subf %587, %601 : vector<2x16x128xf32>
    %cst_291 = arith.constant 9.99999974E-6 : f32
    %603 = vector.broadcast %cst_291 : f32 to vector<1x1x128xf32>
    %604 = arith.addf %600, %603 : vector<1x1x128xf32>
    %605 = math.rsqrt %604 : vector<1x1x128xf32>
    %606 = vector.broadcast %605 : vector<1x1x128xf32> to vector<2x16x128xf32>
    %607 = arith.mulf %602, %606 : vector<2x16x128xf32>
    %608 = vector.shape_cast %588 : vector<1x128xf32> to vector<1x1x128xf32>
    %609 = vector.broadcast %608 : vector<1x1x128xf32> to vector<2x16x128xf32>
    %610 = arith.mulf %607, %609 : vector<2x16x128xf32>
    %611 = vector.shape_cast %589 : vector<1x128xf32> to vector<1x1x128xf32>
    %612 = vector.broadcast %611 : vector<1x1x128xf32> to vector<2x16x128xf32>
    %613 = arith.addf %610, %612 : vector<2x16x128xf32>
    %cst_292 = arith.constant 0.000000e+00 : f32
    %614 = vector.broadcast %cst_292 : f32 to vector<2x16x128xf32>
    %615 = arith.maximumf %613, %614 : vector<2x16x128xf32>
    %616 = arith.addf %615, %547 : vector<2x16x128xf32>
    %c0_293 = arith.constant 0 : index
    %c0_294 = arith.constant 0 : index
    %617 = vector.load %arg3[%c0_293, %c0_294] : memref<128x128xf32, #tpu.memory_space<vmem>>, vector<128x128xf32>
    %618 = vector.extract_strided_slice %616 {offsets = [0, 0, 0], sizes = [1, 16, 128], strides = [1, 1, 1]} : vector<2x16x128xf32> to vector<1x16x128xf32>
    %619 = vector.shape_cast %618 : vector<1x16x128xf32> to vector<16x128xf32>
    %cst_295 = arith.constant dense<0.000000e+00> : vector<128x16xf32>
    %620 = tpu.matmul %617, %619, %cst_295 {dimension_numbers = #tpu.dot_dimension_numbers<[1], [1], [0], [0], [0, 0, 1, 0], [], []>} : vector<128x128xf32>, vector<16x128xf32>, vector<128x16xf32> -> vector<128x16xf32>
    %c0_296 = arith.constant 0 : index
    %c0_297 = arith.constant 0 : index
    %c0_298 = arith.constant 0 : index
    %621 = vector.load %arg38[%c0_296, %c0_297, %c0_298] : memref<2x128x16xf32, #tpu.memory_space<vmem>>, vector<1x128x16xf32>
    %622 = vector.shape_cast %621 : vector<1x128x16xf32> to vector<128x16xf32>
    %623 = vector.shape_cast %620 : vector<128x16xf32> to vector<1x128x16xf32>
    tpu.vector_store %arg38[%c0_296, %c0_297, %c0_298], %623 {strides = array<i32>} : memref<2x128x16xf32, #tpu.memory_space<vmem>>, vector<1x128x16xf32>,
    %624 = vector.extract_strided_slice %616 {offsets = [1, 0, 0], sizes = [1, 16, 128], strides = [1, 1, 1]} : vector<2x16x128xf32> to vector<1x16x128xf32>
    %625 = vector.shape_cast %624 : vector<1x16x128xf32> to vector<16x128xf32>
    %cst_299 = arith.constant dense<0.000000e+00> : vector<128x16xf32>
    %626 = tpu.matmul %617, %625, %cst_299 {dimension_numbers = #tpu.dot_dimension_numbers<[1], [1], [0], [0], [0, 0, 1, 0], [], []>} : vector<128x128xf32>, vector<16x128xf32>, vector<128x16xf32> -> vector<128x16xf32>
    %c1_300 = arith.constant 1 : index
    %c0_301 = arith.constant 0 : index
    %c0_302 = arith.constant 0 : index
    %627 = vector.load %arg38[%c1_300, %c0_301, %c0_302] : memref<2x128x16xf32, #tpu.memory_space<vmem>>, vector<1x128x16xf32>
    %628 = vector.shape_cast %627 : vector<1x128x16xf32> to vector<128x16xf32>
    %629 = vector.shape_cast %626 : vector<128x16xf32> to vector<1x128x16xf32>
    tpu.vector_store %arg38[%c1_300, %c0_301, %c0_302], %629 {strides = array<i32>} : memref<2x128x16xf32, #tpu.memory_space<vmem>>, vector<1x128x16xf32>,
    return
  }
  func.func @transform_0(%arg0: i32) -> (i32, i32, i32) {
    %c0_i32 = arith.constant 0 : i32
    %c0_i32_0 = arith.constant 0 : i32
    %c0_i32_1 = arith.constant 0 : i32
    %c0_i32_2 = arith.constant 0 : i32
    return %c0_i32, %c0_i32_0, %c0_i32_1 : i32, i32, i32
  }
  func.func @transform_1(%arg0: i32) -> (i32, i32) {
    %c0_i32 = arith.constant 0 : i32
    %c0_i32_0 = arith.constant 0 : i32
    %c0_i32_1 = arith.constant 0 : i32
    return %c0_i32, %c0_i32_0 : i32, i32
  }
  func.func @transform_2(%arg0: i32) -> (i32, i32) {
    %c0_i32 = arith.constant 0 : i32
    %c0_i32_0 = arith.constant 0 : i32
    %c0_i32_1 = arith.constant 0 : i32
    return %c0_i32, %c0_i32_0 : i32, i32
  }
  func.func @transform_3(%arg0: i32) -> (i32, i32) {
    %c0_i32 = arith.constant 0 : i32
    %c0_i32_0 = arith.constant 0 : i32
    %c0_i32_1 = arith.constant 0 : i32
    return %c0_i32, %c0_i32_0 : i32, i32
  }
  func.func @transform_4(%arg0: i32) -> (i32, i32) {
    %c0_i32 = arith.constant 0 : i32
    %c0_i32_0 = arith.constant 0 : i32
    %c0_i32_1 = arith.constant 0 : i32
    return %c0_i32, %c0_i32_0 : i32, i32
  }
  func.func @transform_5(%arg0: i32) -> (i32, i32) {
    %c0_i32 = arith.constant 0 : i32
    %c0_i32_0 = arith.constant 0 : i32
    %c0_i32_1 = arith.constant 0 : i32
    return %c0_i32, %c0_i32_0 : i32, i32
  }
  func.func @transform_6(%arg0: i32) -> (i32, i32) {
    %c0_i32 = arith.constant 0 : i32
    %c0_i32_0 = arith.constant 0 : i32
    %c0_i32_1 = arith.constant 0 : i32
    return %c0_i32, %c0_i32_0 : i32, i32
  }
  func.func @transform_7(%arg0: i32) -> (i32, i32, i32) {
    %c0_i32 = arith.constant 0 : i32
    %c0_i32_0 = arith.constant 0 : i32
    %c0_i32_1 = arith.constant 0 : i32
    %c0_i32_2 = arith.constant 0 : i32
    return %c0_i32, %c0_i32_0, %c0_i32_1 : i32, i32, i32
  }
  func.func @transform_8(%arg0: i32) -> (i32, i32, i32) {
    %c0_i32 = arith.constant 0 : i32
    %c0_i32_0 = arith.constant 0 : i32
    %c0_i32_1 = arith.constant 0 : i32
    %c0_i32_2 = arith.constant 0 : i32
    return %c0_i32, %c0_i32_0, %c0_i32_1 : i32, i32, i32
  }
  func.func @transform_9(%arg0: i32) -> (i32, i32, i32) {
    %c0_i32 = arith.constant 0 : i32
    %c0_i32_0 = arith.constant 0 : i32
    %c0_i32_1 = arith.constant 0 : i32
    %c0_i32_2 = arith.constant 0 : i32
    return %c0_i32, %c0_i32_0, %c0_i32_1 : i32, i32, i32
  }
  func.func @transform_10(%arg0: i32) -> (i32, i32, i32) {
    %c0_i32 = arith.constant 0 : i32
    %c0_i32_0 = arith.constant 0 : i32
    %c0_i32_1 = arith.constant 0 : i32
    %c0_i32_2 = arith.constant 0 : i32
    return %c0_i32, %c0_i32_0, %c0_i32_1 : i32, i32, i32
  }
  func.func @transform_11(%arg0: i32) -> (i32, i32, i32) {
    %c0_i32 = arith.constant 0 : i32
    %c0_i32_0 = arith.constant 0 : i32
    %c0_i32_1 = arith.constant 0 : i32
    %c0_i32_2 = arith.constant 0 : i32
    return %c0_i32, %c0_i32_0, %c0_i32_1 : i32, i32, i32
  }
  func.func @transform_12(%arg0: i32) -> (i32, i32, i32) {
    %c0_i32 = arith.constant 0 : i32
    %c0_i32_0 = arith.constant 0 : i32
    %c0_i32_1 = arith.constant 0 : i32
    %c0_i32_2 = arith.constant 0 : i32
    return %c0_i32, %c0_i32_0, %c0_i32_1 : i32, i32, i32
  }
  func.func @transform_13(%arg0: i32) -> (i32, i32, i32) {
    %c0_i32 = arith.constant 0 : i32
    %c0_i32_0 = arith.constant 0 : i32
    %c0_i32_1 = arith.constant 0 : i32
    %c0_i32_2 = arith.constant 0 : i32
    return %c0_i32, %c0_i32_0, %c0_i32_1 : i32, i32, i32
  }
  func.func @transform_14(%arg0: i32) -> (i32, i32, i32) {
    %c0_i32 = arith.constant 0 : i32
    %c0_i32_0 = arith.constant 0 : i32
    %c0_i32_1 = arith.constant 0 : i32
    %c0_i32_2 = arith.constant 0 : i32
    return %c0_i32, %c0_i32_0, %c0_i32_1 : i32, i32, i32
  }
  func.func @transform_15(%arg0: i32) -> (i32, i32, i32) {
    %c0_i32 = arith.constant 0 : i32
    %c0_i32_0 = arith.constant 0 : i32
    %c0_i32_1 = arith.constant 0 : i32
    %c0_i32_2 = arith.constant 0 : i32
    return %c0_i32, %c0_i32_0, %c0_i32_1 : i32, i32, i32
  }
  func.func @transform_16(%arg0: i32) -> (i32, i32, i32) {
    %c0_i32 = arith.constant 0 : i32
    %c0_i32_0 = arith.constant 0 : i32
    %c0_i32_1 = arith.constant 0 : i32
    %c0_i32_2 = arith.constant 0 : i32
    return %c0_i32, %c0_i32_0, %c0_i32_1 : i32, i32, i32
  }
  func.func @transform_17(%arg0: i32) -> (i32, i32, i32) {
    %c0_i32 = arith.constant 0 : i32
    %c0_i32_0 = arith.constant 0 : i32
    %c0_i32_1 = arith.constant 0 : i32
    %c0_i32_2 = arith.constant 0 : i32
    return %c0_i32, %c0_i32_0, %c0_i32_1 : i32, i32, i32
  }
  func.func @transform_18(%arg0: i32) -> (i32, i32, i32) {
    %c0_i32 = arith.constant 0 : i32
    %c0_i32_0 = arith.constant 0 : i32
    %c0_i32_1 = arith.constant 0 : i32
    %c0_i32_2 = arith.constant 0 : i32
    return %c0_i32, %c0_i32_0, %c0_i32_1 : i32, i32, i32
  }
  func.func @transform_19(%arg0: i32) -> (i32, i32, i32) {
    %c0_i32 = arith.constant 0 : i32
    %c0_i32_0 = arith.constant 0 : i32
    %c0_i32_1 = arith.constant 0 : i32
    %c0_i32_2 = arith.constant 0 : i32
    return %c0_i32, %c0_i32_0, %c0_i32_1 : i32, i32, i32
  }
  func.func @transform_20(%arg0: i32) -> (i32, i32) {
    %c0_i32 = arith.constant 0 : i32
    %c0_i32_0 = arith.constant 0 : i32
    %c0_i32_1 = arith.constant 0 : i32
    return %c0_i32, %c0_i32_0 : i32, i32
  }
  func.func @transform_21(%arg0: i32) -> (i32, i32) {
    %c0_i32 = arith.constant 0 : i32
    %c0_i32_0 = arith.constant 0 : i32
    %c0_i32_1 = arith.constant 0 : i32
    return %c0_i32, %c0_i32_0 : i32, i32
  }
  func.func @transform_22(%arg0: i32) -> (i32, i32) {
    %c0_i32 = arith.constant 0 : i32
    %c0_i32_0 = arith.constant 0 : i32
    %c0_i32_1 = arith.constant 0 : i32
    return %c0_i32, %c0_i32_0 : i32, i32
  }
  func.func @transform_23(%arg0: i32) -> (i32, i32) {
    %c0_i32 = arith.constant 0 : i32
    %c0_i32_0 = arith.constant 0 : i32
    %c0_i32_1 = arith.constant 0 : i32
    return %c0_i32, %c0_i32_0 : i32, i32
  }
  func.func @transform_24(%arg0: i32) -> (i32, i32) {
    %c0_i32 = arith.constant 0 : i32
    %c0_i32_0 = arith.constant 0 : i32
    %c0_i32_1 = arith.constant 0 : i32
    return %c0_i32, %c0_i32_0 : i32, i32
  }
  func.func @transform_25(%arg0: i32) -> (i32, i32) {
    %c0_i32 = arith.constant 0 : i32
    %c0_i32_0 = arith.constant 0 : i32
    %c0_i32_1 = arith.constant 0 : i32
    return %c0_i32, %c0_i32_0 : i32, i32
  }
  func.func @transform_26(%arg0: i32) -> (i32, i32) {
    %c0_i32 = arith.constant 0 : i32
    %c0_i32_0 = arith.constant 0 : i32
    %c0_i32_1 = arith.constant 0 : i32
    return %c0_i32, %c0_i32_0 : i32, i32
  }
  func.func @transform_27(%arg0: i32) -> (i32, i32) {
    %c0_i32 = arith.constant 0 : i32
    %c0_i32_0 = arith.constant 0 : i32
    %c0_i32_1 = arith.constant 0 : i32
    return %c0_i32, %c0_i32_0 : i32, i32
  }
  func.func @transform_28(%arg0: i32) -> (i32, i32) {
    %c0_i32 = arith.constant 0 : i32
    %c0_i32_0 = arith.constant 0 : i32
    %c0_i32_1 = arith.constant 0 : i32
    return %c0_i32, %c0_i32_0 : i32, i32
  }
  func.func @transform_29(%arg0: i32) -> (i32, i32) {
    %c0_i32 = arith.constant 0 : i32
    %c0_i32_0 = arith.constant 0 : i32
    %c0_i32_1 = arith.constant 0 : i32
    return %c0_i32, %c0_i32_0 : i32, i32
  }
  func.func @transform_30(%arg0: i32) -> (i32, i32) {
    %c0_i32 = arith.constant 0 : i32
    %c0_i32_0 = arith.constant 0 : i32
    %c0_i32_1 = arith.constant 0 : i32
    return %c0_i32, %c0_i32_0 : i32, i32
  }
  func.func @transform_31(%arg0: i32) -> (i32, i32) {
    %c0_i32 = arith.constant 0 : i32
    %c0_i32_0 = arith.constant 0 : i32
    %c0_i32_1 = arith.constant 0 : i32
    return %c0_i32, %c0_i32_0 : i32, i32
  }
  func.func @transform_32(%arg0: i32) -> (i32, i32) {
    %c0_i32 = arith.constant 0 : i32
    %c0_i32_0 = arith.constant 0 : i32
    %c0_i32_1 = arith.constant 0 : i32
    return %c0_i32, %c0_i32_0 : i32, i32
  }
  func.func @transform_33(%arg0: i32) -> (i32, i32) {
    %c0_i32 = arith.constant 0 : i32
    %c0_i32_0 = arith.constant 0 : i32
    %c0_i32_1 = arith.constant 0 : i32
    return %c0_i32, %c0_i32_0 : i32, i32
  }
  func.func @transform_34(%arg0: i32) -> (i32, i32) {
    %c0_i32 = arith.constant 0 : i32
    %c0_i32_0 = arith.constant 0 : i32
    %c0_i32_1 = arith.constant 0 : i32
    return %c0_i32, %c0_i32_0 : i32, i32
  }
  func.func @transform_35(%arg0: i32) -> (i32, i32) {
    %c0_i32 = arith.constant 0 : i32
    %c0_i32_0 = arith.constant 0 : i32
    %c0_i32_1 = arith.constant 0 : i32
    return %c0_i32, %c0_i32_0 : i32, i32
  }
  func.func @transform_36(%arg0: i32) -> (i32, i32) {
    %c0_i32 = arith.constant 0 : i32
    %c0_i32_0 = arith.constant 0 : i32
    %c0_i32_1 = arith.constant 0 : i32
    return %c0_i32, %c0_i32_0 : i32, i32
  }
  func.func @transform_37(%arg0: i32) -> (i32, i32, i32) {
    %c0_i32 = arith.constant 0 : i32
    %c0_i32_0 = arith.constant 0 : i32
    %c0_i32_1 = arith.constant 0 : i32
    %c0_i32_2 = arith.constant 0 : i32
    return %c0_i32, %c0_i32_0, %c0_i32_1 : i32, i32, i32
  }
}

</mosaic_0001>

<bundles_post_ra>
// kernel: trans_gd_forward.1
= control target key start
LH: loop header
LB: loop body
LE: loop exit
PB: predicated region body
PF: predicated region fallthrough
CT: control target
= control target key end

     0   :  { %s11188_s6 = smov 1   ;;  %s11189_s10 = smov 2   ;;  %s13687_s0 = inlined_call_operand.smem [shape: u32[38], index: -1, kind: input, shape index: {}] }
   0x1   :  { %s11273_s5 = sld [smem:[%s13687_s0]]   ;;  %s11190_s14 = smov 3  }
   0x2   :  { %s11278_s9 = sld [smem:[%s13687_s0 + %s11188_s6]]   ;;  %s11191_s18 = smov 4  }
   0x3   :  { %s11283_s13 = sld [smem:[%s13687_s0 + %s11189_s10]]   ;;  %s11192_s22 = smov 5  }
   0x4   :  { %s11288_s17 = sld [smem:[%s13687_s0 + %s11190_s14]]   ;;  %s11193_s26 = smov 6  }
   0x5   :  { %s11293_s21 = sld [smem:[%s13687_s0 + %s11191_s18]]   ;;  %s11194_s30 = smov 7  }
   0x6   :  { %s11298_s25 = sld [smem:[%s13687_s0 + %s11192_s22]]   ;;  %s11195_s4 = smov 8  }
   0x7   :  { %13695 = sst [smem:[#allocation63_spill]] %s11273_s5  ;;  %s11196_s10 = smov 9  }
   0x8   :  { %13696 = sst [smem:[#allocation64_spill]] %s11278_s9  ;;  %s11197_s15 = smov 10  }
   0x9   :  { %13697 = sst [smem:[#allocation65_spill]] %s11283_s13  ;;  %s11198_s20 = smov 11  }
   0xa   :  { %13698 = sst [smem:[#allocation66_spill]] %s11288_s17  ;;  %s11200_s1 = smov 13  }
   0xb   :  { %s11303_s29 = sld [smem:[%s13687_s0 + %s11193_s26]]   ;;  %s11199_s26 = smov 12  }
   0xc   :  { %13699 = sst [smem:[#allocation67_spill]] %s11298_s25  ;;  %s11201_s7 = smov 14  }
   0xd   :  { %s11308_s3 = sld [smem:[%s13687_s0 + %s11194_s30]]   ;;  %s11203_s22 = smov 16  }
   0xe   :  { %s11313_s8 = sld [smem:[%s13687_s0 + %s11195_s4]]   ;;  %s11204_s28 = smov 17  }
   0xf   :  { %s11318_s14 = sld [smem:[%s13687_s0 + %s11196_s10]]   ;;  %s11219_s23 = smov 32  }
  0x10   :  { %s11323_s19 = sld [smem:[%s13687_s0 + %s11197_s15]]   ;;  %s11202_s15 = smov 15  }
  0x11   :  { %s11328_s24 = sld [smem:[%s13687_s0 + %s11198_s20]]   ;;  %s11221_s10 = smov 34  }
  0x12   :  { %s11333_s30 = sld [smem:[%s13687_s0 + %s11199_s26]]   ;;  %s11222_s16 = smov 35  }
  0x13   :  { %13700 = sst [smem:[#allocation68_spill]] %s11308_s3 }
  0x14   :  { %13701 = sst [smem:[#allocation69_spill]] %s11313_s8 }
  0x15   :  { %13702 = sst [smem:[#allocation70_spill]] %s11318_s14 }
  0x16   :  { %13703 = sst [smem:[#allocation71_spill]] %s11323_s19 }
  0x17   :  { %s11338_s6 = sld [smem:[%s13687_s0 + %s11200_s1]]   ;;  %s11220_s1 = smov 33  }
  0x18   :  { %13704 = sst [smem:[#allocation72_spill]] %s11333_s30 }
  0x19   :  { %s11343_s12 = sld [smem:[%s13687_s0 + %s11201_s7]]   ;;  %s11205_s7 = smov 18  }
  0x1a   :  { %s11348_s20 = sld [smem:[%s13687_s0 + %s11202_s15]]   ;;  %s11206_s15 = smov 19  }
  0x1b   :  { %s11353_s27 = sld [smem:[%s13687_s0 + %s11203_s22]]   ;;  %s11207_s22 = smov 20  }
  0x1c   :  { %s11358_s4 = sld [smem:[%s13687_s0 + %s11204_s28]]   ;;  %s11208_s28 = smov 21  }
  0x1d   :  { %13705 = sst [smem:[#allocation73_spill]] %s11338_s6 }
  0x1e   :  { %s11363_s6 = sld [smem:[%s13687_s0 + %s11205_s7]]   ;;  %s11209_s7 = smov 22  }
  0x1f   :  { %s11368_s17 = sld [smem:[%s13687_s0 + %s11206_s15]]   ;;  %s11210_s15 = smov 23  }
  0x20   :  { %13706 = sst [smem:[#allocation74_spill]] %s11348_s20 }
  0x21   :  { %s11373_s8 = sld [smem:[%s13687_s0 + %s11207_s22]]   ;;  %s11211_s22 = smov 24  }
  0x22   :  { %13707 = sst [smem:[#allocation75_spill]] %s11358_s4 }
  0x23   :  { %s11378_s3 = sld [smem:[%s13687_s0 + %s11208_s28]]   ;;  %s11212_s28 = smov 25  }
  0x24   :  { %s11383_s14 = sld [smem:[%s13687_s0 + %s11209_s7]]   ;;  %s11213_s7 = smov 26  }
  0x25   :  { %13708 = sst [smem:[#allocation76_spill]] %s11368_s17 }
  0x26   :  { %s11388_s9 = sld [smem:[%s13687_s0 + %s11210_s15]]   ;;  %s11214_s15 = smov 27  }
  0x27   :  { %s11393_s5 = sld [smem:[%s13687_s0 + %s11211_s22]]   ;;  %s11215_s22 = smov 28  }
  0x28   :  { %s11403_s17 = sld [smem:[%s13687_s0 + %s11213_s7]]   ;;  %s11217_s7 = smov 30  }
  0x29   :  { %13709 = sst [smem:[#allocation77_spill]] %s11378_s3 }
  0x2a   :  { %s11398_s3 = sld [smem:[%s13687_s0 + %s11212_s28]]   ;;  %s11216_s28 = smov 29  }
  0x2b   :  { %s11413_s4 = sld [smem:[%s13687_s0 + %s11215_s22]]  }
  0x2c   :  { %13710 = sst [smem:[#allocation78_spill]] %s11388_s9 }
  0x2d   :  { %s11408_s9 = sld [smem:[%s13687_s0 + %s11214_s15]]   ;;  %s11218_s15 = smov 31  }
  0x2e   :  { %s11423_s20 = sld [smem:[%s13687_s0 + %s11217_s7]]  }
  0x2f   :  { %s11431_s30 = sld [smem:[%s13687_s0 + %s11219_s23]]   ;;  %s11223_s23 = smov 36  }
  0x30   :  { %13711 = sst [smem:[#allocation79_spill]] %s11398_s3 }
  0x31   :  { %s11418_s3 = sld [smem:[%s13687_s0 + %s11216_s28]]  }
  0x32   :  { %s11441_s19 = sld [smem:[%s13687_s0 + %s11221_s10]]  }
  0x33   :  { %13712 = sst [smem:[#allocation80_spill]] %s11408_s9 }
  0x34   :  { %s7777_s9 = sld [smem:[%s13687_s0 + %s11218_s15]]  }
  0x35   :  { %13714 = sst [smem:[#allocation82_spill]] %s11431_s30 }
  0x36   :  { %s11446_s25 = sld [smem:[%s13687_s0 + %s11222_s16]]  }
  0x37   :  { %13713 = sst [smem:[#allocation81_spill]] %s11418_s3 }
  0x38   :  { %s11436_s3 = sld [smem:[%s13687_s0 + %s11220_s1]]   ;;  %s11224_s1 = smov 37  }
  0x39   :  { %s11451_s30 = sld [smem:[%s13687_s0 + %s11223_s23]]  }
  0x3a   :  { %s11456_s13 = sld [smem:[%s13687_s0 + %s11224_s1]]   ;;  %v80_v0 = vstv %s7777_s9 }
  0x3b   :  { %81 = vst [vmem:[#allocation3] sm:$0x1] %v80_v0 }
  0x3c   :  { %82 = vsyncpa [#allocation5], 0 }
  0x3d   :  { %83 = vsyncpa [#allocation7], 0 }
  0x3e   :  { %84 = vsyncpa [#allocation10], 0 }
  0x3f   :  { %85 = vsyncpa [#allocation13], 0 }
  0x40   :  { %86 = vsyncpa [#allocation16], 0 }
  0x41   :  { %87 = vsyncpa [#allocation19], 0 }
  0x42   :  { %88 = vsyncpa [#allocation22], 0 }
  0x43   :  { %89 = vsyncpa [#allocation25], 0 }
  0x44   :  { %90 = vsyncpa [#allocation28], 0 }
  0x45   :  { %91 = vsyncpa [#allocation31], 0 }
  0x46   :  { %92 = vsyncpa [#allocation34], 0 }
  0x47   :  { %93 = vsyncpa [#allocation37], 0 }
  0x48   :  { %94 = vsyncpa [#allocation40], 0 }
  0x49   :  { %95 = vsyncpa [#allocation43], 0 }
  0x4a   :  { %96 = vsyncpa [#allocation46], 0  ;;  %s11225_s10 = smov [#allocation6]   ;;  %s11226_s7 = smov [#allocation9]  }
  0x4b   :  { %s121_s0 = sshll.u32 %s11225_s10, 4  ;;  %s143_s9 = sshll.u32 %s11226_s7, 4  ;;  %s122_s0 = int_to_ptr.vmem [resolvable:$true] %s121_s0  ;;  %s144_s9 = int_to_ptr.vmem [resolvable:$true] %s143_s9 }
  0x4c   :  { %s10586_s11 = scalar_lea.vmem %s122_s0, 16  ;;  %s10590_s16 = scalar_lea.vmem %s122_s0, 32 }
  0x4d   :  { %p10587_p0 = scmp.ne.s32.totalorder %s122_s0, %s10586_s11  ;;  %p10591_p1 = scmp.lt.s32.totalorder %s122_s0, %s122_s0 }
  0x4e   :  { %p10592_p2 = scmp.lt.s32.totalorder %s10590_s16, %s10586_s11 }
  0x50   :  { %p10593_p3 = por %p10592_p2, %p10591_p1 }
  0x52   :  { %p10594_p4 = pnand %p10593_p3, %p10587_p0 }
  0x54   :  { %10597 = shalt.err (!%p10594_p4)
}
  0x55   :  { %124 = dma.hbm_to_vmem [thread:$0]  %s11293_s21, 16, %s122_s0, [#allocation7]  }
  0x56   :  { %s10606_s15 = scalar_lea.vmem %s144_s9, 16  ;;  %s10610_s18 = scalar_lea.vmem %s144_s9, 32 }
  0x57   :  { %p10607_p5 = scmp.ne.s32.totalorder %s144_s9, %s10606_s15  ;;  %p10611_p6 = scmp.lt.s32.totalorder %s144_s9, %s144_s9 }
  0x58   :  { %p10612_p7 = scmp.lt.s32.totalorder %s10610_s18, %s10606_s15 }
  0x5a   :  { %p10613_p8 = por %p10612_p7, %p10611_p6 }
  0x5c   :  { %p10614_p9 = pnand %p10613_p8, %p10607_p5 }
  0x5e   :  { %10617 = shalt.err (!%p10614_p9)
}
  0x5f   :  { %146 = dma.hbm_to_vmem [thread:$0]  %s11303_s29, 16, %s144_s9, [#allocation10]  }
  0x60   :  { %s11227_s23 = smov [#allocation12]   ;;  %s11228_s26 = smov [#allocation15]  }
  0x61   :  { %s170_s22 = sshll.u32 %s11227_s23, 4  ;;  %s196_s1 = sshll.u32 %s11228_s26, 4  ;;  %s171_s22 = int_to_ptr.vmem [resolvable:$true] %s170_s22  ;;  %s197_s1 = int_to_ptr.vmem [resolvable:$true] %s196_s1 }
  0x62   :  { %s10626_s28 = scalar_lea.vmem %s171_s22, 4096  ;;  %p10631_p11 = scmp.lt.s32.totalorder %s171_s22, %s171_s22 }
  0x63   :  { %p10627_p10 = scmp.ne.s32.totalorder %s171_s22, %s10626_s28  ;;  %p10632_p12 = scmp.lt.s32.totalorder %s10626_s28, %s10626_s28 }
  0x65   :  { %p10633_p13 = por %p10632_p12, %p10631_p11 }
  0x67   :  { %p10634_p0 = pnand %p10633_p13, %p10627_p10 }
  0x69   :  { %10637 = shalt.err (!%p10634_p0)
}
  0x6a   :  { %s11229_s21 = smov 128   ;;  %s11230_s2 = smov 8  }
  0x6b   :  { %176 = dma.hbm_to_vmem [thread:$0]  %s11328_s24, 4096, %s171_s22, [#allocation13], %s11229_s21, %s11229_s21, %s11230_s2  }
  0x6c   :  { %s10646_s29 = scalar_lea.vmem %s197_s1, 32  ;;  %p10651_p2 = scmp.lt.s32.totalorder %s197_s1, %s197_s1 }
  0x6d   :  { %p10647_p1 = scmp.ne.s32.totalorder %s197_s1, %s10646_s29  ;;  %p10652_p3 = scmp.lt.s32.totalorder %s10646_s29, %s10646_s29 }
  0x6f   :  { %p10653_p4 = por %p10652_p3, %p10651_p2 }
  0x71   :  { %p10654_p5 = pnand %p10653_p4, %p10647_p1 }
  0x73   :  { %10657 = shalt.err (!%p10654_p5)
}
  0x74   :  { %s11231_s10 = smov 16   ;;  %s11232_s0 = smov 1  }
  0x75   :  { %202 = dma.hbm_to_vmem [thread:$0]  %s11343_s12, 32, %s197_s1, [#allocation16], %s11231_s10, %s11231_s10, %s11232_s0  }
  0x76   :  { %s11233_s7 = smov [#allocation18]   ;;  %s11234_s11 = smov [#allocation21]  }
  0x77   :  { %s220_s9 = sshll.u32 %s11233_s7, 4  ;;  %s244_s16 = sshll.u32 %s11234_s11, 4  ;;  %s221_s9 = int_to_ptr.vmem [resolvable:$true] %s220_s9  ;;  %s245_s16 = int_to_ptr.vmem [resolvable:$true] %s244_s16 }
  0x78   :  { %s10666_s24 = scalar_lea.vmem %s221_s9, 4096  ;;  %p10671_p7 = scmp.lt.s32.totalorder %s221_s9, %s221_s9 }
  0x79   :  { %p10667_p6 = scmp.ne.s32.totalorder %s221_s9, %s10666_s24  ;;  %p10672_p8 = scmp.lt.s32.totalorder %s10666_s24, %s10666_s24 }
  0x7b   :  { %p10673_p9 = por %p10672_p8, %p10671_p7 }
  0x7d   :  { %p10674_p10 = pnand %p10673_p9, %p10667_p6 }
  0x7f   :  { %10677 = shalt.err (!%p10674_p10)
}
  0x80   :  { %226 = dma.hbm_to_vmem [thread:$0]  %s11353_s27, 4096, %s221_s9, [#allocation19], %s11229_s21, %s11229_s21, %s11230_s2  }
  0x81   :  { %s10686_s15 = scalar_lea.vmem %s245_s16, 4096  ;;  %p10691_p12 = scmp.lt.s32.totalorder %s245_s16, %s245_s16 }
  0x82   :  { %p10687_p11 = scmp.ne.s32.totalorder %s245_s16, %s10686_s15  ;;  %p10692_p13 = scmp.lt.s32.totalorder %s10686_s15, %s10686_s15 }
  0x84   :  { %p10693_p0 = por %p10692_p13, %p10691_p12 }
  0x86   :  { %p10694_p1 = pnand %p10693_p0, %p10687_p11 }
  0x88   :  { %10697 = shalt.err (!%p10694_p1)
}
  0x89   :  { %250 = dma.hbm_to_vmem [thread:$0]  %s11363_s6, 4096, %s245_s16, [#allocation22], %s11229_s21, %s11229_s21, %s11230_s2  }
  0x8a   :  { %s11235_s12 = smov [#allocation24]   ;;  %s11236_s23 = smov [#allocation27]  }
  0x8b   :  { %s268_s18 = sshll.u32 %s11235_s12, 4  ;;  %s290_s22 = sshll.u32 %s11236_s23, 4  ;;  %s269_s18 = int_to_ptr.vmem [resolvable:$true] %s268_s18  ;;  %s291_s22 = int_to_ptr.vmem [resolvable:$true] %s290_s22 }
  0x8c   :  { %s10706_s26 = scalar_lea.vmem %s269_s18, 2048  ;;  %p10711_p3 = scmp.lt.s32.totalorder %s269_s18, %s269_s18 }
  0x8d   :  { %p10707_p2 = scmp.ne.s32.totalorder %s269_s18, %s10706_s26  ;;  %p10712_p4 = scmp.lt.s32.totalorder %s10706_s26, %s10706_s26 }
  0x8f   :  { %p10713_p5 = por %p10712_p4, %p10711_p3 }
  0x91   :  { %p10714_p6 = pnand %p10713_p5, %p10707_p2 }
  0x93   :  { %10717 = shalt.err (!%p10714_p6)
}
  0x94   :  { %274 = dma.hbm_to_vmem [thread:$0]  %s11373_s8, 2048, %s269_s18, [#allocation25], %s11229_s21, %s11229_s21, %s11230_s2  }
  0x95   :  { %s10726_s27 = scalar_lea.vmem %s291_s22, 2048  ;;  %p10731_p8 = scmp.lt.s32.totalorder %s291_s22, %s291_s22 }
  0x96   :  { %p10727_p7 = scmp.ne.s32.totalorder %s291_s22, %s10726_s27  ;;  %p10732_p9 = scmp.lt.s32.totalorder %s10726_s27, %s10726_s27 }
  0x98   :  { %p10733_p10 = por %p10732_p9, %p10731_p8 }
  0x9a   :  { %p10734_p11 = pnand %p10733_p10, %p10727_p7 }
  0x9c   :  { %10737 = shalt.err (!%p10734_p11)
}
  0x9d   :  { %296 = dma.hbm_to_vmem [thread:$0]  %s11383_s14, 2048, %s291_s22, [#allocation28], %s11229_s21, %s11229_s21, %s11230_s2  }
  0x9e   :  { %s11237_s6 = smov [#allocation30]   ;;  %s11238_s28 = smov [#allocation33]  }
  0x9f   :  { %s313_s1 = sshll.u32 %s11237_s6, 4  ;;  %s332_s29 = sshll.u32 %s11238_s28, 4  ;;  %s314_s1 = int_to_ptr.vmem [resolvable:$true] %s313_s1  ;;  %s333_s29 = int_to_ptr.vmem [resolvable:$true] %s332_s29 }
  0xa0   :  { %s10746_s7 = scalar_lea.vmem %s314_s1, 16  ;;  %s10750_s8 = scalar_lea.vmem %s314_s1, 32 }
  0xa1   :  { %p10747_p12 = scmp.ne.s32.totalorder %s314_s1, %s10746_s7  ;;  %p10751_p13 = scmp.lt.s32.totalorder %s314_s1, %s314_s1 }
  0xa2   :  { %p10752_p0 = scmp.lt.s32.totalorder %s10750_s8, %s10746_s7 }
  0xa4   :  { %p10753_p1 = por %p10752_p0, %p10751_p13 }
  0xa6   :  { %p10754_p2 = pnand %p10753_p1, %p10747_p12 }
  0xa8   :  { %10757 = shalt.err (!%p10754_p2)
}
  0xa9   :  { %316 = dma.hbm_to_vmem [thread:$0]  %s11393_s5, 16, %s314_s1, [#allocation31]  }
  0xaa   :  { %s10766_s9 = scalar_lea.vmem %s333_s29, 2048  ;;  %p10771_p4 = scmp.lt.s32.totalorder %s333_s29, %s333_s29 }
  0xab   :  { %p10767_p3 = scmp.ne.s32.totalorder %s333_s29, %s10766_s9  ;;  %p10772_p5 = scmp.lt.s32.totalorder %s10766_s9, %s10766_s9 }
  0xad   :  { %p10773_p6 = por %p10772_p5, %p10771_p4 }
  0xaf   :  { %p10774_p7 = pnand %p10773_p6, %p10767_p3 }
  0xb1   :  { %10777 = shalt.err (!%p10774_p7)
}
  0xb2   :  { %338 = dma.hbm_to_vmem [thread:$0]  %s11403_s17, 2048, %s333_s29, [#allocation34], %s11229_s21, %s11229_s21, %s11230_s2  }
  0xb3   :  { %s11239_s14 = smov [#allocation36]   ;;  %s11240_s16 = smov [#allocation39]  }
  0xb4   :  { %s355_s11 = sshll.u32 %s11239_s14, 4  ;;  %s375_s24 = sshll.u32 %s11240_s16, 4  ;;  %s356_s11 = int_to_ptr.vmem [resolvable:$true] %s355_s11  ;;  %s376_s24 = int_to_ptr.vmem [resolvable:$true] %s375_s24 }
  0xb5   :  { %s10786_s15 = scalar_lea.vmem %s356_s11, 16  ;;  %s10790_s5 = scalar_lea.vmem %s356_s11, 32 }
  0xb6   :  { %p10787_p8 = scmp.ne.s32.totalorder %s356_s11, %s10786_s15  ;;  %p10791_p9 = scmp.lt.s32.totalorder %s356_s11, %s356_s11 }
  0xb7   :  { %p10792_p10 = scmp.lt.s32.totalorder %s10790_s5, %s10786_s15 }
  0xb9   :  { %p10793_p11 = por %p10792_p10, %p10791_p9 }
  0xbb   :  { %p10794_p12 = pnand %p10793_p11, %p10787_p8 }
  0xbd   :  { %10797 = shalt.err (!%p10794_p12)
}
  0xbe   :  { %358 = dma.hbm_to_vmem [thread:$0]  %s11413_s4, 16, %s356_s11, [#allocation37]  }
  0xbf   :  { %s10806_s12 = scalar_lea.vmem %s376_s24, 16  ;;  %s10810_s18 = scalar_lea.vmem %s376_s24, 32 }
  0xc0   :  { %p10807_p13 = scmp.ne.s32.totalorder %s376_s24, %s10806_s12  ;;  %p10811_p0 = scmp.lt.s32.totalorder %s376_s24, %s376_s24 }
  0xc1   :  { %p10812_p1 = scmp.lt.s32.totalorder %s10810_s18, %s10806_s12 }
  0xc3   :  { %p10813_p2 = por %p10812_p1, %p10811_p0 }
  0xc5   :  { %p10814_p3 = pnand %p10813_p2, %p10807_p13 }
  0xc7   :  { %10817 = shalt.err (!%p10814_p3)
}
  0xc8   :  { %378 = dma.hbm_to_vmem [thread:$0]  %s11423_s20, 16, %s376_s24, [#allocation40]  }
  0xc9   :  { %s11241_s17 = smov [#allocation42]   ;;  %s11242_s22 = smov [#allocation45]  }
  0xca   :  { %s398_s23 = sshll.u32 %s11241_s17, 4  ;;  %s421_s26 = sshll.u32 %s11242_s22, 4  ;;  %s399_s23 = int_to_ptr.vmem [resolvable:$true] %s398_s23  ;;  %s422_s26 = int_to_ptr.vmem [resolvable:$true] %s421_s26 }
  0xcb   :  { %s10826_s27 = scalar_lea.vmem %s399_s23, 2048  ;;  %p10831_p5 = scmp.lt.s32.totalorder %s399_s23, %s399_s23 }
  0xcc   :  { %p10827_p4 = scmp.ne.s32.totalorder %s399_s23, %s10826_s27  ;;  %p10832_p6 = scmp.lt.s32.totalorder %s10826_s27, %s10826_s27 }
  0xce   :  { %p10833_p7 = por %p10832_p6, %p10831_p5 }
  0xd0   :  { %p10834_p8 = pnand %p10833_p7, %p10827_p4 }
  0xd2   :  { %10837 = shalt.err (!%p10834_p8)
}
  0xd3   :  { %404 = dma.hbm_to_vmem [thread:$0]  %s11436_s3, 2048, %s399_s23, [#allocation43], %s11229_s21, %s11229_s21, %s11230_s2  }
  0xd4   :  { %s10846_s4 = scalar_lea.vmem %s422_s26, 16  ;;  %s10850_s20 = scalar_lea.vmem %s422_s26, 32 }
  0xd5   :  { %p10847_p9 = scmp.ne.s32.totalorder %s422_s26, %s10846_s4  ;;  %p10851_p10 = scmp.lt.s32.totalorder %s422_s26, %s422_s26 }
  0xd6   :  { %p10852_p11 = scmp.lt.s32.totalorder %s10850_s20, %s10846_s4 }
  0xd8   :  { %p10853_p12 = por %p10852_p11, %p10851_p10 }
  0xda   :  { %p10854_p13 = pnand %p10853_p12, %p10847_p9 }
  0xdc   :  { %10857 = shalt.err (!%p10854_p13)
}
  0xdd   :  { %424 = dma.hbm_to_vmem [thread:$0]  %s11446_s25, 16, %s422_s26, [#allocation46]  }
  0xde   :  { %s11243_s6 = smov [#allocation4]   ;;  %s11244_s28 = smov [#allocation8]  }
  0xdf   :  { %s106_s1 = sshll.u32 %s11243_s6, 4  ;;  %s130_s29 = sshll.u32 %s11244_s28, 4  ;;  %s107_s1 = int_to_ptr.vmem [resolvable:$true] %s106_s1  ;;  %s131_s29 = int_to_ptr.vmem [resolvable:$true] %s130_s29 }
  0xe0   :  { %s10866_s7 = scalar_lea.vmem %s107_s1, 2048  ;;  %p10871_p1 = scmp.lt.s32.totalorder %s107_s1, %s107_s1 }
  0xe1   :  { %p10867_p0 = scmp.ne.s32.totalorder %s107_s1, %s10866_s7  ;;  %p10872_p2 = scmp.lt.s32.totalorder %s10866_s7, %s10866_s7 }
  0xe3   :  { %p10873_p3 = por %p10872_p2, %p10871_p1 }
  0xe5   :  { %p10874_p4 = pnand %p10873_p3, %p10867_p0 }
  0xe7   :  { %10877 = shalt.err (!%p10874_p4)
}
  0xe8   :  { %s13715_s3 = sld [smem:[#allocation65_spill]]  ;;  %s10886_s8 = scalar_lea.vmem %s131_s29, 2048 }
  0xe9   :  { %p10887_p5 = scmp.ne.s32.totalorder %s131_s29, %s10886_s8  ;;  %p10891_p6 = scmp.lt.s32.totalorder %s131_s29, %s131_s29 }
  0xea   :  { %p10892_p7 = scmp.lt.s32.totalorder %s10886_s8, %s10886_s8 }
  0xec   :  { %p10893_p8 = por %p10892_p7, %p10891_p6 }
  0xee   :  { %112 = dma.hbm_to_vmem [thread:$0]  %s13715_s3, 2048, %s107_s1, [#allocation5], %s11229_s21, %s11229_s21, %s11230_s2  }
  0xef   :  { %p10894_p9 = pnand %p10893_p8, %p10887_p5 }
  0xf1   :  { %10897 = shalt.err (!%p10894_p9)
}
  0xf2   :  { %s13716_s25 = sld [smem:[#allocation67_spill]]  ;;  %s11245_s9 = smov [#allocation11]  }
  0xf3   :  { %s158_s14 = sshll.u32 %s11245_s9, 4  ;;  %s11246_s11 = smov [#allocation14]   ;;  %s159_s14 = int_to_ptr.vmem [resolvable:$true] %s158_s14 }
  0xf4   :  { %s182_s16 = sshll.u32 %s11246_s11, 4  ;;  %s10906_s24 = scalar_lea.vmem %s159_s14, 4096  ;;  %s183_s16 = int_to_ptr.vmem [resolvable:$true] %s182_s16 }
  0xf5   :  { %p10907_p10 = scmp.ne.s32.totalorder %s159_s14, %s10906_s24  ;;  %p10911_p11 = scmp.lt.s32.totalorder %s159_s14, %s159_s14 }
  0xf6   :  { %p10912_p12 = scmp.lt.s32.totalorder %s10906_s24, %s10906_s24 }
  0xf8   :  { %136 = dma.hbm_to_vmem [thread:$0]  %s13716_s25, 2048, %s131_s29, [#allocation7], %s11229_s21, %s11229_s21, %s11230_s2  }
  0xf9   :  { %p10913_p13 = por %p10912_p12, %p10911_p11 }
  0xfb   :  { %p10914_p0 = pnand %p10913_p13, %p10907_p10 }
  0xfd   :  { %10917 = shalt.err (!%p10914_p0)
}
  0xfe   :  { %s13717_s15 = sld [smem:[#allocation71_spill]]  ;;  %s10926_s5 = scalar_lea.vmem %s183_s16, 4096 }
  0xff   :  { %p10927_p1 = scmp.ne.s32.totalorder %s183_s16, %s10926_s5  ;;  %p10931_p2 = scmp.lt.s32.totalorder %s183_s16, %s183_s16 }
 0x100   :  { %p10932_p3 = scmp.lt.s32.totalorder %s10926_s5, %s10926_s5 }
 0x102   :  { %p10933_p4 = por %p10932_p3, %p10931_p2 }
 0x104   :  { %164 = dma.hbm_to_vmem [thread:$0]  %s13717_s15, 4096, %s159_s14, [#allocation10], %s11229_s21, %s11229_s21, %s11230_s2  }
 0x105   :  { %p10934_p5 = pnand %p10933_p4, %p10927_p1 }
 0x107   :  { %10937 = shalt.err (!%p10934_p5)
}
 0x108   :  { %s13718_s12 = sld [smem:[#allocation72_spill]]  ;;  %s11247_s18 = smov [#allocation17]  }
 0x109   :  { %s208_s17 = sshll.u32 %s11247_s18, 4  ;;  %s11248_s23 = smov [#allocation20]   ;;  %s209_s17 = int_to_ptr.vmem [resolvable:$true] %s208_s17 }
 0x10a   :  { %s232_s22 = sshll.u32 %s11248_s23, 4  ;;  %s10946_s26 = scalar_lea.vmem %s209_s17, 32  ;;  %s233_s22 = int_to_ptr.vmem [resolvable:$true] %s232_s22 }
 0x10b   :  { %p10947_p6 = scmp.ne.s32.totalorder %s209_s17, %s10946_s26  ;;  %p10951_p7 = scmp.lt.s32.totalorder %s209_s17, %s209_s17 }
 0x10c   :  { %p10952_p8 = scmp.lt.s32.totalorder %s10946_s26, %s10946_s26 }
 0x10e   :  { %188 = dma.hbm_to_vmem [thread:$0]  %s13718_s12, 4096, %s183_s16, [#allocation13], %s11229_s21, %s11229_s21, %s11230_s2  }
 0x10f   :  { %p10953_p9 = por %p10952_p8, %p10951_p7 }
 0x111   :  { %p10954_p10 = pnand %p10953_p9, %p10947_p6 }
 0x113   :  { %10957 = shalt.err (!%p10954_p10)
}
 0x114   :  { %s13719_s27 = sld [smem:[#allocation74_spill]]  ;;  %s10966_s4 = scalar_lea.vmem %s233_s22, 32 }
 0x115   :  { %p10967_p11 = scmp.ne.s32.totalorder %s233_s22, %s10966_s4  ;;  %p10971_p12 = scmp.lt.s32.totalorder %s233_s22, %s233_s22 }
 0x116   :  { %p10972_p13 = scmp.lt.s32.totalorder %s10966_s4, %s10966_s4 }
 0x118   :  { %p10973_p0 = por %p10972_p13, %p10971_p12 }
 0x11a   :  { %214 = dma.hbm_to_vmem [thread:$0]  %s13719_s27, 32, %s209_s17, [#allocation16], %s11231_s10, %s11231_s10, %s11232_s0  }
 0x11b   :  { %p10974_p1 = pnand %p10973_p0, %p10967_p11 }
 0x11d   :  { %10977 = shalt.err (!%p10974_p1)
}
 0x11e   :  { %s13720_s20 = sld [smem:[#allocation75_spill]]  ;;  %s11249_s6 = smov [#allocation23]  }
 0x11f   :  { %s256_s1 = sshll.u32 %s11249_s6, 4  ;;  %s11250_s28 = smov [#allocation26]   ;;  %s257_s1 = int_to_ptr.vmem [resolvable:$true] %s256_s1 }
 0x120   :  { %s281_s29 = sshll.u32 %s11250_s28, 4  ;;  %s10986_s7 = scalar_lea.vmem %s257_s1, 32  ;;  %s282_s29 = int_to_ptr.vmem [resolvable:$true] %s281_s29 }
 0x121   :  { %p10987_p2 = scmp.ne.s32.totalorder %s257_s1, %s10986_s7  ;;  %p10991_p3 = scmp.lt.s32.totalorder %s257_s1, %s257_s1 }
 0x122   :  { %p10992_p4 = scmp.lt.s32.totalorder %s10986_s7, %s10986_s7 }
 0x124   :  { %238 = dma.hbm_to_vmem [thread:$0]  %s13720_s20, 32, %s233_s22, [#allocation19], %s11231_s10, %s11231_s10, %s11232_s0  }
 0x125   :  { %p10993_p5 = por %p10992_p4, %p10991_p3 }
 0x127   :  { %p10994_p6 = pnand %p10993_p5, %p10987_p2 }
 0x129   :  { %10997 = shalt.err (!%p10994_p6)
}
 0x12a   :  { %s13721_s3 = sld [smem:[#allocation76_spill]]  ;;  %s11006_s8 = scalar_lea.vmem %s282_s29, 16 }
 0x12b   :  { %p11007_p7 = scmp.ne.s32.totalorder %s282_s29, %s11006_s8  ;;  %s11010_s25 = scalar_lea.vmem %s282_s29, 32 }
 0x12c   :  { %p11011_p8 = scmp.lt.s32.totalorder %s282_s29, %s282_s29  ;;  %p11012_p9 = scmp.lt.s32.totalorder %s11010_s25, %s11006_s8 }
 0x12e   :  { %p11013_p10 = por %p11012_p9, %p11011_p8 }
 0x130   :  { %262 = dma.hbm_to_vmem [thread:$0]  %s13721_s3, 32, %s257_s1, [#allocation22], %s11231_s10, %s11231_s10, %s11232_s0  }
 0x131   :  { %p11014_p11 = pnand %p11013_p10, %p11007_p7 }
 0x133   :  { %11017 = shalt.err (!%p11014_p11)
}
 0x134   :  { %s13722_s9 = sld [smem:[#allocation77_spill]]  ;;  %s11251_s14 = smov [#allocation29]  }
 0x135   :  { %s303_s11 = sshll.u32 %s11251_s14, 4  ;;  %s11252_s16 = smov [#allocation32]   ;;  %s304_s11 = int_to_ptr.vmem [resolvable:$true] %s303_s11 }
 0x136   :  { %s323_s24 = sshll.u32 %s11252_s16, 4  ;;  %s11026_s15 = scalar_lea.vmem %s304_s11, 16  ;;  %s324_s24 = int_to_ptr.vmem [resolvable:$true] %s323_s24 }
 0x137   :  { %p11027_p12 = scmp.ne.s32.totalorder %s304_s11, %s11026_s15  ;;  %s11030_s5 = scalar_lea.vmem %s304_s11, 32 }
 0x138   :  { %p11031_p13 = scmp.lt.s32.totalorder %s304_s11, %s304_s11  ;;  %p11032_p0 = scmp.lt.s32.totalorder %s11030_s5, %s11026_s15 }
 0x13a   :  { %284 = dma.hbm_to_vmem [thread:$0]  %s13722_s9, 16, %s282_s29, [#allocation25]  }
 0x13b   :  { %p11033_p1 = por %p11032_p0, %p11031_p13 }
 0x13d   :  { %p11034_p2 = pnand %p11033_p1, %p11027_p12 }
 0x13f   :  { %11037 = shalt.err (!%p11034_p2)
}
 0x140   :  { %s13723_s10 = sld [smem:[#allocation78_spill]]  ;;  %s11046_s0 = scalar_lea.vmem %s324_s24, 16 }
 0x141   :  { %p11047_p3 = scmp.ne.s32.totalorder %s324_s24, %s11046_s0  ;;  %s11050_s12 = scalar_lea.vmem %s324_s24, 32 }
 0x142   :  { %p11051_p4 = scmp.lt.s32.totalorder %s324_s24, %s324_s24  ;;  %p11052_p5 = scmp.lt.s32.totalorder %s11050_s12, %s11046_s0 }
 0x144   :  { %p11053_p6 = por %p11052_p5, %p11051_p4 }
 0x146   :  { %306 = dma.hbm_to_vmem [thread:$0]  %s13723_s10, 16, %s304_s11, [#allocation28]  }
 0x147   :  { %p11054_p7 = pnand %p11053_p6, %p11047_p3 }
 0x149   :  { %11057 = shalt.err (!%p11054_p7)
}
 0x14a   :  { %s13724_s18 = sld [smem:[#allocation79_spill]]  ;;  %s11253_s17 = smov [#allocation35]  }
 0x14b   :  { %s345_s23 = sshll.u32 %s11253_s17, 4  ;;  %s11254_s22 = smov [#allocation38]   ;;  %s346_s23 = int_to_ptr.vmem [resolvable:$true] %s345_s23 }
 0x14c   :  { %s365_s26 = sshll.u32 %s11254_s22, 4  ;;  %s11066_s27 = scalar_lea.vmem %s346_s23, 16  ;;  %s366_s26 = int_to_ptr.vmem [resolvable:$true] %s365_s26 }
 0x14d   :  { %p11067_p8 = scmp.ne.s32.totalorder %s346_s23, %s11066_s27  ;;  %s11070_s4 = scalar_lea.vmem %s346_s23, 32 }
 0x14e   :  { %p11071_p9 = scmp.lt.s32.totalorder %s346_s23, %s346_s23  ;;  %p11072_p10 = scmp.lt.s32.totalorder %s11070_s4, %s11066_s27 }
 0x150   :  { %326 = dma.hbm_to_vmem [thread:$0]  %s13724_s18, 16, %s324_s24, [#allocation31]  }
 0x151   :  { %p11073_p11 = por %p11072_p10, %p11071_p9 }
 0x153   :  { %p11074_p12 = pnand %p11073_p11, %p11067_p8 }
 0x155   :  { %11077 = shalt.err (!%p11074_p12)
}
 0x156   :  { %s13725_s20 = sld [smem:[#allocation80_spill]]  ;;  %s11086_s6 = scalar_lea.vmem %s366_s26, 16 }
 0x157   :  { %p11087_p13 = scmp.ne.s32.totalorder %s366_s26, %s11086_s6  ;;  %s11090_s1 = scalar_lea.vmem %s366_s26, 32 }
 0x158   :  { %p11091_p0 = scmp.lt.s32.totalorder %s366_s26, %s366_s26  ;;  %p11092_p1 = scmp.lt.s32.totalorder %s11090_s1, %s11086_s6 }
 0x15a   :  { %p11093_p2 = por %p11092_p1, %p11091_p0 }
 0x15c   :  { %348 = dma.hbm_to_vmem [thread:$0]  %s13725_s20, 16, %s346_s23, [#allocation34]  }
 0x15d   :  { %p11094_p3 = pnand %p11093_p2, %p11087_p13 }
 0x15f   :  { %11097 = shalt.err (!%p11094_p3)
}
 0x160   :  { %s13726_s28 = sld [smem:[#allocation81_spill]]  ;;  %s11255_s29 = smov [#allocation41]  }
 0x161   :  { %s386_s7 = sshll.u32 %s11255_s29, 4  ;;  %s11256_s3 = smov [#allocation44]   ;;  %s387_s7 = int_to_ptr.vmem [resolvable:$true] %s386_s7 }
 0x162   :  { %s411_s8 = sshll.u32 %s11256_s3, 4  ;;  %s11106_s25 = scalar_lea.vmem %s387_s7, 2048  ;;  %s412_s8 = int_to_ptr.vmem [resolvable:$true] %s411_s8 }
 0x163   :  { %p11107_p4 = scmp.ne.s32.totalorder %s387_s7, %s11106_s25  ;;  %p11111_p5 = scmp.lt.s32.totalorder %s387_s7, %s387_s7 }
 0x164   :  { %p11112_p6 = scmp.lt.s32.totalorder %s11106_s25, %s11106_s25 }
 0x166   :  { %368 = dma.hbm_to_vmem [thread:$0]  %s13726_s28, 16, %s366_s26, [#allocation37]  }
 0x167   :  { %p11113_p7 = por %p11112_p6, %p11111_p5 }
 0x169   :  { %p11114_p8 = pnand %p11113_p7, %p11107_p4 }
 0x16b   :  { %11117 = shalt.err (!%p11114_p8)
}
 0x16c   :  { %s13727_s9 = sld [smem:[#allocation82_spill]]  ;;  %s11126_s14 = scalar_lea.vmem %s412_s8, 16 }
 0x16d   :  { %p11127_p9 = scmp.ne.s32.totalorder %s412_s8, %s11126_s14  ;;  %s11130_s11 = scalar_lea.vmem %s412_s8, 32 }
 0x16e   :  { %p11131_p10 = scmp.lt.s32.totalorder %s412_s8, %s412_s8  ;;  %p11132_p11 = scmp.lt.s32.totalorder %s11130_s11, %s11126_s14 }
 0x170   :  { %p11133_p12 = por %p11132_p11, %p11131_p10 }
 0x172   :  { %392 = dma.hbm_to_vmem [thread:$0]  %s13727_s9, 2048, %s387_s7, [#allocation40], %s11229_s21, %s11229_s21, %s11230_s2  }
 0x173   :  { %p11134_p13 = pnand %p11133_p12, %p11127_p9 }
 0x175   :  { %11137 = shalt.err (!%p11134_p13)
}
 0x176   :  { %414 = dma.hbm_to_vmem [thread:$0]  %s11441_s19, 16, %s412_s8, [#allocation43]  }
 0x177   :  { %s11257_s16 = smov [#allocation47]  }
 0x178   :  { %s431_s24 = sshll.u32 %s11257_s16, 4  ;;  %s432_s24 = int_to_ptr.vmem [resolvable:$true] %s431_s24 }
 0x179   :  { %s11146_s15 = scalar_lea.vmem %s432_s24, 16  ;;  %s11150_s5 = scalar_lea.vmem %s432_s24, 32 }
 0x17a   :  { %p11147_p0 = scmp.ne.s32.totalorder %s432_s24, %s11146_s15  ;;  %p11151_p1 = scmp.lt.s32.totalorder %s432_s24, %s432_s24 }
 0x17b   :  { %p11152_p2 = scmp.lt.s32.totalorder %s11150_s5, %s11146_s15 }
 0x17d   :  { %p11153_p3 = por %p11152_p2, %p11151_p1 }
 0x17f   :  { %p11154_p4 = pnand %p11153_p3, %p11147_p0 }
 0x181   :  { %11157 = shalt.err (!%p11154_p4)
}
 0x182   :  { %434 = dma.hbm_to_vmem [thread:$0]  %s11451_s30, 16, %s432_s24, [#allocation46]  }
 0x183   :  { %11158 = dma.done.wait [#allocation5], 2048  }
 0x184   :  { %11159 = vsyncadd [#allocation5], 4294965248 }
 0x185   :  { %11160 = dma.done.wait [#allocation7], 2064  }
 0x186   :  { %11161 = vsyncadd [#allocation7], 4294965232 }
 0x187   :  { %11162 = dma.done.wait [#allocation10], 4112  }
 0x188   :  { %11163 = vsyncadd [#allocation10], 4294963184 }
 0x189   :  { %11164 = dma.done.wait [#allocation13], 8192  }
 0x18a   :  { %11165 = vsyncadd [#allocation13], 4294959104 }
 0x18b   :  { %11166 = dma.done.wait [#allocation16], 64  }
 0x18c   :  { %11167 = vsyncadd [#allocation16], 4294967232 }
 0x18d   :  { %11168 = dma.done.wait [#allocation19], 4128  }
 0x18e   :  { %11169 = vsyncadd [#allocation19], 4294963168 }
 0x18f   :  { %11170 = dma.done.wait [#allocation22], 4128  }
 0x190   :  { %11171 = vsyncadd [#allocation22], 4294963168 }
 0x191   :  { %11172 = dma.done.wait [#allocation25], 2064  }
 0x192   :  { %11173 = vsyncadd [#allocation25], 4294965232 }
 0x193   :  { %11174 = dma.done.wait [#allocation28], 2064  }
 0x194   :  { %11175 = vsyncadd [#allocation28], 4294965232 }
 0x195   :  { %11176 = dma.done.wait [#allocation31], 32  }
 0x196   :  { %11177 = vsyncadd [#allocation31], 4294967264 }
 0x197   :  { %11178 = dma.done.wait [#allocation34], 2064  }
 0x198   :  { %11179 = vsyncadd [#allocation34], 4294965232 }
 0x199   :  { %11180 = dma.done.wait [#allocation37], 32  }
 0x19a   :  { %11181 = vsyncadd [#allocation37], 4294967264 }
 0x19b   :  { %11182 = dma.done.wait [#allocation40], 2064  }
 0x19c   :  { %11183 = vsyncadd [#allocation40], 4294965232 }
 0x19d   :  { %11184 = dma.done.wait [#allocation43], 2064  }
 0x19e   :  { %11185 = vsyncadd [#allocation43], 4294965232 }
 0x19f   :  { %11186 = dma.done.wait [#allocation46], 32  }
 0x1a0   :  { %11187 = vsyncadd [#allocation46], 4294967264  ;;  %s13728_s19 = sld [smem:[#allocation63_spill]]  ;;  %vm558_vm0 = vcmask 130048   ;;  %v11547_v5 = vld [vmem:[#allocation8 + $0x78] sm:$0xff]  ;;  %v11549_v6 = vld [vmem:[#allocation8 + $0x70] sm:$0xff] }
 0x1a1   :  { %s13729_s30 = sld [smem:[#allocation64_spill]]  ;;  %8775 = vmatprep.subr.mxu1 %v11547_v5  ;;  %v11555_v8 = vld [vmem:[#allocation8 + $0x68] sm:$0xff]  ;;  %v11560_v9 = vld [vmem:[#allocation8 + $0x60] sm:$0xff]  ;;  %v11566_v11 = vld [vmem:[#allocation8 + $0x58] sm:$0xff]  ;;  %vm1010_vm1 = vcmask 1041408   ;;  %vm11259_vm2 = vmmov 0  }
 0x1a2   :  { %8776 = vmatpush3.msra.mxu1 %v11547_v5  ;;  %v11571_v12 = vld [vmem:[#allocation8 + $0x50] sm:$0xff]  ;;  %v11577_v14 = vld [vmem:[#allocation8 + $0x48] sm:$0xff]  ;;  %v11582_v15 = vld [vmem:[#allocation8 + $0x40] sm:$0xff]  ;;  %s13730_s21 = sld [smem:[#allocation70_spill]]  ;;  %s11260_s0 = smov 96   ;;  %vm1417_vm3 = vcmask 261120  }
 0x1a3   :  { %8777 = vmatprep.subr.mxu1 %v11549_v6  ;;  %v11588_v17 = vld [vmem:[#allocation8 + $0x38] sm:$0xff]  ;;  %v11593_v18 = vld [vmem:[#allocation8 + $0x30] sm:$0xff]  ;;  %v11599_v20 = vld [vmem:[#allocation8 + $0x28] sm:$0xff]  ;;  %s13731_s2 = sld [smem:[#allocation68_spill]]  ;;  %vm1548_vm4 = vcmask 277504   ;;  %vm1561_vm5 = vcmask 271360  }
 0x1a4   :  { %8778 = vmatpush3.msra.mxu1 %v11549_v6  ;;  %v11604_v21 = vld [vmem:[#allocation8 + $0x20] sm:$0xff]  ;;  %v527_v23 = vld [vmem:[#allocation8 + $0x18] sm:$0xff]  ;;  %v526_v24 = vld [vmem:[#allocation8 + $0x10] sm:$0xff]  ;;  %s13732_s10 = sld [smem:[#allocation69_spill]]  ;;  %s11261_s18 = smov 64  }
 0x1a5   :  { %8779 = vmatprep.subr.mxu1 %v11555_v8  ;;  %v525_v26 = vld [vmem:[#allocation8 + $0x8] sm:$0xff]  ;;  %v524_v34 = vld [vmem:[#allocation8] sm:$0xff]  ;;  %v541_v53 = vld [vmem:[#allocation6] sm:$0x1]  ;;  %s13733_s12 = sld [smem:[#allocation66_spill]]  ;;  %s11262_s17 = smov 32  }
 0x1a6   :  { %v557_v1 = vld [vmem:[%s13728_s19 + $0x78] sm:$0xff]  ;;  %v556_v2 = vld [vmem:[%s13728_s19 + $0x70] sm:$0xff]  ;;  %v555_v3 = vld [vmem:[%s13728_s19 + $0x68] sm:$0xff]  ;;  %8780 = vmatpush3.msra.mxu1 %v11555_v8  ;;  %769 = vst [vmem:[#allocation2] sm:$0x1] %v541_v53  ;;  %s13734_s23 = sld [smem:[#allocation73_spill]] }
 0x1a7   :  { %8740 = vmatprep.subr.msk.mxu0 %vm558_vm0, %v557_v1  ;;  %v11542_v4 = vld [vmem:[%s13729_s30] sm:$0xff]  ;;  %v553_v10 = vld [vmem:[%s13728_s19 + $0x58] sm:$0xff]  ;;  %8781 = vmatprep.subr.mxu1 %v11560_v9  ;;  %v552_v13 = vld [vmem:[%s13728_s19 + $0x50] sm:$0xff]  ;;  %987 = vst [vmem:[#allocation2 + $0x11] sm:$0x1] %v541_v53 }
 0x1a8   :  { %8741 = vmatpush3.xpose.msk.msra.mxu0 %vm558_vm0, %v557_v1  ;;  %8772 = vmatprep.mubr.msk.f32.mxu0 %vm558_vm0, %v11542_v4  ;;  %v554_v7 = vld [vmem:[%s13728_s19 + $0x60] sm:$0xff]  ;;  %v551_v16 = vld [vmem:[%s13728_s19 + $0x48] sm:$0xff]  ;;  %v549_v22 = vld [vmem:[%s13728_s19 + $0x38] sm:$0xff] }
 0x1a9   :  { %8742 = vmatprep.subr.msk.mxu0 %vm558_vm0, %v556_v2  ;;  %8782 = vmatpush3.msra.mxu1 %v11560_v9  ;;  %v550_v19 = vld [vmem:[%s13728_s19 + $0x40] sm:$0xff]  ;;  %v548_v25 = vld [vmem:[%s13728_s19 + $0x30] sm:$0xff]  ;;  %v547_v27 = vld [vmem:[%s13728_s19 + $0x28] sm:$0xff] }
 0x1aa   :  { %8783 = vmatprep.subr.mxu1 %v11566_v11  ;;  %v546_v28 = vld [vmem:[%s13728_s19 + $0x20] sm:$0xff]  ;;  %v545_v29 = vld [vmem:[%s13728_s19 + $0x18] sm:$0xff]  ;;  %v544_v30 = vld [vmem:[%s13728_s19 + $0x10] sm:$0xff] }
 0x1ab   :  { %8784 = vmatpush3.msra.mxu1 %v11566_v11  ;;  %v543_v31 = vld [vmem:[%s13728_s19 + $0x8] sm:$0xff]  ;;  %v542_v32 = vld [vmem:[%s13728_s19] sm:$0xff]  ;;  %v7818_v35 = vld [vmem:[%s13728_s19 + $0xf8] sm:$0xff] }
 0x1ac   :  { %8743 = vmatpush3.xpose.msk.msra.mxu0 %vm558_vm0, %v556_v2  ;;  %8785 = vmatprep.subr.mxu1 %v11571_v12  ;;  %v11637_v33 = vld [vmem:[%s13729_s30 + $0x8] sm:$0xff]  ;;  %v7817_v38 = vld [vmem:[%s13728_s19 + $0xf0] sm:$0xff]  ;;  %v7815_v40 = vld [vmem:[%s13728_s19 + $0xe0] sm:$0xff] }
 0x1ad   :  { %8744 = vmatprep.subr.msk.mxu0 %vm558_vm0, %v555_v3  ;;  %8786 = vmatpush3.msra.mxu1 %v11571_v12  ;;  %v7816_v39 = vld [vmem:[%s13728_s19 + $0xe8] sm:$0xff]  ;;  %v7814_v41 = vld [vmem:[%s13728_s19 + $0xd8] sm:$0xff]  ;;  %v7813_v42 = vld [vmem:[%s13728_s19 + $0xd0] sm:$0xff] }
 0x1ae   :  { %8787 = vmatprep.subr.mxu1 %v11577_v14  ;;  %v7812_v43 = vld [vmem:[%s13728_s19 + $0xc8] sm:$0xff]  ;;  %v7811_v44 = vld [vmem:[%s13728_s19 + $0xc0] sm:$0xff]  ;;  %v7810_v45 = vld [vmem:[%s13728_s19 + $0xb8] sm:$0xff] }
 0x1af   :  { %8788 = vmatpush3.msra.mxu1 %v11577_v14  ;;  %v7809_v46 = vld [vmem:[%s13728_s19 + $0xb0] sm:$0xff]  ;;  %v7808_v47 = vld [vmem:[%s13728_s19 + $0xa8] sm:$0xff]  ;;  %v7807_v48 = vld [vmem:[%s13728_s19 + $0xa0] sm:$0xff] }
 0x1b0   :  { %8745 = vmatpush3.xpose.msk.msra.mxu0 %vm558_vm0, %v555_v3  ;;  %8789 = vmatprep.subr.mxu1 %v11582_v15  ;;  %v7806_v49 = vld [vmem:[%s13728_s19 + $0x98] sm:$0xff]  ;;  %v7805_v50 = vld [vmem:[%s13728_s19 + $0x90] sm:$0xff]  ;;  %v7804_v51 = vld [vmem:[%s13728_s19 + $0x88] sm:$0xff] }
 0x1b1   :  { %8746 = vmatprep.subr.msk.mxu0 %vm558_vm0, %v554_v7  ;;  %8790 = vmatpush3.msra.mxu1 %v11582_v15  ;;  %v7803_v52 = vld [vmem:[%s13728_s19 + $0x80] sm:$0xff]  ;;  %v7802_v54 = vld [vmem:[#allocation9] ss:$0 sm:$0xff] }
 0x1b2   :  { %8791 = vmatprep.subr.mxu1 %v11588_v17 }
 0x1b3   :  { %8792 = vmatpush3.msra.mxu1 %v11588_v17 }
 0x1b4   :  { %8747 = vmatpush3.xpose.msk.msra.mxu0 %vm558_vm0, %v554_v7  ;;  %8793 = vmatprep.subr.mxu1 %v11593_v18 }
 0x1b5   :  { %8748 = vmatprep.subr.msk.mxu0 %vm558_vm0, %v553_v10  ;;  %8794 = vmatpush3.msra.mxu1 %v11593_v18 }
 0x1b6   :  { %8795 = vmatprep.subr.mxu1 %v11599_v20 }
 0x1b7   :  { %8796 = vmatpush3.msra.mxu1 %v11599_v20 }
 0x1b8   :  { %8749 = vmatpush3.xpose.msk.msra.mxu0 %vm558_vm0, %v553_v10  ;;  %8797 = vmatprep.subr.mxu1 %v11604_v21 }
 0x1b9   :  { %8750 = vmatprep.subr.msk.mxu0 %vm558_vm0, %v552_v13  ;;  %8798 = vmatpush3.msra.mxu1 %v11604_v21 }
 0x1ba   :  { %8799 = vmatprep.subr.mxu1 %v527_v23 }
 0x1bb   :  { %8800 = vmatpush3.msra.mxu1 %v527_v23 }
 0x1bc   :  { %8751 = vmatpush3.xpose.msk.msra.mxu0 %vm558_vm0, %v552_v13  ;;  %8801 = vmatprep.subr.mxu1 %v526_v24 }
 0x1bd   :  { %8752 = vmatprep.subr.msk.mxu0 %vm558_vm0, %v551_v16  ;;  %8802 = vmatpush3.msra.mxu1 %v526_v24 }
 0x1be   :  { %8803 = vmatprep.subr.mxu1 %v525_v26 }
 0x1bf   :  { %8804 = vmatpush3.msra.mxu1 %v525_v26 }
 0x1c0   :  { %8753 = vmatpush3.xpose.msk.msra.mxu0 %vm558_vm0, %v551_v16  ;;  %8805 = vmatprep.subr.mxu1 %v524_v34  ;;  %v1098_v16 = vld [vmem:[%s13730_s21 + $0x78] sm:$0xff] }
 0x1c1   :  { %8754 = vmatprep.subr.msk.mxu0 %vm558_vm0, %v550_v19  ;;  %8806 = vmatpush3.msra.mxu1 %v524_v34 }
 0x1c2   :  { %8810 = vmatprep.subr.msk.mxu1 %vm558_vm0, %v7818_v35 }
 0x1c4   :  { %8755 = vmatpush3.xpose.msk.msra.mxu0 %vm558_vm0, %v550_v19  ;;  %v1203_v19 = vld [vmem:[#allocation11 + $0x70] sm:$0xff] }
 0x1c5   :  { %8756 = vmatprep.subr.msk.mxu0 %vm558_vm0, %v549_v22 }
 0x1c8   :  { %8757 = vmatpush3.xpose.msk.msra.mxu0 %vm558_vm0, %v549_v22  ;;  %v1095_v22 = vld [vmem:[%s13730_s21 + $0x60] sm:$0xff] }
 0x1c9   :  { %8758 = vmatprep.subr.msk.mxu0 %vm558_vm0, %v548_v25 }
 0x1cc   :  { %8759 = vmatpush3.xpose.msk.msra.mxu0 %vm558_vm0, %v548_v25  ;;  %v1200_v25 = vld [vmem:[#allocation11 + $0x58] sm:$0xff] }
 0x1cd   :  { %8760 = vmatprep.subr.msk.mxu0 %vm558_vm0, %v547_v27 }
 0x1d0   :  { %8761 = vmatpush3.xpose.msk.msra.mxu0 %vm558_vm0, %v547_v27  ;;  %v1199_v27 = vld [vmem:[#allocation11 + $0x50] sm:$0xff] }
 0x1d1   :  { %8762 = vmatprep.subr.msk.mxu0 %vm558_vm0, %v546_v28 }
 0x1d4   :  { %8763 = vmatpush3.xpose.msk.msra.mxu0 %vm558_vm0, %v546_v28  ;;  %v1092_v28 = vld [vmem:[%s13730_s21 + $0x48] sm:$0xff] }
 0x1d5   :  { %8764 = vmatprep.subr.msk.mxu0 %vm558_vm0, %v545_v29 }
 0x1d8   :  { %8765 = vmatpush3.xpose.msk.msra.mxu0 %vm558_vm0, %v545_v29  ;;  %v1198_v29 = vld [vmem:[#allocation11 + $0x48] sm:$0xff] }
 0x1d9   :  { %8766 = vmatprep.subr.msk.mxu0 %vm558_vm0, %v544_v30 }
 0x1dc   :  { %8767 = vmatpush3.xpose.msk.msra.mxu0 %vm558_vm0, %v544_v30  ;;  %v1091_v30 = vld [vmem:[%s13730_s21 + $0x40] sm:$0xff] }
 0x1dd   :  { %8768 = vmatprep.subr.msk.mxu0 %vm558_vm0, %v543_v31 }
 0x1e0   :  { %8769 = vmatpush3.xpose.msk.msra.mxu0 %vm558_vm0, %v543_v31  ;;  %v1197_v31 = vld [vmem:[#allocation11 + $0x40] sm:$0xff] }
 0x1e1   :  { %8770 = vmatprep.subr.msk.mxu0 %vm558_vm0, %v542_v32 }
 0x1e4   :  { %8771 = vmatpush3.xpose.msk.msra.mxu0 %vm558_vm0, %v542_v32  ;;  %v1090_v32 = vld [vmem:[%s13730_s21 + $0x38] sm:$0xff] }
 0x1e5   :  { %8845 = vmatprep.subr.mxu0 %v11547_v5 }
 0x1e7   :  { %8773 = vmatmul.mubr.msk.f32.vlgmr.msra.gmra.mxu0 %vm558_vm0, %v11637_v33 }
 0x1e8   :  { %8846 = vmatpush3.msra.mxu0 %v11547_v5 }
 0x1e9   :  { %8847 = vmatprep.subr.mxu0 %v11549_v6 }
 0x1ea   :  { %8848 = vmatpush3.msra.mxu0 %v11549_v6 }
 0x1eb   :  { %8849 = vmatprep.subr.mxu0 %v11555_v8 }
 0x1ec   :  { %8850 = vmatpush3.msra.mxu0 %v11555_v8 }
 0x1ed   :  { %8851 = vmatprep.subr.mxu0 %v11560_v9 }
 0x1ee   :  { %8852 = vmatpush3.msra.mxu0 %v11560_v9 }
 0x1ef   :  { %8853 = vmatprep.subr.mxu0 %v11566_v11 }
 0x1f0   :  { %8854 = vmatpush3.msra.mxu0 %v11566_v11 }
 0x1f1   :  { %8855 = vmatprep.subr.mxu0 %v11571_v12 }
 0x1f2   :  { %8856 = vmatpush3.msra.mxu0 %v11571_v12 }
 0x1f3   :  { %8857 = vmatprep.subr.mxu0 %v11577_v14 }
 0x1f4   :  { %8858 = vmatpush3.msra.mxu0 %v11577_v14 }
 0x1f5   :  { %8859 = vmatprep.subr.mxu0 %v11582_v15 }
 0x1f6   :  { %8860 = vmatpush3.msra.mxu0 %v11582_v15  ;;  %v11258_v15 = vmov 0.0  }
 0x1f7   :  { %8861 = vmatprep.subr.mxu0 %v11588_v17 }
 0x1f8   :  { %8862 = vmatpush3.msra.mxu0 %v11588_v17  ;;  %v1204_v17 = vld [vmem:[#allocation11 + $0x78] sm:$0xff] }
 0x1f9   :  { %8863 = vmatprep.subr.mxu0 %v11593_v18 }
 0x1fa   :  { %8864 = vmatpush3.msra.mxu0 %v11593_v18  ;;  %v1097_v18 = vld [vmem:[%s13730_s21 + $0x70] sm:$0xff] }
 0x1fb   :  { %8865 = vmatprep.subr.mxu0 %v11599_v20 }
 0x1fc   :  { %8866 = vmatpush3.msra.mxu0 %v11599_v20  ;;  %v1096_v20 = vld [vmem:[%s13730_s21 + $0x68] sm:$0xff] }
 0x1fd   :  { %8867 = vmatprep.subr.mxu0 %v11604_v21 }
 0x1fe   :  { %8868 = vmatpush3.msra.mxu0 %v11604_v21  ;;  %v1202_v21 = vld [vmem:[#allocation11 + $0x68] sm:$0xff] }
 0x1ff   :  { %8869 = vmatprep.subr.mxu0 %v527_v23 }
 0x200   :  { %8870 = vmatpush3.msra.mxu0 %v527_v23  ;;  %v1201_v23 = vld [vmem:[#allocation11 + $0x60] sm:$0xff] }
 0x201   :  { %8871 = vmatprep.subr.mxu0 %v526_v24 }
 0x202   :  { %8872 = vmatpush3.msra.mxu0 %v526_v24  ;;  %v1094_v24 = vld [vmem:[%s13730_s21 + $0x58] sm:$0xff] }
 0x203   :  { %8873 = vmatprep.subr.mxu0 %v525_v26 }
 0x204   :  { %8874 = vmatpush3.msra.mxu0 %v525_v26  ;;  %v1093_v26 = vld [vmem:[%s13730_s21 + $0x50] sm:$0xff] }
 0x205   :  { %8875 = vmatprep.subr.mxu0 %v524_v34 }
 0x206   :  { %8876 = vmatpush3.msra.mxu0 %v524_v34  ;;  %v1089_v34 = vld [vmem:[%s13730_s21 + $0x30] sm:$0xff] }
 0x207   :  { %8880 = vmatprep.subr.mxu0 %v11258_v15 }
 0x2a7   :  { %v8774_v36 = vpop.f32.mrf.mxu0 }
 0x2a9   :  { %v679_v37 = vpop.f32.mrf.mxu0 }
 0x2aa   :  { %8807 = vmatprep.mubr.f32.mxu1 %v679_v37  ;;  %v1194_v37 = vld [vmem:[#allocation11 + $0x28] sm:$0xff] }
 0x2ab   :  { %8808 = vmatmul.mubr.f32.vlgmr.msra.gmra.mxu1 %v8774_v36  ;;  %v1088_v36 = vld [vmem:[%s13730_s21 + $0x28] sm:$0xff] }
 0x2ac   :  { %8811 = vmatpush3.xpose.msk.msra.mxu1 %vm558_vm0, %v7818_v35  ;;  %8842 = vmatprep.mubr.msk.f32.mxu1 %vm558_vm0, %v11542_v4  ;;  %v1195_v35 = vld [vmem:[#allocation11 + $0x30] sm:$0xff] }
 0x2ad   :  { %8812 = vmatprep.subr.msk.mxu1 %vm558_vm0, %v7817_v38 }
 0x2b0   :  { %8813 = vmatpush3.xpose.msk.msra.mxu1 %vm558_vm0, %v7817_v38  ;;  %v1087_v38 = vld [vmem:[%s13730_s21 + $0x20] sm:$0xff] }
 0x2b1   :  { %8814 = vmatprep.subr.msk.mxu1 %vm558_vm0, %v7816_v39 }
 0x2b4   :  { %8815 = vmatpush3.xpose.msk.msra.mxu1 %vm558_vm0, %v7816_v39  ;;  %v1193_v39 = vld [vmem:[#allocation11 + $0x20] sm:$0xff] }
 0x2b5   :  { %8816 = vmatprep.subr.msk.mxu1 %vm558_vm0, %v7815_v40 }
 0x2b8   :  { %8817 = vmatpush3.xpose.msk.msra.mxu1 %vm558_vm0, %v7815_v40  ;;  %v1086_v40 = vld [vmem:[%s13730_s21 + $0x18] sm:$0xff] }
 0x2b9   :  { %8818 = vmatprep.subr.msk.mxu1 %vm558_vm0, %v7814_v41 }
 0x2bc   :  { %8819 = vmatpush3.xpose.msk.msra.mxu1 %vm558_vm0, %v7814_v41  ;;  %v1192_v41 = vld [vmem:[#allocation11 + $0x18] sm:$0xff] }
 0x2bd   :  { %8820 = vmatprep.subr.msk.mxu1 %vm558_vm0, %v7813_v42 }
 0x2c0   :  { %8821 = vmatpush3.xpose.msk.msra.mxu1 %vm558_vm0, %v7813_v42  ;;  %v1085_v42 = vld [vmem:[%s13730_s21 + $0x10] sm:$0xff] }
 0x2c1   :  { %8822 = vmatprep.subr.msk.mxu1 %vm558_vm0, %v7812_v43 }
 0x2c4   :  { %8823 = vmatpush3.xpose.msk.msra.mxu1 %vm558_vm0, %v7812_v43  ;;  %v1191_v43 = vld [vmem:[#allocation11 + $0x10] sm:$0xff] }
 0x2c5   :  { %8824 = vmatprep.subr.msk.mxu1 %vm558_vm0, %v7811_v44 }
 0x2c8   :  { %8825 = vmatpush3.xpose.msk.msra.mxu1 %vm558_vm0, %v7811_v44  ;;  %v1084_v44 = vld [vmem:[%s13730_s21 + $0x8] sm:$0xff] }
 0x2c9   :  { %8826 = vmatprep.subr.msk.mxu1 %vm558_vm0, %v7810_v45 }
 0x2cc   :  { %8827 = vmatpush3.xpose.msk.msra.mxu1 %vm558_vm0, %v7810_v45  ;;  %v1190_v45 = vld [vmem:[#allocation11 + $0x8] sm:$0xff] }
 0x2cd   :  { %8828 = vmatprep.subr.msk.mxu1 %vm558_vm0, %v7809_v46 }
 0x2d0   :  { %8829 = vmatpush3.xpose.msk.msra.mxu1 %vm558_vm0, %v7809_v46  ;;  %v1083_v46 = vld [vmem:[%s13730_s21] sm:$0xff] }
 0x2d1   :  { %8830 = vmatprep.subr.msk.mxu1 %vm558_vm0, %v7808_v47 }
 0x2d4   :  { %8831 = vmatpush3.xpose.msk.msra.mxu1 %vm558_vm0, %v7808_v47  ;;  %v1189_v47 = vld [vmem:[#allocation11] sm:$0xff] }
 0x2d5   :  { %8832 = vmatprep.subr.msk.mxu1 %vm558_vm0, %v7807_v48 }
 0x2d8   :  { %8833 = vmatpush3.xpose.msk.msra.mxu1 %vm558_vm0, %v7807_v48 }
 0x2d9   :  { %8834 = vmatprep.subr.msk.mxu1 %vm558_vm0, %v7806_v49 }
 0x2dc   :  { %8835 = vmatpush3.xpose.msk.msra.mxu1 %vm558_vm0, %v7806_v49 }
 0x2dd   :  { %8836 = vmatprep.subr.msk.mxu1 %vm558_vm0, %v7805_v50 }
 0x2e0   :  { %8837 = vmatpush3.xpose.msk.msra.mxu1 %vm558_vm0, %v7805_v50 }
 0x2e1   :  { %8838 = vmatprep.subr.msk.mxu1 %vm558_vm0, %v7804_v51 }
 0x2e4   :  { %8839 = vmatpush3.xpose.msk.msra.mxu1 %vm558_vm0, %v7804_v51 }
 0x2e5   :  { %8840 = vmatprep.subr.msk.mxu1 %vm558_vm0, %v7803_v52 }
 0x2e8   :  { %8841 = vmatpush3.xpose.msk.msra.mxu1 %vm558_vm0, %v7803_v52 }
 0x2e9   :  { %8927 = vmatprep.subr.mxu1 %v11258_v15 }
 0x2eb   :  { %8843 = vmatmul.mubr.msk.f32.vlgmr.msra.gmra.mxu1 %vm558_vm0, %v11637_v33  ;;  %v1196_v33 = vld [vmem:[#allocation11 + $0x38] sm:$0xff] }
 0x2ec   :  { %8928 = vmatpush3.msra.mxu1 %v1204_v17  ;;  %8959 = vmatprep.mubr.msk.f32.mxu1 %vm11259_vm2, %v11258_v15  ;;  %v1307_v17 = vld [vmem:[#allocation12 + $0x60] sm:$0xff] }
 0x2ed   :  { %8929 = vmatprep.subr.mxu1 %v11258_v15 }
 0x2ee   :  { %8930 = vmatpush3.msra.mxu1 %v1203_v19  ;;  %v1305_v19 = vld [vmem:[#allocation12 + $0x50] sm:$0xff] }
 0x2ef   :  { %8931 = vmatprep.subr.mxu1 %v11258_v15 }
 0x2f0   :  { %8932 = vmatpush3.msra.mxu1 %v1202_v21  ;;  %v1303_v21 = vld [vmem:[#allocation12 + $0x40] sm:$0xff] }
 0x2f1   :  { %8933 = vmatprep.subr.mxu1 %v11258_v15 }
 0x2f2   :  { %8934 = vmatpush3.msra.mxu1 %v1201_v23  ;;  %v1301_v23 = vld [vmem:[#allocation12 + $0x30] sm:$0xff] }
 0x2f3   :  { %8935 = vmatprep.subr.mxu1 %v11258_v15 }
 0x2f4   :  { %8936 = vmatpush3.msra.mxu1 %v1200_v25  ;;  %v1299_v25 = vld [vmem:[#allocation12 + $0x20] sm:$0xff] }
 0x2f5   :  { %8937 = vmatprep.subr.mxu1 %v11258_v15 }
 0x2f6   :  { %8938 = vmatpush3.msra.mxu1 %v1199_v27  ;;  %v1297_v27 = vld [vmem:[#allocation12 + $0x10] sm:$0xff] }
 0x2f7   :  { %8939 = vmatprep.subr.mxu1 %v11258_v15 }
 0x2f8   :  { %8940 = vmatpush3.msra.mxu1 %v1198_v29  ;;  %v1295_v29 = vld [vmem:[#allocation12] sm:$0xff] }
 0x2f9   :  { %8941 = vmatprep.subr.mxu1 %v11258_v15 }
 0x2fa   :  { %8942 = vmatpush3.msra.mxu1 %v1197_v31 }
 0x2fb   :  { %8943 = vmatprep.subr.mxu1 %v11258_v15 }
 0x2fc   :  { %8944 = vmatpush3.msra.mxu1 %v1196_v33 }
 0x2fd   :  { %8945 = vmatprep.subr.mxu1 %v11258_v15 }
 0x2fe   :  { %8946 = vmatpush3.msra.mxu1 %v1195_v35 }
 0x2ff   :  { %8947 = vmatprep.subr.mxu1 %v11258_v15 }
 0x300   :  { %8948 = vmatpush3.msra.mxu1 %v1194_v37 }
 0x301   :  { %8949 = vmatprep.subr.mxu1 %v11258_v15 }
 0x302   :  { %8950 = vmatpush3.msra.mxu1 %v1193_v39 }
 0x303   :  { %8951 = vmatprep.subr.mxu1 %v11258_v15 }
 0x304   :  { %8952 = vmatpush3.msra.mxu1 %v1192_v41 }
 0x305   :  { %8953 = vmatprep.subr.mxu1 %v11258_v15 }
 0x306   :  { %8954 = vmatpush3.msra.mxu1 %v1191_v43 }
 0x307   :  { %8955 = vmatprep.subr.mxu1 %v11258_v15 }
 0x308   :  { %8956 = vmatpush3.msra.mxu1 %v1190_v45 }
 0x309   :  { %8957 = vmatprep.subr.mxu1 %v11258_v15 }
 0x30a   :  { %8958 = vmatpush3.msra.mxu1 %v1189_v47 }
 0x30b   :  { %9021 = vmatprep.subr.mxu1 %v11258_v15 }
 0x36b   :  { %v8809_v55 = vpop.f32.mrf.mxu1 }
 0x36c   :  { %v766_v56 = vadd.f32 %v8809_v55, %v7802_v54 }
 0x36d   :  { %v760_v57 = vpop.f32.mrf.mxu1 }
 0x36e   :  { %771 = vst [vmem:[#allocation2 + $0x9] sm:$0xff] %v766_v56  ;;  %v761_v58 = vadd.f32 %v7802_v54, %v760_v57 }
 0x370   :  { %770 = vst [vmem:[#allocation2 + $0x1] sm:$0xff] %v761_v58 }
 0x377   :  { %v990_v59 = vld [vmem:[#allocation2] sm:$0xff]  ;;  %v991_v60 = vld [vmem:[#allocation2 + $0x8] sm:$0xff] }
 0x378   :  { %1002 = vadd.xlane.f32.xlu0 %v990_v59 }
 0x37c   :  { %1004 = vadd.xlane.f32.xlu0 %v991_v60 }
 0x3ab   :  { %v8844_v61 = vpop.f32.mrf.mxu1 }
 0x3ad   :  { %v903_v62 = vpop.f32.mrf.mxu1 }
 0x3ae   :  { %8877 = vmatprep.mubr.f32.mxu0 %v903_v62 }
 0x3af   :  { %8878 = vmatmul.mubr.f32.vlgmr.msra.gmra.mxu0 %v8844_v61 }
 0x3b0   :  { %8881 = vmatpush3.msra.mxu0 %v1098_v16  ;;  %8912 = vmatprep.mubr.msk.f32.mxu0 %vm11259_vm2, %v11258_v15  ;;  %v1308_v16 = vld [vmem:[#allocation12 + $0x68] sm:$0xff] }
 0x3b1   :  { %8882 = vmatprep.subr.mxu0 %v11258_v15 }
 0x3b2   :  { %8883 = vmatpush3.msra.mxu0 %v1097_v18  ;;  %v1306_v18 = vld [vmem:[#allocation12 + $0x58] sm:$0xff] }
 0x3b3   :  { %8884 = vmatprep.subr.mxu0 %v11258_v15 }
 0x3b4   :  { %8885 = vmatpush3.msra.mxu0 %v1096_v20  ;;  %v1304_v20 = vld [vmem:[#allocation12 + $0x48] sm:$0xff] }
 0x3b5   :  { %8886 = vmatprep.subr.mxu0 %v11258_v15 }
 0x3b6   :  { %8887 = vmatpush3.msra.mxu0 %v1095_v22  ;;  %v1302_v22 = vld [vmem:[#allocation12 + $0x38] sm:$0xff] }
 0x3b7   :  { %8888 = vmatprep.subr.mxu0 %v11258_v15 }
 0x3b8   :  { %8889 = vmatpush3.msra.mxu0 %v1094_v24  ;;  %v1300_v24 = vld [vmem:[#allocation12 + $0x28] sm:$0xff] }
 0x3b9   :  { %8890 = vmatprep.subr.mxu0 %v11258_v15 }
 0x3ba   :  { %8891 = vmatpush3.msra.mxu0 %v1093_v26  ;;  %v1298_v26 = vld [vmem:[#allocation12 + $0x18] sm:$0xff] }
 0x3bb   :  { %8892 = vmatprep.subr.mxu0 %v11258_v15 }
 0x3bc   :  { %8893 = vmatpush3.msra.mxu0 %v1092_v28  ;;  %v1296_v28 = vld [vmem:[#allocation12 + $0x8] sm:$0xff] }
 0x3bd   :  { %8894 = vmatprep.subr.mxu0 %v11258_v15 }
 0x3be   :  { %8895 = vmatpush3.msra.mxu0 %v1091_v30 }
 0x3bf   :  { %8896 = vmatprep.subr.mxu0 %v11258_v15 }
 0x3c0   :  { %8897 = vmatpush3.msra.mxu0 %v1090_v32 }
 0x3c1   :  { %8898 = vmatprep.subr.mxu0 %v11258_v15 }
 0x3c2   :  { %8899 = vmatpush3.msra.mxu0 %v1089_v34 }
 0x3c3   :  { %8900 = vmatprep.subr.mxu0 %v11258_v15 }
 0x3c4   :  { %8901 = vmatpush3.msra.mxu0 %v1088_v36 }
 0x3c5   :  { %8902 = vmatprep.subr.mxu0 %v11258_v15 }
 0x3c6   :  { %8903 = vmatpush3.msra.mxu0 %v1087_v38 }
 0x3c7   :  { %8904 = vmatprep.subr.mxu0 %v11258_v15 }
 0x3c8   :  { %8905 = vmatpush3.msra.mxu0 %v1086_v40 }
 0x3c9   :  { %8906 = vmatprep.subr.mxu0 %v11258_v15 }
 0x3ca   :  { %8907 = vmatpush3.msra.mxu0 %v1085_v42 }
 0x3cb   :  { %8908 = vmatprep.subr.mxu0 %v11258_v15 }
 0x3cc   :  { %8909 = vmatpush3.msra.mxu0 %v1084_v44 }
 0x3cd   :  { %8910 = vmatprep.subr.mxu0 %v11258_v15 }
 0x3ce   :  { %8911 = vmatpush3.msra.mxu0 %v1083_v46 }
 0x3cf   :  { %8974 = vmatprep.subr.mxu0 %v11258_v15 }
 0x401   :  { %v1003_v63 = vpop.xlane.xlu0 %1002 }
 0x402   :  { %v1015_v8 = vmul.f32 0.0078125, %v1003_v63 }
 0x404   :  { %v11728_v12 = vsub.f32 %v990_v59, %v1015_v8  ;;  %v11808_v8 = vld [vmem:[%s13731_s2] ss:$0 sm:$0xff] }
 0x405   :  { %v1005_v3 = vpop.xlane.xlu0 %1004 }
 0x406   :  { %v1016_v5 = vmul.f32 0.0078125, %v1005_v3  ;;  %v1025_v14 = vmul.f32 %v11728_v12, %v11728_v12 }
 0x408   :  { %v11719_v7 = vsub.f32 %v991_v60, %v1016_v5 }
 0x40a   :  { %v1026_v11 = vmul.f32 %v11719_v7, %v11719_v7 }
 0x46f   :  { %v8879_v0 = vpop.f32.mrf.mxu0 }
 0x470   :  { %v984_v1 = vadd.f32 %v8879_v0, %v7802_v54 }
 0x471   :  { %v978_v2 = vpop.f32.mrf.mxu0 }
 0x472   :  { %989 = vst [vmem:[#allocation2 + $0x1a] sm:$0xff] %v984_v1  ;;  %v979_v4 = vadd.f32 %v7802_v54, %v978_v2 }
 0x474   :  { %988 = vst [vmem:[#allocation2 + $0x12] sm:$0xff] %v979_v4 }
 0x479   :  { %v11717_v6 = vld [vmem:[#allocation2 + $0x20] sm:$0x3] }
 0x47a   :  { %v1011_v9 = vsel %vm1010_vm1, %v11717_v6, 0.0 }
 0x47b   :  { %1012 = vadd.xlane.f32.xlu0 %v1011_v9  ;;  %v11723_v10 = vld [vmem:[#allocation2 + $0x10] sm:$0xff]  ;;  %v11730_v13 = vld [vmem:[#allocation2 + $0x18] sm:$0xff] }
 0x47c   :  { %1006 = vadd.xlane.f32.xlu1 %v11723_v10 }
 0x47f   :  { %1032 = vadd.xlane.f32.xlu0 %v1026_v11 }
 0x480   :  { %1008 = vadd.xlane.f32.xlu1 %v11730_v13 }
 0x484   :  { %1030 = vadd.xlane.f32.xlu1 %v1025_v14  ;;  %v1310_v14 = vld [vmem:[#allocation12 + $0x78] sm:$0xff] }
 0x504   :  { %v1013_v48 = vpop.xlane.xlu0 %1012 }
 0x505   :  { %v1019_v49 = vmul.f32 0.0078125, %v1013_v48  ;;  %v1007_v50 = vpop.xlane.xlu1 %1006 }
 0x506   :  { %v1017_v51 = vmul.f32 0.0078125, %v1007_v50 }
 0x507   :  { %v11790_v52 = vsub.f32 %v11717_v6, %v1019_v49 }
 0x508   :  { %v1033_v53 = vpop.xlane.xlu0 %1032  ;;  %v11793_v54 = vsub.f32 %v11723_v10, %v1017_v51  ;;  %v11812_v10 = vld [vmem:[%s13732_s10] ss:$0 sm:$0xff] }
 0x509   :  { %v1042_v55 = vmul.f32 0.0078125, %v1033_v53  ;;  %v1009_v56 = vpop.xlane.xlu1 %1008  ;;  %v1029_v59 = vmul.f32 %v11790_v52, %v11790_v52 }
 0x50a   :  { %v1018_v57 = vmul.f32 0.0078125, %v1009_v56  ;;  %v1027_v58 = vmul.f32 %v11793_v54, %v11793_v54 }
 0x50b   :  { %v1047_v60 = vadd.f32 1e-05, %v1042_v55  ;;  %v1038_v1 = vsel %vm1010_vm1, %v1029_v59, 0.0 }
 0x50c   :  { %1034 = vadd.xlane.f32.xlu1 %v1027_v58  ;;  %v11800_v61 = vsub.f32 %v11730_v13, %v1018_v57 }
 0x50d   :  { %v1031_v62 = vpop.xlane.xlu1 %1030  ;;  %10286 = vrsqrt.f32 %v1047_v60 }
 0x50e   :  { %v1041_v63 = vmul.f32 0.0078125, %v1031_v62  ;;  %v1028_v0 = vmul.f32 %v11800_v61, %v11800_v61 }
 0x510   :  { %v1046_v2 = vadd.f32 1e-05, %v1041_v63  ;;  %1036 = vadd.xlane.f32.xlu0 %v1028_v0  ;;  %1039 = vadd.xlane.f32.xlu1 %v1038_v1 }
 0x512   :  { %10288 = vrsqrt.f32 %v1046_v2 }
 0x51a   :  { %v10287_v3 = vpop.eup %10286 }
 0x51b   :  { %v1057_v6 = vmul.f32 %v10287_v3, %v11719_v7 }
 0x51d   :  { %v1068_v13 = vmul.f32 %v11808_v8, %v1057_v6 }
 0x51f   :  { %v10289_v4 = vpop.eup %10288  ;;  %v11825_v7 = vadd.f32 %v11812_v10, %v1068_v13 }
 0x520   :  { %v1056_v5 = vmul.f32 %v10289_v4, %v11728_v12  ;;  %v1309_v12 = vld [vmem:[#allocation12 + $0x70] sm:$0xff] }
 0x522   :  { %v1067_v9 = vmul.f32 %v11808_v8, %v1056_v5 }
 0x524   :  { %v11815_v11 = vadd.f32 %v11812_v10, %v1067_v9 }
 0x526   :  { %8913 = vmatmul.mubr.f32.vlgmr.msra.gmra.mxu0 %v11815_v11  ;;  %8960 = vmatmul.mubr.f32.vlgmr.msra.gmra.mxu1 %v11815_v11 }
 0x527   :  { %8915 = vmatprep.mubr.msk.f32.mxu0 %vm11259_vm2, %v11258_v15  ;;  %8962 = vmatprep.mubr.msk.f32.mxu1 %vm11259_vm2, %v11258_v15 }
 0x528   :  { %8975 = vmatpush3.msra.mxu0 %v1310_v14 }
 0x529   :  { %8976 = vmatprep.subr.mxu0 %v11258_v15 }
 0x52a   :  { %8916 = vmatmul.mubr.f32.gmra.mxu0 %v11825_v7  ;;  %8963 = vmatmul.mubr.f32.gmra.mxu1 %v11825_v7 }
 0x52b   :  { %8977 = vmatpush3.msra.mxu0 %v1309_v12  ;;  %8918 = vmatprep.mubr.msk.f32.mxu0 %vm11259_vm2, %v11258_v15 }
 0x52c   :  { %8978 = vmatprep.subr.mxu0 %v11258_v15  ;;  %8965 = vmatprep.mubr.msk.f32.mxu1 %vm11259_vm2, %v11258_v15 }
 0x52d   :  { %8979 = vmatpush3.msra.mxu0 %v1308_v16 }
 0x52e   :  { %8980 = vmatprep.subr.mxu0 %v11258_v15 }
 0x52f   :  { %8981 = vmatpush3.msra.mxu0 %v1307_v17 }
 0x530   :  { %8982 = vmatprep.subr.mxu0 %v11258_v15 }
 0x531   :  { %8983 = vmatpush3.msra.mxu0 %v1306_v18 }
 0x532   :  { %8984 = vmatprep.subr.mxu0 %v11258_v15 }
 0x533   :  { %8985 = vmatpush3.msra.mxu0 %v1305_v19 }
 0x534   :  { %8986 = vmatprep.subr.mxu0 %v11258_v15 }
 0x535   :  { %8987 = vmatpush3.msra.mxu0 %v1304_v20 }
 0x536   :  { %8988 = vmatprep.subr.mxu0 %v11258_v15 }
 0x537   :  { %8989 = vmatpush3.msra.mxu0 %v1303_v21 }
 0x538   :  { %8990 = vmatprep.subr.mxu0 %v11258_v15 }
 0x539   :  { %8991 = vmatpush3.msra.mxu0 %v1302_v22 }
 0x53a   :  { %8992 = vmatprep.subr.mxu0 %v11258_v15 }
 0x53b   :  { %8993 = vmatpush3.msra.mxu0 %v1301_v23 }
 0x53c   :  { %8994 = vmatprep.subr.mxu0 %v11258_v15 }
 0x53d   :  { %8995 = vmatpush3.msra.mxu0 %v1300_v24 }
 0x53e   :  { %8996 = vmatprep.subr.mxu0 %v11258_v15 }
 0x53f   :  { %8997 = vmatpush3.msra.mxu0 %v1299_v25 }
 0x540   :  { %8998 = vmatprep.subr.mxu0 %v11258_v15 }
 0x541   :  { %8999 = vmatpush3.msra.mxu0 %v1298_v26 }
 0x542   :  { %9000 = vmatprep.subr.mxu0 %v11258_v15 }
 0x543   :  { %9001 = vmatpush3.msra.mxu0 %v1297_v27 }
 0x544   :  { %9002 = vmatprep.subr.mxu0 %v11258_v15 }
 0x545   :  { %9003 = vmatpush3.msra.mxu0 %v1296_v28 }
 0x546   :  { %9004 = vmatprep.subr.mxu0 %v11258_v15 }
 0x547   :  { %9005 = vmatpush3.msra.mxu0 %v1295_v29  ;;  %v12004_v29 = vld [vmem:[%s13733_s12] sm:$0xff] }
 0x548   :  { %9071 = vmatprep.subr.mxu0 %v11258_v15 }
 0x595   :  { %v1035_v30 = vpop.xlane.xlu1 %1034 }
 0x596   :  { %v1043_v31 = vmul.f32 0.0078125, %v1035_v30 }
 0x598   :  { %v1048_v32 = vadd.f32 1e-05, %v1043_v31 }
 0x599   :  { %v1040_v33 = vpop.xlane.xlu1 %1039  ;;  %v1037_v34 = vpop.xlane.xlu0 %1036 }
 0x59a   :  { %10290 = vrsqrt.f32 %v1048_v32  ;;  %v1045_v35 = vmul.f32 0.0078125, %v1040_v33  ;;  %v1044_v36 = vmul.f32 0.0078125, %v1037_v34  ;;  %v12010_v34 = vld [vmem:[%s13733_s12 + $0x8] sm:$0xff] }
 0x59c   :  { %v1050_v37 = vadd.f32 1e-05, %v1045_v35  ;;  %v1049_v38 = vadd.f32 1e-05, %v1044_v36 }
 0x59e   :  { %10292 = vrsqrt.f32 %v1050_v37 }
 0x59f   :  { %10294 = vrsqrt.f32 %v1049_v38 }
 0x5a7   :  { %v10291_v39 = vpop.eup %10290 }
 0x5a8   :  { %v1058_v40 = vmul.f32 %v10291_v39, %v11793_v54 }
 0x5aa   :  { %v1069_v41 = vmul.f32 %v11808_v8, %v1058_v40  ;;  %v12018_v40 = vld [vmem:[%s13733_s12 + $0x10] sm:$0xff] }
 0x5ab   :  { %v10293_v42 = vpop.eup %10292 }
 0x5ac   :  { %v10295_v43 = vpop.eup %10294  ;;  %v1080_v44 = vadd.f32 %v11812_v10, %v1069_v41  ;;  %v1060_v46 = vmul.f32 %v10293_v42, %v11790_v52 }
 0x5ad   :  { %v1059_v45 = vmul.f32 %v10295_v43, %v11800_v61 }
 0x5ae   :  { %8919 = vmatmul.mubr.f32.gmra.mxu0 %v1080_v44  ;;  %8966 = vmatmul.mubr.f32.gmra.mxu1 %v1080_v44  ;;  %v1071_v49 = vmul.f32 %v11808_v8, %v1060_v46  ;;  %v12024_v46 = vld [vmem:[%s13733_s12 + $0x18] sm:$0xff] }
 0x5af   :  { %8921 = vmatprep.mubr.msk.f32.mxu0 %vm11259_vm2, %v11258_v15  ;;  %8968 = vmatprep.mubr.msk.f32.mxu1 %vm11259_vm2, %v11258_v15  ;;  %v1070_v47 = vmul.f32 %v11808_v8, %v1059_v45 }
 0x5b0   :  { %v1082_v50 = vadd.f32 %v11812_v10, %v1071_v49 }
 0x5b1   :  { %v1081_v48 = vadd.f32 %v11812_v10, %v1070_v47 }
 0x5b3   :  { %8922 = vmatmul.mubr.f32.gmra.mxu0 %v1081_v48  ;;  %8969 = vmatmul.mubr.f32.gmra.mxu1 %v1081_v48 }
 0x5b4   :  { %8924 = vmatprep.mubr.msk.f32.mxu0 %vm11259_vm2, %v11258_v15  ;;  %8971 = vmatprep.mubr.msk.f32.mxu1 %vm11259_vm2, %v11258_v15 }
 0x5b7   :  { %8925 = vmatmul.mubr.f32.gmra.mxu0 %v1082_v50  ;;  %8972 = vmatmul.mubr.f32.gmra.mxu1 %v1082_v50 }
 0x5b8   :  { %9006 = vmatprep.mubr.msk.f32.mxu0 %vm11259_vm2, %v11258_v15  ;;  %9031 = vmatprep.mubr.msk.f32.mxu1 %vm11259_vm2, %v11258_v15 }
 0x5bb   :  { %9007 = vmatmul.mubr.f32.vlgmr.msra.gmra.mxu0 %v11815_v11 }
 0x5bc   :  { %9009 = vmatprep.mubr.msk.f32.mxu0 %vm11259_vm2, %v11258_v15 }
 0x5bf   :  { %9010 = vmatmul.mubr.f32.gmra.mxu0 %v11825_v7 }
 0x5c0   :  { %9012 = vmatprep.mubr.msk.f32.mxu0 %vm11259_vm2, %v11258_v15 }
 0x5c3   :  { %9013 = vmatmul.mubr.f32.gmra.mxu0 %v1080_v44 }
 0x5c4   :  { %9015 = vmatprep.mubr.msk.f32.mxu0 %vm11259_vm2, %v11258_v15 }
 0x5c7   :  { %9016 = vmatmul.mubr.f32.gmra.mxu0 %v1081_v48 }
 0x5c8   :  { %9018 = vmatprep.mubr.msk.f32.mxu0 %vm11259_vm2, %v11258_v15 }
 0x5cb   :  { %9019 = vmatmul.mubr.f32.gmra.mxu0 %v1082_v50 }
 0x5cc   :  { %9081 = vmatprep.mubr.msk.f32.mxu0 %vm11259_vm2, %v11258_v15 }
 0x5e6   :  { %v11882_v51 = vpop.f32.mrf.mxu0  ;;  %v11884_v52 = vpop.f32.mrf.mxu1 }
 0x5e8   :  { %v8914_v53 = vpop.f32.mrf.mxu0  ;;  %v8961_v54 = vpop.f32.mrf.mxu1 }
 0x5e9   :  { %v12031_v54 = vld [vmem:[%s13733_s12 + $0x20] sm:$0x3] }
 0x5ea   :  { %v11886_v55 = vpop.f32.mrf.mxu0  ;;  %v11888_v56 = vpop.f32.mrf.mxu1 }
 0x5ec   :  { %v8917_v57 = vpop.f32.mrf.mxu0  ;;  %v8964_v58 = vpop.f32.mrf.mxu1 }
 0x66e   :  { %v11890_v59 = vpop.f32.mrf.mxu0  ;;  %v11892_v60 = vpop.f32.mrf.mxu1 }
 0x670   :  { %v8920_v61 = vpop.f32.mrf.mxu0  ;;  %v8967_v62 = vpop.f32.mrf.mxu1 }
 0x673   :  { %v11894_v63 = vpop.f32.mrf.mxu0  ;;  %v11896_v0 = vpop.f32.mrf.mxu1 }
 0x674   :  { %1729 = vrot.lane.b32.xlu1 %v11896_v0, %s11260_s0 }
 0x675   :  { %v8923_v1 = vpop.f32.mrf.mxu0  ;;  %v8970_v2 = vpop.f32.mrf.mxu1 }
 0x677   :  { %v11900_v3 = vpop.f32.mrf.mxu0  ;;  %v11902_v4 = vpop.f32.mrf.mxu1 }
 0x678   :  { %1727 = vrot.lane.b32.xlu1 %v11892_v60, %s11260_s0  ;;  %1731 = vrot.lane.b32.xlu0 %v11902_v4, %s11260_s0 }
 0x679   :  { %9022 = vmatpush3.xpose.msk.msra.mxu1 %vm1417_vm3, %v11902_v4  ;;  %v8926_v5 = vpop.f32.mrf.mxu0  ;;  %v8973_v6 = vpop.f32.mrf.mxu1 }
 0x67a   :  { %9023 = vmatprep.subr.mxu1 %v11258_v15 }
 0x67b   :  { %v11911_v8 = vpop.f32.mrf.mxu0 }
 0x67c   :  { %1725 = vrot.lane.b32.xlu1 %v11888_v56, %s11260_s0  ;;  %1723 = vrot.lane.b32.xlu0 %v11884_v52, %s11260_s0 }
 0x67d   :  { %9024 = vmatpush3.xpose.msk.msra.mxu1 %vm1417_vm3, %v11896_v0  ;;  %v9008_v9 = vpop.f32.mrf.mxu0 }
 0x67e   :  { %9025 = vmatprep.subr.mxu1 %v11258_v15 }
 0x67f   :  { %v11920_v10 = vpop.f32.mrf.mxu0 }
 0x680   :  { %1713 = vrot.lane.b32.xlu1 %v11882_v51, %s11260_s0  ;;  %1715 = vrot.lane.b32.xlu0 %v11886_v55, %s11260_s0 }
 0x681   :  { %9026 = vmatpush3.xpose.msk.msra.mxu1 %vm1417_vm3, %v11892_v60  ;;  %v9011_v11 = vpop.f32.mrf.mxu0 }
 0x682   :  { %9027 = vmatprep.subr.mxu1 %v11258_v15 }
 0x683   :  { %v11929_v13 = vpop.f32.mrf.mxu0 }
 0x684   :  { %1717 = vrot.lane.b32.xlu1 %v11890_v59, %s11260_s0  ;;  %1719 = vrot.lane.b32.xlu0 %v11894_v63, %s11260_s0 }
 0x685   :  { %9028 = vmatpush3.xpose.msk.msra.mxu1 %vm1417_vm3, %v11888_v56  ;;  %v9014_v14 = vpop.f32.mrf.mxu0 }
 0x686   :  { %9029 = vmatprep.subr.mxu1 %v11258_v15 }
 0x687   :  { %v11938_v7 = vpop.f32.mrf.mxu0 }
 0x688   :  { %1721 = vrot.lane.b32.xlu1 %v11900_v3, %s11260_s0 }
 0x689   :  { %9030 = vmatpush3.xpose.msk.msra.mxu1 %vm1417_vm3, %v11884_v52  ;;  %v9017_v12 = vpop.f32.mrf.mxu0 }
 0x68a   :  { %9046 = vmatprep.subr.mxu1 %v11258_v15 }
 0x68b   :  { %v11945_v16 = vpop.f32.mrf.mxu0 }
 0x68c   :  { %9032 = vmatmul.mubr.msk.f32.vlgmr.msra.gmra.mxu1 %vm1417_vm3, %v11882_v51 }
 0x68d   :  { %9047 = vmatpush3.msk.msra.mxu1 %vm1010_vm1, %v11945_v16  ;;  %v9020_v17 = vpop.f32.mrf.mxu0  ;;  %9034 = vmatprep.mubr.msk.f32.mxu1 %vm11259_vm2, %v11258_v15 }
 0x68e   :  { %9048 = vmatprep.subr.mxu1 %v11258_v15 }
 0x68f   :  { %9049 = vmatpush3.msra.mxu1 %v11938_v7 }
 0x690   :  { %9035 = vmatmul.mubr.msk.f32.gmra.mxu1 %vm1417_vm3, %v11886_v55  ;;  %9050 = vmatprep.subr.mxu1 %v11258_v15 }
 0x691   :  { %9051 = vmatpush3.msra.mxu1 %v11929_v13  ;;  %9037 = vmatprep.mubr.msk.f32.mxu1 %vm11259_vm2, %v11258_v15 }
 0x692   :  { %9052 = vmatprep.subr.mxu1 %v11258_v15 }
 0x693   :  { %9053 = vmatpush3.msra.mxu1 %v11920_v10 }
 0x694   :  { %9038 = vmatmul.mubr.msk.f32.gmra.mxu1 %vm1417_vm3, %v11890_v59  ;;  %9054 = vmatprep.subr.mxu1 %v11258_v15 }
 0x695   :  { %9055 = vmatpush3.msra.mxu1 %v11911_v8  ;;  %9040 = vmatprep.mubr.msk.f32.mxu1 %vm11259_vm2, %v11258_v15 }
 0x696   :  { %9096 = vmatprep.subr.mxu1 %v11258_v15 }
 0x698   :  { %9041 = vmatmul.mubr.msk.f32.gmra.mxu1 %vm1417_vm3, %v11894_v63 }
 0x699   :  { %9043 = vmatprep.mubr.msk.f32.mxu1 %vm11259_vm2, %v11258_v15 }
 0x69c   :  { %9044 = vmatmul.mubr.msk.f32.gmra.mxu1 %vm1417_vm3, %v11900_v3 }
 0x69d   :  { %9056 = vmatprep.mubr.msk.f32.mxu1 %vm11259_vm2, %v11258_v15 }
 0x6e6   :  { %v1730_v18 = vpop.permute.xlu1 %1729 }
 0x6ea   :  { %v1732_v19 = vpop.permute.xlu0 %1731  ;;  %v1728_v20 = vpop.permute.xlu1 %1727 }
 0x6eb   :  { %9072 = vmatpush3.xpose.msk.msra.mxu0 %vm1417_vm3, %v1732_v19 }
 0x6ec   :  { %9073 = vmatprep.subr.mxu0 %v11258_v15 }
 0x6ee   :  { %v1726_v21 = vpop.permute.xlu1 %1725  ;;  %v1724_v22 = vpop.permute.xlu0 %1723 }
 0x6ef   :  { %9074 = vmatpush3.xpose.msk.msra.mxu0 %vm1417_vm3, %v1730_v18 }
 0x6f0   :  { %9075 = vmatprep.subr.mxu0 %v11258_v15 }
 0x6f2   :  { %v1714_v23 = vpop.permute.xlu1 %1713  ;;  %v1716_v24 = vpop.permute.xlu0 %1715 }
 0x6f3   :  { %9076 = vmatpush3.xpose.msk.msra.mxu0 %vm1417_vm3, %v1728_v20 }
 0x6f4   :  { %9077 = vmatprep.subr.mxu0 %v11258_v15 }
 0x6f6   :  { %v1718_v25 = vpop.permute.xlu1 %1717  ;;  %v1720_v26 = vpop.permute.xlu0 %1719 }
 0x6f7   :  { %9078 = vmatpush3.xpose.msk.msra.mxu0 %vm1417_vm3, %v1726_v21 }
 0x6f8   :  { %9079 = vmatprep.subr.mxu0 %v11258_v15 }
 0x6fa   :  { %v1722_v27 = vpop.permute.xlu1 %1721 }
 0x6fb   :  { %9080 = vmatpush3.xpose.msk.msra.mxu0 %vm1417_vm3, %v1724_v22 }
 0x6fc   :  { %9121 = vmatprep.subr.mxu0 %v11258_v15 }
 0x6fe   :  { %9082 = vmatmul.mubr.msk.f32.vlgmr.msra.gmra.mxu0 %vm1417_vm3, %v1714_v23 }
 0x6ff   :  { %9084 = vmatprep.mubr.msk.f32.mxu0 %vm11259_vm2, %v11258_v15 }
 0x702   :  { %9085 = vmatmul.mubr.msk.f32.gmra.mxu0 %vm1417_vm3, %v1716_v24 }
 0x703   :  { %9087 = vmatprep.mubr.msk.f32.mxu0 %vm11259_vm2, %v11258_v15 }
 0x706   :  { %9088 = vmatmul.mubr.msk.f32.gmra.mxu0 %vm1417_vm3, %v1718_v25 }
 0x707   :  { %9090 = vmatprep.mubr.msk.f32.mxu0 %vm11259_vm2, %v11258_v15 }
 0x70a   :  { %9091 = vmatmul.mubr.msk.f32.gmra.mxu0 %vm1417_vm3, %v1720_v26 }
 0x70b   :  { %9093 = vmatprep.mubr.msk.f32.mxu0 %vm11259_vm2, %v11258_v15 }
 0x70e   :  { %9094 = vmatmul.mubr.msk.f32.gmra.mxu0 %vm1417_vm3, %v1722_v27 }
 0x70f   :  { %9129 = vmatprep.mubr.msk.f32.mxu0 %vm11259_vm2, %v11258_v15 }
 0x74c   :  { %v1514_v28 = vpop.f32.mrf.mxu1 }
 0x74d   :  { %v1538_v30 = vmul.f32 0.17677669, %v1514_v28 }
 0x74e   :  { %v9033_v31 = vpop.f32.mrf.mxu1 }
 0x74f   :  { %v12007_v32 = vadd.f32 %v1538_v30, %v12004_v29 }
 0x750   :  { %v1519_v33 = vpop.f32.mrf.mxu1 }
 0x751   :  { %v1539_v35 = vmul.f32 0.17677669, %v1519_v33  ;;  %v1549_v36 = vsel %vm1548_vm4, %v12007_v32, -inf }
 0x752   :  { %v9036_v37 = vpop.f32.mrf.mxu1  ;;  %1550 = vmax.xlane.f32.xlu0 %v1549_v36 }
 0x753   :  { %v12015_v38 = vadd.f32 %v1539_v35, %v12010_v34 }
 0x754   :  { %v1524_v39 = vpop.f32.mrf.mxu1 }
 0x755   :  { %v1540_v41 = vmul.f32 0.17677669, %v1524_v39  ;;  %v1552_v42 = vsel %vm1548_vm4, %v12015_v38, -inf }
 0x756   :  { %v9039_v43 = vpop.f32.mrf.mxu1  ;;  %1553 = vmax.xlane.f32.xlu1 %v1552_v42 }
 0x757   :  { %v1545_v44 = vadd.f32 %v1540_v41, %v12018_v40 }
 0x758   :  { %v1529_v45 = vpop.f32.mrf.mxu1 }
 0x759   :  { %v1541_v47 = vmul.f32 0.17677669, %v1529_v45  ;;  %v1555_v48 = vsel %vm1548_vm4, %v1545_v44, -inf }
 0x75a   :  { %1556 = vmax.xlane.f32.xlu0 %v1555_v48  ;;  %v9042_v49 = vpop.f32.mrf.mxu1 }
 0x75b   :  { %v12028_v50 = vadd.f32 %v1541_v47, %v12024_v46 }
 0x75c   :  { %v1534_v53 = vpop.f32.mrf.mxu1 }
 0x75d   :  { %v1542_v57 = vmul.f32 0.17677669, %v1534_v53  ;;  %v1558_v58 = vsel %vm1548_vm4, %v12028_v50, -inf }
 0x75e   :  { %1559 = vmax.xlane.f32.xlu0 %v1558_v58  ;;  %v9045_v61 = vpop.f32.mrf.mxu1 }
 0x75f   :  { %v1547_v62 = vadd.f32 %v1542_v57, %v12031_v54 }
 0x761   :  { %v1562_v1 = vsel %vm1561_vm5, %v1547_v62, -inf }
 0x762   :  { %1563 = vmax.xlane.f32.xlu0 %v1562_v1 }
 0x7be   :  { %v1819_v2 = vpop.f32.mrf.mxu0 }
 0x7bf   :  { %v1843_v5 = vmul.f32 0.17677669, %v1819_v2 }
 0x7c0   :  { %v9083_v6 = vpop.f32.mrf.mxu0 }
 0x7c1   :  { %v12038_v9 = vadd.f32 %v1843_v5, %v12004_v29 }
 0x7c2   :  { %v1824_v11 = vpop.f32.mrf.mxu0 }
 0x7c3   :  { %v1844_v14 = vmul.f32 0.17677669, %v1824_v11  ;;  %v1853_v12 = vsel %vm1548_vm4, %v12038_v9, -inf }
 0x7c4   :  { %1854 = vmax.xlane.f32.xlu1 %v1853_v12  ;;  %v9086_v17 = vpop.f32.mrf.mxu0 }
 0x7c5   :  { %v12043_v18 = vadd.f32 %v1844_v14, %v12010_v34 }
 0x7c6   :  { %v1829_v19 = vpop.f32.mrf.mxu0 }
 0x7c7   :  { %v1845_v20 = vmul.f32 0.17677669, %v1829_v19  ;;  %v1856_v21 = vsel %vm1548_vm4, %v12043_v18, -inf }
 0x7c8   :  { %1857 = vmax.xlane.f32.xlu0 %v1856_v21  ;;  %v9089_v22 = vpop.f32.mrf.mxu0 }
 0x7c9   :  { %v12048_v23 = vadd.f32 %v1845_v20, %v12018_v40 }
 0x7ca   :  { %v1834_v24 = vpop.f32.mrf.mxu0 }
 0x7cb   :  { %v1846_v25 = vmul.f32 0.17677669, %v1834_v24  ;;  %v1859_v26 = vsel %vm1548_vm4, %v12048_v23, -inf }
 0x7cc   :  { %1860 = vmax.xlane.f32.xlu1 %v1859_v26  ;;  %v9092_v27 = vpop.f32.mrf.mxu0 }
 0x7cd   :  { %v1851_v28 = vadd.f32 %v1846_v25, %v12024_v46 }
 0x7ce   :  { %v1839_v30 = vpop.f32.mrf.mxu0 }
 0x7cf   :  { %v1862_v31 = vsel %vm1548_vm4, %v1851_v28, -inf  ;;  %v1847_v48 = vmul.f32 0.17677669, %v1839_v30 }
 0x7d0   :  { %1863 = vmax.xlane.f32.xlu0 %v1862_v31  ;;  %v9095_v33 = vpop.f32.mrf.mxu0 }
 0x7d1   :  { %v1852_v53 = vadd.f32 %v1847_v48, %v12031_v54 }
 0x7d3   :  { %v1865_v57 = vsel %vm1561_vm5, %v1852_v53, -inf }
 0x7db   :  { %v1551_v35 = vpop.xlane.xlu0 %1550 }
 0x7dc   :  { %v1565_v39 = vsub.f32 %v12007_v32, %v1551_v35 }
 0x7dd   :  { %1918 = vrot.lane.b32.xlu1 %v11938_v7, %s11260_s0 }
 0x7de   :  { %v1570_v41 = vmul.f32 1.442695, %v1565_v39 }
 0x7df   :  { %v1554_v2 = vpop.xlane.xlu1 %1553 }
 0x7e0   :  { %10296 = vpow2.f32 %v1570_v41  ;;  %v1566_v5 = vsub.f32 %v12015_v38, %v1554_v2 }
 0x7e2   :  { %v1572_v6 = vmul.f32 1.442695, %v1566_v5 }
 0x7e3   :  { %v1557_v36 = vpop.xlane.xlu0 %1556 }
 0x7e4   :  { %v1567_v42 = vsub.f32 %v1545_v44, %v1557_v36 }
 0x7e6   :  { %1920 = vrot.lane.b32.xlu0 %v11945_v16, %s11260_s0  ;;  %v1574_v45 = vmul.f32 1.442695, %v1567_v42 }
 0x7e7   :  { %v1560_v37 = vpop.xlane.xlu0 %1559 }
 0x7e8   :  { %10298 = vpow2.f32 %v1574_v45  ;;  %v1568_v11 = vsub.f32 %v12028_v50, %v1560_v37 }
 0x7ea   :  { %v1576_v14 = vmul.f32 1.442695, %v1568_v11 }
 0x7eb   :  { %v1564_v43 = vpop.xlane.xlu0 %1563 }
 0x7ec   :  { %v1569_v47 = vsub.f32 %v1547_v62, %v1564_v43 }
 0x7ed   :  { %v12061_v58 = vpop.eup %10296 }
 0x7ee   :  { %v1578_v49 = vmul.f32 1.442695, %v1569_v47  ;;  %v1580_v32 = vsel %vm1548_vm4, %v12061_v58, 0.0 }
 0x7f0   :  { %10300 = vpow2.f32 %v1578_v49 }
 0x7f1   :  { %10302 = vpow2.f32 %v1572_v6 }
 0x7f2   :  { %10304 = vpow2.f32 %v1576_v14 }
 0x7f5   :  { %v12065_v61 = vpop.eup %10298 }
 0x7f6   :  { %v1586_v44 = vsel %vm1548_vm4, %v12065_v61, 0.0 }
 0x7fd   :  { %v12069_v62 = vpop.eup %10300 }
 0x7fe   :  { %v1592_v1 = vsel %vm1561_vm5, %v12069_v62, 0.0  ;;  %v12077_v12 = vpop.eup %10302 }
 0x7ff   :  { %v1583_v17 = vsel %vm1548_vm4, %v12077_v12, 0.0  ;;  %v12081_v19 = vpop.eup %10304 }
 0x800   :  { %v1589_v20 = vsel %vm1548_vm4, %v12081_v19, 0.0 }
 0x801   :  { %1866 = vmax.xlane.f32.xlu1 %v1865_v57 }
 0x805   :  { %1581 = vadd.xlane.f32.xlu0 %v1580_v32 }
 0x809   :  { %1587 = vadd.xlane.f32.xlu0 %v1586_v44 }
 0x80d   :  { %1593 = vadd.xlane.f32.xlu0 %v1592_v1 }
 0x812   :  { %1916 = vrot.lane.b32.xlu1 %v11929_v13, %s11260_s0 }
 0x836   :  { %1584 = vadd.xlane.f32.xlu1 %v1583_v17 }
 0x83a   :  { %1590 = vadd.xlane.f32.xlu1 %v1589_v20 }
 0x84d   :  { %v1855_v21 = vpop.xlane.xlu1 %1854 }
 0x84e   :  { %v1868_v38 = vsub.f32 %v12038_v9, %v1855_v21 }
 0x850   :  { %v1873_v22 = vmul.f32 1.442695, %v1868_v38 }
 0x851   :  { %v1858_v50 = vpop.xlane.xlu0 %1857 }
 0x852   :  { %10306 = vpow2.f32 %v1873_v22  ;;  %v1869_v24 = vsub.f32 %v12043_v18, %v1858_v50 }
 0x854   :  { %v1875_v25 = vmul.f32 1.442695, %v1869_v24  ;;  %v1408_v24 = vld [vmem:[#allocation14 + $0x38] sm:$0xff] }
 0x855   :  { %v1861_v26 = vpop.xlane.xlu1 %1860  ;;  %9122 = vmatpush3.msra.mxu0 %v1408_v24 }
 0x856   :  { %10308 = vpow2.f32 %v1875_v25  ;;  %v1870_v27 = vsub.f32 %v12048_v23, %v1861_v26  ;;  %v1407_v25 = vld [vmem:[#allocation14 + $0x30] sm:$0xff]  ;;  %9123 = vmatprep.subr.mxu0 %v11258_v15 }
 0x857   :  { %9124 = vmatpush3.msra.mxu0 %v1407_v25 }
 0x858   :  { %v1877_v30 = vmul.f32 1.442695, %v1870_v27  ;;  %9125 = vmatprep.subr.mxu0 %v11258_v15 }
 0x859   :  { %v1864_v31 = vpop.xlane.xlu0 %1863  ;;  %v1919_v42 = vpop.permute.xlu1 %1918 }
 0x85a   :  { %10310 = vpow2.f32 %v1877_v30  ;;  %v1871_v33 = vsub.f32 %v1851_v28, %v1864_v31 }
 0x85c   :  { %v1879_v35 = vmul.f32 1.442695, %v1871_v33 }
 0x85d   :  { %v1921_v43 = vpop.permute.xlu0 %1920 }
 0x85e   :  { %10312 = vpow2.f32 %v1879_v35 }
 0x85f   :  { %v12088_v36 = vpop.eup %10306 }
 0x860   :  { %v1883_v9 = vsel %vm1548_vm4, %v12088_v36, 0.0 }
 0x861   :  { %1884 = vadd.xlane.f32.xlu1 %v1883_v9 }
 0x863   :  { %v12092_v37 = vpop.eup %10308 }
 0x864   :  { %v1886_v18 = vsel %vm1548_vm4, %v12092_v37, 0.0 }
 0x865   :  { %1887 = vadd.xlane.f32.xlu0 %v1886_v18  ;;  %v1404_v18 = vld [vmem:[#allocation14 + $0x18] sm:$0xff] }
 0x867   :  { %v12096_v39 = vpop.eup %10310 }
 0x868   :  { %v1889_v23 = vsel %vm1548_vm4, %v12096_v39, 0.0 }
 0x869   :  { %1890 = vadd.xlane.f32.xlu1 %v1889_v23 }
 0x86b   :  { %v12100_v28 = vpop.eup %10312 }
 0x86c   :  { %v1892_v41 = vsel %vm1548_vm4, %v12100_v28, 0.0 }
 0x86d   :  { %1893 = vadd.xlane.f32.xlu0 %v1892_v41  ;;  %v1403_v41 = vld [vmem:[#allocation14 + $0x10] sm:$0xff] }
 0x883   :  { %1912 = vrot.lane.b32.xlu0 %v11911_v8, %s11260_s0 }
 0x887   :  { %2259 = vrot.lane.b32.xlu0 %v11896_v0, %s11261_s18 }
 0x88a   :  { %v1867_v45 = vpop.xlane.xlu1 %1866 }
 0x88b   :  { %v1872_v47 = vsub.f32 %v1852_v53, %v1867_v45  ;;  %2255 = vrot.lane.b32.xlu0 %v11888_v56, %s11261_s18  ;;  %v1401_v45 = vld [vmem:[#allocation14] sm:$0xff] }
 0x88d   :  { %v1881_v48 = vmul.f32 1.442695, %v1872_v47 }
 0x88e   :  { %v1582_v49 = vpop.xlane.xlu0 %1581  ;;  %v1917_v1 = vpop.permute.xlu1 %1916 }
 0x88f   :  { %10314 = vpow2.f32 %v1881_v48  ;;  %2243 = vrot.lane.b32.xlu0 %v11882_v51, %s11261_s18 }
 0x890   :  { %10316 = vrcp.f32 %v1582_v49 }
 0x893   :  { %2247 = vrot.lane.b32.xlu0 %v11890_v59, %s11261_s18 }
 0x897   :  { %2251 = vrot.lane.b32.xlu0 %v11900_v3, %s11261_s18 }
 0x89b   :  { %2444 = vrot.lane.b32.xlu0 %v11938_v7, %s11261_s18 }
 0x89c   :  { %v12118_v53 = vpop.eup %10314 }
 0x89d   :  { %v10317_v57 = vpop.eup %10316  ;;  %v1895_v32 = vsel %vm1561_vm5, %v12118_v53, 0.0 }
 0x89e   :  { %v1596_v44 = vmul.f32 %v10317_v57, %v12061_v58  ;;  %1896 = vadd.xlane.f32.xlu1 %v1895_v32  ;;  %v1588_v58 = vpop.xlane.xlu0 %1587 }
 0x8a0   :  { %9057 = vmatmul.mubr.msk.f32.vlgmr.msra.gmra.mxu1 %vm1548_vm4, %v1596_v44 }
 0x8a1   :  { %9097 = vmatpush3.msk.msra.mxu1 %vm1010_vm1, %v1921_v43  ;;  %9059 = vmatprep.mubr.msk.f32.mxu1 %vm11259_vm2, %v11258_v15 }
 0x8a2   :  { %9098 = vmatprep.subr.mxu1 %v11258_v15  ;;  %v1594_v6 = vpop.xlane.xlu0 %1593 }
 0x8a3   :  { %9099 = vmatpush3.msra.mxu1 %v1919_v42 }
 0x8a4   :  { %9100 = vmatprep.subr.mxu1 %v11258_v15 }
 0x8a5   :  { %9101 = vmatpush3.msra.mxu1 %v1917_v1 }
 0x8a6   :  { %9102 = vmatprep.subr.mxu1 %v11258_v15 }
 0x8af   :  { %1914 = vrot.lane.b32.xlu1 %v11920_v10, %s11260_s0 }
 0x8b3   :  { %2261 = vrot.lane.b32.xlu1 %v11902_v4, %s11261_s18 }
 0x8b7   :  { %2257 = vrot.lane.b32.xlu1 %v11892_v60, %s11261_s18 }
 0x8bb   :  { %2253 = vrot.lane.b32.xlu1 %v11884_v52, %s11261_s18 }
 0x8bf   :  { %2245 = vrot.lane.b32.xlu1 %v11886_v55, %s11261_s18  ;;  %v1585_v2 = vpop.xlane.xlu1 %1584 }
 0x8c0   :  { %10318 = vrcp.f32 %v1585_v2 }
 0x8c1   :  { %10320 = vrcp.f32 %v1588_v58 }
 0x8c3   :  { %2249 = vrot.lane.b32.xlu1 %v11894_v63, %s11261_s18  ;;  %v1591_v5 = vpop.xlane.xlu1 %1590 }
 0x8c4   :  { %10322 = vrcp.f32 %v1591_v5 }
 0x8c5   :  { %10324 = vrcp.f32 %v1594_v6 }
 0x8c7   :  { %2446 = vrot.lane.b32.xlu1 %v11945_v16, %s11261_s18 }
 0x8cb   :  { %2442 = vrot.lane.b32.xlu1 %v11929_v13, %s11261_s18 }
 0x8cd   :  { %v10319_v11 = vpop.eup %10318 }
 0x8ce   :  { %v1598_v14 = vmul.f32 %v10319_v11, %v12077_v12  ;;  %v10321_v17 = vpop.eup %10320 }
 0x8cf   :  { %2440 = vrot.lane.b32.xlu1 %v11920_v10, %s11261_s18  ;;  %v1600_v20 = vmul.f32 %v10321_v17, %v12065_v61 }
 0x8d0   :  { %9060 = vmatmul.mubr.msk.f32.gmra.mxu1 %vm1548_vm4, %v1598_v14 }
 0x8d1   :  { %9062 = vmatprep.mubr.msk.f32.mxu1 %vm11259_vm2, %v11258_v15  ;;  %v10323_v21 = vpop.eup %10322 }
 0x8d2   :  { %v1602_v12 = vmul.f32 %v10323_v21, %v12081_v19  ;;  %v10325_v38 = vpop.eup %10324  ;;  %v1406_v19 = vld [vmem:[#allocation14 + $0x28] sm:$0xff] }
 0x8d3   :  { %2438 = vrot.lane.b32.xlu1 %v11911_v8, %s11261_s18  ;;  %v1604_v22 = vmul.f32 %v10325_v38, %v12069_v62  ;;  %v1405_v62 = vld [vmem:[#allocation14 + $0x20] sm:$0xff]  ;;  %9126 = vmatpush3.msra.mxu0 %v1406_v19 }
 0x8d4   :  { %9063 = vmatmul.mubr.msk.f32.gmra.mxu1 %vm1548_vm4, %v1600_v20  ;;  %9127 = vmatprep.subr.mxu0 %v11258_v15 }
 0x8d5   :  { %9065 = vmatprep.mubr.msk.f32.mxu1 %vm11259_vm2, %v11258_v15  ;;  %9128 = vmatpush3.msra.mxu0 %v1405_v62 }
 0x8d6   :  { %9167 = vmatprep.subr.mxu0 %v11258_v15 }
 0x8d8   :  { %9066 = vmatmul.mubr.msk.f32.gmra.mxu1 %vm1548_vm4, %v1602_v12 }
 0x8d9   :  { %9068 = vmatprep.mubr.msk.f32.mxu1 %vm11259_vm2, %v11258_v15 }
 0x8dc   :  { %9069 = vmatmul.mubr.msk.f32.gmra.mxu1 %vm1548_vm4, %v1604_v22 }
 0x8dd   :  { %9106 = vmatprep.mubr.msk.f32.mxu1 %vm11259_vm2, %v11258_v15 }
 0x8ea   :  { %v1885_v61 = vpop.xlane.xlu1 %1884 }
 0x8eb   :  { %10326 = vrcp.f32 %v1885_v61 }
 0x8ee   :  { %v1888_v50 = vpop.xlane.xlu0 %1887 }
 0x8ef   :  { %10328 = vrcp.f32 %v1888_v50 }
 0x8f2   :  { %v1891_v26 = vpop.xlane.xlu1 %1890 }
 0x8f3   :  { %10330 = vrcp.f32 %v1891_v26 }
 0x8f6   :  { %v1894_v27 = vpop.xlane.xlu0 %1893 }
 0x8f7   :  { %10332 = vrcp.f32 %v1894_v27 }
 0x8f8   :  { %v10327_v31 = vpop.eup %10326 }
 0x8f9   :  { %v1899_v35 = vmul.f32 %v10327_v31, %v12088_v36  ;;  %v1402_v36 = vld [vmem:[#allocation14 + $0x8] sm:$0xff] }
 0x8fa   :  { %v1913_v9 = vpop.permute.xlu0 %1912 }
 0x8fc   :  { %v10329_v23 = vpop.eup %10328 }
 0x8fd   :  { %v1901_v42 = vmul.f32 %v10329_v23, %v12092_v37 }
 0x8fe   :  { %v2260_v44 = vpop.permute.xlu0 %2259 }
 0x900   :  { %v10331_v43 = vpop.eup %10330 }
 0x901   :  { %v1903_v47 = vmul.f32 %v10331_v43, %v12096_v39 }
 0x902   :  { %v2256_v58 = vpop.permute.xlu0 %2255 }
 0x904   :  { %v10333_v48 = vpop.eup %10332 }
 0x905   :  { %v1905_v49 = vmul.f32 %v10333_v48, %v12100_v28 }
 0x906   :  { %v12200_v28 = vpop.permute.xlu0 %2243 }
 0x90a   :  { %v12204_v6 = vpop.permute.xlu0 %2247 }
 0x927   :  { %v1897_v30 = vpop.xlane.xlu1 %1896 }
 0x928   :  { %10334 = vrcp.f32 %v1897_v30 }
 0x92b   :  { %v1915_v33 = vpop.permute.xlu1 %1914 }
 0x92c   :  { %9103 = vmatpush3.msra.mxu1 %v1915_v33 }
 0x92d   :  { %9104 = vmatprep.subr.mxu1 %v11258_v15 }
 0x92e   :  { %9105 = vmatpush3.msra.mxu1 %v1913_v9 }
 0x92f   :  { %9107 = vmatmul.mubr.msk.f32.vlgmr.msra.gmra.mxu1 %vm1548_vm4, %v1899_v35  ;;  %9144 = vmatprep.subr.mxu1 %v11258_v15  ;;  %v2262_v37 = vpop.permute.xlu1 %2261 }
 0x930   :  { %9109 = vmatprep.mubr.msk.f32.mxu1 %vm11259_vm2, %v11258_v15  ;;  %9145 = vmatpush3.msra.mxu1 %v1404_v18 }
 0x931   :  { %9146 = vmatprep.subr.mxu1 %v11258_v15 }
 0x932   :  { %9147 = vmatpush3.msra.mxu1 %v1403_v41 }
 0x933   :  { %9110 = vmatmul.mubr.msk.f32.gmra.mxu1 %vm1548_vm4, %v1901_v42  ;;  %9148 = vmatprep.subr.mxu1 %v11258_v15  ;;  %v2258_v32 = vpop.permute.xlu1 %2257 }
 0x934   :  { %9112 = vmatprep.mubr.msk.f32.mxu1 %vm11259_vm2, %v11258_v15  ;;  %9149 = vmatpush3.msra.mxu1 %v1402_v36 }
 0x935   :  { %9150 = vmatprep.subr.mxu1 %v11258_v15  ;;  %v10335_v57 = vpop.eup %10334 }
 0x936   :  { %9151 = vmatpush3.msra.mxu1 %v1401_v45  ;;  %v1907_v39 = vmul.f32 %v10335_v57, %v12118_v53  ;;  %v12206_v53 = vpop.permute.xlu0 %2251 }
 0x937   :  { %9113 = vmatmul.mubr.msk.f32.gmra.mxu1 %vm1548_vm4, %v1903_v47  ;;  %9192 = vmatprep.subr.mxu1 %v11258_v15  ;;  %v12196_v1 = vpop.permute.xlu1 %2253 }
 0x938   :  { %9115 = vmatprep.mubr.msk.f32.mxu1 %vm11259_vm2, %v11258_v15 }
 0x93a   :  { %v2445_v21 = vpop.permute.xlu0 %2444 }
 0x93b   :  { %9116 = vmatmul.mubr.msk.f32.gmra.mxu1 %vm1548_vm4, %v1905_v49  ;;  %v12198_v2 = vpop.permute.xlu1 %2245 }
 0x93c   :  { %9118 = vmatprep.mubr.msk.f32.mxu1 %vm11259_vm2, %v11258_v15 }
 0x93f   :  { %9119 = vmatmul.mubr.msk.f32.gmra.mxu1 %vm1548_vm4, %v1907_v39  ;;  %v12202_v5 = vpop.permute.xlu1 %2249 }
 0x940   :  { %9152 = vmatprep.mubr.msk.f32.mxu1 %vm11259_vm2, %v11258_v15 }
 0x943   :  { %v2447_v11 = vpop.permute.xlu1 %2446 }
 0x947   :  { %v2443_v14 = vpop.permute.xlu1 %2442 }
 0x94b   :  { %v2441_v12 = vpop.permute.xlu1 %2440 }
 0x94f   :  { %v2439_v38 = vpop.permute.xlu1 %2438 }
 0x960   :  { %v1689_v17 = vpop.f32.mrf.mxu1 }
 0x961   :  { %9153 = vmatmul.mubr.msk.f32.vlgmr.msra.gmra.mxu1 %vm1417_vm3, %v1689_v17 }
 0x962   :  { %9193 = vmatpush3.msk.msra.mxu1 %vm1010_vm1, %v2447_v11  ;;  %v9058_v20 = vpop.f32.mrf.mxu1  ;;  %9155 = vmatprep.mubr.msk.f32.mxu1 %vm11259_vm2, %v11258_v15 }
 0x963   :  { %9194 = vmatprep.subr.mxu1 %v11258_v15 }
 0x964   :  { %9195 = vmatpush3.msra.mxu1 %v2445_v21 }
 0x965   :  { %9196 = vmatprep.subr.mxu1 %v11258_v15 }
 0x966   :  { %9197 = vmatpush3.msra.mxu1 %v2443_v14 }
 0x967   :  { %9198 = vmatprep.subr.mxu1 %v11258_v15 }
 0x968   :  { %9199 = vmatpush3.msra.mxu1 %v2441_v12 }
 0x969   :  { %9200 = vmatprep.subr.mxu1 %v11258_v15 }
 0x96a   :  { %9201 = vmatpush3.msra.mxu1 %v2439_v38 }
 0x96b   :  { %9240 = vmatprep.subr.mxu1 %v11258_v15 }
 0x990   :  { %v1694_v22 = vpop.f32.mrf.mxu1 }
 0x991   :  { %9156 = vmatmul.mubr.msk.f32.gmra.mxu1 %vm1417_vm3, %v1694_v22 }
 0x992   :  { %v9061_v61 = vpop.f32.mrf.mxu1  ;;  %9158 = vmatprep.mubr.msk.f32.mxu1 %vm11259_vm2, %v11258_v15 }
 0x994   :  { %v1699_v50 = vpop.f32.mrf.mxu1 }
 0x995   :  { %9159 = vmatmul.mubr.msk.f32.gmra.mxu1 %vm1417_vm3, %v1699_v50 }
 0x996   :  { %v9064_v24 = vpop.f32.mrf.mxu1  ;;  %9161 = vmatprep.mubr.msk.f32.mxu1 %vm11259_vm2, %v11258_v15 }
 0x998   :  { %v1704_v25 = vpop.f32.mrf.mxu1 }
 0x999   :  { %9162 = vmatmul.mubr.msk.f32.gmra.mxu1 %vm1417_vm3, %v1704_v25 }
 0x99a   :  { %v9067_v19 = vpop.f32.mrf.mxu1  ;;  %9164 = vmatprep.mubr.msk.f32.mxu1 %vm11259_vm2, %v11258_v15 }
 0x99c   :  { %v1709_v26 = vpop.f32.mrf.mxu1 }
 0x99d   :  { %9165 = vmatmul.mubr.msk.f32.gmra.mxu1 %vm1417_vm3, %v1709_v26 }
 0x99e   :  { %v9070_v62 = vpop.f32.mrf.mxu1  ;;  %9202 = vmatprep.mubr.msk.f32.mxu1 %vm11259_vm2, %v11258_v15 }
 0x9ef   :  { %v2009_v27 = vpop.f32.mrf.mxu1 }
 0x9f0   :  { %9130 = vmatmul.mubr.msk.f32.vlgmr.msra.gmra.mxu0 %vm1417_vm3, %v2009_v27 }
 0x9f1   :  { %9168 = vmatpush3.xpose.msk.msra.mxu0 %vm1417_vm3, %v2262_v37  ;;  %v9108_v30 = vpop.f32.mrf.mxu1  ;;  %9132 = vmatprep.mubr.msk.f32.mxu0 %vm11259_vm2, %v11258_v15 }
 0x9f2   :  { %9169 = vmatprep.subr.mxu0 %v11258_v15 }
 0x9f3   :  { %v2014_v31 = vpop.f32.mrf.mxu1 }
 0x9f4   :  { %9133 = vmatmul.mubr.msk.f32.gmra.mxu0 %vm1417_vm3, %v2014_v31 }
 0x9f5   :  { %9170 = vmatpush3.xpose.msk.msra.mxu0 %vm1417_vm3, %v2260_v44  ;;  %v9111_v33 = vpop.f32.mrf.mxu1  ;;  %9135 = vmatprep.mubr.msk.f32.mxu0 %vm11259_vm2, %v11258_v15 }
 0x9f6   :  { %9171 = vmatprep.subr.mxu0 %v11258_v15 }
 0x9f7   :  { %v2019_v35 = vpop.f32.mrf.mxu1 }
 0x9f8   :  { %9136 = vmatmul.mubr.msk.f32.gmra.mxu0 %vm1417_vm3, %v2019_v35 }
 0x9f9   :  { %9172 = vmatpush3.xpose.msk.msra.mxu0 %vm1417_vm3, %v2258_v32  ;;  %v9114_v9 = vpop.f32.mrf.mxu1  ;;  %9138 = vmatprep.mubr.msk.f32.mxu0 %vm11259_vm2, %v11258_v15 }
 0x9fa   :  { %9173 = vmatprep.subr.mxu0 %v11258_v15 }
 0x9fb   :  { %v2024_v18 = vpop.f32.mrf.mxu1 }
 0x9fc   :  { %9139 = vmatmul.mubr.msk.f32.gmra.mxu0 %vm1417_vm3, %v2024_v18 }
 0x9fd   :  { %9174 = vmatpush3.xpose.msk.msra.mxu0 %vm1417_vm3, %v2256_v58  ;;  %v9117_v23 = vpop.f32.mrf.mxu1  ;;  %9141 = vmatprep.mubr.msk.f32.mxu0 %vm11259_vm2, %v11258_v15 }
 0x9fe   :  { %9175 = vmatprep.subr.mxu0 %v11258_v15 }
 0x9ff   :  { %v2029_v41 = vpop.f32.mrf.mxu1 }
 0xa00   :  { %9142 = vmatmul.mubr.msk.f32.gmra.mxu0 %vm1417_vm3, %v2029_v41 }
 0xa01   :  { %9176 = vmatpush3.xpose.msk.msra.mxu0 %vm1417_vm3, %v12196_v1  ;;  %v9120_v42 = vpop.f32.mrf.mxu1  ;;  %9177 = vmatprep.mubr.msk.f32.mxu0 %vm11259_vm2, %v11258_v15 }
 0xa02   :  { %9217 = vmatprep.subr.mxu0 %v11258_v15 }
 0xa04   :  { %9178 = vmatmul.mubr.msk.f32.vlgmr.msra.gmra.mxu0 %vm1417_vm3, %v12200_v28 }
 0xa05   :  { %9180 = vmatprep.mubr.msk.f32.mxu0 %vm11259_vm2, %v11258_v15 }
 0xa08   :  { %9181 = vmatmul.mubr.msk.f32.gmra.mxu0 %vm1417_vm3, %v12198_v2 }
 0xa09   :  { %9183 = vmatprep.mubr.msk.f32.mxu0 %vm11259_vm2, %v11258_v15 }
 0xa0c   :  { %9184 = vmatmul.mubr.msk.f32.gmra.mxu0 %vm1417_vm3, %v12204_v6 }
 0xa0d   :  { %9186 = vmatprep.mubr.msk.f32.mxu0 %vm11259_vm2, %v11258_v15 }
 0xa10   :  { %9187 = vmatmul.mubr.msk.f32.gmra.mxu0 %vm1417_vm3, %v12202_v5 }
 0xa11   :  { %9189 = vmatprep.mubr.msk.f32.mxu0 %vm11259_vm2, %v11258_v15 }
 0xa14   :  { %9190 = vmatmul.mubr.msk.f32.gmra.mxu0 %vm1417_vm3, %v12206_v53 }
 0xa15   :  { %9225 = vmatprep.mubr.msk.f32.mxu0 %vm11259_vm2, %v11258_v15 }
 0xa21   :  { %v12275_v36 = vpop.f32.mrf.mxu1 }
 0xa23   :  { %v9154_v43 = vpop.f32.mrf.mxu1 }
 0xa51   :  { %v12277_v45 = vpop.f32.mrf.mxu1 }
 0xa53   :  { %v9157_v47 = vpop.f32.mrf.mxu1 }
 0xa55   :  { %v12279_v48 = vpop.f32.mrf.mxu1 }
 0xa57   :  { %v9160_v37 = vpop.f32.mrf.mxu1 }
 0xa59   :  { %v12281_v49 = vpop.f32.mrf.mxu1 }
 0xa5b   :  { %v9163_v57 = vpop.f32.mrf.mxu1 }
 0xa5d   :  { %v12283_v39 = vpop.f32.mrf.mxu1 }
 0xa5f   :  { %v9166_v32 = vpop.f32.mrf.mxu1 }
 0xab0   :  { %v12285_v44 = vpop.f32.mrf.mxu0 }
 0xab2   :  { %v9131_v1 = vpop.f32.mrf.mxu0 }
 0xab4   :  { %v12287_v58 = vpop.f32.mrf.mxu0 }
 0xab6   :  { %v9134_v2 = vpop.f32.mrf.mxu0 }
 0xab8   :  { %v12289_v28 = vpop.f32.mrf.mxu0 }
 0xaba   :  { %v9137_v5 = vpop.f32.mrf.mxu0 }
 0xabc   :  { %v12291_v6 = vpop.f32.mrf.mxu0 }
 0xabe   :  { %v9140_v11 = vpop.f32.mrf.mxu0 }
 0xac0   :  { %v12293_v53 = vpop.f32.mrf.mxu0 }
 0xac2   :  { %v9143_v14 = vpop.f32.mrf.mxu0 }
 0xac4   :  { %v2349_v17 = vpop.f32.mrf.mxu0 }
 0xac5   :  { %v2373_v20 = vmul.f32 0.17677669, %v2349_v17 }
 0xac6   :  { %v9179_v21 = vpop.f32.mrf.mxu0 }
 0xac7   :  { %v2378_v12 = vadd.f32 %v2373_v20, %v12004_v29 }
 0xac8   :  { %v2354_v38 = vpop.f32.mrf.mxu0 }
 0xac9   :  { %v2374_v22 = vmul.f32 0.17677669, %v2354_v38  ;;  %v2383_v61 = vsel %vm1548_vm4, %v2378_v12, -inf }
 0xaca   :  { %2384 = vmax.xlane.f32.xlu1 %v2383_v61  ;;  %v9182_v50 = vpop.f32.mrf.mxu0 }
 0xacb   :  { %v2379_v24 = vadd.f32 %v2374_v22, %v12010_v34 }
 0xacc   :  { %v2359_v25 = vpop.f32.mrf.mxu0 }
 0xacd   :  { %v2375_v19 = vmul.f32 0.17677669, %v2359_v25  ;;  %v2386_v26 = vsel %vm1548_vm4, %v2379_v24, -inf }
 0xace   :  { %2387 = vmax.xlane.f32.xlu0 %v2386_v26  ;;  %v9185_v62 = vpop.f32.mrf.mxu0 }
 0xacf   :  { %v2380_v27 = vadd.f32 %v2375_v19, %v12018_v40 }
 0xad0   :  { %v2364_v30 = vpop.f32.mrf.mxu0 }
 0xad1   :  { %v2376_v31 = vmul.f32 0.17677669, %v2364_v30  ;;  %v2389_v29 = vsel %vm1548_vm4, %v2380_v27, -inf }
 0xad2   :  { %2390 = vmax.xlane.f32.xlu0 %v2389_v29  ;;  %v9188_v33 = vpop.f32.mrf.mxu0 }
 0xad3   :  { %v2381_v35 = vadd.f32 %v2376_v31, %v12024_v46 }
 0xad4   :  { %v2369_v9 = vpop.f32.mrf.mxu0 }
 0xad5   :  { %v2377_v18 = vmul.f32 0.17677669, %v2369_v9  ;;  %v2392_v34 = vsel %vm1548_vm4, %v2381_v35, -inf }
 0xad6   :  { %2393 = vmax.xlane.f32.xlu0 %v2392_v34  ;;  %v9191_v23 = vpop.f32.mrf.mxu0 }
 0xad7   :  { %v2382_v41 = vadd.f32 %v2377_v18, %v12031_v54 }
 0xad9   :  { %v2395_v42 = vsel %vm1561_vm5, %v2382_v41, -inf }
 0xada   :  { %2396 = vmax.xlane.f32.xlu1 %v2395_v42 }
 0xaeb   :  { %2685 = vrot.lane.b32.xlu1 %v11896_v0, %s11262_s17 }
 0xaec   :  { %2687 = vrot.lane.b32.xlu0 %v11902_v4, %s11262_s17 }
 0xb53   :  { %v2385_v40 = vpop.xlane.xlu1 %2384 }
 0xb54   :  { %v2398_v46 = vsub.f32 %v2378_v12, %v2385_v40 }
 0xb56   :  { %v2403_v43 = vmul.f32 1.442695, %v2398_v46  ;;  %v1409_v46 = vld [vmem:[#allocation14 + $0x40] sm:$0xff] }
 0xb57   :  { %v2388_v47 = vpop.xlane.xlu0 %2387 }
 0xb58   :  { %10336 = vpow2.f32 %v2403_v43  ;;  %v2399_v37 = vsub.f32 %v2379_v24, %v2388_v47 }
 0xb5a   :  { %v2405_v57 = vmul.f32 1.442695, %v2399_v37 }
 0xb5b   :  { %v2391_v32 = vpop.xlane.xlu0 %2390 }
 0xb5c   :  { %10338 = vpow2.f32 %v2405_v57  ;;  %v2400_v54 = vsub.f32 %v2380_v27, %v2391_v32 }
 0xb5e   :  { %v2407_v1 = vmul.f32 1.442695, %v2400_v54 }
 0xb5f   :  { %v2394_v17 = vpop.xlane.xlu0 %2393 }
 0xb60   :  { %10340 = vpow2.f32 %v2407_v1  ;;  %v2401_v20 = vsub.f32 %v2381_v35, %v2394_v17 }
 0xb62   :  { %v2409_v12 = vmul.f32 1.442695, %v2401_v20 }
 0xb63   :  { %v2397_v21 = vpop.xlane.xlu1 %2396 }
 0xb64   :  { %v2402_v38 = vsub.f32 %v2382_v41, %v2397_v21  ;;  %10342 = vpow2.f32 %v2409_v12 }
 0xb65   :  { %v10337_v2 = vpop.eup %10336 }
 0xb66   :  { %v2413_v5 = vsel %vm1548_vm4, %v10337_v2, 0.0  ;;  %v2411_v22 = vmul.f32 1.442695, %v2402_v38  ;;  %v10556_v38 = vld [vmem:[%s13733_s12] sm:$0xff] }
 0xb67   :  { %2414 = vadd.xlane.f32.xlu0 %v2413_v5 }
 0xb68   :  { %10344 = vpow2.f32 %v2411_v22 }
 0xb69   :  { %v10339_v0 = vpop.eup %10338 }
 0xb6a   :  { %v2416_v11 = vsel %vm1548_vm4, %v10339_v0, 0.0 }
 0xb6b   :  { %2417 = vadd.xlane.f32.xlu1 %v2416_v11 }
 0xb6d   :  { %v10341_v4 = vpop.eup %10340 }
 0xb6e   :  { %v2419_v14 = vsel %vm1548_vm4, %v10341_v4, 0.0 }
 0xb6f   :  { %2420 = vadd.xlane.f32.xlu0 %v2419_v14 }
 0xb71   :  { %v10343_v61 = vpop.eup %10342 }
 0xb72   :  { %v2422_v50 = vsel %vm1548_vm4, %v10343_v61, 0.0 }
 0xb75   :  { %v10345_v24 = vpop.eup %10344 }
 0xb76   :  { %v2425_v25 = vsel %vm1561_vm5, %v10345_v24, 0.0 }
 0xb7c   :  { %2681 = vrot.lane.b32.xlu1 %v11888_v56, %s11262_s17  ;;  %v1412_v56 = vld [vmem:[#allocation14 + $0x58] sm:$0xff] }
 0xb7d   :  { %9218 = vmatpush3.msra.mxu0 %v1412_v56  ;;  %v10557_v56 = vld [vmem:[%s13733_s12 + $0x8] sm:$0xff] }
 0xb7e   :  { %9219 = vmatprep.subr.mxu0 %v11258_v15 }
 0xb85   :  { %2683 = vrot.lane.b32.xlu0 %v11892_v60, %s11262_s17  ;;  %v1411_v60 = vld [vmem:[#allocation14 + $0x50] sm:$0xff] }
 0xb86   :  { %9220 = vmatpush3.msra.mxu0 %v1411_v60 }
 0xb87   :  { %9221 = vmatprep.subr.mxu0 %v11258_v15 }
 0xba0   :  { %2423 = vadd.xlane.f32.xlu1 %v2422_v50 }
 0xba4   :  { %2426 = vadd.xlane.f32.xlu0 %v2425_v25 }
 0xbb1   :  { %2669 = vrot.lane.b32.xlu1 %v11882_v51, %s11262_s17  ;;  %v1410_v51 = vld [vmem:[#allocation14 + $0x48] sm:$0xff] }
 0xbb2   :  { %9222 = vmatpush3.msra.mxu0 %v1410_v51 }
 0xbb3   :  { %9223 = vmatprep.subr.mxu0 %v11258_v15 }
 0xbb4   :  { %9224 = vmatpush3.msra.mxu0 %v1409_v46 }
 0xbb5   :  { %2673 = vrot.lane.b32.xlu1 %v11890_v59, %s11262_s17  ;;  %v2688_v59 = vpop.permute.xlu0 %2687  ;;  %9265 = vmatprep.subr.mxu0 %v11258_v15 }
 0xbb9   :  { %2677 = vrot.lane.b32.xlu1 %v11900_v3, %s11262_s17 }
 0xbba   :  { %2679 = vrot.lane.b32.xlu0 %v11884_v52, %s11262_s17  ;;  %v2686_v52 = vpop.permute.xlu1 %2685 }
 0xbbe   :  { %2671 = vrot.lane.b32.xlu0 %v11886_v55, %s11262_s17 }
 0xbc2   :  { %2675 = vrot.lane.b32.xlu0 %v11894_v63, %s11262_s17 }
 0xbf0   :  { %v2415_v3 = vpop.xlane.xlu0 %2414 }
 0xbf1   :  { %10346 = vrcp.f32 %v2415_v3 }
 0xbf4   :  { %v2418_v55 = vpop.xlane.xlu1 %2417 }
 0xbf5   :  { %10348 = vrcp.f32 %v2418_v55  ;;  %v10558_v55 = vld [vmem:[%s13733_s12 + $0x10] sm:$0xff] }
 0xbf8   :  { %v2421_v19 = vpop.xlane.xlu0 %2420  ;;  %v2682_v33 = vpop.permute.xlu1 %2681 }
 0xbf9   :  { %10350 = vrcp.f32 %v2421_v19 }
 0xbfc   :  { %v2684_v29 = vpop.permute.xlu0 %2683 }
 0xbfe   :  { %v10347_v63 = vpop.eup %10346 }
 0xbff   :  { %v2429_v26 = vmul.f32 %v10347_v63, %v10337_v2 }
 0xc01   :  { %9203 = vmatmul.mubr.msk.f32.vlgmr.msra.gmra.mxu1 %vm1548_vm4, %v2429_v26 }
 0xc02   :  { %v10349_v62 = vpop.eup %10348  ;;  %9241 = vmatpush3.xpose.msk.msra.mxu1 %vm1417_vm3, %v2688_v59  ;;  %9205 = vmatprep.mubr.msk.f32.mxu1 %vm11259_vm2, %v11258_v15 }
 0xc03   :  { %9242 = vmatprep.subr.mxu1 %v11258_v15  ;;  %v2431_v27 = vmul.f32 %v10349_v62, %v10339_v0 }
 0xc05   :  { %9206 = vmatmul.mubr.msk.f32.gmra.mxu1 %vm1548_vm4, %v2431_v27 }
 0xc06   :  { %v10351_v30 = vpop.eup %10350  ;;  %9243 = vmatpush3.xpose.msk.msra.mxu1 %vm1417_vm3, %v2686_v52  ;;  %9208 = vmatprep.mubr.msk.f32.mxu1 %vm11259_vm2, %v11258_v15 }
 0xc07   :  { %9244 = vmatprep.subr.mxu1 %v11258_v15  ;;  %v2433_v31 = vmul.f32 %v10351_v30, %v10341_v4  ;;  %v10559_v30 = vld [vmem:[%s13733_s12 + $0x18] sm:$0xff] }
 0xc09   :  { %9209 = vmatmul.mubr.msk.f32.gmra.mxu1 %vm1548_vm4, %v2433_v31 }
 0xc0a   :  { %9245 = vmatpush3.xpose.msk.msra.mxu1 %vm1417_vm3, %v2684_v29  ;;  %9211 = vmatprep.mubr.msk.f32.mxu1 %vm11259_vm2, %v11258_v15 }
 0xc0b   :  { %9246 = vmatprep.subr.mxu1 %v11258_v15 }
 0xc0e   :  { %9247 = vmatpush3.xpose.msk.msra.mxu1 %vm1417_vm3, %v2682_v33 }
 0xc0f   :  { %9248 = vmatprep.subr.mxu1 %v11258_v15 }
 0xc29   :  { %v2424_v35 = vpop.xlane.xlu1 %2423 }
 0xc2a   :  { %10352 = vrcp.f32 %v2424_v35 }
 0xc2d   :  { %v2427_v9 = vpop.xlane.xlu0 %2426  ;;  %v2670_v40 = vpop.permute.xlu1 %2669 }
 0xc2e   :  { %10354 = vrcp.f32 %v2427_v9 }
 0xc31   :  { %v2680_v18 = vpop.permute.xlu0 %2679  ;;  %v2674_v47 = vpop.permute.xlu1 %2673 }
 0xc32   :  { %9249 = vmatpush3.xpose.msk.msra.mxu1 %vm1417_vm3, %v2680_v18  ;;  %v10560_v18 = vld [vmem:[%s13733_s12 + $0x20] sm:$0x3] }
 0xc33   :  { %9290 = vmatprep.subr.mxu1 %v11258_v15 }
 0xc35   :  { %v2672_v43 = vpop.permute.xlu0 %2671  ;;  %v2678_v57 = vpop.permute.xlu1 %2677 }
 0xc37   :  { %v10353_v34 = vpop.eup %10352 }
 0xc38   :  { %v2435_v23 = vmul.f32 %v10353_v34, %v10343_v61 }
 0xc39   :  { %v2676_v37 = vpop.permute.xlu0 %2675 }
 0xc3a   :  { %9212 = vmatmul.mubr.msk.f32.gmra.mxu1 %vm1548_vm4, %v2435_v23 }
 0xc3b   :  { %v10355_v41 = vpop.eup %10354  ;;  %9214 = vmatprep.mubr.msk.f32.mxu1 %vm11259_vm2, %v11258_v15 }
 0xc3c   :  { %v2437_v42 = vmul.f32 %v10355_v41, %v10345_v24  ;;  %v2220_v41 = vadd.f32 %v12275_v36, %v12285_v44 }
 0xc3e   :  { %9215 = vmatmul.mubr.msk.f32.gmra.mxu1 %vm1548_vm4, %v2437_v42 }
 0xc3f   :  { %9250 = vmatprep.mubr.msk.f32.mxu1 %vm11259_vm2, %v11258_v15 }
 0xc42   :  { %9251 = vmatmul.mubr.msk.f32.vlgmr.msra.gmra.mxu1 %vm1417_vm3, %v2670_v40 }
 0xc43   :  { %9253 = vmatprep.mubr.msk.f32.mxu1 %vm11259_vm2, %v11258_v15 }
 0xc46   :  { %9254 = vmatmul.mubr.msk.f32.gmra.mxu1 %vm1417_vm3, %v2672_v43  ;;  %v2225_v43 = vadd.f32 %v12277_v45, %v12287_v58 }
 0xc47   :  { %9256 = vmatprep.mubr.msk.f32.mxu1 %vm11259_vm2, %v11258_v15 }
 0xc4a   :  { %9257 = vmatmul.mubr.msk.f32.gmra.mxu1 %vm1417_vm3, %v2674_v47 }
 0xc4b   :  { %9259 = vmatprep.mubr.msk.f32.mxu1 %vm11259_vm2, %v11258_v15 }
 0xc4e   :  { %9260 = vmatmul.mubr.msk.f32.gmra.mxu1 %vm1417_vm3, %v2676_v37 }
 0xc4f   :  { %9262 = vmatprep.mubr.msk.f32.mxu1 %vm11259_vm2, %v11258_v15 }
 0xc52   :  { %9263 = vmatmul.mubr.msk.f32.gmra.mxu1 %vm1417_vm3, %v2678_v57 }
 0xc53   :  { %9298 = vmatprep.mubr.msk.f32.mxu1 %vm11259_vm2, %v11258_v15 }
 0xcc1   :  { %v2535_v32 = vpop.f32.mrf.mxu1 }
 0xcc2   :  { %9226 = vmatmul.mubr.msk.f32.vlgmr.msra.gmra.mxu0 %vm1417_vm3, %v2535_v32 }
 0xcc3   :  { %v9204_v54 = vpop.f32.mrf.mxu1  ;;  %9228 = vmatprep.mubr.msk.f32.mxu0 %vm11259_vm2, %v11258_v15 }
 0xcc5   :  { %v2540_v1 = vpop.f32.mrf.mxu1 }
 0xcc6   :  { %9229 = vmatmul.mubr.msk.f32.gmra.mxu0 %vm1417_vm3, %v2540_v1 }
 0xcc7   :  { %v9207_v2 = vpop.f32.mrf.mxu1  ;;  %9231 = vmatprep.mubr.msk.f32.mxu0 %vm11259_vm2, %v11258_v15 }
 0xcc9   :  { %v2545_v5 = vpop.f32.mrf.mxu1 }
 0xcca   :  { %9232 = vmatmul.mubr.msk.f32.gmra.mxu0 %vm1417_vm3, %v2545_v5 }
 0xccb   :  { %v9210_v0 = vpop.f32.mrf.mxu1  ;;  %9234 = vmatprep.mubr.msk.f32.mxu0 %vm11259_vm2, %v11258_v15 }
 0xcfa   :  { %v2550_v11 = vpop.f32.mrf.mxu1 }
 0xcfb   :  { %9235 = vmatmul.mubr.msk.f32.gmra.mxu0 %vm1417_vm3, %v2550_v11 }
 0xcfc   :  { %v9213_v4 = vpop.f32.mrf.mxu1  ;;  %9237 = vmatprep.mubr.msk.f32.mxu0 %vm11259_vm2, %v11258_v15 }
 0xcfe   :  { %v2555_v14 = vpop.f32.mrf.mxu1 }
 0xcff   :  { %9238 = vmatmul.mubr.msk.f32.gmra.mxu0 %vm1417_vm3, %v2555_v14 }
 0xd00   :  { %v9216_v17 = vpop.f32.mrf.mxu1  ;;  %9275 = vmatprep.mubr.msk.f32.mxu0 %vm11259_vm2, %v11258_v15 }
 0xd02   :  { %v2775_v20 = vpop.f32.mrf.mxu1 }
 0xd03   :  { %v2799_v21 = vmul.f32 0.17677669, %v2775_v20 }
 0xd04   :  { %v9252_v12 = vpop.f32.mrf.mxu1 }
 0xd05   :  { %v2804_v22 = vadd.f32 %v10556_v38, %v2799_v21 }
 0xd06   :  { %v2780_v61 = vpop.f32.mrf.mxu1 }
 0xd07   :  { %v2800_v50 = vmul.f32 0.17677669, %v2780_v61  ;;  %v2809_v24 = vsel %vm1548_vm4, %v2804_v22, -inf }
 0xd08   :  { %2810 = vmax.xlane.f32.xlu0 %v2809_v24  ;;  %v9255_v25 = vpop.f32.mrf.mxu1 }
 0xd09   :  { %v2805_v60 = vadd.f32 %v10557_v56, %v2800_v50 }
 0xd0a   :  { %v2785_v51 = vpop.f32.mrf.mxu1 }
 0xd0b   :  { %v2801_v59 = vmul.f32 0.17677669, %v2785_v51  ;;  %v2812_v52 = vsel %vm1548_vm4, %v2805_v60, -inf }
 0xd0c   :  { %2813 = vmax.xlane.f32.xlu1 %v2812_v52  ;;  %v9258_v3 = vpop.f32.mrf.mxu1  ;;  %v2235_v52 = vadd.f32 %v12281_v49, %v12291_v6  ;;  %v1414_v49 = vld [vmem:[#allocation14 + $0x68] sm:$0xff] }
 0xd0d   :  { %v2806_v19 = vadd.f32 %v10558_v55, %v2801_v59 }
 0xd0e   :  { %v2790_v63 = vpop.f32.mrf.mxu1 }
 0xd0f   :  { %v2802_v26 = vmul.f32 0.17677669, %v2790_v63  ;;  %v2815_v62 = vsel %vm1548_vm4, %v2806_v19, -inf  ;;  %v2240_v63 = vadd.f32 %v12283_v39, %v12293_v53 }
 0xd10   :  { %2816 = vmax.xlane.f32.xlu0 %v2815_v62  ;;  %v9261_v27 = vpop.f32.mrf.mxu1 }
 0xd11   :  { %v2807_v31 = vadd.f32 %v10559_v30, %v2802_v26  ;;  %v1416_v30 = vld [vmem:[#allocation14 + $0x78] sm:$0xff] }
 0xd12   :  { %v2795_v29 = vpop.f32.mrf.mxu1  ;;  %9291 = vmatpush3.msra.mxu1 %v1416_v30 }
 0xd13   :  { %v2803_v33 = vmul.f32 0.17677669, %v2795_v29  ;;  %v2818_v35 = vsel %vm1548_vm4, %v2807_v31, -inf  ;;  %9292 = vmatprep.subr.mxu1 %v11258_v15 }
 0xd14   :  { %2819 = vmax.xlane.f32.xlu0 %v2818_v35  ;;  %v9264_v9 = vpop.f32.mrf.mxu1 }
 0xd15   :  { %v2808_v34 = vadd.f32 %v10560_v18, %v2803_v33 }
 0xd17   :  { %v2821_v23 = vsel %vm1561_vm5, %v2808_v34, -inf }
 0xd18   :  { %2822 = vmax.xlane.f32.xlu0 %v2821_v23 }
 0xd1d   :  { %2870 = vrot.lane.b32.xlu1 %v11938_v7, %s11262_s17 }
 0xd21   :  { %2868 = vrot.lane.b32.xlu1 %v11929_v13, %s11262_s17  ;;  %v2230_v13 = vadd.f32 %v12279_v48, %v12289_v28 }
 0xd2e   :  { %2872 = vrot.lane.b32.xlu0 %v11945_v16, %s11262_s17 }
 0xd82   :  { %v2640_v42 = vpop.f32.mrf.mxu0 }
 0xd83   :  { %v12407_v40 = vadd.f32 %v2640_v42, %v2220_v41 }
 0xd84   :  { %v9227_v46 = vpop.f32.mrf.mxu0 }
 0xd86   :  { %v2645_v47 = vpop.f32.mrf.mxu0 }
 0xd87   :  { %v12411_v37 = vadd.f32 %v2645_v47, %v2225_v43 }
 0xd88   :  { %v9230_v7 = vpop.f32.mrf.mxu0 }
 0xd89   :  { %v1413_v7 = vld [vmem:[#allocation14 + $0x60] sm:$0xff] }
 0xd8a   :  { %v2650_v57 = vpop.f32.mrf.mxu0 }
 0xd8b   :  { %v12415_v32 = vadd.f32 %v2650_v57, %v2230_v13 }
 0xd8c   :  { %v9233_v16 = vpop.f32.mrf.mxu0 }
 0xd91   :  { %v2811_v54 = vpop.xlane.xlu0 %2810 }
 0xd92   :  { %v2824_v36 = vsub.f32 %v2804_v22, %v2811_v54 }
 0xd94   :  { %v2829_v44 = vmul.f32 1.442695, %v2824_v36 }
 0xd95   :  { %v2814_v1 = vpop.xlane.xlu1 %2813 }
 0xd96   :  { %10356 = vpow2.f32 %v2829_v44  ;;  %v2825_v2 = vsub.f32 %v2805_v60, %v2814_v1 }
 0xd98   :  { %v2831_v5 = vmul.f32 1.442695, %v2825_v2 }
 0xd99   :  { %v2817_v0 = vpop.xlane.xlu0 %2816  ;;  %v2871_v20 = vpop.permute.xlu1 %2870 }
 0xd9a   :  { %10358 = vpow2.f32 %v2831_v5  ;;  %v2826_v45 = vsub.f32 %v2806_v19, %v2817_v0 }
 0xd9c   :  { %v2833_v58 = vmul.f32 1.442695, %v2826_v45 }
 0xd9d   :  { %v2820_v11 = vpop.xlane.xlu0 %2819  ;;  %v2869_v50 = vpop.permute.xlu1 %2868 }
 0xd9e   :  { %10360 = vpow2.f32 %v2833_v58  ;;  %v2827_v4 = vsub.f32 %v2807_v31, %v2820_v11  ;;  %v1415_v31 = vld [vmem:[#allocation14 + $0x70] sm:$0xff] }
 0xd9f   :  { %9293 = vmatpush3.msra.mxu1 %v1415_v31  ;;  %v3208_v31 = vld [vmem:[#allocation18 + $0x78] sm:$0xff] }
 0xda0   :  { %v2835_v14 = vmul.f32 1.442695, %v2827_v4  ;;  %9294 = vmatprep.subr.mxu1 %v11258_v15  ;;  %v7923_v4 = vld [vmem:[%s13734_s23] ss:$0 sm:$0xff] }
 0xda1   :  { %v2823_v48 = vpop.xlane.xlu0 %2822  ;;  %9295 = vmatpush3.msra.mxu1 %v1414_v49  ;;  %v3207_v49 = vld [vmem:[#allocation18 + $0x70] sm:$0xff] }
 0xda2   :  { %10362 = vpow2.f32 %v2835_v14  ;;  %v2828_v28 = vsub.f32 %v2808_v34, %v2823_v48  ;;  %9296 = vmatprep.subr.mxu1 %v11258_v15  ;;  %v10561_v14 = vld [vmem:[#allocation2] sm:$0xff] }
 0xda3   :  { %v10357_v17 = vpop.eup %10356  ;;  %9297 = vmatpush3.msra.mxu1 %v1413_v7 }
 0xda4   :  { %v2837_v21 = vmul.f32 1.442695, %v2828_v28  ;;  %v2839_v12 = vsel %vm1548_vm4, %v10357_v17, 0.0  ;;  %9360 = vmatprep.subr.mxu1 %v11258_v15 }
 0xda5   :  { %2840 = vadd.xlane.f32.xlu1 %v2839_v12  ;;  %v2873_v38 = vpop.permute.xlu0 %2872  ;;  %v10562_v12 = vld [vmem:[#allocation2 + $0x8] sm:$0xff] }
 0xda6   :  { %10364 = vpow2.f32 %v2837_v21  ;;  %9266 = vmatpush3.msk.msra.mxu0 %vm1010_vm1, %v2873_v38 }
 0xda7   :  { %v10359_v22 = vpop.eup %10358  ;;  %9267 = vmatprep.subr.mxu0 %v11258_v15 }
 0xda8   :  { %9268 = vmatpush3.msra.mxu0 %v2871_v20  ;;  %v2842_v61 = vsel %vm1548_vm4, %v10359_v22, 0.0 }
 0xda9   :  { %2843 = vadd.xlane.f32.xlu0 %v2842_v61  ;;  %9269 = vmatprep.subr.mxu0 %v11258_v15 }
 0xdaa   :  { %9270 = vmatpush3.msra.mxu0 %v2869_v50 }
 0xdab   :  { %v10361_v24 = vpop.eup %10360  ;;  %9271 = vmatprep.subr.mxu0 %v11258_v15 }
 0xdac   :  { %v2845_v25 = vsel %vm1548_vm4, %v10361_v24, 0.0 }
 0xdad   :  { %2846 = vadd.xlane.f32.xlu1 %v2845_v25 }
 0xdaf   :  { %v10363_v56 = vpop.eup %10362 }
 0xdb0   :  { %v2848_v60 = vsel %vm1548_vm4, %v10363_v56, 0.0 }
 0xdb1   :  { %2849 = vadd.xlane.f32.xlu0 %v2848_v60 }
 0xdb3   :  { %v10365_v51 = vpop.eup %10364 }
 0xdb4   :  { %v2851_v59 = vsel %vm1561_vm5, %v10365_v51, 0.0 }
 0xdb5   :  { %2852 = vadd.xlane.f32.xlu1 %v2851_v59  ;;  %v10564_v59 = vld [vmem:[#allocation2 + $0x18] sm:$0xff] }
 0xdbb   :  { %v2655_v3 = vpop.f32.mrf.mxu0 }
 0xdbc   :  { %v12428_v55 = vadd.f32 %v2655_v3, %v2235_v52 }
 0xdbd   :  { %v9236_v19 = vpop.f32.mrf.mxu0 }
 0xdbf   :  { %v2660_v26 = vpop.f32.mrf.mxu0 }
 0xdc0   :  { %v12432_v62 = vadd.f32 %v2660_v26, %v2240_v63  ;;  %v10565_v26 = vld [vmem:[#allocation2 + $0x20] sm:$0x3] }
 0xdc1   :  { %v9239_v27 = vpop.f32.mrf.mxu0 }
 0xdc6   :  { %2866 = vrot.lane.b32.xlu1 %v11920_v10, %s11262_s17 }
 0xdc7   :  { %2864 = vrot.lane.b32.xlu0 %v11911_v8, %s11262_s17 }
 0xe2e   :  { %v2841_v39 = vpop.xlane.xlu1 %2840 }
 0xe2f   :  { %10366 = vrcp.f32 %v2841_v39  ;;  %v3206_v39 = vld [vmem:[#allocation18 + $0x68] sm:$0xff] }
 0xe32   :  { %v2844_v6 = vpop.xlane.xlu0 %2843 }
 0xe33   :  { %10368 = vrcp.f32 %v2844_v6 }
 0xe36   :  { %v2847_v10 = vpop.xlane.xlu1 %2846 }
 0xe37   :  { %10370 = vrcp.f32 %v2847_v10 }
 0xe3a   :  { %v2850_v53 = vpop.xlane.xlu0 %2849 }
 0xe3b   :  { %10372 = vrcp.f32 %v2850_v53 }
 0xe3c   :  { %v10367_v29 = vpop.eup %10366 }
 0xe3d   :  { %v2855_v35 = vmul.f32 %v10367_v29, %v10357_v17 }
 0xe3e   :  { %v2853_v8 = vpop.xlane.xlu1 %2852  ;;  %v2865_v9 = vpop.permute.xlu0 %2864 }
 0xe3f   :  { %10374 = vrcp.f32 %v2853_v8 }
 0xe40   :  { %v10369_v18 = vpop.eup %10368 }
 0xe41   :  { %v2857_v34 = vmul.f32 %v10369_v18, %v10359_v22 }
 0xe42   :  { %v2867_v33 = vpop.permute.xlu1 %2866 }
 0xe43   :  { %9272 = vmatpush3.msra.mxu0 %v2867_v33 }
 0xe44   :  { %9273 = vmatprep.subr.mxu0 %v11258_v15  ;;  %v10371_v23 = vpop.eup %10370 }
 0xe45   :  { %9274 = vmatpush3.msra.mxu0 %v2865_v9  ;;  %v2859_v41 = vmul.f32 %v10371_v23, %v10361_v24  ;;  %v10563_v24 = vld [vmem:[#allocation2 + $0x10] sm:$0xff] }
 0xe46   :  { %9276 = vmatmul.mubr.msk.f32.vlgmr.msra.gmra.mxu0 %vm1548_vm4, %v2855_v35  ;;  %9313 = vmatprep.subr.mxu0 %v11258_v15 }
 0xe47   :  { %9278 = vmatprep.mubr.msk.f32.mxu0 %vm11259_vm2, %v11258_v15  ;;  %9314 = vmatpush3.msra.mxu0 %v3208_v31 }
 0xe48   :  { %v10373_v42 = vpop.eup %10372  ;;  %9315 = vmatprep.subr.mxu0 %v11258_v15 }
 0xe49   :  { %v2861_v46 = vmul.f32 %v10373_v42, %v10363_v56  ;;  %9316 = vmatpush3.msra.mxu0 %v3207_v49 }
 0xe4a   :  { %9279 = vmatmul.mubr.msk.f32.gmra.mxu0 %vm1548_vm4, %v2857_v34  ;;  %9317 = vmatprep.subr.mxu0 %v11258_v15 }
 0xe4b   :  { %9281 = vmatprep.mubr.msk.f32.mxu0 %vm11259_vm2, %v11258_v15  ;;  %9318 = vmatpush3.msra.mxu0 %v3206_v39 }
 0xe4c   :  { %v10375_v43 = vpop.eup %10374  ;;  %9319 = vmatprep.subr.mxu0 %v11258_v15 }
 0xe4d   :  { %v2863_v47 = vmul.f32 %v10375_v43, %v10365_v51 }
 0xe4e   :  { %9282 = vmatmul.mubr.msk.f32.gmra.mxu0 %vm1548_vm4, %v2859_v41 }
 0xe4f   :  { %9284 = vmatprep.mubr.msk.f32.mxu0 %vm11259_vm2, %v11258_v15 }
 0xe52   :  { %9285 = vmatmul.mubr.msk.f32.gmra.mxu0 %vm1548_vm4, %v2861_v46 }
 0xe53   :  { %9287 = vmatprep.mubr.msk.f32.mxu0 %vm11259_vm2, %v11258_v15 }
 0xe56   :  { %9288 = vmatmul.mubr.msk.f32.gmra.mxu0 %vm1548_vm4, %v2863_v47 }
 0xe57   :  { %9345 = vmatprep.mubr.msk.f32.mxu0 %vm11259_vm2, %v11258_v15 }
 0xf06   :  { %v2961_v13 = vpop.f32.mrf.mxu0 }
 0xf07   :  { %9299 = vmatmul.mubr.msk.f32.vlgmr.msra.gmra.mxu1 %vm1417_vm3, %v2961_v13 }
 0xf08   :  { %v9277_v57 = vpop.f32.mrf.mxu0  ;;  %9301 = vmatprep.mubr.msk.f32.mxu1 %vm11259_vm2, %v11258_v15 }
 0xf09   :  { %v3204_v57 = vld [vmem:[#allocation18 + $0x58] sm:$0xff] }
 0xf0a   :  { %v2966_v16 = vpop.f32.mrf.mxu0 }
 0xf0b   :  { %9302 = vmatmul.mubr.msk.f32.gmra.mxu1 %vm1417_vm3, %v2966_v16 }
 0xf0c   :  { %v9280_v54 = vpop.f32.mrf.mxu0  ;;  %9304 = vmatprep.mubr.msk.f32.mxu1 %vm11259_vm2, %v11258_v15 }
 0xf0d   :  { %v3203_v54 = vld [vmem:[#allocation18 + $0x50] sm:$0xff] }
 0xf0e   :  { %v2971_v36 = vpop.f32.mrf.mxu0 }
 0xf0f   :  { %9305 = vmatmul.mubr.msk.f32.gmra.mxu1 %vm1417_vm3, %v2971_v36 }
 0xf10   :  { %v9283_v44 = vpop.f32.mrf.mxu0  ;;  %9307 = vmatprep.mubr.msk.f32.mxu1 %vm11259_vm2, %v11258_v15 }
 0xf11   :  { %v3202_v44 = vld [vmem:[#allocation18 + $0x48] sm:$0xff] }
 0xf12   :  { %v2976_v1 = vpop.f32.mrf.mxu0 }
 0xf13   :  { %9308 = vmatmul.mubr.msk.f32.gmra.mxu1 %vm1417_vm3, %v2976_v1 }
 0xf14   :  { %v9286_v2 = vpop.f32.mrf.mxu0  ;;  %9310 = vmatprep.mubr.msk.f32.mxu1 %vm11259_vm2, %v11258_v15 }
 0xf15   :  { %v3201_v2 = vld [vmem:[#allocation18 + $0x40] sm:$0xff] }
 0xf16   :  { %v2981_v5 = vpop.f32.mrf.mxu0 }
 0xf17   :  { %9311 = vmatmul.mubr.msk.f32.gmra.mxu1 %vm1417_vm3, %v2981_v5  ;;  %v3200_v5 = vld [vmem:[#allocation18 + $0x38] sm:$0xff] }
 0xf18   :  { %v9289_v0 = vpop.f32.mrf.mxu0  ;;  %9392 = vmatprep.mubr.msk.f32.mxu1 %vm11259_vm2, %v11258_v15 }
 0xf19   :  { %v3199_v0 = vld [vmem:[#allocation18 + $0x30] sm:$0xff] }
 0xfc7   :  { %v3066_v45 = vpop.f32.mrf.mxu1 }
 0xfc8   :  { %v3090_v58 = vadd.f32 %v3066_v45, %v12407_v40  ;;  %v3198_v45 = vld [vmem:[#allocation18 + $0x28] sm:$0xff] }
 0xfc9   :  { %v9300_v11 = vpop.f32.mrf.mxu1 }
 0xfca   :  { %v3095_v48 = vadd.f32 %v10561_v14, %v3090_v58  ;;  %v3197_v58 = vld [vmem:[#allocation18 + $0x20] sm:$0xff]  ;;  %v3196_v11 = vld [vmem:[#allocation18 + $0x18] sm:$0xff]  ;;  %v3194_v14 = vld [vmem:[#allocation18 + $0x8] sm:$0xff] }
 0xfcb   :  { %v3071_v28 = vpop.f32.mrf.mxu1 }
 0xfcc   :  { %v3091_v17 = vadd.f32 %v3071_v28, %v12411_v37  ;;  %v12477_v20 = vadd.f32 %v7923_v4, %v3095_v48  ;;  %v3193_v48 = vld [vmem:[#allocation18] sm:$0xff] }
 0xfcd   :  { %v9303_v21 = vpop.f32.mrf.mxu1 }
 0xfce   :  { %v3096_v38 = vadd.f32 %v10562_v12, %v3091_v17  ;;  %3114 = vadd.xlane.f32.xlu1 %v12477_v20 }
 0xfcf   :  { %v3076_v22 = vpop.f32.mrf.mxu1 }
 0xfd0   :  { %v3092_v61 = vadd.f32 %v3076_v22, %v12415_v32  ;;  %v12481_v50 = vadd.f32 %v7923_v4, %v3096_v38 }
 0xfd1   :  { %v9306_v40 = vpop.f32.mrf.mxu1 }
 0xfd2   :  { %v3097_v25 = vadd.f32 %v10563_v24, %v3092_v61  ;;  %3116 = vadd.xlane.f32.xlu0 %v12481_v50 }
 0xfd3   :  { %v3081_v56 = vpop.f32.mrf.mxu1 }
 0xfd4   :  { %v3093_v37 = vadd.f32 %v3081_v56, %v12428_v55  ;;  %v12485_v60 = vadd.f32 %v7923_v4, %v3097_v25 }
 0xfd5   :  { %v9309_v51 = vpop.f32.mrf.mxu1 }
 0xfd6   :  { %v3098_v52 = vadd.f32 %v10564_v59, %v3093_v37  ;;  %3118 = vadd.xlane.f32.xlu0 %v12485_v60 }
 0xfd7   :  { %v3086_v3 = vpop.f32.mrf.mxu1 }
 0xfd8   :  { %v3094_v32 = vadd.f32 %v3086_v3, %v12432_v62  ;;  %v12489_v19 = vadd.f32 %v7923_v4, %v3098_v52  ;;  %v3205_v62 = vld [vmem:[#allocation18 + $0x60] sm:$0xff]  ;;  %v7924_v52 = vld [vmem:[#allocation15] ss:$0 sm:$0xff] }
 0xfd9   :  { %v9312_v63 = vpop.f32.mrf.mxu1  ;;  %9320 = vmatpush3.msra.mxu0 %v3205_v62 }
 0xfda   :  { %v3099_v27 = vadd.f32 %v10565_v26, %v3094_v32  ;;  %3120 = vadd.xlane.f32.xlu0 %v12489_v19  ;;  %9321 = vmatprep.subr.mxu0 %v11258_v15  ;;  %v7925_v63 = vld [vmem:[#allocation17] ss:$0 sm:$0xff] }
 0xfdb   :  { %9322 = vmatpush3.msra.mxu0 %v3204_v57  ;;  %v3450_v57 = vld [vmem:[#allocation21 + $0x48] sm:$0xff] }
 0xfdc   :  { %v12492_v30 = vadd.f32 %v7923_v4, %v3099_v27  ;;  %9323 = vmatprep.subr.mxu0 %v11258_v15  ;;  %v3195_v4 = vld [vmem:[#allocation18 + $0x10] sm:$0xff] }
 0xfdd   :  { %9324 = vmatpush3.msra.mxu0 %v3203_v54  ;;  %v3448_v54 = vld [vmem:[#allocation21 + $0x38] sm:$0xff] }
 0xfde   :  { %v3122_v55 = vsel %vm1010_vm1, %v12492_v30, 0.0  ;;  %9325 = vmatprep.subr.mxu0 %v11258_v15 }
 0xfdf   :  { %3123 = vadd.xlane.f32.xlu1 %v3122_v55  ;;  %9326 = vmatpush3.msra.mxu0 %v3202_v44  ;;  %v3446_v44 = vld [vmem:[#allocation21 + $0x28] sm:$0xff] }
 0xfe0   :  { %9327 = vmatprep.subr.mxu0 %v11258_v15 }
 0xfe1   :  { %9328 = vmatpush3.msra.mxu0 %v3201_v2  ;;  %v3444_v2 = vld [vmem:[#allocation21 + $0x18] sm:$0xff] }
 0xfe2   :  { %9329 = vmatprep.subr.mxu0 %v11258_v15 }
 0xfe3   :  { %9330 = vmatpush3.msra.mxu0 %v3200_v5  ;;  %v3443_v5 = vld [vmem:[#allocation21 + $0x10] sm:$0xff] }
 0xfe4   :  { %9331 = vmatprep.subr.mxu0 %v11258_v15 }
 0xfe5   :  { %9332 = vmatpush3.msra.mxu0 %v3199_v0  ;;  %v3442_v0 = vld [vmem:[#allocation21 + $0x8] sm:$0xff] }
 0xfe6   :  { %9333 = vmatprep.subr.mxu0 %v11258_v15 }
 0xfe7   :  { %9334 = vmatpush3.msra.mxu0 %v3198_v45  ;;  %v3441_v45 = vld [vmem:[#allocation21] sm:$0xff] }
 0xfe8   :  { %9335 = vmatprep.subr.mxu0 %v11258_v15 }
 0xfe9   :  { %9336 = vmatpush3.msra.mxu0 %v3197_v58  ;;  %v7926_v58 = vld [vmem:[#allocation20] ss:$0 sm:$0xff] }
 0xfea   :  { %9337 = vmatprep.subr.mxu0 %v11258_v15 }
 0xfeb   :  { %9338 = vmatpush3.msra.mxu0 %v3196_v11 }
 0xfec   :  { %9339 = vmatprep.subr.mxu0 %v11258_v15 }
 0xfed   :  { %9340 = vmatpush3.msra.mxu0 %v3195_v4 }
 0xfee   :  { %9341 = vmatprep.subr.mxu0 %v11258_v15 }
 0xfef   :  { %9342 = vmatpush3.msra.mxu0 %v3194_v14 }
 0xff0   :  { %9343 = vmatprep.subr.mxu0 %v11258_v15 }
 0xff1   :  { %9344 = vmatpush3.msra.mxu0 %v3193_v48 }
 0xff2   :  { %9407 = vmatprep.subr.mxu0 %v11258_v15 }
0x1057   :  { %v3115_v6 = vpop.xlane.xlu1 %3114 }
0x1058   :  { %v3125_v10 = vmul.f32 0.0078125, %v3115_v6 }
0x105a   :  { %v12501_v53 = vsub.f32 %v12477_v20, %v3125_v10 }
0x105b   :  { %v3117_v8 = vpop.xlane.xlu0 %3116 }
0x105c   :  { %v3126_v29 = vmul.f32 0.0078125, %v3117_v8  ;;  %v3135_v33 = vmul.f32 %v12501_v53, %v12501_v53 }
0x105e   :  { %v12506_v35 = vsub.f32 %v12481_v50, %v3126_v29  ;;  %3140 = vadd.xlane.f32.xlu0 %v3135_v33 }
0x105f   :  { %v3119_v9 = vpop.xlane.xlu0 %3118 }
0x1060   :  { %v3127_v18 = vmul.f32 0.0078125, %v3119_v9  ;;  %v3136_v34 = vmul.f32 %v12506_v35, %v12506_v35 }
0x1062   :  { %v12511_v23 = vsub.f32 %v12485_v60, %v3127_v18  ;;  %3142 = vadd.xlane.f32.xlu1 %v3136_v34 }
0x1063   :  { %v3121_v41 = vpop.xlane.xlu0 %3120 }
0x1064   :  { %v3128_v42 = vmul.f32 0.0078125, %v3121_v41  ;;  %v3137_v46 = vmul.f32 %v12511_v23, %v12511_v23 }
0x1066   :  { %v12516_v43 = vsub.f32 %v12489_v19, %v3128_v42  ;;  %3144 = vadd.xlane.f32.xlu0 %v3137_v46  ;;  %v3456_v42 = vld [vmem:[#allocation21 + $0x78] sm:$0xff]  ;;  %v3455_v46 = vld [vmem:[#allocation21 + $0x70] sm:$0xff] }
0x1067   :  { %9361 = vmatpush3.msra.mxu1 %v3456_v42 }
0x1068   :  { %v3124_v47 = vpop.xlane.xlu1 %3123  ;;  %v3138_v7 = vmul.f32 %v12516_v43, %v12516_v43  ;;  %9362 = vmatprep.subr.mxu1 %v11258_v15 }
0x1069   :  { %v3129_v13 = vmul.f32 0.0078125, %v3124_v47  ;;  %9363 = vmatpush3.msra.mxu1 %v3455_v46  ;;  %v3453_v47 = vld [vmem:[#allocation21 + $0x60] sm:$0xff] }
0x106a   :  { %3146 = vadd.xlane.f32.xlu1 %v3138_v7  ;;  %9364 = vmatprep.subr.mxu1 %v11258_v15  ;;  %v3452_v7 = vld [vmem:[#allocation21 + $0x58] sm:$0xff] }
0x106b   :  { %v12521_v16 = vsub.f32 %v12492_v30, %v3129_v13  ;;  %v3451_v13 = vld [vmem:[#allocation21 + $0x50] sm:$0xff] }
0x106d   :  { %v3139_v36 = vmul.f32 %v12521_v16, %v12521_v16 }
0x106f   :  { %v3148_v1 = vsel %vm1010_vm1, %v3139_v36, 0.0  ;;  %v3447_v36 = vld [vmem:[#allocation21 + $0x30] sm:$0xff] }
0x1070   :  { %3149 = vadd.xlane.f32.xlu0 %v3148_v1  ;;  %v3445_v1 = vld [vmem:[#allocation21 + $0x20] sm:$0xff] }
0x10e7   :  { %v3141_v28 = vpop.xlane.xlu0 %3140 }
0x10e8   :  { %v3151_v17 = vmul.f32 0.0078125, %v3141_v28 }
0x10ea   :  { %v3156_v21 = vadd.f32 1e-05, %v3151_v17 }
0x10eb   :  { %v3143_v12 = vpop.xlane.xlu1 %3142 }
0x10ec   :  { %10376 = vrsqrt.f32 %v3156_v21  ;;  %v3152_v38 = vmul.f32 0.0078125, %v3143_v12  ;;  %v11263_v21 = vmov -1.0  }
0x10ee   :  { %v3157_v22 = vadd.f32 1e-05, %v3152_v38 }
0x10ef   :  { %v3145_v61 = vpop.xlane.xlu0 %3144 }
0x10f0   :  { %10378 = vrsqrt.f32 %v3157_v22  ;;  %v3153_v40 = vmul.f32 0.0078125, %v3145_v61 }
0x10f2   :  { %v3158_v24 = vadd.f32 1e-05, %v3153_v40 }
0x10f3   :  { %v3147_v25 = vpop.xlane.xlu1 %3146 }
0x10f4   :  { %10380 = vrsqrt.f32 %v3158_v24  ;;  %v3154_v56 = vmul.f32 0.0078125, %v3147_v25 }
0x10f6   :  { %v3159_v37 = vadd.f32 1e-05, %v3154_v56 }
0x10f8   :  { %10382 = vrsqrt.f32 %v3159_v37 }
0x10f9   :  { %v10377_v51 = vpop.eup %10376  ;;  %v3150_v59 = vpop.xlane.xlu0 %3149 }
0x10fa   :  { %v3155_v3 = vmul.f32 0.0078125, %v3150_v59  ;;  %v3166_v32 = vmul.f32 %v10377_v51, %v12501_v53 }
0x10fc   :  { %v3160_v26 = vadd.f32 1e-05, %v3155_v3  ;;  %v3177_v27 = vmul.f32 %v7924_v52, %v3166_v32 }
0x10fd   :  { %v10379_v55 = vpop.eup %10378 }
0x10fe   :  { %10384 = vrsqrt.f32 %v3160_v26  ;;  %v3188_v31 = vadd.f32 %v7925_v63, %v3177_v27  ;;  %v3167_v49 = vmul.f32 %v10379_v55, %v12506_v35 }
0x1100   :  { %9346 = vmatmul.mubr.f32.vlgmr.msra.gmra.mxu0 %v3188_v31  ;;  %v3178_v39 = vmul.f32 %v7924_v52, %v3167_v49 }
0x1101   :  { %v10381_v62 = vpop.eup %10380  ;;  %9348 = vmatprep.mubr.msk.f32.mxu0 %vm11259_vm2, %v11258_v15 }
0x1102   :  { %v3189_v6 = vadd.f32 %v7925_v63, %v3178_v39  ;;  %v3168_v10 = vmul.f32 %v10381_v62, %v12511_v23 }
0x1104   :  { %9349 = vmatmul.mubr.f32.gmra.mxu0 %v3189_v6  ;;  %v3179_v8 = vmul.f32 %v7924_v52, %v3168_v10 }
0x1105   :  { %v10383_v53 = vpop.eup %10382  ;;  %9351 = vmatprep.mubr.msk.f32.mxu0 %vm11259_vm2, %v11258_v15 }
0x1106   :  { %v3190_v29 = vadd.f32 %v7925_v63, %v3179_v8  ;;  %v3169_v33 = vmul.f32 %v10383_v53, %v12516_v43  ;;  %v3454_v43 = vld [vmem:[#allocation21 + $0x68] sm:$0xff] }
0x1107   :  { %9365 = vmatpush3.msra.mxu1 %v3454_v43 }
0x1108   :  { %9352 = vmatmul.mubr.f32.gmra.mxu0 %v3190_v29  ;;  %v3180_v35 = vmul.f32 %v7924_v52, %v3169_v33  ;;  %9366 = vmatprep.subr.mxu1 %v11258_v15 }
0x1109   :  { %9354 = vmatprep.mubr.msk.f32.mxu0 %vm11259_vm2, %v11258_v15  ;;  %9367 = vmatpush3.msra.mxu1 %v3453_v47 }
0x110a   :  { %v3191_v9 = vadd.f32 %v7925_v63, %v3180_v35  ;;  %9368 = vmatprep.subr.mxu1 %v11258_v15 }
0x110b   :  { %v10385_v18 = vpop.eup %10384  ;;  %9369 = vmatpush3.msra.mxu1 %v3452_v7 }
0x110c   :  { %9355 = vmatmul.mubr.f32.gmra.mxu0 %v3191_v9  ;;  %v3170_v34 = vmul.f32 %v10385_v18, %v12521_v16  ;;  %9370 = vmatprep.subr.mxu1 %v11258_v15  ;;  %v3449_v16 = vld [vmem:[#allocation21 + $0x40] sm:$0xff] }
0x110d   :  { %9357 = vmatprep.mubr.msk.f32.mxu0 %vm11259_vm2, %v11258_v15  ;;  %9371 = vmatpush3.msra.mxu1 %v3451_v13 }
0x110e   :  { %v3181_v23 = vmul.f32 %v7924_v52, %v3170_v34  ;;  %9372 = vmatprep.subr.mxu1 %v11258_v15 }
0x110f   :  { %9373 = vmatpush3.msra.mxu1 %v3450_v57 }
0x1110   :  { %v3192_v41 = vadd.f32 %v7925_v63, %v3181_v23  ;;  %9374 = vmatprep.subr.mxu1 %v11258_v15 }
0x1111   :  { %9375 = vmatpush3.msra.mxu1 %v3449_v16 }
0x1112   :  { %9358 = vmatmul.mubr.f32.gmra.mxu0 %v3192_v41  ;;  %9376 = vmatprep.subr.mxu1 %v11258_v15 }
0x1113   :  { %9439 = vmatprep.mubr.msk.f32.mxu0 %vm11259_vm2, %v11258_v15  ;;  %9377 = vmatpush3.msra.mxu1 %v3448_v54 }
0x1114   :  { %9378 = vmatprep.subr.mxu1 %v11258_v15 }
0x1115   :  { %9379 = vmatpush3.msra.mxu1 %v3447_v36 }
0x1116   :  { %9380 = vmatprep.subr.mxu1 %v11258_v15 }
0x1117   :  { %9381 = vmatpush3.msra.mxu1 %v3446_v44 }
0x1118   :  { %9382 = vmatprep.subr.mxu1 %v11258_v15 }
0x1119   :  { %9383 = vmatpush3.msra.mxu1 %v3445_v1 }
0x111a   :  { %9384 = vmatprep.subr.mxu1 %v11258_v15 }
0x111b   :  { %9385 = vmatpush3.msra.mxu1 %v3444_v2 }
0x111c   :  { %9386 = vmatprep.subr.mxu1 %v11258_v15 }
0x111d   :  { %9387 = vmatpush3.msra.mxu1 %v3443_v5 }
0x111e   :  { %9388 = vmatprep.subr.mxu1 %v11258_v15 }
0x111f   :  { %9389 = vmatpush3.msra.mxu1 %v3442_v0 }
0x1120   :  { %9390 = vmatprep.subr.mxu1 %v11258_v15 }
0x1121   :  { %9391 = vmatpush3.msra.mxu1 %v3441_v45 }
0x1122   :  { %9454 = vmatprep.subr.mxu1 %v11258_v15 }
0x11c0   :  { %v3282_v11 = vpop.f32.mrf.mxu0 }
0x11c1   :  { %v12569_v4 = vadd.f32 %v7926_v58, %v3282_v11 }
0x11c2   :  { %v9347_v14 = vpop.f32.mrf.mxu0 }
0x11c3   :  { %v3311_v48 = vmul.f32 0.70710677, %v12569_v4 }
0x11c4   :  { %v3287_v28 = vpop.f32.mrf.mxu0 }
0x11c5   :  { %vm3316_vm6 = vcmp.ge.f32.partialorder %v3311_v48, 0.0  ;;  %v12572_v17 = vadd.f32 %v7926_v58, %v3287_v28 }
0x11c6   :  { %v12575_v12 = vsel %vm3316_vm6, 1.0, %v11263_v21  ;;  %v9350_v38 = vpop.f32.mrf.mxu0 }
0x11c7   :  { %v3326_v22 = vmul.f32 %v12575_v12, %v3311_v48  ;;  %v3312_v61 = vmul.f32 0.70710677, %v12572_v17 }
0x11c8   :  { %v3292_v40 = vpop.f32.mrf.mxu0 }
0x11c9   :  { %v3331_v24 = vmul.f32 0.3275911, %v3326_v22  ;;  %vm3317_vm7 = vcmp.ge.f32.partialorder %v3312_v61, 0.0  ;;  %v12579_v25 = vadd.f32 %v7926_v58, %v3292_v40  ;;  %v3396_v39 = vsub.f32 0.0, %v3326_v22 }
0x11ca   :  { %v12582_v56 = vsel %vm3317_vm7, 1.0, %v11263_v21  ;;  %v9353_v37 = vpop.f32.mrf.mxu0 }
0x11cb   :  { %v3336_v51 = vadd.f32 1.0, %v3331_v24  ;;  %v3327_v59 = vmul.f32 %v12582_v56, %v3312_v61  ;;  %v3313_v52 = vmul.f32 0.70710677, %v12579_v25  ;;  %v3401_v9 = vmul.f32 %v3396_v39, %v3326_v22 }
0x11cc   :  { %v3297_v3 = vpop.f32.mrf.mxu0 }
0x11cd   :  { %10386 = vrcp.f32 %v3336_v51  ;;  %v3332_v32 = vmul.f32 0.3275911, %v3327_v59  ;;  %vm3318_vm8 = vcmp.ge.f32.partialorder %v3313_v52, 0.0  ;;  %v12586_v63 = vadd.f32 %v7926_v58, %v3297_v3 }
0x11ce   :  { %v9356_v26 = vpop.f32.mrf.mxu0  ;;  %v12589_v55 = vsel %vm3318_vm8, 1.0, %v11263_v21  ;;  %v3397_v34 = vsub.f32 0.0, %v3327_v59  ;;  %v3406_v43 = vmul.f32 1.442695, %v3401_v9 }
0x11cf   :  { %v3337_v27 = vadd.f32 1.0, %v3332_v32  ;;  %v3328_v31 = vmul.f32 %v12589_v55, %v3313_v52  ;;  %v3314_v49 = vmul.f32 0.70710677, %v12586_v63 }
0x11d0   :  { %v3402_v7 = vmul.f32 %v3397_v34, %v3327_v59 }
0x11d1   :  { %10388 = vrcp.f32 %v3337_v27  ;;  %v3333_v62 = vmul.f32 0.3275911, %v3328_v31  ;;  %vm3319_vm9 = vcmp.ge.f32.partialorder %v3314_v49, 0.0  ;;  %v3398_v57 = vsub.f32 0.0, %v3328_v31 }
0x11d2   :  { %v3302_v6 = vpop.f32.mrf.mxu0  ;;  %v12594_v10 = vsel %vm3319_vm9, 1.0, %v11263_v21  ;;  %v3408_v1 = vmul.f32 1.442695, %v3402_v7 }
0x11d3   :  { %v12596_v8 = vadd.f32 %v7926_v58, %v3302_v6  ;;  %v3338_v53 = vadd.f32 1.0, %v3333_v62  ;;  %v3329_v29 = vmul.f32 %v12594_v10, %v3314_v49  ;;  %v3403_v5 = vmul.f32 %v3398_v57, %v3328_v31 }
0x11d4   :  { %v9359_v33 = vpop.f32.mrf.mxu0 }
0x11d5   :  { %v3315_v35 = vmul.f32 0.70710677, %v12596_v8  ;;  %10390 = vrcp.f32 %v3338_v53  ;;  %v3334_v18 = vmul.f32 0.3275911, %v3329_v29  ;;  %v3399_v0 = vsub.f32 0.0, %v3329_v29 }
0x11d6   :  { %v3410_v28 = vmul.f32 1.442695, %v3403_v5 }
0x11d7   :  { %vm3320_vm10 = vcmp.ge.f32.partialorder %v3315_v35, 0.0  ;;  %v3339_v23 = vadd.f32 1.0, %v3334_v18  ;;  %v3404_v38 = vmul.f32 %v3399_v0, %v3329_v29 }
0x11d8   :  { %v12601_v41 = vsel %vm3320_vm10, 1.0, %v11263_v21 }
0x11d9   :  { %v3330_v42 = vmul.f32 %v12601_v41, %v3315_v35  ;;  %10392 = vrcp.f32 %v3339_v23  ;;  %v3412_v3 = vmul.f32 1.442695, %v3404_v38 }
0x11da   :  { %v10387_v46 = vpop.eup %10386  ;;  %10394 = vpow2.f32 %v3406_v43 }
0x11db   :  { %v3351_v47 = vmul.f32 1.0614054, %v10387_v46  ;;  %v3335_v13 = vmul.f32 0.3275911, %v3330_v42  ;;  %v3400_v40 = vsub.f32 0.0, %v3330_v42 }
0x11dd   :  { %v3356_v16 = vadd.f32 -1.4531521, %v3351_v47  ;;  %v3340_v54 = vadd.f32 1.0, %v3335_v13  ;;  %v3405_v31 = vmul.f32 %v3400_v40, %v3330_v42 }
0x11de   :  { %v10389_v36 = vpop.eup %10388 }
0x11df   :  { %v3361_v44 = vmul.f32 %v10387_v46, %v3356_v16  ;;  %10396 = vrcp.f32 %v3340_v54  ;;  %v3352_v2 = vmul.f32 1.0614054, %v10389_v36  ;;  %v3414_v34 = vmul.f32 1.442695, %v3405_v31 }
0x11e0   :  { %10398 = vpow2.f32 %v3408_v1 }
0x11e1   :  { %v3366_v45 = vadd.f32 1.4214138, %v3361_v44  ;;  %v3357_v58 = vadd.f32 -1.4531521, %v3352_v2  ;;  %10400 = vpow2.f32 %v3410_v28 }
0x11e2   :  { %v10391_v11 = vpop.eup %10390  ;;  %10402 = vpow2.f32 %v3412_v3 }
0x11e3   :  { %v3371_v14 = vmul.f32 %v10387_v46, %v3366_v45  ;;  %v3362_v48 = vmul.f32 %v10389_v36, %v3357_v58  ;;  %v3353_v22 = vmul.f32 1.0614054, %v10391_v11  ;;  %10404 = vpow2.f32 %v3414_v34 }
0x11e4   :  { %v3306_v45 = vmul.f32 0.5, %v12569_v4  ;;  %v3310_v34 = vmul.f32 0.5, %v12596_v8 }
0x11e5   :  { %v3376_v61 = vadd.f32 -0.28449672, %v3371_v14  ;;  %v3367_v24 = vadd.f32 1.4214138, %v3362_v48  ;;  %v3358_v37 = vadd.f32 -1.4531521, %v3353_v22 }
0x11e6   :  { %v10393_v51 = vpop.eup %10392 }
0x11e7   :  { %v3381_v59 = vmul.f32 %v10387_v46, %v3376_v61  ;;  %v3372_v52 = vmul.f32 %v10389_v36, %v3367_v24  ;;  %v3363_v32 = vmul.f32 %v10391_v11, %v3358_v37  ;;  %v3354_v26 = vmul.f32 1.0614054, %v10393_v51  ;;  %v10395_v6 = vpop.eup %10394 }
0x11e9   :  { %v3386_v27 = vadd.f32 0.2548296, %v3381_v59  ;;  %v3377_v49 = vadd.f32 -0.28449672, %v3372_v52  ;;  %v3368_v39 = vadd.f32 1.4214138, %v3363_v32 }
0x11ea   :  { %v3359_v62 = vadd.f32 -1.4531521, %v3354_v26 }
0x11eb   :  { %v3391_v53 = vmul.f32 %v10387_v46, %v3386_v27  ;;  %v3382_v29 = vmul.f32 %v10389_v36, %v3377_v49  ;;  %v3373_v35 = vmul.f32 %v10391_v11, %v3368_v39  ;;  %v3308_v49 = vmul.f32 0.5, %v12579_v25 }
0x11ec   :  { %v10397_v33 = vpop.eup %10396  ;;  %v3364_v9 = vmul.f32 %v10393_v51, %v3359_v62 }
0x11ed   :  { %v3416_v18 = vmul.f32 %v10395_v6, %v3391_v53  ;;  %v3387_v23 = vadd.f32 0.2548296, %v3382_v29  ;;  %v3355_v43 = vmul.f32 1.0614054, %v10397_v33  ;;  %v3378_v47 = vadd.f32 -0.28449672, %v3373_v35  ;;  %v10399_v42 = vpop.eup %10398 }
0x11ee   :  { %v3369_v7 = vadd.f32 1.4214138, %v3364_v9  ;;  %v10401_v22 = vpop.eup %10400  ;;  %v3309_v35 = vmul.f32 0.5, %v12586_v63  ;;  %v7927_v63 = vld [vmem:[#allocation23] ss:$0 sm:$0xff] }
0x11ef   :  { %v3421_v13 = vsub.f32 1.0, %v3416_v18  ;;  %v3392_v57 = vmul.f32 %v10389_v36, %v3387_v23  ;;  %v3360_v16 = vadd.f32 -1.4531521, %v3355_v43  ;;  %v3383_v54 = vmul.f32 %v10391_v11, %v3378_v47  ;;  %v10403_v32 = vpop.eup %10402 }
0x11f0   :  { %v3374_v44 = vmul.f32 %v10393_v51, %v3369_v7  ;;  %v10405_v6 = vpop.eup %10404 }
0x11f1   :  { %v3426_v1 = vmul.f32 %v3421_v13, %v12575_v12  ;;  %v3417_v46 = vmul.f32 %v10399_v42, %v3392_v57  ;;  %v3365_v2 = vmul.f32 %v10397_v33, %v3360_v16  ;;  %v3388_v5 = vadd.f32 0.2548296, %v3383_v54 }
0x11f2   :  { %v3379_v0 = vadd.f32 -0.28449672, %v3374_v44  ;;  %v3307_v12 = vmul.f32 0.5, %v12572_v17 }
0x11f3   :  { %v3431_v58 = vadd.f32 1.0, %v3426_v1  ;;  %v3422_v14 = vsub.f32 1.0, %v3417_v46  ;;  %v3370_v48 = vadd.f32 1.4214138, %v3365_v2  ;;  %v3393_v28 = vmul.f32 %v10391_v11, %v3388_v5 }
0x11f4   :  { %v3384_v38 = vmul.f32 %v10393_v51, %v3379_v0 }
0x11f5   :  { %v3436_v36 = vmul.f32 %v3431_v58, %v3306_v45  ;;  %v3427_v61 = vmul.f32 %v3422_v14, %v12582_v56  ;;  %v3375_v40 = vmul.f32 %v10397_v33, %v3370_v48  ;;  %v3418_v24 = vmul.f32 %v10401_v22, %v3393_v28  ;;  %v7947_v58 = vld [vmem:[%s13730_s21 + $0xf8] sm:$0xff]  ;;  %v3765_v14 = vld [vmem:[#allocation11 + $0xf8] sm:$0xff]  ;;  %v7946_v48 = vld [vmem:[%s13730_s21 + $0xf0] sm:$0xff] }
0x11f6   :  { %v3389_v37 = vadd.f32 0.2548296, %v3384_v38  ;;  %9408 = vmatpush3.msra.mxu0 %v7947_v58  ;;  %v7945_v28 = vld [vmem:[%s13730_s21 + $0xe8] sm:$0xff]  ;;  %v3763_v38 = vld [vmem:[#allocation11 + $0xe8] sm:$0xff] }
0x11f7   :  { %9393 = vmatmul.mubr.f32.vlgmr.msra.gmra.mxu1 %v3436_v36  ;;  %v3432_v59 = vadd.f32 1.0, %v3427_v61  ;;  %v3380_v52 = vadd.f32 -0.28449672, %v3375_v40  ;;  %v3423_v4 = vsub.f32 1.0, %v3418_v24  ;;  %9409 = vmatprep.subr.mxu0 %v11258_v15  ;;  %v3762_v22 = vld [vmem:[#allocation11 + $0xe0] sm:$0xff] }
0x11f8   :  { %9395 = vmatprep.mubr.msk.f32.mxu1 %vm11259_vm2, %v11258_v15  ;;  %v3394_v3 = vmul.f32 %v10393_v51, %v3389_v37  ;;  %9455 = vmatpush3.msra.mxu1 %v3765_v14 }
0x11f9   :  { %v3437_v11 = vmul.f32 %v3432_v59, %v3307_v12  ;;  %v3385_v26 = vmul.f32 %v10397_v33, %v3380_v52  ;;  %v3428_v27 = vmul.f32 %v3423_v4, %v12589_v55  ;;  %9456 = vmatprep.subr.mxu1 %v11258_v15  ;;  %9410 = vmatpush3.msra.mxu0 %v7946_v48 }
0x11fa   :  { %v3419_v31 = vmul.f32 %v10403_v32, %v3394_v3  ;;  %9411 = vmatprep.subr.mxu0 %v11258_v15 }
0x11fb   :  { %9396 = vmatmul.mubr.f32.gmra.mxu1 %v3437_v11  ;;  %v3390_v56 = vadd.f32 0.2548296, %v3385_v26  ;;  %v3433_v17 = vadd.f32 1.0, %v3428_v27  ;;  %9412 = vmatpush3.msra.mxu0 %v7945_v28 }
0x11fc   :  { %9398 = vmatprep.mubr.msk.f32.mxu1 %vm11259_vm2, %v11258_v15  ;;  %v3424_v39 = vsub.f32 1.0, %v3419_v31  ;;  %9413 = vmatprep.subr.mxu0 %v11258_v15 }
0x11fd   :  { %v3395_v62 = vmul.f32 %v10397_v33, %v3390_v56  ;;  %v3438_v53 = vmul.f32 %v3433_v17, %v3308_v49  ;;  %v7943_v49 = vld [vmem:[%s13730_s21 + $0xd8] sm:$0xff] }
0x11fe   :  { %v3429_v51 = vmul.f32 %v3424_v39, %v12594_v10  ;;  %v3761_v39 = vld [vmem:[#allocation11 + $0xd8] sm:$0xff] }
0x11ff   :  { %v3420_v29 = vmul.f32 %v10405_v6, %v3395_v62  ;;  %9399 = vmatmul.mubr.f32.gmra.mxu1 %v3438_v53  ;;  %v7942_v6 = vld [vmem:[%s13730_s21 + $0xd0] sm:$0xff]  ;;  %v3760_v53 = vld [vmem:[#allocation11 + $0xd0] sm:$0xff] }
0x1200   :  { %v3434_v55 = vadd.f32 1.0, %v3429_v51  ;;  %9401 = vmatprep.mubr.msk.f32.mxu1 %vm11259_vm2, %v11258_v15 }
0x1201   :  { %v3425_v9 = vsub.f32 1.0, %v3420_v29  ;;  %v7941_v29 = vld [vmem:[%s13730_s21 + $0xc8] sm:$0xff] }
0x1202   :  { %v3439_v25 = vmul.f32 %v3434_v55, %v3309_v35  ;;  %v3759_v35 = vld [vmem:[#allocation11 + $0xc8] sm:$0xff] }
0x1203   :  { %v3430_v18 = vmul.f32 %v3425_v9, %v12601_v41  ;;  %v7940_v9 = vld [vmem:[%s13730_s21 + $0xc0] sm:$0xff] }
0x1204   :  { %9402 = vmatmul.mubr.f32.gmra.mxu1 %v3439_v25  ;;  %v3758_v25 = vld [vmem:[#allocation11 + $0xc0] sm:$0xff] }
0x1205   :  { %9404 = vmatprep.mubr.msk.f32.mxu1 %vm11259_vm2, %v11258_v15  ;;  %v3435_v33 = vadd.f32 1.0, %v3430_v18 }
0x1207   :  { %v3440_v10 = vmul.f32 %v3435_v33, %v3310_v34  ;;  %v7939_v34 = vld [vmem:[%s13730_s21 + $0xb8] sm:$0xff]  ;;  %v3757_v33 = vld [vmem:[#allocation11 + $0xb8] sm:$0xff] }
0x1209   :  { %9405 = vmatmul.mubr.f32.gmra.mxu1 %v3440_v10  ;;  %v7938_v10 = vld [vmem:[%s13730_s21 + $0xb0] sm:$0xff] }
0x120a   :  { %9486 = vmatprep.mubr.msk.f32.mxu1 %vm11259_vm2, %v11258_v15 }
0x12b7   :  { %v3530_v23 = vpop.f32.mrf.mxu1 }
0x12b8   :  { %v3531_v43 = vadd.f32 %v7927_v63, %v3530_v23  ;;  %v7937_v23 = vld [vmem:[%s13730_s21 + $0xa8] sm:$0xff] }
0x12b9   :  { %v9394_v47 = vpop.f32.mrf.mxu1 }
0x12ba   :  { %v12625_v7 = vadd.f32 %v3531_v43, %v12477_v20  ;;  %v3755_v43 = vld [vmem:[#allocation11 + $0xa8] sm:$0xff]  ;;  %v7936_v47 = vld [vmem:[%s13730_s21 + $0xa0] sm:$0xff] }
0x12bb   :  { %v3535_v41 = vpop.f32.mrf.mxu1 }
0x12bc   :  { %v3536_v13 = vadd.f32 %v7927_v63, %v3535_v41  ;;  %3563 = vadd.xlane.f32.xlu1 %v12625_v7  ;;  %v3754_v41 = vld [vmem:[#allocation11 + $0xa0] sm:$0xff] }
0x12bd   :  { %v9397_v8 = vpop.f32.mrf.mxu1 }
0x12be   :  { %v12629_v57 = vadd.f32 %v3536_v13, %v12481_v50  ;;  %v7935_v13 = vld [vmem:[%s13730_s21 + $0x98] sm:$0xff]  ;;  %v3753_v8 = vld [vmem:[#allocation11 + $0x98] sm:$0xff] }
0x12bf   :  { %v3540_v16 = vpop.f32.mrf.mxu1 }
0x12c0   :  { %3565 = vadd.xlane.f32.xlu0 %v12629_v57  ;;  %v3541_v42 = vadd.f32 %v7927_v63, %v3540_v16  ;;  %v7934_v16 = vld [vmem:[%s13730_s21 + $0x90] sm:$0xff] }
0x12c1   :  { %v9400_v54 = vpop.f32.mrf.mxu1 }
0x12c2   :  { %v12633_v44 = vadd.f32 %v3541_v42, %v12485_v60  ;;  %v3752_v42 = vld [vmem:[#allocation11 + $0x90] sm:$0xff]  ;;  %v7933_v54 = vld [vmem:[%s13730_s21 + $0x88] sm:$0xff] }
0x12c4   :  { %v3545_v20 = vpop.f32.mrf.mxu1  ;;  %3567 = vadd.xlane.f32.xlu1 %v12633_v44 }
0x12c5   :  { %v3546_v1 = vadd.f32 %v7927_v63, %v3545_v20  ;;  %v3751_v20 = vld [vmem:[#allocation11 + $0x88] sm:$0xff] }
0x12c6   :  { %v9403_v46 = vpop.f32.mrf.mxu1 }
0x12c7   :  { %v12637_v2 = vadd.f32 %v3546_v1, %v12489_v19  ;;  %v3764_v19 = vld [vmem:[#allocation11 + $0xf0] sm:$0xff]  ;;  %v3750_v46 = vld [vmem:[#allocation11 + $0x80] sm:$0xff] }
0x12c8   :  { %9457 = vmatpush3.msra.mxu1 %v3764_v19  ;;  %v7932_v1 = vld [vmem:[%s13730_s21 + $0x80] sm:$0xff] }
0x12c9   :  { %3569 = vadd.xlane.f32.xlu0 %v12637_v2  ;;  %v3550_v50 = vpop.f32.mrf.mxu1  ;;  %9458 = vmatprep.subr.mxu1 %v11258_v15 }
0x12ca   :  { %v3551_v5 = vadd.f32 %v7927_v63, %v3550_v50  ;;  %9459 = vmatpush3.msra.mxu1 %v3763_v38  ;;  %v3756_v63 = vld [vmem:[#allocation11 + $0xb0] sm:$0xff] }
0x12cb   :  { %v9406_v0 = vpop.f32.mrf.mxu1  ;;  %9460 = vmatprep.subr.mxu1 %v11258_v15 }
0x12cc   :  { %v12641_v45 = vadd.f32 %v3551_v5, %v12492_v30  ;;  %v7944_v30 = vld [vmem:[%s13730_s21 + $0xe0] sm:$0xff]  ;;  %9461 = vmatpush3.msra.mxu1 %v3762_v22 }
0x12cd   :  { %9414 = vmatpush3.msra.mxu0 %v7944_v30  ;;  %9462 = vmatprep.subr.mxu1 %v11258_v15 }
0x12ce   :  { %v3571_v60 = vsel %vm1010_vm1, %v12641_v45, 0.0  ;;  %9415 = vmatprep.subr.mxu0 %v11258_v15  ;;  %9463 = vmatpush3.msra.mxu1 %v3761_v39  ;;  %v3870_v39 = vld [vmem:[#allocation12 + $0xe8] sm:$0xff] }
0x12cf   :  { %3572 = vadd.xlane.f32.xlu1 %v3571_v60  ;;  %9416 = vmatpush3.msra.mxu0 %v7943_v49 }
0x12d0   :  { %9417 = vmatprep.subr.mxu0 %v11258_v15  ;;  %9464 = vmatprep.subr.mxu1 %v11258_v15 }
0x12d1   :  { %9418 = vmatpush3.msra.mxu0 %v7942_v6  ;;  %9465 = vmatpush3.msra.mxu1 %v3760_v53  ;;  %v3869_v6 = vld [vmem:[#allocation12 + $0xe0] sm:$0xff] }
0x12d2   :  { %9419 = vmatprep.subr.mxu0 %v11258_v15  ;;  %9466 = vmatprep.subr.mxu1 %v11258_v15 }
0x12d3   :  { %9420 = vmatpush3.msra.mxu0 %v7941_v29  ;;  %9467 = vmatpush3.msra.mxu1 %v3759_v35  ;;  %v3868_v35 = vld [vmem:[#allocation12 + $0xd8] sm:$0xff] }
0x12d4   :  { %9421 = vmatprep.subr.mxu0 %v11258_v15  ;;  %9468 = vmatprep.subr.mxu1 %v11258_v15 }
0x12d5   :  { %9422 = vmatpush3.msra.mxu0 %v7940_v9  ;;  %9469 = vmatpush3.msra.mxu1 %v3758_v25  ;;  %v3867_v9 = vld [vmem:[#allocation12 + $0xd0] sm:$0xff] }
0x12d6   :  { %9423 = vmatprep.subr.mxu0 %v11258_v15  ;;  %9470 = vmatprep.subr.mxu1 %v11258_v15 }
0x12d7   :  { %9424 = vmatpush3.msra.mxu0 %v7939_v34  ;;  %9471 = vmatpush3.msra.mxu1 %v3757_v33  ;;  %v3866_v34 = vld [vmem:[#allocation12 + $0xc8] sm:$0xff]  ;;  %v3865_v33 = vld [vmem:[#allocation12 + $0xc0] sm:$0xff] }
0x12d8   :  { %9425 = vmatprep.subr.mxu0 %v11258_v15  ;;  %9472 = vmatprep.subr.mxu1 %v11258_v15 }
0x12d9   :  { %9426 = vmatpush3.msra.mxu0 %v7938_v10  ;;  %9473 = vmatpush3.msra.mxu1 %v3756_v63  ;;  %v3864_v63 = vld [vmem:[#allocation12 + $0xb8] sm:$0xff] }
0x12da   :  { %9427 = vmatprep.subr.mxu0 %v11258_v15  ;;  %9474 = vmatprep.subr.mxu1 %v11258_v15 }
0x12db   :  { %9428 = vmatpush3.msra.mxu0 %v7937_v23  ;;  %9475 = vmatpush3.msra.mxu1 %v3755_v43  ;;  %v3863_v43 = vld [vmem:[#allocation12 + $0xb0] sm:$0xff] }
0x12dc   :  { %9429 = vmatprep.subr.mxu0 %v11258_v15  ;;  %9476 = vmatprep.subr.mxu1 %v11258_v15 }
0x12dd   :  { %9430 = vmatpush3.msra.mxu0 %v7936_v47  ;;  %9477 = vmatpush3.msra.mxu1 %v3754_v41  ;;  %v3861_v41 = vld [vmem:[#allocation12 + $0xa0] sm:$0xff] }
0x12de   :  { %9431 = vmatprep.subr.mxu0 %v11258_v15  ;;  %9478 = vmatprep.subr.mxu1 %v11258_v15 }
0x12df   :  { %9432 = vmatpush3.msra.mxu0 %v7935_v13  ;;  %9479 = vmatpush3.msra.mxu1 %v3753_v8  ;;  %v3860_v13 = vld [vmem:[#allocation12 + $0x98] sm:$0xff]  ;;  %v3859_v8 = vld [vmem:[#allocation12 + $0x90] sm:$0xff] }
0x12e0   :  { %9433 = vmatprep.subr.mxu0 %v11258_v15  ;;  %9480 = vmatprep.subr.mxu1 %v11258_v15 }
0x12e1   :  { %9434 = vmatpush3.msra.mxu0 %v7934_v16  ;;  %9481 = vmatpush3.msra.mxu1 %v3752_v42  ;;  %v3858_v16 = vld [vmem:[#allocation12 + $0x88] sm:$0xff]  ;;  %v3857_v42 = vld [vmem:[#allocation12 + $0x80] sm:$0xff] }
0x12e2   :  { %9435 = vmatprep.subr.mxu0 %v11258_v15  ;;  %9482 = vmatprep.subr.mxu1 %v11258_v15 }
0x12e3   :  { %9436 = vmatpush3.msra.mxu0 %v7933_v54  ;;  %9483 = vmatpush3.msra.mxu1 %v3751_v20 }
0x12e4   :  { %9437 = vmatprep.subr.mxu0 %v11258_v15  ;;  %9484 = vmatprep.subr.mxu1 %v11258_v15 }
0x12e5   :  { %9438 = vmatpush3.msra.mxu0 %v7932_v1  ;;  %9485 = vmatpush3.msra.mxu1 %v3750_v46 }
0x12e6   :  { %9501 = vmatprep.subr.mxu0 %v11258_v15  ;;  %9548 = vmatprep.subr.mxu1 %v11258_v15 }
0x1345   :  { %v3564_v36 = vpop.xlane.xlu1 %3563 }
0x1346   :  { %v3574_v61 = vmul.f32 0.0078125, %v3564_v36 }
0x1348   :  { %v12658_v40 = vsub.f32 %v12625_v7, %v3574_v61  ;;  %v12720_v61 = vld [vmem:[%s13731_s2 + $0x1] ss:$0 sm:$0xff] }
0x1349   :  { %v3566_v24 = vpop.xlane.xlu0 %3565 }
0x134a   :  { %v3575_v37 = vmul.f32 0.0078125, %v3566_v24  ;;  %v3584_v12 = vmul.f32 %v12658_v40, %v12658_v40 }
0x134c   :  { %v12663_v59 = vsub.f32 %v12629_v57, %v3575_v37  ;;  %3589 = vadd.xlane.f32.xlu0 %v3584_v12  ;;  %v12724_v12 = vld [vmem:[%s13732_s10 + $0x1] ss:$0 sm:$0xff] }
0x134d   :  { %v3568_v52 = vpop.xlane.xlu1 %3567 }
0x134e   :  { %v3585_v4 = vmul.f32 %v12663_v59, %v12663_v59  ;;  %v3576_v3 = vmul.f32 0.0078125, %v3568_v52 }
0x1350   :  { %3591 = vadd.xlane.f32.xlu1 %v3585_v4  ;;  %v12668_v32 = vsub.f32 %v12633_v44, %v3576_v3 }
0x1352   :  { %v3570_v11 = vpop.xlane.xlu0 %3569  ;;  %v3586_v27 = vmul.f32 %v12668_v32, %v12668_v32 }
0x1353   :  { %v3577_v26 = vmul.f32 0.0078125, %v3570_v11 }
0x1354   :  { %3593 = vadd.xlane.f32.xlu0 %v3586_v27  ;;  %v3872_v27 = vld [vmem:[#allocation12 + $0xf8] sm:$0xff] }
0x1355   :  { %v12673_v31 = vsub.f32 %v12637_v2, %v3577_v26 }
0x1357   :  { %v3587_v56 = vmul.f32 %v12673_v31, %v12673_v31 }
0x1358   :  { %v3573_v17 = vpop.xlane.xlu1 %3572 }
0x1359   :  { %3595 = vadd.xlane.f32.xlu1 %v3587_v56  ;;  %v3578_v62 = vmul.f32 0.0078125, %v3573_v17 }
0x135b   :  { %v12681_v51 = vsub.f32 %v12641_v45, %v3578_v62 }
0x135d   :  { %v3588_v55 = vmul.f32 %v12681_v51, %v12681_v51 }
0x135f   :  { %v3597_v18 = vsel %vm1010_vm1, %v3588_v55, 0.0 }
0x1360   :  { %3598 = vadd.xlane.f32.xlu0 %v3597_v18 }
0x13d5   :  { %v3590_v50 = vpop.xlane.xlu0 %3589 }
0x13d6   :  { %v3600_v5 = vmul.f32 0.0078125, %v3590_v50 }
0x13d8   :  { %v3605_v0 = vadd.f32 1e-05, %v3600_v5 }
0x13d9   :  { %v3592_v60 = vpop.xlane.xlu1 %3591 }
0x13da   :  { %10406 = vrsqrt.f32 %v3605_v0  ;;  %v3601_v58 = vmul.f32 0.0078125, %v3592_v60 }
0x13dc   :  { %v3606_v14 = vadd.f32 1e-05, %v3601_v58 }
0x13dd   :  { %v3594_v48 = vpop.xlane.xlu0 %3593 }
0x13de   :  { %10408 = vrsqrt.f32 %v3606_v14  ;;  %v3602_v19 = vmul.f32 0.0078125, %v3594_v48 }
0x13e0   :  { %v3607_v28 = vadd.f32 1e-05, %v3602_v19 }
0x13e2   :  { %v3596_v38 = vpop.xlane.xlu1 %3595  ;;  %10410 = vrsqrt.f32 %v3607_v28 }
0x13e3   :  { %v3603_v30 = vmul.f32 0.0078125, %v3596_v38 }
0x13e5   :  { %v3608_v22 = vadd.f32 1e-05, %v3603_v30 }
0x13e7   :  { %v10407_v36 = vpop.eup %10406  ;;  %10412 = vrsqrt.f32 %v3608_v22 }
0x13e8   :  { %v3615_v24 = vmul.f32 %v10407_v36, %v12658_v40  ;;  %v3871_v40 = vld [vmem:[#allocation12 + $0xf0] sm:$0xff] }
0x13e9   :  { %v3599_v37 = vpop.xlane.xlu0 %3598 }
0x13ea   :  { %v3604_v52 = vmul.f32 0.0078125, %v3599_v37  ;;  %v3626_v4 = vmul.f32 %v12720_v61, %v3615_v24 }
0x13eb   :  { %v10409_v3 = vpop.eup %10408 }
0x13ec   :  { %v3609_v11 = vadd.f32 1e-05, %v3604_v52  ;;  %v12728_v26 = vadd.f32 %v12724_v12, %v3626_v4  ;;  %v3616_v56 = vmul.f32 %v10409_v3, %v12663_v59 }
0x13ee   :  { %10414 = vrsqrt.f32 %v3609_v11  ;;  %9440 = vmatmul.mubr.f32.vlgmr.msra.gmra.mxu0 %v12728_v26  ;;  %9487 = vmatmul.mubr.f32.vlgmr.msra.gmra.mxu1 %v12728_v26  ;;  %v3627_v49 = vmul.f32 %v12720_v61, %v3616_v56 }
0x13ef   :  { %9502 = vmatpush3.msra.mxu0 %v3872_v27  ;;  %9442 = vmatprep.mubr.msk.f32.mxu0 %vm11259_vm2, %v11258_v15  ;;  %v10411_v17 = vpop.eup %10410 }
0x13f0   :  { %9503 = vmatprep.subr.mxu0 %v11258_v15  ;;  %9489 = vmatprep.mubr.msk.f32.mxu1 %vm11259_vm2, %v11258_v15  ;;  %v12740_v59 = vadd.f32 %v12724_v12, %v3627_v49  ;;  %v3617_v62 = vmul.f32 %v10411_v17, %v12668_v32 }
0x13f1   :  { %9504 = vmatpush3.msra.mxu0 %v3871_v40 }
0x13f2   :  { %9505 = vmatprep.subr.mxu0 %v11258_v15  ;;  %9443 = vmatmul.mubr.f32.gmra.mxu0 %v12740_v59  ;;  %v3628_v53 = vmul.f32 %v12720_v61, %v3617_v62 }
0x13f3   :  { %9490 = vmatmul.mubr.f32.gmra.mxu1 %v12740_v59  ;;  %9506 = vmatpush3.msra.mxu0 %v3870_v39 }
0x13f4   :  { %v10413_v29 = vpop.eup %10412  ;;  %9507 = vmatprep.subr.mxu0 %v11258_v15  ;;  %9445 = vmatprep.mubr.msk.f32.mxu0 %vm11259_vm2, %v11258_v15  ;;  %v3639_v32 = vadd.f32 %v12724_v12, %v3628_v53 }
0x13f5   :  { %9508 = vmatpush3.msra.mxu0 %v3869_v6  ;;  %9492 = vmatprep.mubr.msk.f32.mxu1 %vm11259_vm2, %v11258_v15  ;;  %v3618_v55 = vmul.f32 %v10413_v29, %v12673_v31 }
0x13f6   :  { %9509 = vmatprep.subr.mxu0 %v11258_v15  ;;  %9446 = vmatmul.mubr.f32.gmra.mxu0 %v3639_v32 }
0x13f7   :  { %9493 = vmatmul.mubr.f32.gmra.mxu1 %v3639_v32  ;;  %v3629_v25 = vmul.f32 %v12720_v61, %v3618_v55  ;;  %9510 = vmatpush3.msra.mxu0 %v3868_v35 }
0x13f8   :  { %9448 = vmatprep.mubr.msk.f32.mxu0 %vm11259_vm2, %v11258_v15  ;;  %9511 = vmatprep.subr.mxu0 %v11258_v15 }
0x13f9   :  { %9495 = vmatprep.mubr.msk.f32.mxu1 %vm11259_vm2, %v11258_v15  ;;  %v3640_v18 = vadd.f32 %v12724_v12, %v3629_v25  ;;  %9512 = vmatpush3.msra.mxu0 %v3867_v9 }
0x13fa   :  { %9513 = vmatprep.subr.mxu0 %v11258_v15 }
0x13fb   :  { %v10415_v31 = vpop.eup %10414  ;;  %9449 = vmatmul.mubr.f32.gmra.mxu0 %v3640_v18  ;;  %9496 = vmatmul.mubr.f32.gmra.mxu1 %v3640_v18 }
0x13fc   :  { %9514 = vmatpush3.msra.mxu0 %v3866_v34  ;;  %v3619_v10 = vmul.f32 %v10415_v31, %v12681_v51  ;;  %9451 = vmatprep.mubr.msk.f32.mxu0 %vm11259_vm2, %v11258_v15  ;;  %v3862_v51 = vld [vmem:[#allocation12 + $0xa8] sm:$0xff]  ;;  %v12918_v34 = vld [vmem:[%s13733_s12] sm:$0xff] }
0x13fd   :  { %9515 = vmatprep.subr.mxu0 %v11258_v15  ;;  %9498 = vmatprep.mubr.msk.f32.mxu1 %vm11259_vm2, %v11258_v15 }
0x13fe   :  { %9516 = vmatpush3.msra.mxu0 %v3865_v33  ;;  %v3630_v23 = vmul.f32 %v12720_v61, %v3619_v10 }
0x13ff   :  { %9517 = vmatprep.subr.mxu0 %v11258_v15 }
0x1400   :  { %9518 = vmatpush3.msra.mxu0 %v3864_v63  ;;  %v3641_v47 = vadd.f32 %v12724_v12, %v3630_v23 }
0x1401   :  { %9519 = vmatprep.subr.mxu0 %v11258_v15 }
0x1402   :  { %9520 = vmatpush3.msra.mxu0 %v3863_v43  ;;  %9499 = vmatmul.mubr.f32.gmra.mxu1 %v3641_v47  ;;  %v12926_v43 = vld [vmem:[%s13733_s12 + $0x8] sm:$0xff] }
0x1403   :  { %9521 = vmatprep.subr.mxu0 %v11258_v15  ;;  %9452 = vmatmul.mubr.f32.gmra.mxu0 %v3641_v47 }
0x1404   :  { %9522 = vmatpush3.msra.mxu0 %v3862_v51  ;;  %9533 = vmatprep.mubr.msk.f32.mxu0 %vm11259_vm2, %v11258_v15 }
0x1405   :  { %9523 = vmatprep.subr.mxu0 %v11258_v15  ;;  %9558 = vmatprep.mubr.msk.f32.mxu1 %vm11259_vm2, %v11258_v15 }
0x1406   :  { %9524 = vmatpush3.msra.mxu0 %v3861_v41 }
0x1407   :  { %9525 = vmatprep.subr.mxu0 %v11258_v15 }
0x1408   :  { %9526 = vmatpush3.msra.mxu0 %v3860_v13 }
0x1409   :  { %9527 = vmatprep.subr.mxu0 %v11258_v15 }
0x140a   :  { %9528 = vmatpush3.msra.mxu0 %v3859_v8 }
0x140b   :  { %9529 = vmatprep.subr.mxu0 %v11258_v15 }
0x140c   :  { %9530 = vmatpush3.msra.mxu0 %v3858_v16  ;;  %v12931_v16 = vld [vmem:[%s13733_s12 + $0x10] sm:$0xff] }
0x140d   :  { %9531 = vmatprep.subr.mxu0 %v11258_v15 }
0x140e   :  { %9532 = vmatpush3.msra.mxu0 %v3857_v42 }
0x140f   :  { %9534 = vmatmul.mubr.f32.vlgmr.msra.gmra.mxu0 %v12728_v26  ;;  %9598 = vmatprep.subr.mxu0 %v11258_v15 }
0x1410   :  { %9536 = vmatprep.mubr.msk.f32.mxu0 %vm11259_vm2, %v11258_v15 }
0x1413   :  { %9537 = vmatmul.mubr.f32.gmra.mxu0 %v12740_v59 }
0x1414   :  { %9539 = vmatprep.mubr.msk.f32.mxu0 %vm11259_vm2, %v11258_v15 }
0x1417   :  { %9540 = vmatmul.mubr.f32.gmra.mxu0 %v3639_v32 }
0x1418   :  { %9542 = vmatprep.mubr.msk.f32.mxu0 %vm11259_vm2, %v11258_v15 }
0x141b   :  { %9543 = vmatmul.mubr.f32.gmra.mxu0 %v3640_v18 }
0x141c   :  { %9545 = vmatprep.mubr.msk.f32.mxu0 %vm11259_vm2, %v11258_v15 }
0x141f   :  { %9546 = vmatmul.mubr.f32.gmra.mxu0 %v3641_v47 }
0x1420   :  { %9608 = vmatprep.mubr.msk.f32.mxu0 %vm11259_vm2, %v11258_v15 }
0x14ae   :  { %v12796_v54 = vpop.f32.mrf.mxu0  ;;  %v12798_v20 = vpop.f32.mrf.mxu1 }
0x14b0   :  { %v9441_v1 = vpop.f32.mrf.mxu0  ;;  %v9488_v46 = vpop.f32.mrf.mxu1 }
0x14b2   :  { %v12800_v50 = vpop.f32.mrf.mxu0 }
0x14b3   :  { %v12802_v5 = vpop.f32.mrf.mxu1 }
0x14b4   :  { %v9444_v0 = vpop.f32.mrf.mxu0 }
0x14b5   :  { %v9491_v60 = vpop.f32.mrf.mxu1 }
0x14b6   :  { %v12804_v58 = vpop.f32.mrf.mxu0 }
0x14b7   :  { %v12806_v14 = vpop.f32.mrf.mxu1 }
0x14b8   :  { %v9447_v48 = vpop.f32.mrf.mxu0 }
0x14b9   :  { %v9494_v19 = vpop.f32.mrf.mxu1  ;;  %v12939_v48 = vld [vmem:[%s13733_s12 + $0x18] sm:$0xff] }
0x14bb   :  { %v12808_v28 = vpop.f32.mrf.mxu0  ;;  %v12810_v38 = vpop.f32.mrf.mxu1 }
0x14bc   :  { %4289 = vrot.lane.b32.xlu0 %v12810_v38, %s11260_s0 }
0x14bd   :  { %v9450_v30 = vpop.f32.mrf.mxu0  ;;  %v9497_v22 = vpop.f32.mrf.mxu1 }
0x14c0   :  { %4273 = vrot.lane.b32.xlu0 %v12796_v54, %s11260_s0 }
0x14c2   :  { %v12816_v36 = vpop.f32.mrf.mxu1 }
0x14c3   :  { %v12818_v61 = vpop.f32.mrf.mxu0  ;;  %4291 = vrot.lane.b32.xlu1 %v12816_v36, %s11260_s0  ;;  %9549 = vmatpush3.xpose.msk.msra.mxu1 %vm1417_vm3, %v12816_v36 }
0x14c4   :  { %v9500_v24 = vpop.f32.mrf.mxu1  ;;  %9550 = vmatprep.subr.mxu1 %v11258_v15  ;;  %4277 = vrot.lane.b32.xlu0 %v12804_v58, %s11260_s0 }
0x14c5   :  { %v9453_v37 = vpop.f32.mrf.mxu0 }
0x14c7   :  { %4287 = vrot.lane.b32.xlu1 %v12806_v14, %s11260_s0  ;;  %9551 = vmatpush3.xpose.msk.msra.mxu1 %vm1417_vm3, %v12810_v38 }
0x14c8   :  { %9552 = vmatprep.subr.mxu1 %v11258_v15  ;;  %4281 = vrot.lane.b32.xlu0 %v12818_v61, %s11260_s0 }
0x14cb   :  { %4285 = vrot.lane.b32.xlu1 %v12802_v5, %s11260_s0  ;;  %9553 = vmatpush3.xpose.msk.msra.mxu1 %vm1417_vm3, %v12806_v14 }
0x14cc   :  { %9554 = vmatprep.subr.mxu1 %v11258_v15 }
0x14cf   :  { %v12839_v12 = vpop.f32.mrf.mxu0  ;;  %4283 = vrot.lane.b32.xlu1 %v12798_v20, %s11260_s0  ;;  %9555 = vmatpush3.xpose.msk.msra.mxu1 %vm1417_vm3, %v12802_v5 }
0x14d0   :  { %9556 = vmatprep.subr.mxu1 %v11258_v15 }
0x14d1   :  { %v9535_v52 = vpop.f32.mrf.mxu0 }
0x14d2   :  { %v12944_v52 = vld [vmem:[%s13733_s12 + $0x20] sm:$0x3] }
0x14d3   :  { %v12846_v4 = vpop.f32.mrf.mxu0  ;;  %9557 = vmatpush3.xpose.msk.msra.mxu1 %vm1417_vm3, %v12798_v20  ;;  %4275 = vrot.lane.b32.xlu1 %v12800_v50, %s11260_s0 }
0x14d4   :  { %9573 = vmatprep.subr.mxu1 %v11258_v15 }
0x14d5   :  { %v9538_v3 = vpop.f32.mrf.mxu0 }
0x14d6   :  { %9559 = vmatmul.mubr.msk.f32.vlgmr.msra.gmra.mxu1 %vm1417_vm3, %v12796_v54 }
0x14d7   :  { %v12855_v11 = vpop.f32.mrf.mxu0  ;;  %4279 = vrot.lane.b32.xlu1 %v12808_v28, %s11260_s0  ;;  %9561 = vmatprep.mubr.msk.f32.mxu1 %vm11259_vm2, %v11258_v15 }
0x14d9   :  { %v9541_v26 = vpop.f32.mrf.mxu0 }
0x14da   :  { %9562 = vmatmul.mubr.msk.f32.gmra.mxu1 %vm1417_vm3, %v12800_v50 }
0x14db   :  { %v12863_v27 = vpop.f32.mrf.mxu0  ;;  %9564 = vmatprep.mubr.msk.f32.mxu1 %vm11259_vm2, %v11258_v15 }
0x14dd   :  { %v9544_v56 = vpop.f32.mrf.mxu0 }
0x14de   :  { %9565 = vmatmul.mubr.msk.f32.gmra.mxu1 %vm1417_vm3, %v12804_v58 }
0x14df   :  { %v12869_v40 = vpop.f32.mrf.mxu0  ;;  %9567 = vmatprep.mubr.msk.f32.mxu1 %vm11259_vm2, %v11258_v15 }
0x14e0   :  { %9574 = vmatpush3.msk.msra.mxu1 %vm1010_vm1, %v12869_v40 }
0x14e1   :  { %v9547_v49 = vpop.f32.mrf.mxu0  ;;  %9575 = vmatprep.subr.mxu1 %v11258_v15 }
0x14e2   :  { %9576 = vmatpush3.msra.mxu1 %v12863_v27 }
0x14e3   :  { %9577 = vmatprep.subr.mxu1 %v11258_v15  ;;  %9568 = vmatmul.mubr.msk.f32.gmra.mxu1 %vm1417_vm3, %v12808_v28 }
0x14e4   :  { %9578 = vmatpush3.msra.mxu1 %v12855_v11  ;;  %9570 = vmatprep.mubr.msk.f32.mxu1 %vm11259_vm2, %v11258_v15 }
0x14e5   :  { %9579 = vmatprep.subr.mxu1 %v11258_v15 }
0x14e6   :  { %9580 = vmatpush3.msra.mxu1 %v12846_v4 }
0x14e7   :  { %9581 = vmatprep.subr.mxu1 %v11258_v15  ;;  %9571 = vmatmul.mubr.msk.f32.gmra.mxu1 %vm1417_vm3, %v12818_v61 }
0x14e8   :  { %9582 = vmatpush3.msra.mxu1 %v12839_v12  ;;  %9583 = vmatprep.mubr.msk.f32.mxu1 %vm11259_vm2, %v11258_v15 }
0x14e9   :  { %9623 = vmatprep.subr.mxu1 %v11258_v15 }
0x152e   :  { %v4290_v59 = vpop.permute.xlu0 %4289 }
0x1532   :  { %v4274_v53 = vpop.permute.xlu0 %4273 }
0x1535   :  { %v4292_v17 = vpop.permute.xlu1 %4291 }
0x1536   :  { %9599 = vmatpush3.xpose.msk.msra.mxu0 %vm1417_vm3, %v4292_v17  ;;  %v4278_v32 = vpop.permute.xlu0 %4277 }
0x1537   :  { %9600 = vmatprep.subr.mxu0 %v11258_v15 }
0x1539   :  { %v4288_v39 = vpop.permute.xlu1 %4287 }
0x153a   :  { %9601 = vmatpush3.xpose.msk.msra.mxu0 %vm1417_vm3, %v4290_v59  ;;  %v4282_v55 = vpop.permute.xlu0 %4281 }
0x153b   :  { %9602 = vmatprep.subr.mxu0 %v11258_v15 }
0x153d   :  { %v4286_v62 = vpop.permute.xlu1 %4285 }
0x153e   :  { %9603 = vmatpush3.xpose.msk.msra.mxu0 %vm1417_vm3, %v4288_v39 }
0x153f   :  { %9604 = vmatprep.subr.mxu0 %v11258_v15 }
0x1541   :  { %v4284_v6 = vpop.permute.xlu1 %4283 }
0x1542   :  { %9605 = vmatpush3.xpose.msk.msra.mxu0 %vm1417_vm3, %v4286_v62 }
0x1543   :  { %9606 = vmatprep.subr.mxu0 %v11258_v15 }
0x1545   :  { %v4276_v29 = vpop.permute.xlu1 %4275 }
0x1546   :  { %9607 = vmatpush3.xpose.msk.msra.mxu0 %vm1417_vm3, %v4284_v6 }
0x1547   :  { %9648 = vmatprep.subr.mxu0 %v11258_v15 }
0x1549   :  { %9609 = vmatmul.mubr.msk.f32.vlgmr.msra.gmra.mxu0 %vm1417_vm3, %v4274_v53  ;;  %v4280_v35 = vpop.permute.xlu1 %4279 }
0x154a   :  { %9611 = vmatprep.mubr.msk.f32.mxu0 %vm11259_vm2, %v11258_v15 }
0x154d   :  { %9612 = vmatmul.mubr.msk.f32.gmra.mxu0 %vm1417_vm3, %v4276_v29 }
0x154e   :  { %9614 = vmatprep.mubr.msk.f32.mxu0 %vm11259_vm2, %v11258_v15 }
0x1551   :  { %9615 = vmatmul.mubr.msk.f32.gmra.mxu0 %vm1417_vm3, %v4278_v32 }
0x1552   :  { %9617 = vmatprep.mubr.msk.f32.mxu0 %vm11259_vm2, %v11258_v15 }
0x1555   :  { %9618 = vmatmul.mubr.msk.f32.gmra.mxu0 %vm1417_vm3, %v4280_v35 }
0x1556   :  { %9620 = vmatprep.mubr.msk.f32.mxu0 %vm11259_vm2, %v11258_v15 }
0x1559   :  { %9621 = vmatmul.mubr.msk.f32.gmra.mxu0 %vm1417_vm3, %v4282_v55 }
0x155a   :  { %9656 = vmatprep.mubr.msk.f32.mxu0 %vm11259_vm2, %v11258_v15 }
0x1596   :  { %v4076_v9 = vpop.f32.mrf.mxu1 }
0x1597   :  { %v4100_v25 = vmul.f32 0.17677669, %v4076_v9 }
0x1598   :  { %v9560_v18 = vpop.f32.mrf.mxu1 }
0x1599   :  { %v12921_v31 = vadd.f32 %v12918_v34, %v4100_v25 }
0x159a   :  { %v4081_v33 = vpop.f32.mrf.mxu1 }
0x159b   :  { %v4101_v10 = vmul.f32 0.17677669, %v4081_v33  ;;  %v4110_v63 = vsel %vm1548_vm4, %v12921_v31, -inf }
0x159c   :  { %v9563_v23 = vpop.f32.mrf.mxu1  ;;  %4111 = vmax.xlane.f32.xlu1 %v4110_v63 }
0x159d   :  { %v4106_v47 = vadd.f32 %v12926_v43, %v4101_v10 }
0x159e   :  { %v4086_v51 = vpop.f32.mrf.mxu1 }
0x159f   :  { %v4102_v41 = vmul.f32 0.17677669, %v4086_v51  ;;  %v4113_v13 = vsel %vm1548_vm4, %v4106_v47, -inf }
0x15a0   :  { %v9566_v8 = vpop.f32.mrf.mxu1  ;;  %4114 = vmax.xlane.f32.xlu0 %v4113_v13 }
0x15a1   :  { %v12934_v42 = vadd.f32 %v12931_v16, %v4102_v41 }
0x15a3   :  { %v4091_v1 = vpop.f32.mrf.mxu1  ;;  %v4116_v46 = vsel %vm1548_vm4, %v12934_v42, -inf }
0x15a4   :  { %v4103_v0 = vmul.f32 0.17677669, %v4091_v1  ;;  %4117 = vmax.xlane.f32.xlu0 %v4116_v46 }
0x15a5   :  { %v9569_v60 = vpop.f32.mrf.mxu1 }
0x15a6   :  { %v4108_v19 = vadd.f32 %v12939_v48, %v4103_v0 }
0x15a7   :  { %v4096_v30 = vpop.f32.mrf.mxu1 }
0x15a8   :  { %v4104_v22 = vmul.f32 0.17677669, %v4096_v30  ;;  %v4119_v24 = vsel %vm1548_vm4, %v4108_v19, -inf }
0x15a9   :  { %4120 = vmax.xlane.f32.xlu0 %v4119_v24  ;;  %v9572_v37 = vpop.f32.mrf.mxu1 }
0x15aa   :  { %v4109_v3 = vadd.f32 %v12944_v52, %v4104_v22 }
0x15ac   :  { %v4122_v26 = vsel %vm1561_vm5, %v4109_v3, -inf }
0x15ad   :  { %4123 = vmax.xlane.f32.xlu1 %v4122_v26 }
0x1609   :  { %v4379_v56 = vpop.f32.mrf.mxu0 }
0x160a   :  { %v4403_v49 = vmul.f32 0.17677669, %v4379_v56 }
0x160b   :  { %v9610_v17 = vpop.f32.mrf.mxu0 }
0x160c   :  { %v12949_v59 = vadd.f32 %v12918_v34, %v4403_v49 }
0x160d   :  { %v4384_v39 = vpop.f32.mrf.mxu0 }
0x160e   :  { %v4404_v62 = vmul.f32 0.17677669, %v4384_v39  ;;  %v4413_v6 = vsel %vm1548_vm4, %v12949_v59, -inf }
0x160f   :  { %4414 = vmax.xlane.f32.xlu0 %v4413_v6  ;;  %v9613_v53 = vpop.f32.mrf.mxu0 }
0x1610   :  { %v12954_v29 = vadd.f32 %v12926_v43, %v4404_v62 }
0x1611   :  { %v4389_v32 = vpop.f32.mrf.mxu0 }
0x1612   :  { %v4405_v35 = vmul.f32 0.17677669, %v4389_v32  ;;  %v4416_v55 = vsel %vm1548_vm4, %v12954_v29, -inf }
0x1613   :  { %4417 = vmax.xlane.f32.xlu1 %v4416_v55  ;;  %v9616_v9 = vpop.f32.mrf.mxu0 }
0x1614   :  { %v4410_v25 = vadd.f32 %v12931_v16, %v4405_v35 }
0x1615   :  { %v4394_v18 = vpop.f32.mrf.mxu0 }
0x1616   :  { %v4406_v33 = vmul.f32 0.17677669, %v4394_v18  ;;  %v4419_v10 = vsel %vm1548_vm4, %v4410_v25, -inf }
0x1617   :  { %4420 = vmax.xlane.f32.xlu0 %v4419_v10  ;;  %v9619_v63 = vpop.f32.mrf.mxu0 }
0x1618   :  { %v4411_v23 = vadd.f32 %v12939_v48, %v4406_v33 }
0x1619   :  { %v4399_v51 = vpop.f32.mrf.mxu0 }
0x161a   :  { %v4407_v41 = vmul.f32 0.17677669, %v4399_v51  ;;  %v4422_v13 = vsel %vm1548_vm4, %v4411_v23, -inf }
0x161b   :  { %4423 = vmax.xlane.f32.xlu1 %v4422_v13  ;;  %v9622_v8 = vpop.f32.mrf.mxu0 }
0x161c   :  { %v4412_v1 = vadd.f32 %v12944_v52, %v4407_v41 }
0x161e   :  { %v4425_v46 = vsel %vm1561_vm5, %v4412_v1, -inf }
0x161f   :  { %4426 = vmax.xlane.f32.xlu0 %v4425_v46 }
0x1625   :  { %v4112_v26 = vpop.xlane.xlu1 %4111 }
0x1626   :  { %v4125_v49 = vsub.f32 %v12921_v31, %v4112_v26 }
0x1628   :  { %v4130_v39 = vmul.f32 1.442695, %v4125_v49 }
0x1629   :  { %v4115_v0 = vpop.xlane.xlu0 %4114 }
0x162a   :  { %v4126_v60 = vsub.f32 %v4106_v47, %v4115_v0 }
0x162c   :  { %v4132_v30 = vmul.f32 1.442695, %v4126_v60  ;;  %4480 = vrot.lane.b32.xlu1 %v12869_v40, %s11260_s0 }
0x162d   :  { %v4118_v22 = vpop.xlane.xlu0 %4117 }
0x162e   :  { %10416 = vpow2.f32 %v4132_v30  ;;  %v4127_v62 = vsub.f32 %v12934_v42, %v4118_v22 }
0x1630   :  { %v4134_v53 = vmul.f32 1.442695, %v4127_v62 }
0x1632   :  { %v4121_v24 = vpop.xlane.xlu0 %4120 }
0x1633   :  { %v4128_v37 = vsub.f32 %v4108_v19, %v4121_v24 }
0x1635   :  { %v4136_v56 = vmul.f32 1.442695, %v4128_v37 }
0x1636   :  { %v4124_v6 = vpop.xlane.xlu1 %4123 }
0x1637   :  { %10418 = vpow2.f32 %v4136_v56  ;;  %v4129_v32 = vsub.f32 %v4109_v3, %v4124_v6 }
0x1638   :  { %10420 = vpow2.f32 %v4130_v39 }
0x1639   :  { %10422 = vpow2.f32 %v4134_v53  ;;  %v4138_v19 = vmul.f32 1.442695, %v4129_v32 }
0x163b   :  { %v12967_v17 = vpop.eup %10416  ;;  %10424 = vpow2.f32 %v4138_v19 }
0x163c   :  { %v4143_v47 = vsel %vm1548_vm4, %v12967_v17, 0.0 }
0x163d   :  { %4144 = vadd.xlane.f32.xlu0 %v4143_v47 }
0x1644   :  { %v12972_v35 = vpop.eup %10418 }
0x1645   :  { %v4149_v31 = vsel %vm1548_vm4, %v12972_v35, 0.0  ;;  %v12976_v55 = vpop.eup %10420 }
0x1646   :  { %4150 = vadd.xlane.f32.xlu0 %v4149_v31  ;;  %v4140_v42 = vsel %vm1548_vm4, %v12976_v55, 0.0  ;;  %v12980_v9 = vpop.eup %10422 }
0x1647   :  { %v4146_v3 = vsel %vm1548_vm4, %v12980_v9, 0.0 }
0x1648   :  { %v12984_v18 = vpop.eup %10424 }
0x1649   :  { %v4152_v33 = vsel %vm1561_vm5, %v12984_v18, 0.0 }
0x1650   :  { %4141 = vadd.xlane.f32.xlu1 %v4140_v42 }
0x1654   :  { %4147 = vadd.xlane.f32.xlu1 %v4146_v3 }
0x1658   :  { %4153 = vadd.xlane.f32.xlu1 %v4152_v33 }
0x1698   :  { %v4415_v10 = vpop.xlane.xlu0 %4414 }
0x1699   :  { %v4428_v63 = vsub.f32 %v12949_v59, %v4415_v10 }
0x169b   :  { %v4433_v51 = vmul.f32 1.442695, %v4428_v63 }
0x169c   :  { %v4418_v41 = vpop.xlane.xlu1 %4417 }
0x169d   :  { %10426 = vpow2.f32 %v4433_v51  ;;  %v4429_v13 = vsub.f32 %v12954_v29, %v4418_v41 }
0x169f   :  { %v4435_v8 = vmul.f32 1.442695, %v4429_v13 }
0x16a0   :  { %v4421_v46 = vpop.xlane.xlu0 %4420 }
0x16a1   :  { %10428 = vpow2.f32 %v4435_v8  ;;  %v4430_v0 = vsub.f32 %v4410_v25, %v4421_v46 }
0x16a3   :  { %v4437_v60 = vmul.f32 1.442695, %v4430_v0  ;;  %v3971_v0 = vld [vmem:[#allocation14 + $0xb8] sm:$0xff] }
0x16a4   :  { %v4424_v30 = vpop.xlane.xlu1 %4423  ;;  %9649 = vmatpush3.msra.mxu0 %v3971_v0 }
0x16a5   :  { %10430 = vpow2.f32 %v4437_v60  ;;  %v4431_v22 = vsub.f32 %v4411_v23, %v4424_v30  ;;  %v3970_v60 = vld [vmem:[#allocation14 + $0xb0] sm:$0xff]  ;;  %9650 = vmatprep.subr.mxu0 %v11258_v15 }
0x16a6   :  { %9651 = vmatpush3.msra.mxu0 %v3970_v60 }
0x16a7   :  { %v4439_v24 = vmul.f32 1.442695, %v4431_v22  ;;  %9652 = vmatprep.subr.mxu0 %v11258_v15  ;;  %v3968_v22 = vld [vmem:[#allocation14 + $0xa0] sm:$0xff] }
0x16a8   :  { %v4427_v37 = vpop.xlane.xlu0 %4426  ;;  %v4481_v53 = vpop.permute.xlu1 %4480 }
0x16a9   :  { %10432 = vpow2.f32 %v4439_v24  ;;  %v4432_v26 = vsub.f32 %v4412_v1, %v4427_v37 }
0x16aa   :  { %v12990_v56 = vpop.eup %10426 }
0x16ab   :  { %v4441_v59 = vmul.f32 1.442695, %v4432_v26  ;;  %v4443_v49 = vsel %vm1548_vm4, %v12990_v56, 0.0 }
0x16ac   :  { %4444 = vadd.xlane.f32.xlu0 %v4443_v49 }
0x16ad   :  { %10434 = vpow2.f32 %v4441_v59 }
0x16ae   :  { %v12994_v29 = vpop.eup %10428 }
0x16af   :  { %v4446_v25 = vsel %vm1548_vm4, %v12994_v29, 0.0 }
0x16b0   :  { %4447 = vadd.xlane.f32.xlu1 %v4446_v25 }
0x16b2   :  { %v12998_v39 = vpop.eup %10430 }
0x16b3   :  { %v4449_v23 = vsel %vm1548_vm4, %v12998_v39, 0.0 }
0x16b4   :  { %4450 = vadd.xlane.f32.xlu0 %v4449_v23 }
0x16b6   :  { %v13002_v1 = vpop.eup %10432 }
0x16b7   :  { %v4452_v62 = vsel %vm1548_vm4, %v13002_v1, 0.0 }
0x16b8   :  { %4453 = vadd.xlane.f32.xlu1 %v4452_v62 }
0x16ba   :  { %v13006_v6 = vpop.eup %10434 }
0x16bb   :  { %v4455_v47 = vsel %vm1561_vm5, %v13006_v6, 0.0 }
0x16bc   :  { %4456 = vadd.xlane.f32.xlu0 %v4455_v47  ;;  %v3967_v47 = vld [vmem:[#allocation14 + $0x98] sm:$0xff] }
0x16c6   :  { %v4145_v32 = vpop.xlane.xlu0 %4144 }
0x16c9   :  { %4476 = vrot.lane.b32.xlu1 %v12855_v11, %s11260_s0 }
0x16cd   :  { %4474 = vrot.lane.b32.xlu1 %v12846_v4, %s11260_s0 }
0x16cf   :  { %v4151_v42 = vpop.xlane.xlu0 %4150 }
0x16d1   :  { %4472 = vrot.lane.b32.xlu1 %v12839_v12, %s11260_s0 }
0x16d2   :  { %4478 = vrot.lane.b32.xlu0 %v12863_v27, %s11260_s0 }
0x16d5   :  { %4819 = vrot.lane.b32.xlu1 %v12810_v38, %s11261_s18 }
0x16d6   :  { %4821 = vrot.lane.b32.xlu0 %v12816_v36, %s11261_s18 }
0x16d9   :  { %4815 = vrot.lane.b32.xlu1 %v12802_v5, %s11261_s18  ;;  %v4142_v19 = vpop.xlane.xlu1 %4141 }
0x16da   :  { %10436 = vrcp.f32 %v4142_v19  ;;  %4817 = vrot.lane.b32.xlu0 %v12806_v14, %s11261_s18 }
0x16db   :  { %10438 = vrcp.f32 %v4145_v32  ;;  %v3966_v32 = vld [vmem:[#allocation14 + $0x90] sm:$0xff] }
0x16dd   :  { %4803 = vrot.lane.b32.xlu1 %v12796_v54, %s11261_s18  ;;  %v4148_v31 = vpop.xlane.xlu1 %4147 }
0x16de   :  { %4813 = vrot.lane.b32.xlu0 %v12798_v20, %s11261_s18  ;;  %10440 = vrcp.f32 %v4148_v31 }
0x16df   :  { %10442 = vrcp.f32 %v4151_v42  ;;  %v3964_v42 = vld [vmem:[#allocation14 + $0x80] sm:$0xff] }
0x16e1   :  { %4807 = vrot.lane.b32.xlu1 %v12804_v58, %s11261_s18  ;;  %v4154_v3 = vpop.xlane.xlu1 %4153 }
0x16e2   :  { %4805 = vrot.lane.b32.xlu0 %v12800_v50, %s11261_s18  ;;  %10444 = vrcp.f32 %v4154_v3 }
0x16e5   :  { %4811 = vrot.lane.b32.xlu1 %v12818_v61, %s11261_s18 }
0x16e6   :  { %4809 = vrot.lane.b32.xlu0 %v12808_v28, %s11261_s18 }
0x16e7   :  { %v10437_v33 = vpop.eup %10436 }
0x16e8   :  { %v4156_v10 = vmul.f32 %v10437_v33, %v12976_v55  ;;  %v10439_v63 = vpop.eup %10438 }
0x16e9   :  { %5004 = vrot.lane.b32.xlu1 %v12863_v27, %s11261_s18  ;;  %v4158_v51 = vmul.f32 %v10439_v63, %v12967_v17 }
0x16ea   :  { %9584 = vmatmul.mubr.msk.f32.vlgmr.msra.gmra.mxu1 %vm1548_vm4, %v4156_v10  ;;  %5006 = vrot.lane.b32.xlu0 %v12869_v40, %s11261_s18 }
0x16eb   :  { %9624 = vmatpush3.msk.msra.mxu1 %vm1010_vm1, %v4481_v53  ;;  %9586 = vmatprep.mubr.msk.f32.mxu1 %vm11259_vm2, %v11258_v15  ;;  %v10441_v55 = vpop.eup %10440 }
0x16ec   :  { %9625 = vmatprep.subr.mxu1 %v11258_v15  ;;  %v4160_v41 = vmul.f32 %v10441_v55, %v12980_v9  ;;  %v10443_v13 = vpop.eup %10442 }
0x16ed   :  { %5002 = vrot.lane.b32.xlu1 %v12855_v11, %s11261_s18  ;;  %v4162_v17 = vmul.f32 %v10443_v13, %v12972_v35  ;;  %v3969_v35 = vld [vmem:[#allocation14 + $0xa8] sm:$0xff] }
0x16ee   :  { %9587 = vmatmul.mubr.msk.f32.gmra.mxu1 %vm1548_vm4, %v4158_v51  ;;  %9653 = vmatpush3.msra.mxu0 %v3969_v35 }
0x16ef   :  { %9589 = vmatprep.mubr.msk.f32.mxu1 %vm11259_vm2, %v11258_v15  ;;  %v10445_v8 = vpop.eup %10444  ;;  %9654 = vmatprep.subr.mxu0 %v11258_v15 }
0x16f0   :  { %v4164_v46 = vmul.f32 %v10445_v8, %v12984_v18  ;;  %9655 = vmatpush3.msra.mxu0 %v3968_v22 }
0x16f1   :  { %5000 = vrot.lane.b32.xlu1 %v12846_v4, %s11261_s18  ;;  %9694 = vmatprep.subr.mxu0 %v11258_v15 }
0x16f2   :  { %9590 = vmatmul.mubr.msk.f32.gmra.mxu1 %vm1548_vm4, %v4160_v41 }
0x16f3   :  { %9592 = vmatprep.mubr.msk.f32.mxu1 %vm11259_vm2, %v11258_v15 }
0x16f6   :  { %9593 = vmatmul.mubr.msk.f32.gmra.mxu1 %vm1548_vm4, %v4162_v17 }
0x16f7   :  { %9595 = vmatprep.mubr.msk.f32.mxu1 %vm11259_vm2, %v11258_v15 }
0x16fa   :  { %9596 = vmatmul.mubr.msk.f32.gmra.mxu1 %vm1548_vm4, %v4164_v46 }
0x16fb   :  { %9633 = vmatprep.mubr.msk.f32.mxu1 %vm11259_vm2, %v11258_v15 }
0x1735   :  { %v4445_v9 = vpop.xlane.xlu0 %4444 }
0x1736   :  { %10446 = vrcp.f32 %v4445_v9 }
0x1739   :  { %v4448_v30 = vpop.xlane.xlu1 %4447 }
0x173a   :  { %10448 = vrcp.f32 %v4448_v30 }
0x173d   :  { %v4451_v24 = vpop.xlane.xlu0 %4450 }
0x173e   :  { %10450 = vrcp.f32 %v4451_v24 }
0x1741   :  { %v4454_v18 = vpop.xlane.xlu1 %4453 }
0x1742   :  { %10452 = vrcp.f32 %v4454_v18 }
0x1743   :  { %v10447_v25 = vpop.eup %10446 }
0x1744   :  { %v4459_v23 = vmul.f32 %v10447_v25, %v12990_v56  ;;  %v3965_v56 = vld [vmem:[#allocation14 + $0x88] sm:$0xff] }
0x1745   :  { %v4477_v37 = vpop.permute.xlu1 %4476  ;;  %v4457_v26 = vpop.xlane.xlu0 %4456 }
0x1746   :  { %10454 = vrcp.f32 %v4457_v26 }
0x1747   :  { %v10449_v53 = vpop.eup %10448 }
0x1748   :  { %v4461_v19 = vmul.f32 %v10449_v53, %v12994_v29 }
0x1749   :  { %v4475_v59 = vpop.permute.xlu1 %4474  ;;  %v4479_v49 = vpop.permute.xlu0 %4478 }
0x174a   :  { %9626 = vmatpush3.msra.mxu1 %v4479_v49 }
0x174b   :  { %9627 = vmatprep.subr.mxu1 %v11258_v15  ;;  %v10451_v31 = vpop.eup %10450 }
0x174c   :  { %9628 = vmatpush3.msra.mxu1 %v4477_v37  ;;  %v4463_v3 = vmul.f32 %v10451_v31, %v12998_v39 }
0x174d   :  { %9629 = vmatprep.subr.mxu1 %v11258_v15  ;;  %v4473_v62 = vpop.permute.xlu1 %4472  ;;  %v4822_v51 = vpop.permute.xlu0 %4821 }
0x174e   :  { %9630 = vmatpush3.msra.mxu1 %v4475_v59 }
0x174f   :  { %9631 = vmatprep.subr.mxu1 %v11258_v15  ;;  %v10453_v33 = vpop.eup %10452 }
0x1750   :  { %9632 = vmatpush3.msra.mxu1 %v4473_v62  ;;  %v4465_v29 = vmul.f32 %v10453_v33, %v13002_v1 }
0x1751   :  { %9634 = vmatmul.mubr.msk.f32.vlgmr.msra.gmra.mxu1 %vm1548_vm4, %v4459_v23  ;;  %9671 = vmatprep.subr.mxu1 %v11258_v15  ;;  %v4820_v63 = vpop.permute.xlu1 %4819  ;;  %v4818_v41 = vpop.permute.xlu0 %4817 }
0x1752   :  { %9636 = vmatprep.mubr.msk.f32.mxu1 %vm11259_vm2, %v11258_v15  ;;  %9672 = vmatpush3.msra.mxu1 %v3967_v47 }
0x1753   :  { %9673 = vmatprep.subr.mxu1 %v11258_v15  ;;  %v10455_v10 = vpop.eup %10454 }
0x1754   :  { %9674 = vmatpush3.msra.mxu1 %v3966_v32  ;;  %v4467_v39 = vmul.f32 %v10455_v10, %v13006_v6 }
0x1755   :  { %9637 = vmatmul.mubr.msk.f32.gmra.mxu1 %vm1548_vm4, %v4461_v19  ;;  %9675 = vmatprep.subr.mxu1 %v11258_v15  ;;  %v4816_v55 = vpop.permute.xlu1 %4815  ;;  %v13102_v1 = vpop.permute.xlu0 %4813 }
0x1756   :  { %9639 = vmatprep.mubr.msk.f32.mxu1 %vm11259_vm2, %v11258_v15  ;;  %9676 = vmatpush3.msra.mxu1 %v3965_v56 }
0x1757   :  { %9677 = vmatprep.subr.mxu1 %v11258_v15 }
0x1758   :  { %9678 = vmatpush3.msra.mxu1 %v3964_v42 }
0x1759   :  { %9640 = vmatmul.mubr.msk.f32.gmra.mxu1 %vm1548_vm4, %v4463_v3  ;;  %9719 = vmatprep.subr.mxu1 %v11258_v15  ;;  %v13100_v13 = vpop.permute.xlu1 %4803  ;;  %v13106_v8 = vpop.permute.xlu0 %4805 }
0x175a   :  { %9642 = vmatprep.mubr.msk.f32.mxu1 %vm11259_vm2, %v11258_v15 }
0x175d   :  { %9643 = vmatmul.mubr.msk.f32.gmra.mxu1 %vm1548_vm4, %v4465_v29  ;;  %v13104_v17 = vpop.permute.xlu1 %4807  ;;  %v13110_v6 = vpop.permute.xlu0 %4809 }
0x175e   :  { %9645 = vmatprep.mubr.msk.f32.mxu1 %vm11259_vm2, %v11258_v15 }
0x1761   :  { %9646 = vmatmul.mubr.msk.f32.gmra.mxu1 %vm1548_vm4, %v4467_v39  ;;  %v13108_v46 = vpop.permute.xlu1 %4811  ;;  %v5007_v60 = vpop.permute.xlu0 %5006 }
0x1762   :  { %9679 = vmatprep.mubr.msk.f32.mxu1 %vm11259_vm2, %v11258_v15 }
0x1765   :  { %v5005_v9 = vpop.permute.xlu1 %5004 }
0x1769   :  { %v5003_v30 = vpop.permute.xlu1 %5002 }
0x176d   :  { %v5001_v18 = vpop.permute.xlu1 %5000 }
0x17aa   :  { %v4249_v0 = vpop.f32.mrf.mxu1 }
0x17ab   :  { %9680 = vmatmul.mubr.msk.f32.vlgmr.msra.gmra.mxu1 %vm1417_vm3, %v4249_v0 }
0x17ac   :  { %9720 = vmatpush3.msk.msra.mxu1 %vm1010_vm1, %v5007_v60  ;;  %v9585_v35 = vpop.f32.mrf.mxu1  ;;  %9682 = vmatprep.mubr.msk.f32.mxu1 %vm11259_vm2, %v11258_v15 }
0x17ad   :  { %9721 = vmatprep.subr.mxu1 %v11258_v15 }
0x17ae   :  { %9722 = vmatpush3.msra.mxu1 %v5005_v9  ;;  %v4254_v22 = vpop.f32.mrf.mxu1 }
0x17af   :  { %9723 = vmatprep.subr.mxu1 %v11258_v15  ;;  %9683 = vmatmul.mubr.msk.f32.gmra.mxu1 %vm1417_vm3, %v4254_v22 }
0x17b0   :  { %9724 = vmatpush3.msra.mxu1 %v5003_v30  ;;  %v9588_v24 = vpop.f32.mrf.mxu1  ;;  %9685 = vmatprep.mubr.msk.f32.mxu1 %vm11259_vm2, %v11258_v15 }
0x17b1   :  { %9725 = vmatprep.subr.mxu1 %v11258_v15 }
0x17b2   :  { %9726 = vmatpush3.msra.mxu1 %v5001_v18  ;;  %v4259_v37 = vpop.f32.mrf.mxu1 }
0x17b3   :  { %9686 = vmatmul.mubr.msk.f32.gmra.mxu1 %vm1417_vm3, %v4259_v37  ;;  %9727 = vmatprep.subr.mxu1 %v11258_v15 }
0x17b4   :  { %v9591_v26 = vpop.f32.mrf.mxu1  ;;  %9688 = vmatprep.mubr.msk.f32.mxu1 %vm11259_vm2, %v11258_v15 }
0x17b6   :  { %v4264_v59 = vpop.f32.mrf.mxu1 }
0x17b7   :  { %9689 = vmatmul.mubr.msk.f32.gmra.mxu1 %vm1417_vm3, %v4264_v59 }
0x17b8   :  { %v9594_v49 = vpop.f32.mrf.mxu1  ;;  %9691 = vmatprep.mubr.msk.f32.mxu1 %vm11259_vm2, %v11258_v15 }
0x17ba   :  { %v4269_v25 = vpop.f32.mrf.mxu1 }
0x17bb   :  { %9692 = vmatmul.mubr.msk.f32.gmra.mxu1 %vm1417_vm3, %v4269_v25 }
0x17bc   :  { %v9597_v23 = vpop.f32.mrf.mxu1  ;;  %9729 = vmatprep.mubr.msk.f32.mxu1 %vm11259_vm2, %v11258_v15 }
0x1811   :  { %v4569_v62 = vpop.f32.mrf.mxu1 }
0x1812   :  { %9657 = vmatmul.mubr.msk.f32.vlgmr.msra.gmra.mxu0 %vm1417_vm3, %v4569_v62 }
0x1813   :  { %9695 = vmatpush3.xpose.msk.msra.mxu0 %vm1417_vm3, %v4822_v51  ;;  %v9635_v47 = vpop.f32.mrf.mxu1  ;;  %9659 = vmatprep.mubr.msk.f32.mxu0 %vm11259_vm2, %v11258_v15 }
0x1814   :  { %9696 = vmatprep.subr.mxu0 %v11258_v15 }
0x1815   :  { %v4574_v53 = vpop.f32.mrf.mxu1 }
0x1816   :  { %9660 = vmatmul.mubr.msk.f32.gmra.mxu0 %vm1417_vm3, %v4574_v53 }
0x1817   :  { %9697 = vmatpush3.xpose.msk.msra.mxu0 %vm1417_vm3, %v4820_v63  ;;  %v9638_v32 = vpop.f32.mrf.mxu1  ;;  %9662 = vmatprep.mubr.msk.f32.mxu0 %vm11259_vm2, %v11258_v15 }
0x1818   :  { %9698 = vmatprep.subr.mxu0 %v11258_v15 }
0x1819   :  { %v4579_v19 = vpop.f32.mrf.mxu1 }
0x181a   :  { %9663 = vmatmul.mubr.msk.f32.gmra.mxu0 %vm1417_vm3, %v4579_v19 }
0x181b   :  { %9699 = vmatpush3.xpose.msk.msra.mxu0 %vm1417_vm3, %v4818_v41  ;;  %v9641_v56 = vpop.f32.mrf.mxu1  ;;  %9665 = vmatprep.mubr.msk.f32.mxu0 %vm11259_vm2, %v11258_v15 }
0x181c   :  { %9700 = vmatprep.subr.mxu0 %v11258_v15 }
0x181d   :  { %v4584_v31 = vpop.f32.mrf.mxu1 }
0x181e   :  { %9666 = vmatmul.mubr.msk.f32.gmra.mxu0 %vm1417_vm3, %v4584_v31 }
0x181f   :  { %9701 = vmatpush3.xpose.msk.msra.mxu0 %vm1417_vm3, %v4816_v55  ;;  %v9644_v42 = vpop.f32.mrf.mxu1  ;;  %9668 = vmatprep.mubr.msk.f32.mxu0 %vm11259_vm2, %v11258_v15 }
0x1820   :  { %9702 = vmatprep.subr.mxu0 %v11258_v15 }
0x1821   :  { %v4589_v3 = vpop.f32.mrf.mxu1 }
0x1822   :  { %9669 = vmatmul.mubr.msk.f32.gmra.mxu0 %vm1417_vm3, %v4589_v3 }
0x1823   :  { %9703 = vmatpush3.xpose.msk.msra.mxu0 %vm1417_vm3, %v13102_v1  ;;  %v9647_v33 = vpop.f32.mrf.mxu1  ;;  %9704 = vmatprep.mubr.msk.f32.mxu0 %vm11259_vm2, %v11258_v15 }
0x1824   :  { %9744 = vmatprep.subr.mxu0 %v11258_v15 }
0x1826   :  { %9705 = vmatmul.mubr.msk.f32.vlgmr.msra.gmra.mxu0 %vm1417_vm3, %v13100_v13 }
0x1827   :  { %9707 = vmatprep.mubr.msk.f32.mxu0 %vm11259_vm2, %v11258_v15 }
0x182a   :  { %9708 = vmatmul.mubr.msk.f32.gmra.mxu0 %vm1417_vm3, %v13106_v8 }
0x182b   :  { %9710 = vmatprep.mubr.msk.f32.mxu0 %vm11259_vm2, %v11258_v15 }
0x182e   :  { %9711 = vmatmul.mubr.msk.f32.gmra.mxu0 %vm1417_vm3, %v13104_v17 }
0x182f   :  { %9713 = vmatprep.mubr.msk.f32.mxu0 %vm11259_vm2, %v11258_v15 }
0x1832   :  { %9714 = vmatmul.mubr.msk.f32.gmra.mxu0 %vm1417_vm3, %v13110_v6 }
0x1833   :  { %9716 = vmatprep.mubr.msk.f32.mxu0 %vm11259_vm2, %v11258_v15 }
0x1836   :  { %9717 = vmatmul.mubr.msk.f32.gmra.mxu0 %vm1417_vm3, %v13108_v46 }
0x1837   :  { %9752 = vmatprep.mubr.msk.f32.mxu0 %vm11259_vm2, %v11258_v15 }
0x186b   :  { %v13178_v29 = vpop.f32.mrf.mxu1 }
0x186d   :  { %v9681_v10 = vpop.f32.mrf.mxu1 }
0x186f   :  { %v13180_v39 = vpop.f32.mrf.mxu1 }
0x1871   :  { %v9684_v63 = vpop.f32.mrf.mxu1 }
0x1873   :  { %v13182_v51 = vpop.f32.mrf.mxu1 }
0x1875   :  { %v9687_v55 = vpop.f32.mrf.mxu1 }
0x1877   :  { %v13184_v41 = vpop.f32.mrf.mxu1 }
0x1879   :  { %v9690_v13 = vpop.f32.mrf.mxu1 }
0x187b   :  { %v13186_v1 = vpop.f32.mrf.mxu1 }
0x187d   :  { %v9693_v17 = vpop.f32.mrf.mxu1 }
0x18d2   :  { %v13188_v8 = vpop.f32.mrf.mxu0 }
0x18d4   :  { %v9658_v46 = vpop.f32.mrf.mxu0 }
0x18d6   :  { %v13190_v6 = vpop.f32.mrf.mxu0 }
0x18d8   :  { %v9661_v9 = vpop.f32.mrf.mxu0 }
0x18da   :  { %v13192_v0 = vpop.f32.mrf.mxu0 }
0x18dc   :  { %v9664_v60 = vpop.f32.mrf.mxu0 }
0x18de   :  { %v13194_v30 = vpop.f32.mrf.mxu0 }
0x18e0   :  { %v9667_v35 = vpop.f32.mrf.mxu0 }
0x18e2   :  { %v13196_v22 = vpop.f32.mrf.mxu0 }
0x18e4   :  { %v9670_v24 = vpop.f32.mrf.mxu0 }
0x18e6   :  { %v4909_v18 = vpop.f32.mrf.mxu0 }
0x18e7   :  { %v4933_v37 = vmul.f32 0.17677669, %v4909_v18 }
0x18e8   :  { %v9706_v26 = vpop.f32.mrf.mxu0 }
0x18e9   :  { %v4938_v59 = vadd.f32 %v12918_v34, %v4933_v37 }
0x18ea   :  { %v4914_v49 = vpop.f32.mrf.mxu0 }
0x18eb   :  { %v4934_v25 = vmul.f32 0.17677669, %v4914_v49  ;;  %v4943_v23 = vsel %vm1548_vm4, %v4938_v59, -inf }
0x18ec   :  { %4944 = vmax.xlane.f32.xlu0 %v4943_v23  ;;  %v9709_v62 = vpop.f32.mrf.mxu0 }
0x18ed   :  { %v4939_v47 = vadd.f32 %v12926_v43, %v4934_v25 }
0x18ee   :  { %v4919_v53 = vpop.f32.mrf.mxu0 }
0x18ef   :  { %v4935_v32 = vmul.f32 0.17677669, %v4919_v53  ;;  %v4946_v19 = vsel %vm1548_vm4, %v4939_v47, -inf }
0x18f0   :  { %4947 = vmax.xlane.f32.xlu1 %v4946_v19  ;;  %v9712_v56 = vpop.f32.mrf.mxu0 }
0x18f1   :  { %v4940_v31 = vadd.f32 %v12931_v16, %v4935_v32 }
0x18f2   :  { %v4924_v42 = vpop.f32.mrf.mxu0 }
0x18f3   :  { %v4936_v3 = vmul.f32 0.17677669, %v4924_v42  ;;  %v4949_v34 = vsel %vm1548_vm4, %v4940_v31, -inf }
0x18f4   :  { %4950 = vmax.xlane.f32.xlu0 %v4949_v34  ;;  %v9715_v33 = vpop.f32.mrf.mxu0 }
0x18f5   :  { %v4941_v10 = vadd.f32 %v12939_v48, %v4936_v3  ;;  %v3975_v33 = vld [vmem:[#allocation14 + $0xd8] sm:$0xff] }
0x18f6   :  { %v4929_v63 = vpop.f32.mrf.mxu0  ;;  %9745 = vmatpush3.msra.mxu0 %v3975_v33 }
0x18f7   :  { %v4937_v55 = vmul.f32 0.17677669, %v4929_v63  ;;  %v4952_v43 = vsel %vm1548_vm4, %v4941_v10, -inf  ;;  %9746 = vmatprep.subr.mxu0 %v11258_v15 }
0x18f8   :  { %4953 = vmax.xlane.f32.xlu0 %v4952_v43  ;;  %v9718_v13 = vpop.f32.mrf.mxu0 }
0x18f9   :  { %v4942_v17 = vadd.f32 %v12944_v52, %v4937_v55 }
0x18fb   :  { %v4955_v46 = vsel %vm1561_vm5, %v4942_v17, -inf }
0x18fc   :  { %4956 = vmax.xlane.f32.xlu0 %v4955_v46 }
0x1901   :  { %5247 = vrot.lane.b32.xlu1 %v12816_v36, %s11262_s17 }
0x1912   :  { %4998 = vrot.lane.b32.xlu0 %v12839_v12, %s11261_s18 }
0x1975   :  { %v4945_v16 = vpop.xlane.xlu0 %4944 }
0x1976   :  { %v4958_v9 = vsub.f32 %v4938_v59, %v4945_v16 }
0x1978   :  { %v4963_v48 = vmul.f32 1.442695, %v4958_v9 }
0x1979   :  { %v4948_v60 = vpop.xlane.xlu1 %4947 }
0x197a   :  { %10456 = vpow2.f32 %v4963_v48  ;;  %v4959_v35 = vsub.f32 %v4939_v47, %v4948_v60 }
0x197c   :  { %v4965_v24 = vmul.f32 1.442695, %v4959_v35  ;;  %v3972_v35 = vld [vmem:[#allocation14 + $0xc0] sm:$0xff] }
0x197d   :  { %v4951_v18 = vpop.xlane.xlu0 %4950 }
0x197e   :  { %10458 = vpow2.f32 %v4965_v24  ;;  %v4960_v23 = vsub.f32 %v4940_v31, %v4951_v18 }
0x1980   :  { %v4967_v62 = vmul.f32 1.442695, %v4960_v23 }
0x1981   :  { %v4954_v37 = vpop.xlane.xlu0 %4953 }
0x1982   :  { %v4961_v47 = vsub.f32 %v4941_v10, %v4954_v37  ;;  %10460 = vpow2.f32 %v4967_v62 }
0x1984   :  { %v4969_v53 = vmul.f32 1.442695, %v4961_v47 }
0x1985   :  { %v4957_v52 = vpop.xlane.xlu0 %4956 }
0x1986   :  { %10462 = vpow2.f32 %v4969_v53 }
0x1987   :  { %v10457_v26 = vpop.eup %10456 }
0x1988   :  { %v4973_v49 = vsel %vm1548_vm4, %v10457_v26, 0.0 }
0x1989   :  { %4974 = vadd.xlane.f32.xlu1 %v4973_v49  ;;  %v4999_v25 = vpop.permute.xlu0 %4998 }
0x198a   :  { %9728 = vmatpush3.msra.mxu1 %v4999_v25 }
0x198b   :  { %v10459_v36 = vpop.eup %10458  ;;  %9767 = vmatprep.subr.mxu1 %v11258_v15 }
0x198c   :  { %v4976_v59 = vsel %vm1548_vm4, %v10459_v36, 0.0 }
0x198d   :  { %4977 = vadd.xlane.f32.xlu0 %v4976_v59 }
0x198f   :  { %v10461_v32 = vpop.eup %10460 }
0x1990   :  { %v4979_v19 = vsel %vm1548_vm4, %v10461_v32, 0.0 }
0x1993   :  { %v10463_v56 = vpop.eup %10462 }
0x1994   :  { %v4982_v42 = vsel %vm1548_vm4, %v10463_v56, 0.0 }
0x199a   :  { %5243 = vrot.lane.b32.xlu1 %v12806_v14, %s11262_s17  ;;  %v4962_v14 = vsub.f32 %v4942_v17, %v4957_v52 }
0x19a3   :  { %5245 = vrot.lane.b32.xlu0 %v12810_v38, %s11262_s17  ;;  %v4971_v38 = vmul.f32 1.442695, %v4962_v14 }
0x19a5   :  { %10464 = vpow2.f32 %v4971_v38 }
0x19b2   :  { %v10465_v31 = vpop.eup %10464 }
0x19b3   :  { %v4985_v3 = vsel %vm1561_vm5, %v10465_v31, 0.0 }
0x19be   :  { %4980 = vadd.xlane.f32.xlu1 %v4979_v19 }
0x19c2   :  { %4983 = vadd.xlane.f32.xlu0 %v4982_v42 }
0x19cf   :  { %5239 = vrot.lane.b32.xlu1 %v12798_v20, %s11262_s17  ;;  %v5248_v20 = vpop.permute.xlu1 %5247 }
0x19d8   :  { %5241 = vrot.lane.b32.xlu0 %v12802_v5, %s11262_s17 }
0x19dc   :  { %5229 = vrot.lane.b32.xlu0 %v12796_v54, %s11262_s17 }
0x19e0   :  { %5233 = vrot.lane.b32.xlu0 %v12804_v58, %s11262_s17 }
0x19e4   :  { %5237 = vrot.lane.b32.xlu0 %v12818_v61, %s11262_s17  ;;  %v3974_v61 = vld [vmem:[#allocation14 + $0xd0] sm:$0xff] }
0x19e5   :  { %9747 = vmatpush3.msra.mxu0 %v3974_v61  ;;  %v10572_v61 = vld [vmem:[%s13733_s12 + $0x8] sm:$0xff] }
0x19e6   :  { %9748 = vmatprep.subr.mxu0 %v11258_v15 }
0x19f3   :  { %4986 = vadd.xlane.f32.xlu1 %v4985_v3 }
0x1a04   :  { %5231 = vrot.lane.b32.xlu1 %v12800_v50, %s11262_s17  ;;  %v3973_v50 = vld [vmem:[#allocation14 + $0xc8] sm:$0xff] }
0x1a05   :  { %9749 = vmatpush3.msra.mxu0 %v3973_v50 }
0x1a06   :  { %9750 = vmatprep.subr.mxu0 %v11258_v15 }
0x1a07   :  { %9751 = vmatpush3.msra.mxu0 %v3972_v35 }
0x1a08   :  { %5235 = vrot.lane.b32.xlu1 %v12808_v28, %s11262_s17  ;;  %9792 = vmatprep.subr.mxu0 %v11258_v15 }
0x1a12   :  { %v4975_v54 = vpop.xlane.xlu1 %4974 }
0x1a13   :  { %10466 = vrcp.f32 %v4975_v54 }
0x1a16   :  { %v4978_v5 = vpop.xlane.xlu0 %4977  ;;  %v5244_v55 = vpop.permute.xlu1 %5243 }
0x1a17   :  { %10468 = vrcp.f32 %v4978_v5 }
0x1a1a   :  { %v5246_v63 = vpop.permute.xlu0 %5245 }
0x1a20   :  { %v10467_v58 = vpop.eup %10466 }
0x1a21   :  { %v4989_v34 = vmul.f32 %v10467_v58, %v10457_v26 }
0x1a23   :  { %9730 = vmatmul.mubr.msk.f32.vlgmr.msra.gmra.mxu1 %vm1548_vm4, %v4989_v34 }
0x1a24   :  { %v10469_v10 = vpop.eup %10468  ;;  %9768 = vmatpush3.xpose.msk.msra.mxu1 %vm1417_vm3, %v5248_v20  ;;  %9732 = vmatprep.mubr.msk.f32.mxu1 %vm11259_vm2, %v11258_v15  ;;  %v10571_v20 = vld [vmem:[%s13733_s12] sm:$0xff] }
0x1a25   :  { %9769 = vmatprep.subr.mxu1 %v11258_v15  ;;  %v4991_v28 = vmul.f32 %v10469_v10, %v10459_v36 }
0x1a27   :  { %9733 = vmatmul.mubr.msk.f32.gmra.mxu1 %vm1548_vm4, %v4991_v28 }
0x1a28   :  { %9770 = vmatpush3.xpose.msk.msra.mxu1 %vm1417_vm3, %v5246_v63  ;;  %9735 = vmatprep.mubr.msk.f32.mxu1 %vm11259_vm2, %v11258_v15 }
0x1a29   :  { %9771 = vmatprep.subr.mxu1 %v11258_v15 }
0x1a2c   :  { %9772 = vmatpush3.xpose.msk.msra.mxu1 %vm1417_vm3, %v5244_v55 }
0x1a2d   :  { %9773 = vmatprep.subr.mxu1 %v11258_v15 }
0x1a47   :  { %v4981_v43 = vpop.xlane.xlu1 %4980 }
0x1a48   :  { %10470 = vrcp.f32 %v4981_v43  ;;  %v10573_v43 = vld [vmem:[%s13733_s12 + $0x10] sm:$0xff] }
0x1a4b   :  { %v4984_v13 = vpop.xlane.xlu0 %4983  ;;  %v5240_v46 = vpop.permute.xlu1 %5239 }
0x1a4c   :  { %10472 = vrcp.f32 %v4984_v13 }
0x1a4f   :  { %v5242_v17 = vpop.permute.xlu0 %5241 }
0x1a50   :  { %9774 = vmatpush3.xpose.msk.msra.mxu1 %vm1417_vm3, %v5242_v17 }
0x1a51   :  { %9775 = vmatprep.subr.mxu1 %v11258_v15 }
0x1a53   :  { %v5230_v52 = vpop.permute.xlu0 %5229 }
0x1a54   :  { %9776 = vmatpush3.xpose.msk.msra.mxu1 %vm1417_vm3, %v5240_v46 }
0x1a55   :  { %v10471_v16 = vpop.eup %10470  ;;  %9817 = vmatprep.subr.mxu1 %v11258_v15 }
0x1a56   :  { %v4993_v9 = vmul.f32 %v10471_v16, %v10461_v32 }
0x1a57   :  { %v5234_v49 = vpop.permute.xlu0 %5233 }
0x1a58   :  { %9736 = vmatmul.mubr.msk.f32.gmra.mxu1 %vm1548_vm4, %v4993_v9 }
0x1a59   :  { %v10473_v48 = vpop.eup %10472  ;;  %9738 = vmatprep.mubr.msk.f32.mxu1 %vm11259_vm2, %v11258_v15 }
0x1a5a   :  { %v4995_v60 = vmul.f32 %v10473_v48, %v10463_v56  ;;  %v10574_v48 = vld [vmem:[%s13733_s12 + $0x18] sm:$0xff] }
0x1a5b   :  { %v5238_v36 = vpop.permute.xlu0 %5237 }
0x1a5c   :  { %9739 = vmatmul.mubr.msk.f32.gmra.mxu1 %vm1548_vm4, %v4995_v60 }
0x1a5d   :  { %9741 = vmatprep.mubr.msk.f32.mxu1 %vm11259_vm2, %v11258_v15 }
0x1a7c   :  { %v4987_v24 = vpop.xlane.xlu1 %4986 }
0x1a7d   :  { %10474 = vrcp.f32 %v4987_v24 }
0x1a80   :  { %v5232_v26 = vpop.permute.xlu1 %5231 }
0x1a84   :  { %v5236_v25 = vpop.permute.xlu1 %5235 }
0x1a8a   :  { %v10475_v18 = vpop.eup %10474 }
0x1a8b   :  { %v4997_v37 = vmul.f32 %v10475_v18, %v10465_v31 }
0x1a8d   :  { %9742 = vmatmul.mubr.msk.f32.gmra.mxu1 %vm1548_vm4, %v4997_v37 }
0x1a8e   :  { %9777 = vmatprep.mubr.msk.f32.mxu1 %vm11259_vm2, %v11258_v15 }
0x1a91   :  { %9778 = vmatmul.mubr.msk.f32.vlgmr.msra.gmra.mxu1 %vm1417_vm3, %v5230_v52  ;;  %v10575_v52 = vld [vmem:[%s13733_s12 + $0x20] sm:$0x3] }
0x1a92   :  { %9780 = vmatprep.mubr.msk.f32.mxu1 %vm11259_vm2, %v11258_v15 }
0x1a95   :  { %9781 = vmatmul.mubr.msk.f32.gmra.mxu1 %vm1417_vm3, %v5232_v26 }
0x1a96   :  { %9783 = vmatprep.mubr.msk.f32.mxu1 %vm11259_vm2, %v11258_v15 }
0x1a99   :  { %9784 = vmatmul.mubr.msk.f32.gmra.mxu1 %vm1417_vm3, %v5234_v49 }
0x1a9a   :  { %9786 = vmatprep.mubr.msk.f32.mxu1 %vm11259_vm2, %v11258_v15 }
0x1a9d   :  { %9787 = vmatmul.mubr.msk.f32.gmra.mxu1 %vm1417_vm3, %v5236_v25  ;;  %v4780_v25 = vadd.f32 %v13178_v29, %v13188_v8  ;;  %v4795_v29 = vadd.f32 %v13184_v41, %v13194_v30 }
0x1a9e   :  { %9789 = vmatprep.mubr.msk.f32.mxu1 %vm11259_vm2, %v11258_v15 }
0x1aa1   :  { %9790 = vmatmul.mubr.msk.f32.gmra.mxu1 %vm1417_vm3, %v5238_v36 }
0x1aa2   :  { %9825 = vmatprep.mubr.msk.f32.mxu1 %vm11259_vm2, %v11258_v15 }
0x1ae3   :  { %v5095_v59 = vpop.f32.mrf.mxu1 }
0x1ae4   :  { %9753 = vmatmul.mubr.msk.f32.vlgmr.msra.gmra.mxu0 %vm1417_vm3, %v5095_v59 }
0x1ae5   :  { %v9731_v23 = vpop.f32.mrf.mxu1  ;;  %9755 = vmatprep.mubr.msk.f32.mxu0 %vm11259_vm2, %v11258_v15 }
0x1ae7   :  { %v5100_v62 = vpop.f32.mrf.mxu1 }
0x1ae8   :  { %9756 = vmatmul.mubr.msk.f32.gmra.mxu0 %vm1417_vm3, %v5100_v62  ;;  %v4785_v62 = vadd.f32 %v13180_v39, %v13190_v6 }
0x1ae9   :  { %v9734_v47 = vpop.f32.mrf.mxu1  ;;  %9758 = vmatprep.mubr.msk.f32.mxu0 %vm11259_vm2, %v11258_v15 }
0x1b18   :  { %v5105_v53 = vpop.f32.mrf.mxu1 }
0x1b19   :  { %9759 = vmatmul.mubr.msk.f32.gmra.mxu0 %vm1417_vm3, %v5105_v53 }
0x1b1a   :  { %v9737_v32 = vpop.f32.mrf.mxu1  ;;  %9761 = vmatprep.mubr.msk.f32.mxu0 %vm11259_vm2, %v11258_v15 }
0x1b1c   :  { %v5110_v19 = vpop.f32.mrf.mxu1 }
0x1b1d   :  { %9762 = vmatmul.mubr.msk.f32.gmra.mxu0 %vm1417_vm3, %v5110_v19  ;;  %v4790_v19 = vadd.f32 %v13182_v51, %v13192_v0 }
0x1b1e   :  { %v9740_v56 = vpop.f32.mrf.mxu1  ;;  %9764 = vmatprep.mubr.msk.f32.mxu0 %vm11259_vm2, %v11258_v15 }
0x1b4d   :  { %v5115_v42 = vpop.f32.mrf.mxu1 }
0x1b4e   :  { %9765 = vmatmul.mubr.msk.f32.gmra.mxu0 %vm1417_vm3, %v5115_v42 }
0x1b4f   :  { %v9743_v14 = vpop.f32.mrf.mxu1  ;;  %9802 = vmatprep.mubr.msk.f32.mxu0 %vm11259_vm2, %v11258_v15 }
0x1b51   :  { %v5335_v38 = vpop.f32.mrf.mxu1 }
0x1b52   :  { %v5359_v31 = vmul.f32 0.17677669, %v5335_v38 }
0x1b53   :  { %v9779_v3 = vpop.f32.mrf.mxu1 }
0x1b54   :  { %v5364_v54 = vadd.f32 %v10571_v20, %v5359_v31 }
0x1b55   :  { %v5340_v5 = vpop.f32.mrf.mxu1 }
0x1b56   :  { %v5360_v58 = vmul.f32 0.17677669, %v5340_v5  ;;  %v5369_v34 = vsel %vm1548_vm4, %v5364_v54, -inf }
0x1b57   :  { %5370 = vmax.xlane.f32.xlu1 %v5369_v34  ;;  %v9782_v33 = vpop.f32.mrf.mxu1 }
0x1b58   :  { %v5365_v10 = vadd.f32 %v10572_v61, %v5360_v58 }
0x1b59   :  { %v5345_v50 = vpop.f32.mrf.mxu1 }
0x1b5a   :  { %v5361_v28 = vmul.f32 0.17677669, %v5345_v50  ;;  %v5372_v63 = vsel %vm1548_vm4, %v5365_v10, -inf }
0x1b5b   :  { %5373 = vmax.xlane.f32.xlu0 %v5372_v63  ;;  %v9785_v55 = vpop.f32.mrf.mxu1 }
0x1b5c   :  { %v5366_v13 = vadd.f32 %v10573_v43, %v5361_v28 }
0x1b5d   :  { %v5350_v17 = vpop.f32.mrf.mxu1 }
0x1b5e   :  { %v5362_v46 = vmul.f32 0.17677669, %v5350_v17  ;;  %v5375_v16 = vsel %vm1548_vm4, %v5366_v13, -inf }
0x1b5f   :  { %5376 = vmax.xlane.f32.xlu0 %v5375_v16  ;;  %v9788_v9 = vpop.f32.mrf.mxu1 }
0x1b60   :  { %v5367_v60 = vadd.f32 %v10574_v48, %v5362_v46  ;;  %v4800_v48 = vadd.f32 %v13186_v1, %v13196_v22  ;;  %v3977_v1 = vld [vmem:[#allocation14 + $0xe8] sm:$0xff] }
0x1b61   :  { %v5355_v35 = vpop.f32.mrf.mxu1 }
0x1b62   :  { %v5363_v24 = vmul.f32 0.17677669, %v5355_v35  ;;  %v5378_v18 = vsel %vm1548_vm4, %v5367_v60, -inf }
0x1b63   :  { %5379 = vmax.xlane.f32.xlu0 %v5378_v18  ;;  %v9791_v37 = vpop.f32.mrf.mxu1  ;;  %v3979_v18 = vld [vmem:[#allocation14 + $0xf8] sm:$0xff] }
0x1b64   :  { %v5368_v26 = vadd.f32 %v10575_v52, %v5363_v24  ;;  %v3978_v37 = vld [vmem:[#allocation14 + $0xf0] sm:$0xff]  ;;  %9818 = vmatpush3.msra.mxu1 %v3979_v18 }
0x1b65   :  { %9819 = vmatprep.subr.mxu1 %v11258_v15 }
0x1b66   :  { %v5381_v49 = vsel %vm1561_vm5, %v5368_v26, -inf  ;;  %9820 = vmatpush3.msra.mxu1 %v3978_v37  ;;  %v5772_v37 = vld [vmem:[#allocation18 + $0xf8] sm:$0xff] }
0x1b67   :  { %5382 = vmax.xlane.f32.xlu1 %v5381_v49  ;;  %9821 = vmatprep.subr.mxu1 %v11258_v15 }
0x1b68   :  { %9822 = vmatpush3.msra.mxu1 %v3977_v1  ;;  %v5770_v1 = vld [vmem:[#allocation18 + $0xe8] sm:$0xff] }
0x1b69   :  { %9823 = vmatprep.subr.mxu1 %v11258_v15 }
0x1b78   :  { %5432 = vrot.lane.b32.xlu1 %v12869_v40, %s11262_s17 }
0x1ba4   :  { %v5200_v36 = vpop.f32.mrf.mxu0 }
0x1ba5   :  { %v13309_v59 = vadd.f32 %v5200_v36, %v4780_v25 }
0x1ba6   :  { %v9754_v23 = vpop.f32.mrf.mxu0 }
0x1ba8   :  { %v5205_v47 = vpop.f32.mrf.mxu0 }
0x1ba9   :  { %v13313_v53 = vadd.f32 %v5205_v47, %v4785_v62 }
0x1baa   :  { %v9757_v32 = vpop.f32.mrf.mxu0 }
0x1bd9   :  { %v5210_v56 = vpop.f32.mrf.mxu0 }
0x1bda   :  { %v13317_v42 = vadd.f32 %v5210_v56, %v4790_v19 }
0x1bdb   :  { %v9760_v40 = vpop.f32.mrf.mxu0 }
0x1bdd   :  { %v5215_v8 = vpop.f32.mrf.mxu0 }
0x1bde   :  { %v13321_v14 = vadd.f32 %v5215_v8, %v4795_v29 }
0x1bdf   :  { %v9763_v38 = vpop.f32.mrf.mxu0 }
0x1be0   :  { %v5371_v31 = vpop.xlane.xlu1 %5370  ;;  %v3976_v38 = vld [vmem:[#allocation14 + $0xe0] sm:$0xff] }
0x1be1   :  { %v5384_v39 = vsub.f32 %v5364_v54, %v5371_v31  ;;  %9824 = vmatpush3.msra.mxu1 %v3976_v38  ;;  %v5767_v38 = vld [vmem:[#allocation18 + $0xd0] sm:$0xff] }
0x1be2   :  { %9887 = vmatprep.subr.mxu1 %v11258_v15 }
0x1be3   :  { %v5389_v6 = vmul.f32 1.442695, %v5384_v39 }
0x1be4   :  { %v5374_v3 = vpop.xlane.xlu0 %5373 }
0x1be5   :  { %10476 = vpow2.f32 %v5389_v6  ;;  %v5385_v20 = vsub.f32 %v5365_v10, %v5374_v3 }
0x1be7   :  { %v5391_v5 = vmul.f32 1.442695, %v5385_v20 }
0x1be8   :  { %v5377_v58 = vpop.xlane.xlu0 %5376 }
0x1be9   :  { %10478 = vpow2.f32 %v5391_v5  ;;  %v5386_v51 = vsub.f32 %v5366_v13, %v5377_v58 }
0x1beb   :  { %v5393_v0 = vmul.f32 1.442695, %v5386_v51 }
0x1bec   :  { %v5380_v34 = vpop.xlane.xlu0 %5379 }
0x1bed   :  { %10480 = vpow2.f32 %v5393_v0  ;;  %v5387_v33 = vsub.f32 %v5367_v60, %v5380_v34 }
0x1bef   :  { %v5395_v61 = vmul.f32 1.442695, %v5387_v33 }
0x1bf0   :  { %v5383_v41 = vpop.xlane.xlu1 %5382 }
0x1bf1   :  { %10482 = vpow2.f32 %v5395_v61  ;;  %v5388_v30 = vsub.f32 %v5368_v26, %v5383_v41 }
0x1bf2   :  { %v10477_v50 = vpop.eup %10476 }
0x1bf3   :  { %v5397_v28 = vmul.f32 1.442695, %v5388_v30  ;;  %v5399_v54 = vsel %vm1548_vm4, %v10477_v50, 0.0  ;;  %v8033_v30 = vld [vmem:[%s13734_s23 + $0x1] ss:$0 sm:$0xff] }
0x1bf4   :  { %5400 = vadd.xlane.f32.xlu0 %v5399_v54  ;;  %v5433_v63 = vpop.permute.xlu1 %5432 }
0x1bf5   :  { %10484 = vpow2.f32 %v5397_v28  ;;  %9793 = vmatpush3.msk.msra.mxu0 %vm1010_vm1, %v5433_v63 }
0x1bf6   :  { %v10479_v10 = vpop.eup %10478  ;;  %9794 = vmatprep.subr.mxu0 %v11258_v15 }
0x1bf7   :  { %v5402_v55 = vsel %vm1548_vm4, %v10479_v10, 0.0 }
0x1bf8   :  { %5403 = vadd.xlane.f32.xlu1 %v5402_v55 }
0x1bfa   :  { %v10481_v43 = vpop.eup %10480 }
0x1bfb   :  { %v5405_v13 = vsel %vm1548_vm4, %v10481_v43, 0.0 }
0x1bfc   :  { %5406 = vadd.xlane.f32.xlu0 %v5405_v13 }
0x1bfe   :  { %v10483_v17 = vpop.eup %10482 }
0x1bff   :  { %v5408_v46 = vsel %vm1548_vm4, %v10483_v17, 0.0 }
0x1c00   :  { %5409 = vadd.xlane.f32.xlu1 %v5408_v46 }
0x1c02   :  { %v10485_v16 = vpop.eup %10484 }
0x1c03   :  { %v5411_v9 = vsel %vm1561_vm5, %v10485_v16, 0.0 }
0x1c04   :  { %5412 = vadd.xlane.f32.xlu0 %v5411_v9 }
0x1c0e   :  { %v5220_v60 = vpop.f32.mrf.mxu0 }
0x1c0f   :  { %v13332_v35 = vadd.f32 %v5220_v60, %v4800_v48 }
0x1c10   :  { %v9766_v24 = vpop.f32.mrf.mxu0 }
0x1c11   :  { %5428 = vrot.lane.b32.xlu1 %v12855_v11, %s11262_s17 }
0x1c15   :  { %5426 = vrot.lane.b32.xlu1 %v12846_v4, %s11262_s17 }
0x1c19   :  { %5424 = vrot.lane.b32.xlu1 %v12839_v12, %s11262_s17 }
0x1c1a   :  { %5430 = vrot.lane.b32.xlu0 %v12863_v27, %s11262_s17 }
0x1c7d   :  { %v5401_v11 = vpop.xlane.xlu0 %5400 }
0x1c7e   :  { %10486 = vrcp.f32 %v5401_v11 }
0x1c81   :  { %v5404_v4 = vpop.xlane.xlu1 %5403 }
0x1c82   :  { %10488 = vrcp.f32 %v5404_v4 }
0x1c85   :  { %v5407_v22 = vpop.xlane.xlu0 %5406 }
0x1c86   :  { %10490 = vrcp.f32 %v5407_v22 }
0x1c89   :  { %v5410_v12 = vpop.xlane.xlu1 %5409 }
0x1c8a   :  { %10492 = vrcp.f32 %v5410_v12 }
0x1c8b   :  { %v10487_v25 = vpop.eup %10486 }
0x1c8c   :  { %v5415_v36 = vmul.f32 %v10487_v25, %v10477_v50 }
0x1c8d   :  { %v5429_v52 = vpop.permute.xlu1 %5428  ;;  %v5413_v27 = vpop.xlane.xlu0 %5412 }
0x1c8e   :  { %10494 = vrcp.f32 %v5413_v27 }
0x1c8f   :  { %v10489_v62 = vpop.eup %10488 }
0x1c90   :  { %v5417_v47 = vmul.f32 %v10489_v62, %v10479_v10 }
0x1c91   :  { %v5427_v26 = vpop.permute.xlu1 %5426  ;;  %v5431_v49 = vpop.permute.xlu0 %5430 }
0x1c92   :  { %9795 = vmatpush3.msra.mxu0 %v5431_v49 }
0x1c93   :  { %9796 = vmatprep.subr.mxu0 %v11258_v15  ;;  %v10491_v32 = vpop.eup %10490 }
0x1c94   :  { %9797 = vmatpush3.msra.mxu0 %v5429_v52  ;;  %v5419_v19 = vmul.f32 %v10491_v32, %v10481_v43 }
0x1c95   :  { %9798 = vmatprep.subr.mxu0 %v11258_v15  ;;  %v5425_v23 = vpop.permute.xlu1 %5424 }
0x1c96   :  { %9799 = vmatpush3.msra.mxu0 %v5427_v26 }
0x1c97   :  { %9800 = vmatprep.subr.mxu0 %v11258_v15  ;;  %v10493_v56 = vpop.eup %10492 }
0x1c98   :  { %9801 = vmatpush3.msra.mxu0 %v5425_v23  ;;  %v5421_v40 = vmul.f32 %v10493_v56, %v10483_v17 }
0x1c99   :  { %9803 = vmatmul.mubr.msk.f32.vlgmr.msra.gmra.mxu0 %vm1548_vm4, %v5415_v36  ;;  %9840 = vmatprep.subr.mxu0 %v11258_v15 }
0x1c9a   :  { %9805 = vmatprep.mubr.msk.f32.mxu0 %vm11259_vm2, %v11258_v15  ;;  %9841 = vmatpush3.msra.mxu0 %v5772_v37 }
0x1c9b   :  { %v10495_v29 = vpop.eup %10494  ;;  %9842 = vmatprep.subr.mxu0 %v11258_v15 }
0x1c9c   :  { %v5423_v8 = vmul.f32 %v10495_v29, %v10485_v16  ;;  %v5768_v29 = vld [vmem:[#allocation18 + $0xd8] sm:$0xff] }
0x1c9d   :  { %9806 = vmatmul.mubr.msk.f32.gmra.mxu0 %vm1548_vm4, %v5417_v47 }
0x1c9e   :  { %9808 = vmatprep.mubr.msk.f32.mxu0 %vm11259_vm2, %v11258_v15 }
0x1ca1   :  { %9809 = vmatmul.mubr.msk.f32.gmra.mxu0 %vm1548_vm4, %v5419_v19 }
0x1ca2   :  { %9811 = vmatprep.mubr.msk.f32.mxu0 %vm11259_vm2, %v11258_v15 }
0x1ca5   :  { %9812 = vmatmul.mubr.msk.f32.gmra.mxu0 %vm1548_vm4, %v5421_v40 }
0x1ca6   :  { %9814 = vmatprep.mubr.msk.f32.mxu0 %vm11259_vm2, %v11258_v15 }
0x1ca9   :  { %9815 = vmatmul.mubr.msk.f32.gmra.mxu0 %vm1548_vm4, %v5423_v8 }
0x1caa   :  { %9872 = vmatprep.mubr.msk.f32.mxu0 %vm11259_vm2, %v11258_v15 }
0x1d59   :  { %v5521_v31 = vpop.f32.mrf.mxu0 }
0x1d5a   :  { %9826 = vmatmul.mubr.msk.f32.vlgmr.msra.gmra.mxu1 %vm1417_vm3, %v5521_v31 }
0x1d5b   :  { %v9804_v39 = vpop.f32.mrf.mxu0  ;;  %9828 = vmatprep.mubr.msk.f32.mxu1 %vm11259_vm2, %v11258_v15 }
0x1d5c   :  { %v5766_v39 = vld [vmem:[#allocation18 + $0xc8] sm:$0xff] }
0x1d5d   :  { %v5526_v6 = vpop.f32.mrf.mxu0 }
0x1d5e   :  { %9829 = vmatmul.mubr.msk.f32.gmra.mxu1 %vm1417_vm3, %v5526_v6 }
0x1d5f   :  { %v9807_v3 = vpop.f32.mrf.mxu0  ;;  %9831 = vmatprep.mubr.msk.f32.mxu1 %vm11259_vm2, %v11258_v15 }
0x1d60   :  { %v5765_v3 = vld [vmem:[#allocation18 + $0xc0] sm:$0xff] }
0x1d61   :  { %v5531_v20 = vpop.f32.mrf.mxu0 }
0x1d62   :  { %9832 = vmatmul.mubr.msk.f32.gmra.mxu1 %vm1417_vm3, %v5531_v20  ;;  %v5764_v20 = vld [vmem:[#allocation18 + $0xb8] sm:$0xff] }
0x1d63   :  { %v9810_v5 = vpop.f32.mrf.mxu0  ;;  %9834 = vmatprep.mubr.msk.f32.mxu1 %vm11259_vm2, %v11258_v15 }
0x1d64   :  { %v5763_v5 = vld [vmem:[#allocation18 + $0xb0] sm:$0xff] }
0x1d65   :  { %v5536_v58 = vpop.f32.mrf.mxu0 }
0x1d66   :  { %9835 = vmatmul.mubr.msk.f32.gmra.mxu1 %vm1417_vm3, %v5536_v58  ;;  %v5762_v58 = vld [vmem:[#allocation18 + $0xa8] sm:$0xff] }
0x1d67   :  { %v9813_v51 = vpop.f32.mrf.mxu0  ;;  %9837 = vmatprep.mubr.msk.f32.mxu1 %vm11259_vm2, %v11258_v15 }
0x1d68   :  { %v5761_v51 = vld [vmem:[#allocation18 + $0xa0] sm:$0xff] }
0x1d69   :  { %v5541_v0 = vpop.f32.mrf.mxu0 }
0x1d6a   :  { %9838 = vmatmul.mubr.msk.f32.gmra.mxu1 %vm1417_vm3, %v5541_v0  ;;  %v5760_v0 = vld [vmem:[#allocation18 + $0x98] sm:$0xff] }
0x1d6b   :  { %v9816_v34 = vpop.f32.mrf.mxu0  ;;  %9919 = vmatprep.mubr.msk.f32.mxu1 %vm11259_vm2, %v11258_v15 }
0x1d6c   :  { %v5759_v34 = vld [vmem:[#allocation18 + $0x90] sm:$0xff] }
0x1e1a   :  { %v5626_v33 = vpop.f32.mrf.mxu1 }
0x1e1b   :  { %v5650_v61 = vadd.f32 %v5626_v33, %v13309_v59  ;;  %v5758_v33 = vld [vmem:[#allocation18 + $0x88] sm:$0xff] }
0x1e1c   :  { %v9827_v41 = vpop.f32.mrf.mxu1 }
0x1e1d   :  { %v5655_v50 = vadd.f32 %v5650_v61, %v12625_v7  ;;  %v5757_v61 = vld [vmem:[#allocation18 + $0x80] sm:$0xff] }
0x1e1e   :  { %v5631_v28 = vpop.f32.mrf.mxu1 }
0x1e1f   :  { %v5651_v54 = vadd.f32 %v5631_v28, %v13313_v53  ;;  %v13384_v63 = vadd.f32 %v8033_v30, %v5655_v50 }
0x1e20   :  { %v9830_v10 = vpop.f32.mrf.mxu1 }
0x1e21   :  { %v5656_v55 = vadd.f32 %v5651_v54, %v12629_v57  ;;  %5677 = vadd.xlane.f32.xlu0 %v13384_v63 }
0x1e22   :  { %v5636_v43 = vpop.f32.mrf.mxu1 }
0x1e23   :  { %v5652_v13 = vadd.f32 %v5636_v43, %v13317_v42  ;;  %v13389_v17 = vadd.f32 %v8033_v30, %v5656_v55 }
0x1e24   :  { %v9833_v59 = vpop.f32.mrf.mxu1 }
0x1e25   :  { %v5657_v46 = vadd.f32 %v5652_v13, %v12633_v44  ;;  %5679 = vadd.xlane.f32.xlu1 %v13389_v17 }
0x1e26   :  { %v5641_v7 = vpop.f32.mrf.mxu1 }
0x1e27   :  { %v5653_v53 = vadd.f32 %v5641_v7, %v13321_v14  ;;  %v13394_v16 = vadd.f32 %v8033_v30, %v5657_v46 }
0x1e28   :  { %v9836_v9 = vpop.f32.mrf.mxu1 }
0x1e29   :  { %v5658_v57 = vadd.f32 %v5653_v53, %v12637_v2  ;;  %5681 = vadd.xlane.f32.xlu0 %v13394_v16  ;;  %v5771_v2 = vld [vmem:[#allocation18 + $0xf0] sm:$0xff]  ;;  %v8034_v9 = vld [vmem:[#allocation15 + $0x1] ss:$0 sm:$0xff] }
0x1e2a   :  { %v5646_v48 = vpop.f32.mrf.mxu1  ;;  %9843 = vmatpush3.msra.mxu0 %v5771_v2 }
0x1e2b   :  { %v5654_v42 = vadd.f32 %v5646_v48, %v13332_v35  ;;  %v13399_v60 = vadd.f32 %v8033_v30, %v5658_v57  ;;  %9844 = vmatprep.subr.mxu0 %v11258_v15  ;;  %v5769_v35 = vld [vmem:[#allocation18 + $0xe0] sm:$0xff] }
0x1e2c   :  { %v9839_v24 = vpop.f32.mrf.mxu1  ;;  %9845 = vmatpush3.msra.mxu0 %v5770_v1 }
0x1e2d   :  { %v5659_v44 = vadd.f32 %v5654_v42, %v12641_v45  ;;  %5683 = vadd.xlane.f32.xlu0 %v13399_v60  ;;  %9846 = vmatprep.subr.mxu0 %v11258_v15  ;;  %v8035_v24 = vld [vmem:[#allocation17 + $0x1] ss:$0 sm:$0xff] }
0x1e2e   :  { %9847 = vmatpush3.msra.mxu0 %v5769_v35 }
0x1e2f   :  { %v13403_v18 = vadd.f32 %v8033_v30, %v5659_v44  ;;  %9848 = vmatprep.subr.mxu0 %v11258_v15 }
0x1e30   :  { %9849 = vmatpush3.msra.mxu0 %v5768_v29  ;;  %v6017_v29 = vld [vmem:[#allocation21 + $0xd0] sm:$0xff] }
0x1e31   :  { %v5685_v14 = vsel %vm1010_vm1, %v13403_v18, 0.0  ;;  %9850 = vmatprep.subr.mxu0 %v11258_v15 }
0x1e32   :  { %5686 = vadd.xlane.f32.xlu0 %v5685_v14  ;;  %9851 = vmatpush3.msra.mxu0 %v5767_v38  ;;  %v6015_v38 = vld [vmem:[#allocation21 + $0xc0] sm:$0xff] }
0x1e33   :  { %9852 = vmatprep.subr.mxu0 %v11258_v15 }
0x1e34   :  { %9853 = vmatpush3.msra.mxu0 %v5766_v39  ;;  %v6013_v39 = vld [vmem:[#allocation21 + $0xb0] sm:$0xff] }
0x1e35   :  { %9854 = vmatprep.subr.mxu0 %v11258_v15 }
0x1e36   :  { %9855 = vmatpush3.msra.mxu0 %v5765_v3  ;;  %v6011_v3 = vld [vmem:[#allocation21 + $0xa0] sm:$0xff] }
0x1e37   :  { %9856 = vmatprep.subr.mxu0 %v11258_v15 }
0x1e38   :  { %9857 = vmatpush3.msra.mxu0 %v5764_v20  ;;  %v6010_v20 = vld [vmem:[#allocation21 + $0x98] sm:$0xff] }
0x1e39   :  { %9858 = vmatprep.subr.mxu0 %v11258_v15 }
0x1e3a   :  { %9859 = vmatpush3.msra.mxu0 %v5763_v5  ;;  %v6009_v5 = vld [vmem:[#allocation21 + $0x90] sm:$0xff] }
0x1e3b   :  { %9860 = vmatprep.subr.mxu0 %v11258_v15 }
0x1e3c   :  { %9861 = vmatpush3.msra.mxu0 %v5762_v58  ;;  %v6008_v58 = vld [vmem:[#allocation21 + $0x88] sm:$0xff] }
0x1e3d   :  { %9862 = vmatprep.subr.mxu0 %v11258_v15 }
0x1e3e   :  { %9863 = vmatpush3.msra.mxu0 %v5761_v51  ;;  %v6007_v51 = vld [vmem:[#allocation21 + $0x80] sm:$0xff] }
0x1e3f   :  { %9864 = vmatprep.subr.mxu0 %v11258_v15 }
0x1e40   :  { %9865 = vmatpush3.msra.mxu0 %v5760_v0  ;;  %v6150_v0 = vld [vmem:[#allocation24 + $0x78] sm:$0xff] }
0x1e41   :  { %9866 = vmatprep.subr.mxu0 %v11258_v15 }
0x1e42   :  { %9867 = vmatpush3.msra.mxu0 %v5759_v34  ;;  %v13476_v34 = vld [vmem:[#allocation27 + $0x78] sm:$0xff] }
0x1e43   :  { %9868 = vmatprep.subr.mxu0 %v11258_v15 }
0x1e44   :  { %9869 = vmatpush3.msra.mxu0 %v5758_v33  ;;  %v6149_v33 = vld [vmem:[#allocation24 + $0x70] sm:$0xff] }
0x1e45   :  { %9870 = vmatprep.subr.mxu0 %v11258_v15 }
0x1e46   :  { %9871 = vmatpush3.msra.mxu0 %v5757_v61  ;;  %v6148_v61 = vld [vmem:[#allocation24 + $0x68] sm:$0xff] }
0x1e47   :  { %9934 = vmatprep.subr.mxu0 %v6150_v0 }
0x1eaa   :  { %v5678_v45 = vpop.xlane.xlu0 %5677 }
0x1eab   :  { %v5688_v11 = vmul.f32 0.0078125, %v5678_v45 }
0x1ead   :  { %v13412_v4 = vsub.f32 %v13384_v63, %v5688_v11 }
0x1eae   :  { %v5680_v22 = vpop.xlane.xlu1 %5679 }
0x1eaf   :  { %v5689_v12 = vmul.f32 0.0078125, %v5680_v22  ;;  %v5698_v52 = vmul.f32 %v13412_v4, %v13412_v4 }
0x1eb1   :  { %v13417_v27 = vsub.f32 %v13389_v17, %v5689_v12  ;;  %5703 = vadd.xlane.f32.xlu1 %v5698_v52 }
0x1eb2   :  { %v5682_v26 = vpop.xlane.xlu0 %5681 }
0x1eb3   :  { %v5690_v49 = vmul.f32 0.0078125, %v5682_v26  ;;  %v5699_v25 = vmul.f32 %v13417_v27, %v13417_v27 }
0x1eb5   :  { %v13422_v36 = vsub.f32 %v13394_v16, %v5690_v49  ;;  %5705 = vadd.xlane.f32.xlu0 %v5699_v25 }
0x1eb6   :  { %v5684_v23 = vpop.xlane.xlu0 %5683 }
0x1eb7   :  { %v5691_v62 = vmul.f32 0.0078125, %v5684_v23  ;;  %v5700_v47 = vmul.f32 %v13422_v36, %v13422_v36 }
0x1eb9   :  { %v13427_v32 = vsub.f32 %v13399_v60, %v5691_v62  ;;  %5707 = vadd.xlane.f32.xlu1 %v5700_v47  ;;  %v6022_v47 = vld [vmem:[#allocation21 + $0xf8] sm:$0xff] }
0x1eba   :  { %9888 = vmatpush3.msra.mxu1 %v6022_v47 }
0x1ebb   :  { %v5687_v19 = vpop.xlane.xlu0 %5686  ;;  %v5701_v56 = vmul.f32 %v13427_v32, %v13427_v32  ;;  %9889 = vmatprep.subr.mxu1 %v11258_v15 }
0x1ebc   :  { %v5692_v40 = vmul.f32 0.0078125, %v5687_v19  ;;  %v6020_v19 = vld [vmem:[#allocation21 + $0xe8] sm:$0xff] }
0x1ebd   :  { %5709 = vadd.xlane.f32.xlu0 %v5701_v56  ;;  %v6019_v56 = vld [vmem:[#allocation21 + $0xe0] sm:$0xff] }
0x1ebe   :  { %v13432_v8 = vsub.f32 %v13403_v18, %v5692_v40  ;;  %v6018_v40 = vld [vmem:[#allocation21 + $0xd8] sm:$0xff] }
0x1ec0   :  { %v5702_v31 = vmul.f32 %v13432_v8, %v13432_v8 }
0x1ec2   :  { %v5711_v6 = vsel %vm1010_vm1, %v5702_v31, 0.0  ;;  %v6014_v31 = vld [vmem:[#allocation21 + $0xb8] sm:$0xff]  ;;  %vm6737_vm1 = vcmask 130112  }
0x1ec3   :  { %5712 = vadd.xlane.f32.xlu1 %v5711_v6  ;;  %v6012_v6 = vld [vmem:[#allocation21 + $0xa8] sm:$0xff] }
0x1f3a   :  { %v5704_v41 = vpop.xlane.xlu1 %5703 }
0x1f3b   :  { %v5714_v30 = vmul.f32 0.0078125, %v5704_v41  ;;  %v6147_v41 = vld [vmem:[#allocation24 + $0x60] sm:$0xff] }
0x1f3d   :  { %v5719_v50 = vadd.f32 1e-05, %v5714_v30  ;;  %v6146_v30 = vld [vmem:[#allocation24 + $0x58] sm:$0xff] }
0x1f3e   :  { %v5706_v28 = vpop.xlane.xlu0 %5705 }
0x1f3f   :  { %10496 = vrsqrt.f32 %v5719_v50  ;;  %v5715_v54 = vmul.f32 0.0078125, %v5706_v28  ;;  %v6145_v50 = vld [vmem:[#allocation24 + $0x50] sm:$0xff]  ;;  %v8036_v28 = vld [vmem:[#allocation20 + $0x1] ss:$0 sm:$0xff] }
0x1f41   :  { %v5720_v10 = vadd.f32 1e-05, %v5715_v54 }
0x1f42   :  { %v5708_v55 = vpop.xlane.xlu1 %5707 }
0x1f43   :  { %10498 = vrsqrt.f32 %v5720_v10  ;;  %v5716_v43 = vmul.f32 0.0078125, %v5708_v55 }
0x1f45   :  { %v5721_v13 = vadd.f32 1e-05, %v5716_v43 }
0x1f46   :  { %v5710_v59 = vpop.xlane.xlu0 %5709 }
0x1f47   :  { %10500 = vrsqrt.f32 %v5721_v13  ;;  %v5717_v46 = vmul.f32 0.0078125, %v5710_v59 }
0x1f49   :  { %v5722_v7 = vadd.f32 1e-05, %v5717_v46 }
0x1f4b   :  { %10502 = vrsqrt.f32 %v5722_v7 }
0x1f4c   :  { %v10497_v53 = vpop.eup %10496  ;;  %v5713_v57 = vpop.xlane.xlu1 %5712 }
0x1f4d   :  { %v5729_v48 = vmul.f32 %v10497_v53, %v13412_v4  ;;  %v5718_v42 = vmul.f32 0.0078125, %v5713_v57 }
0x1f4f   :  { %v5740_v44 = vmul.f32 %v8034_v9, %v5729_v48  ;;  %v5723_v14 = vadd.f32 1e-05, %v5718_v42 }
0x1f50   :  { %v10499_v37 = vpop.eup %10498 }
0x1f51   :  { %10504 = vrsqrt.f32 %v5723_v14  ;;  %v5751_v2 = vadd.f32 %v8035_v24, %v5740_v44  ;;  %v5730_v1 = vmul.f32 %v10499_v37, %v13417_v27 }
0x1f53   :  { %9873 = vmatmul.mubr.f32.vlgmr.msra.gmra.mxu0 %v5751_v2  ;;  %v5741_v35 = vmul.f32 %v8034_v9, %v5730_v1 }
0x1f54   :  { %v10501_v45 = vpop.eup %10500  ;;  %9875 = vmatprep.mubr.msk.f32.mxu0 %vm11259_vm2, %v11258_v15  ;;  %9935 = vmatpush3.msra.mxu0 %v6150_v0 }
0x1f55   :  { %v5752_v11 = vadd.f32 %v8035_v24, %v5741_v35  ;;  %v5731_v22 = vmul.f32 %v10501_v45, %v13422_v36  ;;  %9936 = vmatprep.subr.mxu0 %v6149_v33 }
0x1f56   :  { %9937 = vmatpush3.msra.mxu0 %v6149_v33 }
0x1f57   :  { %9876 = vmatmul.mubr.f32.gmra.mxu0 %v5752_v11  ;;  %v5742_v4 = vmul.f32 %v8034_v9, %v5731_v22  ;;  %9938 = vmatprep.subr.mxu0 %v6148_v61 }
0x1f58   :  { %v10503_v12 = vpop.eup %10502  ;;  %9878 = vmatprep.mubr.msk.f32.mxu0 %vm11259_vm2, %v11258_v15  ;;  %9939 = vmatpush3.msra.mxu0 %v6148_v61 }
0x1f59   :  { %v5753_v52 = vadd.f32 %v8035_v24, %v5742_v4  ;;  %v5732_v26 = vmul.f32 %v10503_v12, %v13427_v32  ;;  %v6021_v32 = vld [vmem:[#allocation21 + $0xf0] sm:$0xff]  ;;  %9940 = vmatprep.subr.mxu0 %v6147_v41 }
0x1f5a   :  { %9890 = vmatpush3.msra.mxu1 %v6021_v32  ;;  %9941 = vmatpush3.msra.mxu0 %v6147_v41 }
0x1f5b   :  { %9879 = vmatmul.mubr.f32.gmra.mxu0 %v5753_v52  ;;  %v5743_v27 = vmul.f32 %v8034_v9, %v5732_v26  ;;  %9891 = vmatprep.subr.mxu1 %v11258_v15 }
0x1f5c   :  { %9881 = vmatprep.mubr.msk.f32.mxu0 %vm11259_vm2, %v11258_v15  ;;  %9892 = vmatpush3.msra.mxu1 %v6020_v19 }
0x1f5d   :  { %v5754_v49 = vadd.f32 %v8035_v24, %v5743_v27  ;;  %9893 = vmatprep.subr.mxu1 %v11258_v15  ;;  %9942 = vmatprep.subr.mxu0 %v6146_v30 }
0x1f5e   :  { %v10505_v25 = vpop.eup %10504  ;;  %9894 = vmatpush3.msra.mxu1 %v6019_v56  ;;  %9943 = vmatpush3.msra.mxu0 %v6146_v30 }
0x1f5f   :  { %9882 = vmatmul.mubr.f32.gmra.mxu0 %v5754_v49  ;;  %v5733_v23 = vmul.f32 %v10505_v25, %v13432_v8  ;;  %9895 = vmatprep.subr.mxu1 %v11258_v15  ;;  %v6016_v8 = vld [vmem:[#allocation21 + $0xc8] sm:$0xff] }
0x1f60   :  { %9884 = vmatprep.mubr.msk.f32.mxu0 %vm11259_vm2, %v11258_v15  ;;  %9896 = vmatpush3.msra.mxu1 %v6018_v40 }
0x1f61   :  { %v5744_v36 = vmul.f32 %v8034_v9, %v5733_v23  ;;  %9897 = vmatprep.subr.mxu1 %v11258_v15  ;;  %9944 = vmatprep.subr.mxu0 %v6145_v50 }
0x1f62   :  { %9898 = vmatpush3.msra.mxu1 %v6017_v29  ;;  %9945 = vmatpush3.msra.mxu0 %v6145_v50 }
0x1f63   :  { %v5755_v62 = vadd.f32 %v8035_v24, %v5744_v36  ;;  %9899 = vmatprep.subr.mxu1 %v11258_v15 }
0x1f64   :  { %9900 = vmatpush3.msra.mxu1 %v6016_v8 }
0x1f65   :  { %9885 = vmatmul.mubr.f32.gmra.mxu0 %v5755_v62  ;;  %9901 = vmatprep.subr.mxu1 %v11258_v15 }
0x1f66   :  { %9902 = vmatpush3.msra.mxu1 %v6015_v38 }
0x1f67   :  { %9903 = vmatprep.subr.mxu1 %v11258_v15 }
0x1f68   :  { %9904 = vmatpush3.msra.mxu1 %v6014_v31 }
0x1f69   :  { %9905 = vmatprep.subr.mxu1 %v11258_v15 }
0x1f6a   :  { %9906 = vmatpush3.msra.mxu1 %v6013_v39 }
0x1f6b   :  { %9907 = vmatprep.subr.mxu1 %v11258_v15 }
0x1f6c   :  { %9908 = vmatpush3.msra.mxu1 %v6012_v6 }
0x1f6d   :  { %9909 = vmatprep.subr.mxu1 %v11258_v15 }
0x1f6e   :  { %9910 = vmatpush3.msra.mxu1 %v6011_v3 }
0x1f6f   :  { %9911 = vmatprep.subr.mxu1 %v11258_v15 }
0x1f70   :  { %9912 = vmatpush3.msra.mxu1 %v6010_v20 }
0x1f71   :  { %9913 = vmatprep.subr.mxu1 %v11258_v15 }
0x1f72   :  { %9914 = vmatpush3.msra.mxu1 %v6009_v5 }
0x1f73   :  { %9915 = vmatprep.subr.mxu1 %v11258_v15 }
0x1f74   :  { %9916 = vmatpush3.msra.mxu1 %v6008_v58 }
0x1f75   :  { %9917 = vmatprep.subr.mxu1 %v11258_v15 }
0x1f76   :  { %9918 = vmatpush3.msra.mxu1 %v6007_v51 }
0x1f77   :  { %9972 = vmatprep.subr.mxu1 %v13476_v34 }
0x2013   :  { %v5847_v54 = vpop.f32.mrf.mxu0 }
0x2014   :  { %v13479_v10 = vadd.f32 %v8036_v28, %v5847_v54 }
0x2015   :  { %v9874_v55 = vpop.f32.mrf.mxu0 }
0x2016   :  { %v5876_v43 = vmul.f32 0.70710677, %v13479_v10 }
0x2017   :  { %v5852_v13 = vpop.f32.mrf.mxu0 }
0x2018   :  { %vm5881_vm11 = vcmp.ge.f32.partialorder %v5876_v43, 0.0  ;;  %v13482_v59 = vadd.f32 %v8036_v28, %v5852_v13 }
0x2019   :  { %v13485_v46 = vsel %vm5881_vm11, 1.0, %v11263_v21  ;;  %v9877_v7 = vpop.f32.mrf.mxu0 }
0x201a   :  { %v5891_v53 = vmul.f32 %v13485_v46, %v5876_v43  ;;  %v5877_v9 = vmul.f32 0.70710677, %v13482_v59 }
0x201b   :  { %v5857_v57 = vpop.f32.mrf.mxu0 }
0x201c   :  { %v5896_v48 = vmul.f32 0.3275911, %v5891_v53  ;;  %vm5882_vm12 = vcmp.ge.f32.partialorder %v5877_v9, 0.0  ;;  %v13489_v42 = vadd.f32 %v8036_v28, %v5857_v57  ;;  %v5961_v26 = vsub.f32 0.0, %v5891_v53 }
0x201d   :  { %v13492_v24 = vsel %vm5882_vm12, 1.0, %v11263_v21  ;;  %v9880_v44 = vpop.f32.mrf.mxu0 }
0x201e   :  { %v5901_v14 = vadd.f32 1.0, %v5896_v48  ;;  %v5892_v37 = vmul.f32 %v13492_v24, %v5877_v9  ;;  %v5878_v2 = vmul.f32 0.70710677, %v13489_v42  ;;  %v5966_v19 = vmul.f32 %v5961_v26, %v5891_v53 }
0x201f   :  { %v5862_v1 = vpop.f32.mrf.mxu0 }
0x2020   :  { %10506 = vrcp.f32 %v5901_v14  ;;  %v5897_v35 = vmul.f32 0.3275911, %v5892_v37  ;;  %vm5883_vm13 = vcmp.ge.f32.partialorder %v5878_v2, 0.0  ;;  %v13496_v45 = vadd.f32 %v8036_v28, %v5862_v1 }
0x2021   :  { %v9883_v11 = vpop.f32.mrf.mxu0  ;;  %v13499_v4 = vsel %vm5883_vm13, 1.0, %v11263_v21  ;;  %v5962_v40 = vsub.f32 0.0, %v5892_v37  ;;  %v5971_v39 = vmul.f32 1.442695, %v5966_v19 }
0x2022   :  { %v5902_v22 = vadd.f32 1.0, %v5897_v35  ;;  %v5893_v12 = vmul.f32 %v13499_v4, %v5878_v2  ;;  %v5879_v52 = vmul.f32 0.70710677, %v13496_v45 }
0x2023   :  { %v5967_v3 = vmul.f32 %v5962_v40, %v5892_v37 }
0x2024   :  { %10508 = vrcp.f32 %v5902_v22  ;;  %v5898_v27 = vmul.f32 0.3275911, %v5893_v12  ;;  %vm5884_vm14 = vcmp.ge.f32.partialorder %v5879_v52, 0.0  ;;  %v5963_v5 = vsub.f32 0.0, %v5893_v12 }
0x2025   :  { %v5867_v49 = vpop.f32.mrf.mxu0  ;;  %v13504_v25 = vsel %vm5884_vm14, 1.0, %v11263_v21  ;;  %v5973_v41 = vmul.f32 1.442695, %v5967_v3 }
0x2026   :  { %v13506_v23 = vadd.f32 %v8036_v28, %v5867_v49  ;;  %v5903_v36 = vadd.f32 1.0, %v5898_v27  ;;  %v5894_v62 = vmul.f32 %v13504_v25, %v5879_v52  ;;  %v5968_v30 = vmul.f32 %v5963_v5, %v5893_v12 }
0x2027   :  { %v9886_v47 = vpop.f32.mrf.mxu0 }
0x2028   :  { %v5880_v32 = vmul.f32 0.70710677, %v13506_v23  ;;  %10510 = vrcp.f32 %v5903_v36  ;;  %v5899_v56 = vmul.f32 0.3275911, %v5894_v62  ;;  %v5975_v7 = vmul.f32 1.442695, %v5968_v30 }
0x202a   :  { %vm5885_vm15 = vcmp.ge.f32.partialorder %v5880_v32, 0.0  ;;  %v5904_v29 = vadd.f32 1.0, %v5899_v56 }
0x202b   :  { %v13511_v8 = vsel %vm5885_vm15, 1.0, %v11263_v21  ;;  %v5964_v21 = vsub.f32 0.0, %v5894_v62 }
0x202c   :  { %v5895_v38 = vmul.f32 %v13511_v8, %v5880_v32  ;;  %10512 = vrcp.f32 %v5904_v29 }
0x202d   :  { %v10507_v31 = vpop.eup %10506  ;;  %10514 = vpow2.f32 %v5971_v39  ;;  %v5969_v53 = vmul.f32 %v5964_v21, %v5894_v62 }
0x202e   :  { %v5916_v6 = vmul.f32 1.0614054, %v10507_v31  ;;  %v5900_v20 = vmul.f32 0.3275911, %v5895_v38  ;;  %v5965_v48 = vsub.f32 0.0, %v5895_v38 }
0x202f   :  { %v5977_v11 = vmul.f32 1.442695, %v5969_v53 }
0x2030   :  { %v5921_v58 = vadd.f32 -1.4531521, %v5916_v6  ;;  %v5905_v51 = vadd.f32 1.0, %v5900_v20  ;;  %v5970_v52 = vmul.f32 %v5965_v48, %v5895_v38 }
0x2031   :  { %v10509_v0 = vpop.eup %10508 }
0x2032   :  { %v5926_v33 = vmul.f32 %v10507_v31, %v5921_v58  ;;  %v5917_v61 = vmul.f32 1.0614054, %v10509_v0  ;;  %10516 = vrcp.f32 %v5905_v51  ;;  %v5979_v39 = vmul.f32 1.442695, %v5970_v52 }
0x2033   :  { %10518 = vpow2.f32 %v5973_v41 }
0x2034   :  { %v5931_v50 = vadd.f32 1.4214138, %v5926_v33  ;;  %v5922_v28 = vadd.f32 -1.4531521, %v5917_v61  ;;  %10520 = vpow2.f32 %v5975_v7 }
0x2035   :  { %v10511_v54 = vpop.eup %10510  ;;  %10522 = vpow2.f32 %v5977_v11 }
0x2036   :  { %v5936_v55 = vmul.f32 %v10507_v31, %v5931_v50  ;;  %v5927_v43 = vmul.f32 %v10509_v0, %v5922_v28  ;;  %v5918_v13 = vmul.f32 1.0614054, %v10511_v54  ;;  %10524 = vpow2.f32 %v5979_v39 }
0x2037   :  { %v5871_v50 = vmul.f32 0.5, %v13479_v10 }
0x2038   :  { %v5941_v9 = vadd.f32 -0.28449672, %v5936_v55  ;;  %v5932_v57 = vadd.f32 1.4214138, %v5927_v43  ;;  %v5923_v44 = vadd.f32 -1.4531521, %v5918_v13 }
0x2039   :  { %v10513_v14 = vpop.eup %10512 }
0x203a   :  { %v5946_v37 = vmul.f32 %v10507_v31, %v5941_v9  ;;  %v5937_v2 = vmul.f32 %v10509_v0, %v5932_v57  ;;  %v5928_v1 = vmul.f32 %v10511_v54, %v5923_v44  ;;  %v5919_v35 = vmul.f32 1.0614054, %v10513_v14  ;;  %v10515_v49 = vpop.eup %10514 }
0x203c   :  { %v5951_v22 = vadd.f32 0.2548296, %v5946_v37  ;;  %v5942_v12 = vadd.f32 -0.28449672, %v5937_v2  ;;  %v5933_v26 = vadd.f32 1.4214138, %v5928_v1 }
0x203d   :  { %v5924_v27 = vadd.f32 -1.4531521, %v5919_v35  ;;  %v5872_v37 = vmul.f32 0.5, %v13482_v59  ;;  %v6255_v59 = vld [vmem:[#allocation27 + $0x60] sm:$0xff] }
0x203e   :  { %v5956_v36 = vmul.f32 %v10507_v31, %v5951_v22  ;;  %v5947_v47 = vmul.f32 %v10509_v0, %v5942_v12  ;;  %v5938_v32 = vmul.f32 %v10511_v54, %v5933_v26 }
0x203f   :  { %v10517_v62 = vpop.eup %10516  ;;  %v5929_v19 = vmul.f32 %v10513_v14, %v5924_v27 }
0x2040   :  { %v5981_v56 = vmul.f32 %v10515_v49, %v5956_v36  ;;  %v5952_v40 = vadd.f32 0.2548296, %v5947_v47  ;;  %v5920_v29 = vmul.f32 1.0614054, %v10517_v62  ;;  %v5943_v6 = vadd.f32 -0.28449672, %v5938_v32  ;;  %v10519_v51 = vpop.eup %10518 }
0x2041   :  { %v5934_v3 = vadd.f32 1.4214138, %v5929_v19  ;;  %v10521_v53 = vpop.eup %10520 }
0x2042   :  { %v5986_v20 = vsub.f32 1.0, %v5981_v56  ;;  %v5957_v5 = vmul.f32 %v10509_v0, %v5952_v40  ;;  %v5925_v58 = vadd.f32 -1.4531521, %v5920_v29  ;;  %v5948_v38 = vmul.f32 %v10511_v54, %v5943_v6  ;;  %v10523_v11 = vpop.eup %10522  ;;  %v6253_v56 = vld [vmem:[#allocation27 + $0x50] sm:$0xff] }
0x2043   :  { %v5939_v33 = vmul.f32 %v10513_v14, %v5934_v3  ;;  %v10525_v47 = vpop.eup %10524  ;;  %v5874_v40 = vmul.f32 0.5, %v13496_v45  ;;  %v6144_v3 = vld [vmem:[#allocation24 + $0x48] sm:$0xff] }
0x2044   :  { %v5991_v61 = vmul.f32 %v5986_v20, %v13485_v46  ;;  %v5982_v31 = vmul.f32 %v10519_v51, %v5957_v5  ;;  %v5930_v41 = vmul.f32 %v10517_v62, %v5925_v58  ;;  %v5953_v30 = vadd.f32 0.2548296, %v5948_v38  ;;  %v6257_v46 = vld [vmem:[#allocation27 + $0x70] sm:$0xff]  ;;  %v6252_v20 = vld [vmem:[#allocation27 + $0x48] sm:$0xff]  ;;  %9946 = vmatprep.subr.mxu0 %v6144_v3  ;;  %v6143_v5 = vld [vmem:[#allocation24 + $0x40] sm:$0xff] }
0x2045   :  { %v5944_v21 = vadd.f32 -0.28449672, %v5939_v33  ;;  %9947 = vmatpush3.msra.mxu0 %v6144_v3  ;;  %v6251_v58 = vld [vmem:[#allocation27 + $0x40] sm:$0xff]  ;;  %v6249_v51 = vld [vmem:[#allocation27 + $0x30] sm:$0xff]  ;;  %v6248_v33 = vld [vmem:[#allocation27 + $0x28] sm:$0xff] }
0x2046   :  { %v5996_v28 = vadd.f32 1.0, %v5991_v61  ;;  %v5987_v55 = vsub.f32 1.0, %v5982_v31  ;;  %v5935_v43 = vadd.f32 1.4214138, %v5930_v41  ;;  %v5958_v13 = vmul.f32 %v10511_v54, %v5953_v30  ;;  %v6256_v54 = vld [vmem:[#allocation27 + $0x68] sm:$0xff]  ;;  %9948 = vmatprep.subr.mxu0 %v6143_v5  ;;  %v6139_v61 = vld [vmem:[#allocation24 + $0x20] sm:$0xff] }
0x2047   :  { %v5949_v7 = vmul.f32 %v10513_v14, %v5944_v21  ;;  %9949 = vmatpush3.msra.mxu0 %v6143_v5  ;;  %v6140_v38 = vld [vmem:[#allocation24 + $0x28] sm:$0xff]  ;;  %v6138_v41 = vld [vmem:[#allocation24 + $0x18] sm:$0xff]  ;;  %v6137_v21 = vld [vmem:[#allocation24 + $0x10] sm:$0xff] }
0x2048   :  { %v6001_v0 = vmul.f32 %v5996_v28, %v5871_v50  ;;  %v5992_v9 = vmul.f32 %v5987_v55, %v13492_v24  ;;  %v5940_v57 = vmul.f32 %v10517_v62, %v5935_v43  ;;  %v5983_v48 = vmul.f32 %v10521_v53, %v5958_v13  ;;  %v6247_v31 = vld [vmem:[#allocation27 + $0x20] sm:$0xff]  ;;  %v6246_v30 = vld [vmem:[#allocation27 + $0x18] sm:$0xff]  ;;  %v6245_v50 = vld [vmem:[#allocation27 + $0x10] sm:$0xff] }
0x2049   :  { %v5954_v44 = vadd.f32 0.2548296, %v5949_v7  ;;  %v6136_v28 = vld [vmem:[#allocation24 + $0x8] sm:$0xff]  ;;  %v6135_v43 = vld [vmem:[#allocation24] sm:$0xff]  ;;  %v8037_v7 = vld [vmem:[#allocation23 + $0x1] ss:$0 sm:$0xff] }
0x204a   :  { %v5997_v2 = vadd.f32 1.0, %v5992_v9  ;;  %v5945_v1 = vadd.f32 -0.28449672, %v5940_v57  ;;  %9920 = vmatmul.mubr.f32.vlgmr.msra.gmra.mxu1 %v6001_v0  ;;  %v5988_v35 = vsub.f32 1.0, %v5983_v48  ;;  %v6244_v55 = vld [vmem:[#allocation27 + $0x8] sm:$0xff]  ;;  %v6243_v13 = vld [vmem:[#allocation27] sm:$0xff] }
0x204b   :  { %v5959_v10 = vmul.f32 %v10513_v14, %v5954_v44  ;;  %9922 = vmatprep.mubr.msk.f32.mxu1 %vm11259_vm2, %v11258_v15  ;;  %9973 = vmatpush3.msra.mxu1 %v13476_v34  ;;  %v5873_v14 = vmul.f32 0.5, %v13489_v42  ;;  %v6254_v34 = vld [vmem:[#allocation27 + $0x58] sm:$0xff] }
0x204c   :  { %v6002_v22 = vmul.f32 %v5997_v2, %v5872_v37  ;;  %v5950_v24 = vmul.f32 %v10517_v62, %v5945_v1  ;;  %9974 = vmatprep.subr.mxu1 %v6257_v46  ;;  %v5993_v12 = vmul.f32 %v5988_v35, %v13499_v4 }
0x204d   :  { %v5984_v52 = vmul.f32 %v10523_v11, %v5959_v10  ;;  %9975 = vmatpush3.msra.mxu1 %v6257_v46 }
0x204e   :  { %v5955_v26 = vadd.f32 0.2548296, %v5950_v24  ;;  %9923 = vmatmul.mubr.f32.gmra.mxu1 %v6002_v22  ;;  %9976 = vmatprep.subr.mxu1 %v6256_v54  ;;  %v5998_v27 = vadd.f32 1.0, %v5993_v12 }
0x204f   :  { %v5989_v49 = vsub.f32 1.0, %v5984_v52  ;;  %9925 = vmatprep.mubr.msk.f32.mxu1 %vm11259_vm2, %v11258_v15  ;;  %9977 = vmatpush3.msra.mxu1 %v6256_v54 }
0x2050   :  { %v5960_v36 = vmul.f32 %v10517_v62, %v5955_v26  ;;  %9978 = vmatprep.subr.mxu1 %v6255_v59  ;;  %v6003_v32 = vmul.f32 %v5998_v27, %v5873_v14  ;;  %v6475_v27 = vld [vmem:[#allocation33 + $0x70] sm:$0xff] }
0x2051   :  { %v5994_v4 = vmul.f32 %v5989_v49, %v13504_v25  ;;  %9979 = vmatpush3.msra.mxu1 %v6255_v59  ;;  %v5875_v25 = vmul.f32 0.5, %v13506_v23  ;;  %v6250_v23 = vld [vmem:[#allocation27 + $0x38] sm:$0xff]  ;;  %v6474_v49 = vld [vmem:[#allocation33 + $0x68] sm:$0xff] }
0x2052   :  { %v5985_v19 = vmul.f32 %v10525_v47, %v5960_v36  ;;  %9980 = vmatprep.subr.mxu1 %v6254_v34  ;;  %9926 = vmatmul.mubr.f32.gmra.mxu1 %v6003_v32  ;;  %v6471_v36 = vld [vmem:[#allocation33 + $0x50] sm:$0xff]  ;;  %v6470_v47 = vld [vmem:[#allocation33 + $0x48] sm:$0xff]  ;;  %v6469_v32 = vld [vmem:[#allocation33 + $0x40] sm:$0xff] }
0x2053   :  { %v5999_v42 = vadd.f32 1.0, %v5994_v4  ;;  %9928 = vmatprep.mubr.msk.f32.mxu1 %vm11259_vm2, %v11258_v15  ;;  %9981 = vmatpush3.msra.mxu1 %v6254_v34  ;;  %v6472_v34 = vld [vmem:[#allocation33 + $0x58] sm:$0xff] }
0x2054   :  { %v5990_v29 = vsub.f32 1.0, %v5985_v19  ;;  %9982 = vmatprep.subr.mxu1 %v6253_v56  ;;  %v6468_v4 = vld [vmem:[#allocation33 + $0x38] sm:$0xff]  ;;  %v6467_v19 = vld [vmem:[#allocation33 + $0x30] sm:$0xff] }
0x2055   :  { %v6004_v39 = vmul.f32 %v5999_v42, %v5874_v40  ;;  %9983 = vmatpush3.msra.mxu1 %v6253_v56  ;;  %v6466_v56 = vld [vmem:[#allocation33 + $0x28] sm:$0xff]  ;;  %v6465_v40 = vld [vmem:[#allocation33 + $0x20] sm:$0xff]  ;;  %v6464_v42 = vld [vmem:[#allocation33 + $0x18] sm:$0xff] }
0x2056   :  { %v5995_v62 = vmul.f32 %v5990_v29, %v13511_v8  ;;  %9984 = vmatprep.subr.mxu1 %v6252_v20  ;;  %v6142_v8 = vld [vmem:[#allocation24 + $0x38] sm:$0xff] }
0x2057   :  { %9929 = vmatmul.mubr.f32.gmra.mxu1 %v6004_v39  ;;  %9950 = vmatprep.subr.mxu0 %v6142_v8  ;;  %v8039_v39 = vld [vmem:[#allocation29] ss:$0 sm:$0xff] }
0x2058   :  { %v6000_v6 = vadd.f32 1.0, %v5995_v62  ;;  %9931 = vmatprep.mubr.msk.f32.mxu1 %vm11259_vm2, %v11258_v15  ;;  %9985 = vmatpush3.msra.mxu1 %v6252_v20  ;;  %v6141_v15 = vld [vmem:[#allocation24 + $0x30] sm:$0xff]  ;;  %v6463_v62 = vld [vmem:[#allocation33 + $0x10] sm:$0xff]  ;;  %v6461_v20 = vld [vmem:[#allocation33] sm:$0xff] }
0x2059   :  { %9986 = vmatprep.subr.mxu1 %v6251_v58  ;;  %9951 = vmatpush3.msra.mxu0 %v6142_v8 }
0x205a   :  { %v6005_v45 = vmul.f32 %v6000_v6, %v5875_v25  ;;  %9987 = vmatpush3.msra.mxu1 %v6251_v58  ;;  %9952 = vmatprep.subr.mxu0 %v6141_v15  ;;  %v6462_v6 = vld [vmem:[#allocation33 + $0x8] sm:$0xff] }
0x205b   :  { %9988 = vmatprep.subr.mxu1 %v6250_v23  ;;  %9953 = vmatpush3.msra.mxu0 %v6141_v15 }
0x205c   :  { %9932 = vmatmul.mubr.f32.gmra.mxu1 %v6005_v45  ;;  %9954 = vmatprep.subr.mxu0 %v6140_v38 }
0x205d   :  { %9989 = vmatpush3.msra.mxu1 %v6250_v23  ;;  %9955 = vmatpush3.msra.mxu0 %v6140_v38 }
0x205e   :  { %9990 = vmatprep.subr.mxu1 %v6249_v51  ;;  %9956 = vmatprep.subr.mxu0 %v6139_v61 }
0x205f   :  { %9991 = vmatpush3.msra.mxu1 %v6249_v51  ;;  %9957 = vmatpush3.msra.mxu0 %v6139_v61 }
0x2060   :  { %9992 = vmatprep.subr.mxu1 %v6248_v33  ;;  %9958 = vmatprep.subr.mxu0 %v6138_v41 }
0x2061   :  { %9993 = vmatpush3.msra.mxu1 %v6248_v33  ;;  %9959 = vmatpush3.msra.mxu0 %v6138_v41 }
0x2062   :  { %9994 = vmatprep.subr.mxu1 %v6247_v31  ;;  %9960 = vmatprep.subr.mxu0 %v6137_v21 }
0x2063   :  { %9995 = vmatpush3.msra.mxu1 %v6247_v31  ;;  %9961 = vmatpush3.msra.mxu0 %v6137_v21 }
0x2064   :  { %9996 = vmatprep.subr.mxu1 %v6246_v30  ;;  %9962 = vmatprep.subr.mxu0 %v6136_v28 }
0x2065   :  { %9997 = vmatpush3.msra.mxu1 %v6246_v30  ;;  %9963 = vmatpush3.msra.mxu0 %v6136_v28 }
0x2066   :  { %9998 = vmatprep.subr.mxu1 %v6245_v50  ;;  %9964 = vmatprep.subr.mxu0 %v6135_v43 }
0x2067   :  { %9999 = vmatpush3.msra.mxu1 %v6245_v50  ;;  %9965 = vmatpush3.msra.mxu0 %v6135_v43 }
0x2068   :  { %10000 = vmatprep.subr.mxu1 %v6244_v55 }
0x2069   :  { %10001 = vmatpush3.msra.mxu1 %v6244_v55 }
0x206a   :  { %10002 = vmatprep.subr.mxu1 %v6243_v13 }
0x206b   :  { %10003 = vmatpush3.msra.mxu1 %v6243_v13 }
0x210a   :  { %v6097_v53 = vpop.f32.mrf.mxu1 }
0x210b   :  { %v6098_v0 = vadd.f32 %v8037_v7, %v6097_v53 }
0x210c   :  { %v9921_v9 = vpop.f32.mrf.mxu1 }
0x210d   :  { %v6121_v57 = vadd.f32 %v6098_v0, %v13384_v63 }
0x210e   :  { %v6102_v48 = vpop.f32.mrf.mxu1 }
0x210f   :  { %6126 = vst [vmem:[#allocation2] sm:$0xff] %v6121_v57  ;;  %v6103_v44 = vadd.f32 %v8037_v7, %v6102_v48 }
0x2110   :  { %v9924_v46 = vpop.f32.mrf.mxu1 }
0x2111   :  { %v6122_v37 = vadd.f32 %v6103_v44, %v13389_v17 }
0x2112   :  { %v6107_v2 = vpop.f32.mrf.mxu1 }
0x2113   :  { %6127 = vst [vmem:[#allocation2 + $0x8] sm:$0xff] %v6122_v37  ;;  %v6108_v1 = vadd.f32 %v8037_v7, %v6107_v2 }
0x2114   :  { %v9927_v35 = vpop.f32.mrf.mxu1 }
0x2115   :  { %v6123_v10 = vadd.f32 %v6108_v1, %v13394_v16 }
0x2117   :  { %v6112_v54 = vpop.f32.mrf.mxu1  ;;  %6128 = vst [vmem:[#allocation2 + $0x10] sm:$0xff] %v6123_v10 }
0x2118   :  { %v6113_v11 = vadd.f32 %v8037_v7, %v6112_v54 }
0x2119   :  { %v9930_v22 = vpop.f32.mrf.mxu1 }
0x211a   :  { %v6124_v24 = vadd.f32 %v6113_v11, %v13399_v60  ;;  %v6131_v12 = vld [vmem:[#allocation2 + $0x1] sm:$0xff]  ;;  %v6476_v60 = vld [vmem:[#allocation33 + $0x78] sm:$0xff] }
0x211b   :  { %9966 = vmatprep.mubr.f32.mxu0 %v6131_v12  ;;  %10004 = vmatprep.mubr.f32.mxu1 %v6131_v12 }
0x211c   :  { %6129 = vst [vmem:[#allocation2 + $0x18] sm:$0xff] %v6124_v24  ;;  %v6117_v63 = vpop.f32.mrf.mxu1  ;;  %10010 = vmatprep.subr.mxu0 %v6476_v60 }
0x211d   :  { %v6118_v52 = vadd.f32 %v8037_v7, %v6117_v63 }
0x211e   :  { %v9933_v59 = vpop.f32.mrf.mxu1  ;;  %v6132_v26 = vld [vmem:[#allocation2 + $0x9] sm:$0xff] }
0x211f   :  { %v6125_v17 = vadd.f32 %v6118_v52, %v13403_v18  ;;  %9967 = vmatmul.mubr.f32.vlgmr.msra.gmra.mxu0 %v6132_v26  ;;  %10005 = vmatmul.mubr.f32.vlgmr.msra.gmra.mxu1 %v6132_v26  ;;  %v6473_v18 = vld [vmem:[#allocation33 + $0x60] sm:$0xff] }
0x2120   :  { %10011 = vmatpush3.msra.mxu0 %v6476_v60 }
0x2121   :  { %6130 = vst [vmem:[#allocation2 + $0x20] sm:$0x3] %v6125_v17  ;;  %10012 = vmatprep.subr.mxu0 %v6475_v27 }
0x2122   :  { %10013 = vmatpush3.msra.mxu0 %v6475_v27 }
0x2123   :  { %v6133_v16 = vld [vmem:[#allocation2 + $0x12] sm:$0xff]  ;;  %10014 = vmatprep.subr.mxu0 %v6474_v49 }
0x2124   :  { %9969 = vmatprep.mubr.f32.mxu0 %v6133_v16  ;;  %10007 = vmatprep.mubr.f32.mxu1 %v6133_v16 }
0x2125   :  { %10015 = vmatpush3.msra.mxu0 %v6474_v49 }
0x2126   :  { %10016 = vmatprep.subr.mxu0 %v6473_v18 }
0x2127   :  { %10017 = vmatpush3.msra.mxu0 %v6473_v18 }
0x2128   :  { %v6134_v14 = vld [vmem:[#allocation2 + $0x1a] sm:$0xff]  ;;  %10018 = vmatprep.subr.mxu0 %v6472_v34 }
0x2129   :  { %9970 = vmatmul.mubr.f32.gmra.mxu0 %v6134_v14  ;;  %10008 = vmatmul.mubr.f32.gmra.mxu1 %v6134_v14 }
0x212a   :  { %10019 = vmatpush3.msra.mxu0 %v6472_v34 }
0x212b   :  { %10020 = vmatprep.subr.mxu0 %v6471_v36 }
0x212c   :  { %10021 = vmatpush3.msra.mxu0 %v6471_v36 }
0x212d   :  { %10022 = vmatprep.subr.mxu0 %v6470_v47 }
0x212e   :  { %10023 = vmatpush3.msra.mxu0 %v6470_v47 }
0x212f   :  { %10024 = vmatprep.subr.mxu0 %v6469_v32 }
0x2130   :  { %10025 = vmatpush3.msra.mxu0 %v6469_v32 }
0x2131   :  { %10026 = vmatprep.subr.mxu0 %v6468_v4 }
0x2132   :  { %10027 = vmatpush3.msra.mxu0 %v6468_v4 }
0x2133   :  { %10028 = vmatprep.subr.mxu0 %v6467_v19 }
0x2134   :  { %10029 = vmatpush3.msra.mxu0 %v6467_v19 }
0x2135   :  { %10030 = vmatprep.subr.mxu0 %v6466_v56 }
0x2136   :  { %10031 = vmatpush3.msra.mxu0 %v6466_v56 }
0x2137   :  { %10032 = vmatprep.subr.mxu0 %v6465_v40 }
0x2138   :  { %10033 = vmatpush3.msra.mxu0 %v6465_v40 }
0x2139   :  { %10034 = vmatprep.subr.mxu0 %v6464_v42 }
0x213a   :  { %10035 = vmatpush3.msra.mxu0 %v6464_v42 }
0x213b   :  { %10036 = vmatprep.subr.mxu0 %v6463_v62 }
0x213c   :  { %10037 = vmatpush3.msra.mxu0 %v6463_v62 }
0x213d   :  { %10038 = vmatprep.subr.mxu0 %v6462_v6 }
0x213e   :  { %10039 = vmatpush3.msra.mxu0 %v6462_v6 }
0x213f   :  { %10040 = vmatprep.subr.mxu0 %v6461_v20 }
0x2140   :  { %10041 = vmatpush3.msra.mxu0 %v6461_v20 }
0x21df   :  { %v10006_v29 = vpop.f32.mrf.mxu1 }
0x21e0   :  { %v6338_v45 = vadd.f32 %v10006_v29, %v8039_v39 }
0x21e1   :  { %v6332_v25 = vpop.f32.mrf.mxu1 }
0x21e2   :  { %v6333_v3 = vadd.f32 %v8039_v39, %v6332_v25 }
0x21e4   :  { %v6351_v5 = vadd.f32 %v6338_v45, %v6333_v3 }
0x21e6   :  { %v6352_v58 = vrot.slane %v6351_v5, 4 }
0x21e8   :  { %v6353_v8 = vadd.f32 %v6352_v58, %v6351_v5 }
0x21e9   :  { %v10009_v23 = vpop.f32.mrf.mxu1 }
0x21ea   :  { %v6354_v15 = vrot.slane %v6353_v8, 2  ;;  %v6348_v38 = vadd.f32 %v10009_v23, %v8039_v39 }
0x21eb   :  { %v6342_v51 = vpop.f32.mrf.mxu1 }
0x21ec   :  { %v6343_v33 = vadd.f32 %v8039_v39, %v6342_v51  ;;  %v6355_v61 = vadd.f32 %v6354_v15, %v6353_v8 }
0x21ee   :  { %v6358_v31 = vadd.f32 %v6348_v38, %v6343_v33  ;;  %v6356_v41 = vrot.slane %v6355_v61, 1 }
0x21f0   :  { %v6359_v30 = vrot.slane %v6358_v31, 4  ;;  %v6357_v21 = vadd.f32 %v6356_v41, %v6355_v61 }
0x21f2   :  { %v6360_v50 = vadd.f32 %v6359_v30, %v6358_v31  ;;  %v6366_v28 = vmul.f32 0.0625, %v6357_v21 }
0x21f4   :  { %v6361_v55 = vrot.slane %v6360_v50, 2  ;;  %v6368_v43 = vsub.f32 %v6333_v3, %v6366_v28  ;;  %v6369_v13 = vsub.f32 %v6338_v45, %v6366_v28 }
0x21f6   :  { %v6362_v7 = vadd.f32 %v6361_v55, %v6360_v50  ;;  %v6372_v53 = vmul.f32 %v6368_v43, %v6368_v43  ;;  %v6373_v0 = vmul.f32 %v6369_v13, %v6369_v13 }
0x21f8   :  { %v6363_v9 = vrot.slane %v6362_v7, 1  ;;  %v6376_v57 = vadd.f32 %v6373_v0, %v6372_v53 }
0x21fa   :  { %v6364_v48 = vadd.f32 %v6363_v9, %v6362_v7  ;;  %v6377_v44 = vrot.slane %v6376_v57, 4  ;;  %v8040_v7 = vld [vmem:[#allocation30] ss:$0 sm:$0xff] }
0x21fc   :  { %v6367_v46 = vmul.f32 0.0625, %v6364_v48  ;;  %v6378_v37 = vadd.f32 %v6377_v44, %v6376_v57  ;;  %v8041_v48 = vld [vmem:[#allocation32] ss:$0 sm:$0xff] }
0x21fe   :  { %v6370_v2 = vsub.f32 %v6343_v33, %v6367_v46  ;;  %v6371_v1 = vsub.f32 %v6348_v38, %v6367_v46  ;;  %v6379_v35 = vrot.slane %v6378_v37, 2 }
0x2200   :  { %v6374_v10 = vmul.f32 %v6370_v2, %v6370_v2  ;;  %v6375_v54 = vmul.f32 %v6371_v1, %v6371_v1  ;;  %v6380_v11 = vadd.f32 %v6379_v35, %v6378_v37 }
0x2202   :  { %v6383_v22 = vadd.f32 %v6375_v54, %v6374_v10  ;;  %v6381_v24 = vrot.slane %v6380_v11, 1 }
0x2204   :  { %v6384_v12 = vrot.slane %v6383_v22, 4  ;;  %v6382_v63 = vadd.f32 %v6381_v24, %v6380_v11 }
0x2206   :  { %v6385_v52 = vadd.f32 %v6384_v12, %v6383_v22  ;;  %v6390_v59 = vmul.f32 0.0625, %v6382_v63  ;;  %v13538_v63 = vpop.f32.mrf.mxu0 }
0x2208   :  { %v6386_v17 = vrot.slane %v6385_v52, 2  ;;  %v6392_v26 = vadd.f32 1e-05, %v6390_v59 }
0x220a   :  { %v6387_v16 = vadd.f32 %v6386_v17, %v6385_v52  ;;  %10526 = vrsqrt.f32 %v6392_v26  ;;  %v13540_v52 = vpop.f32.mrf.mxu0 }
0x220c   :  { %v6388_v14 = vrot.slane %v6387_v16, 1  ;;  %v13542_v59 = vpop.f32.mrf.mxu0 }
0x220e   :  { %v6389_v60 = vadd.f32 %v6388_v14, %v6387_v16  ;;  %v13544_v17 = vpop.f32.mrf.mxu0  ;;  %v8042_v16 = vld [vmem:[#allocation35] ss:$0 sm:$0xff] }
0x2210   :  { %v6391_v27 = vmul.f32 0.0625, %v6389_v60 }
0x2212   :  { %v6393_v49 = vadd.f32 1e-05, %v6391_v27 }
0x2214   :  { %10528 = vrsqrt.f32 %v6393_v49 }
0x2217   :  { %v10527_v18 = vpop.eup %10526 }
0x2218   :  { %v6396_v34 = vmul.f32 %v10527_v18, %v6368_v43  ;;  %v6397_v36 = vmul.f32 %v10527_v18, %v6369_v13 }
0x221a   :  { %v6402_v32 = vadd.f32 %v6397_v36, %v6396_v34 }
0x2221   :  { %v10529_v47 = vpop.eup %10528 }
0x2222   :  { %v6398_v4 = vmul.f32 %v10529_v47, %v6370_v2  ;;  %v6399_v19 = vmul.f32 %v10529_v47, %v6371_v1 }
0x2224   :  { %v6403_v56 = vadd.f32 %v6402_v32, %v6398_v4 }
0x2226   :  { %v6404_v40 = vadd.f32 %v6403_v56, %v6399_v19 }
0x2228   :  { %v6405_v42 = vrot.slane %v6404_v40, 4 }
0x222a   :  { %v6406_v29 = vadd.f32 %v6405_v42, %v6404_v40  ;;  %v11264_v42 = vmov 0  }
0x222b   :  { %10285 = vset.pattern.permute.xlu0 %v11264_v42 }
0x222c   :  { %v6407_v39 = vrot.slane %v6406_v29, 2 }
0x222e   :  { %v6408_v62 = vadd.f32 %v6407_v39, %v6406_v29 }
0x2230   :  { %v6409_v25 = vrot.slane %v6408_v62, 1 }
0x2232   :  { %v6410_v6 = vadd.f32 %v6409_v25, %v6408_v62 }
0x2234   :  { %v6412_v45 = vmul.f32 0.03125, %v6410_v6 }
0x2236   :  { %v6413_v3 = vsub.f32 %v6396_v34, %v6412_v45  ;;  %v6414_v20 = vsub.f32 %v6397_v36, %v6412_v45  ;;  %v6415_v5 = vsub.f32 %v6398_v4, %v6412_v45  ;;  %v6416_v58 = vsub.f32 %v6399_v19, %v6412_v45 }
0x2238   :  { %v6417_v8 = vmul.f32 %v6413_v3, %v6413_v3  ;;  %v6418_v23 = vmul.f32 %v6414_v20, %v6414_v20  ;;  %v6419_v15 = vmul.f32 %v6415_v5, %v6415_v5  ;;  %v6420_v38 = vmul.f32 %v6416_v58, %v6416_v58 }
0x223a   :  { %v6421_v51 = vadd.f32 %v6418_v23, %v6417_v8 }
0x223c   :  { %v6422_v33 = vadd.f32 %v6421_v51, %v6419_v15 }
0x223e   :  { %v6423_v61 = vadd.f32 %v6422_v33, %v6420_v38 }
0x2240   :  { %v6424_v31 = vrot.slane %v6423_v61, 4 }
0x2242   :  { %v6425_v41 = vadd.f32 %v6424_v31, %v6423_v61 }
0x2244   :  { %v6426_v30 = vrot.slane %v6425_v41, 2 }
0x2246   :  { %v6427_v21 = vadd.f32 %v6426_v30, %v6425_v41 }
0x2248   :  { %v6428_v50 = vrot.slane %v6427_v21, 1 }
0x224a   :  { %v6429_v28 = vadd.f32 %v6428_v50, %v6427_v21 }
0x224c   :  { %v6430_v55 = vmul.f32 0.03125, %v6429_v28 }
0x224e   :  { %v6431_v43 = vadd.f32 1e-05, %v6430_v55 }
0x2250   :  { %10530 = vrsqrt.f32 %v6431_v43 }
0x225d   :  { %v10531_v13 = vpop.eup %10530 }
0x225e   :  { %v6433_v53 = vmul.f32 %v10531_v13, %v6413_v3  ;;  %v6434_v0 = vmul.f32 %v10531_v13, %v6414_v20  ;;  %v6435_v9 = vmul.f32 %v10531_v13, %v6415_v5  ;;  %v6436_v57 = vmul.f32 %v10531_v13, %v6416_v58 }
0x2260   :  { %v6443_v44 = vmul.f32 %v8040_v7, %v6433_v53  ;;  %v6444_v46 = vmul.f32 %v8040_v7, %v6434_v0  ;;  %v6445_v37 = vmul.f32 %v8040_v7, %v6435_v9  ;;  %v6446_v2 = vmul.f32 %v8040_v7, %v6436_v57 }
0x2262   :  { %v6453_v1 = vadd.f32 %v8041_v48, %v6443_v44  ;;  %v6454_v35 = vadd.f32 %v8041_v48, %v6444_v46  ;;  %v6455_v10 = vadd.f32 %v8041_v48, %v6445_v37  ;;  %v6456_v22 = vadd.f32 %v8041_v48, %v6446_v2 }
0x2264   :  { %v6457_v54 = vmax.f32 %v6453_v1, 0.0  ;;  %v6458_v11 = vmax.f32 %v6454_v35, 0.0  ;;  %v6459_v24 = vmax.f32 %v6455_v10, 0.0  ;;  %v6460_v12 = vmax.f32 %v6456_v22, 0.0 }
0x2266   :  { %10042 = vmatprep.mubr.f32.mxu0 %v6457_v54 }
0x2267   :  { %10043 = vmatmul.mubr.f32.vlgmr.msra.gmra.mxu0 %v6458_v11 }
0x2268   :  { %10045 = vmatprep.mubr.f32.mxu0 %v6459_v24 }
0x226b   :  { %10046 = vmatmul.mubr.f32.gmra.mxu0 %v6460_v12 }
0x2327   :  { %v10044_v26 = vpop.f32.mrf.mxu0 }
0x2328   :  { %v6556_v60 = vadd.f32 %v10044_v26, %v8042_v16 }
0x2329   :  { %v6550_v14 = vpop.f32.mrf.mxu0 }
0x232a   :  { %v6551_v27 = vadd.f32 %v8042_v16, %v6550_v14 }
0x232b   :  { %v10047_v49 = vpop.f32.mrf.mxu0 }
0x232c   :  { %v6569_v18 = vadd.f32 %v6556_v60, %v6551_v27  ;;  %v6566_v47 = vadd.f32 %v10047_v49, %v8042_v16 }
0x232d   :  { %v6560_v34 = vpop.f32.mrf.mxu0 }
0x232e   :  { %v6570_v36 = vrot.slane %v6569_v18, 4  ;;  %v6561_v32 = vadd.f32 %v8042_v16, %v6560_v34 }
0x2330   :  { %v6571_v4 = vadd.f32 %v6570_v36, %v6569_v18  ;;  %v6576_v19 = vadd.f32 %v6566_v47, %v6561_v32 }
0x2332   :  { %v6572_v56 = vrot.slane %v6571_v4, 2  ;;  %v6577_v40 = vrot.slane %v6576_v19, 4 }
0x2334   :  { %v6573_v29 = vadd.f32 %v6572_v56, %v6571_v4  ;;  %v6578_v39 = vadd.f32 %v6577_v40, %v6576_v19 }
0x2336   :  { %v6574_v62 = vrot.slane %v6573_v29, 1  ;;  %v6579_v25 = vrot.slane %v6578_v39, 2 }
0x2338   :  { %v6575_v6 = vadd.f32 %v6574_v62, %v6573_v29  ;;  %v6580_v45 = vadd.f32 %v6579_v25, %v6578_v39 }
0x233a   :  { %v6583_v3 = vmul.f32 0.0625, %v6575_v6  ;;  %v6581_v20 = vrot.slane %v6580_v45, 1 }
0x233c   :  { %v6585_v5 = vsub.f32 %v6551_v27, %v6583_v3  ;;  %v6586_v58 = vsub.f32 %v6556_v60, %v6583_v3  ;;  %v6582_v8 = vadd.f32 %v6581_v20, %v6580_v45 }
0x233e   :  { %v6589_v23 = vmul.f32 %v6585_v5, %v6585_v5  ;;  %v6590_v15 = vmul.f32 %v6586_v58, %v6586_v58  ;;  %v6584_v51 = vmul.f32 0.0625, %v6582_v8 }
0x2340   :  { %v6593_v38 = vadd.f32 %v6590_v15, %v6589_v23  ;;  %v6587_v33 = vsub.f32 %v6561_v32, %v6584_v51  ;;  %v6588_v61 = vsub.f32 %v6566_v47, %v6584_v51  ;;  %v8043_v15 = vld [vmem:[#allocation36] ss:$0 sm:$0xff]  ;;  %v8038_v51 = vld [vmem:[#allocation26] ss:$0 sm:$0xff] }
0x2342   :  { %v6594_v31 = vrot.slane %v6593_v38, 4  ;;  %v6591_v41 = vmul.f32 %v6587_v33, %v6587_v33  ;;  %v6592_v30 = vmul.f32 %v6588_v61, %v6588_v61 }
0x2344   :  { %v6595_v21 = vadd.f32 %v6594_v31, %v6593_v38  ;;  %v6600_v50 = vadd.f32 %v6592_v30, %v6591_v41  ;;  %v8044_v41 = vld [vmem:[#allocation38] ss:$0 sm:$0xff] }
0x2346   :  { %v6596_v28 = vrot.slane %v6595_v21, 2  ;;  %v6601_v55 = vrot.slane %v6600_v50, 4 }
0x2348   :  { %v6597_v43 = vadd.f32 %v6596_v28, %v6595_v21  ;;  %v6602_v13 = vadd.f32 %v6601_v55, %v6600_v50  ;;  %v6230_v55 = vadd.f32 %v13538_v63, %v8038_v51 }
0x234a   :  { %v6598_v7 = vrot.slane %v6597_v43, 1  ;;  %v6603_v53 = vrot.slane %v6602_v13, 2 }
0x234c   :  { %v6599_v0 = vadd.f32 %v6598_v7, %v6597_v43  ;;  %v6604_v9 = vadd.f32 %v6603_v53, %v6602_v13  ;;  %v6225_v43 = vadd.f32 %v8038_v51, %v13540_v52  ;;  %v6240_v13 = vadd.f32 %v13542_v59, %v8038_v51 }
0x234e   :  { %v6607_v57 = vmul.f32 0.0625, %v6599_v0  ;;  %v6605_v48 = vrot.slane %v6604_v9, 1 }
0x2350   :  { %v6609_v44 = vadd.f32 1e-05, %v6607_v57  ;;  %v6606_v46 = vadd.f32 %v6605_v48, %v6604_v9  ;;  %v6235_v57 = vadd.f32 %v8038_v51, %v13544_v17 }
0x2352   :  { %10532 = vrsqrt.f32 %v6609_v44  ;;  %v6608_v37 = vmul.f32 0.0625, %v6606_v46 }
0x2354   :  { %v6610_v2 = vadd.f32 1e-05, %v6608_v37 }
0x2356   :  { %10534 = vrsqrt.f32 %v6610_v2  ;;  %v8045_v2 = vld [vmem:[#allocation39] ss:$0 sm:$0xff] }
0x235f   :  { %v10533_v1 = vpop.eup %10532 }
0x2360   :  { %v6613_v35 = vmul.f32 %v10533_v1, %v6585_v5  ;;  %v6614_v10 = vmul.f32 %v10533_v1, %v6586_v58 }
0x2362   :  { %v6619_v11 = vadd.f32 %v6614_v10, %v6613_v35 }
0x2363   :  { %v10535_v54 = vpop.eup %10534 }
0x2364   :  { %v6615_v22 = vmul.f32 %v10535_v54, %v6587_v33  ;;  %v6616_v24 = vmul.f32 %v10535_v54, %v6588_v61 }
0x2366   :  { %v6620_v12 = vadd.f32 %v6619_v11, %v6615_v22  ;;  %v8046_v11 = vld [vmem:[#allocation3] ss:$0 sm:$0xff] }
0x2368   :  { %v6621_v26 = vadd.f32 %v6620_v12, %v6616_v24 }
0x236a   :  { %v6622_v16 = vrot.slane %v6621_v26, 4 }
0x236c   :  { %v6623_v14 = vadd.f32 %v6622_v16, %v6621_v26 }
0x236e   :  { %v6624_v60 = vrot.slane %v6623_v14, 2 }
0x2370   :  { %v6625_v27 = vadd.f32 %v6624_v60, %v6623_v14 }
0x2372   :  { %v6626_v49 = vrot.slane %v6625_v27, 1 }
0x2374   :  { %v6627_v18 = vadd.f32 %v6626_v49, %v6625_v27 }
0x2376   :  { %v6628_v34 = vmul.f32 0.03125, %v6627_v18  ;;  %v6726_v18 = vlaneseq }
0x2378   :  { %v6629_v36 = vsub.f32 %v6613_v35, %v6628_v34  ;;  %v6630_v47 = vsub.f32 %v6614_v10, %v6628_v34  ;;  %v6631_v32 = vsub.f32 %v6615_v22, %v6628_v34  ;;  %v6632_v4 = vsub.f32 %v6616_v24, %v6628_v34 }
0x2379   :  { %v6727_v34 = vand.u32 127, %v6726_v18 }
0x237a   :  { %v6633_v19 = vmul.f32 %v6629_v36, %v6629_v36  ;;  %v6634_v56 = vmul.f32 %v6630_v47, %v6630_v47  ;;  %v6635_v40 = vmul.f32 %v6631_v32, %v6631_v32  ;;  %v6636_v29 = vmul.f32 %v6632_v4, %v6632_v4 }
0x237c   :  { %v6637_v42 = vadd.f32 %v6634_v56, %v6633_v19 }
0x237e   :  { %v6638_v39 = vadd.f32 %v6637_v42, %v6635_v40 }
0x2380   :  { %v6639_v62 = vadd.f32 %v6638_v39, %v6636_v29 }
0x2382   :  { %v6640_v25 = vrot.slane %v6639_v62, 4 }
0x2384   :  { %v6641_v6 = vadd.f32 %v6640_v25, %v6639_v62 }
0x2386   :  { %v6642_v45 = vrot.slane %v6641_v6, 2 }
0x2388   :  { %v6643_v3 = vadd.f32 %v6642_v45, %v6641_v6 }
0x238a   :  { %v6644_v20 = vrot.slane %v6643_v3, 1 }
0x238c   :  { %v6645_v5 = vadd.f32 %v6644_v20, %v6643_v3 }
0x238e   :  { %v6646_v58 = vmul.f32 0.03125, %v6645_v5 }
0x2390   :  { %v6647_v8 = vadd.f32 1e-05, %v6646_v58 }
0x2392   :  { %10536 = vrsqrt.f32 %v6647_v8 }
0x239f   :  { %v10537_v23 = vpop.eup %10536 }
0x23a0   :  { %v6651_v38 = vmul.f32 %v10537_v23, %v6631_v32  ;;  %v6652_v33 = vmul.f32 %v10537_v23, %v6632_v4  ;;  %v6650_v61 = vmul.f32 %v10537_v23, %v6630_v47  ;;  %v6649_v31 = vmul.f32 %v10537_v23, %v6629_v36 }
0x23a1   :  { %v6729_v36 = vshrl.u32 %v6726_v18, 7  ;;  %v6732_v47 = vadd.s32 4294967288, %v6727_v34  ;;  %v7126_v18 = vld [vmem:[#allocation41 + $0x70] sm:$0xff] }
0x23a2   :  { %v6661_v30 = vmul.f32 %v8043_v15, %v6651_v38  ;;  %v6662_v21 = vmul.f32 %v8043_v15, %v6652_v33  ;;  %v6660_v50 = vmul.f32 %v8043_v15, %v6650_v61  ;;  %v6659_v28 = vmul.f32 %v8043_v15, %v6649_v31  ;;  %v10576_v15 = vld [vmem:[%s13729_s30] sm:$0xff]  ;;  %v10577_v38 = vld [vmem:[%s13729_s30 + $0x8] sm:$0xff] }
0x23a3   :  { %v6730_v32 = vsub.s32 %v6727_v34, %v6729_v36  ;;  %v6735_v19 = vsub.s32 %v6732_v47, %v6729_v36  ;;  %v7125_v34 = vld [vmem:[#allocation41 + $0x68] sm:$0xff]  ;;  %v7124_v36 = vld [vmem:[#allocation41 + $0x60] sm:$0xff]  ;;  %v7123_v47 = vld [vmem:[#allocation41 + $0x58] sm:$0xff] }
0x23a4   :  { %v6671_v7 = vadd.f32 %v8044_v41, %v6661_v30  ;;  %v6670_v53 = vadd.f32 %v8044_v41, %v6660_v50  ;;  %v6669_v0 = vadd.f32 %v8044_v41, %v6659_v28  ;;  %v6672_v9 = vadd.f32 %v8044_v41, %v6662_v21 }
0x23a6   :  { %v6674_v48 = vadd.f32 %v6670_v53, %v6230_v55  ;;  %v6673_v44 = vadd.f32 %v6669_v0, %v6225_v43  ;;  %v6676_v46 = vadd.f32 %v6672_v9, %v6240_v13  ;;  %v6675_v37 = vadd.f32 %v6671_v7, %v6235_v57  ;;  %v7143_v43 = vld [vmem:[#allocation42 + $0x78] sm:$0xff]  ;;  %v7142_v13 = vld [vmem:[#allocation42 + $0x70] sm:$0xff]  ;;  %v7141_v7 = vld [vmem:[#allocation42 + $0x68] sm:$0xff] }
0x23a7   :  { %10076 = vmatprep.subr.mxu0 %v7143_v43  ;;  %v7140_v53 = vld [vmem:[#allocation42 + $0x60] sm:$0xff]  ;;  %v7139_v0 = vld [vmem:[#allocation42 + $0x58] sm:$0xff]  ;;  %v7138_v9 = vld [vmem:[#allocation42 + $0x50] sm:$0xff] }
0x23a8   :  { %v13550_v1 = vmax.f32 %v6674_v48, 0.0  ;;  %v13552_v35 = vmax.f32 %v6673_v44, 0.0  ;;  %v13557_v59 = vmax.f32 %v6676_v46, 0.0  ;;  %v13559_v10 = vmax.f32 %v6675_v37, 0.0  ;;  %10077 = vmatpush3.msra.mxu0 %v7143_v43  ;;  %v7137_v57 = vld [vmem:[#allocation42 + $0x48] sm:$0xff]  ;;  %v7136_v48 = vld [vmem:[#allocation42 + $0x40] sm:$0xff] }
0x23a9   :  { %10078 = vmatprep.subr.mxu0 %v7142_v13  ;;  %v7135_v44 = vld [vmem:[#allocation42 + $0x38] sm:$0xff]  ;;  %v7134_v46 = vld [vmem:[#allocation42 + $0x30] sm:$0xff]  ;;  %v7133_v37 = vld [vmem:[#allocation42 + $0x28] sm:$0xff] }
0x23aa   :  { %10048 = vmatprep.subr.mxu1 %v13550_v1  ;;  %v6689_v63 = vmul.f32 %v8045_v2, %v13550_v1  ;;  %v6688_v52 = vmul.f32 %v8045_v2, %v13552_v35  ;;  %v6691_v17 = vmul.f32 %v8045_v2, %v13557_v59  ;;  %v6690_v54 = vmul.f32 %v8045_v2, %v13559_v10  ;;  %v7132_v2 = vld [vmem:[#allocation42 + $0x20] sm:$0xff] }
0x23ab   :  { %10049 = vmatpush3.msra.mxu1 %v13550_v1  ;;  %10079 = vmatpush3.msra.mxu0 %v7142_v13 }
0x23ac   :  { %6694 = vadd.xlane.f32.xlu1 %v6689_v63  ;;  %10050 = vmatprep.subr.mxu1 %v13552_v35  ;;  %v7131_v63 = vld [vmem:[#allocation42 + $0x18] sm:$0xff] }
0x23ad   :  { %6692 = vadd.xlane.f32.xlu0 %v6688_v52  ;;  %10051 = vmatpush3.msra.mxu1 %v13552_v35 }
0x23ae   :  { %10055 = vmatprep.subr.mxu1 %v13557_v59  ;;  %10080 = vmatprep.subr.mxu0 %v7141_v7 }
0x23af   :  { %10081 = vmatpush3.msra.mxu0 %v7141_v7 }
0x23b0   :  { %6698 = vadd.xlane.f32.xlu1 %v6691_v17  ;;  %10082 = vmatprep.subr.mxu0 %v7140_v53 }
0x23b1   :  { %6696 = vadd.xlane.f32.xlu0 %v6690_v54  ;;  %10083 = vmatpush3.msra.mxu0 %v7140_v53 }
0x23b2   :  { %10084 = vmatprep.subr.mxu0 %v7139_v0 }
0x23b3   :  { %10085 = vmatpush3.msra.mxu0 %v7139_v0  ;;  %v8055_v0 = vld [vmem:[#allocation44] ss:$0 sm:$0xff] }
0x23b4   :  { %10086 = vmatprep.subr.mxu0 %v7138_v9 }
0x23b5   :  { %10087 = vmatpush3.msra.mxu0 %v7138_v9 }
0x23b6   :  { %10088 = vmatprep.subr.mxu0 %v7137_v57 }
0x23b7   :  { %10089 = vmatpush3.msra.mxu0 %v7137_v57 }
0x23b8   :  { %10090 = vmatprep.subr.mxu0 %v7136_v48 }
0x23b9   :  { %10091 = vmatpush3.msra.mxu0 %v7136_v48 }
0x23ba   :  { %10092 = vmatprep.subr.mxu0 %v7135_v44 }
0x23bb   :  { %10093 = vmatpush3.msra.mxu0 %v7135_v44 }
0x23bc   :  { %10094 = vmatprep.subr.mxu0 %v7134_v46 }
0x23bd   :  { %10095 = vmatpush3.msra.mxu0 %v7134_v46 }
0x23be   :  { %10096 = vmatprep.subr.mxu0 %v7133_v37 }
0x23bf   :  { %10097 = vmatpush3.msra.mxu0 %v7133_v37 }
0x23c0   :  { %10098 = vmatprep.subr.mxu0 %v7132_v2 }
0x23c1   :  { %10099 = vmatpush3.msra.mxu0 %v7132_v2 }
0x23c2   :  { %10100 = vmatprep.subr.mxu0 %v7131_v63 }
0x23c3   :  { %10101 = vmatpush3.msra.mxu0 %v7131_v63 }
0x23c7   :  { %6707 = vperm.xlu0 %10285, %v8046_v11  }
0x2435   :  { %v6695_v24 = vpop.xlane.xlu1 %6694 }
0x2436   :  { %v6693_v22 = vpop.xlane.xlu0 %6692 }
0x2439   :  { %v6699_v16 = vpop.xlane.xlu1 %6698 }
0x243a   :  { %v6697_v12 = vpop.xlane.xlu0 %6696 }
0x2442   :  { %v6708_v26 = vpop.permute.xlu0 %6707 }
0x2443   :  { %v6710_v14 = vadd.f32 %v6708_v26, %v6693_v22  ;;  %v6711_v60 = vadd.f32 %v6708_v26, %v6695_v24  ;;  %v6712_v27 = vadd.f32 %v6708_v26, %v6697_v12  ;;  %v6713_v49 = vadd.f32 %v6708_v26, %v6699_v16 }
0x2445   :  { %10538 = vtanh.f32 %v6710_v14 }
0x2446   :  { %10540 = vtanh.f32 %v6711_v60 }
0x2447   :  { %10542 = vtanh.f32 %v6712_v27 }
0x2448   :  { %10544 = vtanh.f32 %v6713_v49  ;;  %v7127_v49 = vld [vmem:[#allocation41 + $0x78] sm:$0xff] }
0x2452   :  { %v10539_v4 = vpop.eup %10538 }
0x2453   :  { %v10541_v56 = vpop.eup %10540  ;;  %v6718_v40 = vmax.f32 %v10539_v4, 0.0  ;;  %v7121_v4 = vld [vmem:[#allocation41 + $0x48] sm:$0xff] }
0x2454   :  { %v10543_v42 = vpop.eup %10542  ;;  %v6719_v29 = vmax.f32 %v10541_v56, 0.0  ;;  %v7119_v56 = vld [vmem:[#allocation41 + $0x38] sm:$0xff] }
0x2455   :  { %v10545_v39 = vpop.eup %10544  ;;  %v6720_v62 = vmax.f32 %v10543_v42, 0.0  ;;  %v6731_v25 = vrot.slane %v6718_v40, %v6730_v32  ;;  %v7117_v42 = vld [vmem:[#allocation41 + $0x28] sm:$0xff] }
0x2456   :  { %v6721_v6 = vmax.f32 %v10545_v39, 0.0  ;;  %v6736_v45 = vrot.slane %v6719_v29, %v6735_v19  ;;  %v7115_v39 = vld [vmem:[#allocation41 + $0x18] sm:$0xff] }
0x2457   :  { %v6742_v3 = vrot.slane %v6720_v62, %v6730_v32  ;;  %v7122_v32 = vld [vmem:[#allocation41 + $0x50] sm:$0xff] }
0x2458   :  { %v6746_v20 = vrot.slane %v6721_v6, %v6735_v19  ;;  %v6738_v5 = vsel %vm6737_vm1, %v6736_v45, %v6731_v25  ;;  %v7120_v19 = vld [vmem:[#allocation41 + $0x40] sm:$0xff] }
0x2459   :  { %v6768_v58 = vmul.f32 %v6738_v5, %v6718_v40  ;;  %v6769_v8 = vmul.f32 %v6738_v5, %v6719_v29  ;;  %v7118_v40 = vld [vmem:[#allocation41 + $0x30] sm:$0xff]  ;;  %v7116_v29 = vld [vmem:[#allocation41 + $0x20] sm:$0xff] }
0x245a   :  { %v6747_v23 = vsel %vm6737_vm1, %v6746_v20, %v6742_v3  ;;  %v7112_v3 = vld [vmem:[#allocation41] sm:$0xff] }
0x245b   :  { %v6772_v51 = vadd.f32 %v10576_v15, %v6768_v58  ;;  %v13569_v33 = vadd.f32 %v10577_v38, %v6769_v8  ;;  %v6770_v61 = vmul.f32 %v6747_v23, %v6720_v62  ;;  %v6771_v31 = vmul.f32 %v6747_v23, %v6721_v6  ;;  %v7114_v62 = vld [vmem:[#allocation41 + $0x10] sm:$0xff]  ;;  %v7113_v6 = vld [vmem:[#allocation41 + $0x8] sm:$0xff]  ;;  %v7128_v23 = vld [vmem:[#allocation42] sm:$0xff] }
0x245c   :  { %v7130_v58 = vld [vmem:[#allocation42 + $0x10] sm:$0xff]  ;;  %v7129_v8 = vld [vmem:[#allocation42 + $0x8] sm:$0xff] }
0x245d   :  { %10052 = vmatprep.mubr.msk.f32.mxu1 %vm558_vm0, %v6772_v51  ;;  %v6779_v41 = vsel %vm558_vm0, %v13569_v33, 0.0  ;;  %v13574_v30 = vadd.f32 %v10576_v15, %v6770_v61  ;;  %v13581_v21 = vadd.f32 %v10577_v38, %v6771_v31  ;;  %v6776_v50 = vsel %vm558_vm0, %v6772_v51, 0.0  ;;  %10102 = vmatprep.subr.mxu0 %v7130_v58 }
0x245e   :  { %6780 = vadd.xlane.f32.xlu1 %v6779_v41  ;;  %10053 = vmatmul.mubr.msk.f32.vlgmr.msra.gmra.mxu1 %vm558_vm0, %v13569_v33 }
0x245f   :  { %10056 = vmatpush3.msra.mxu1 %v13557_v59  ;;  %10059 = vmatprep.mubr.msk.f32.mxu1 %vm558_vm0, %v13574_v30  ;;  %v6785_v28 = vsel %vm558_vm0, %v13581_v21, 0.0  ;;  %v6782_v55 = vsel %vm558_vm0, %v13574_v30, 0.0 }
0x2460   :  { %10057 = vmatprep.subr.mxu1 %v13559_v10  ;;  %10103 = vmatpush3.msra.mxu0 %v7130_v58 }
0x2461   :  { %10058 = vmatpush3.msra.mxu1 %v13559_v10  ;;  %10104 = vmatprep.subr.mxu0 %v7129_v8 }
0x2462   :  { %10060 = vmatmul.mubr.msk.f32.vlgmr.msra.gmra.mxu1 %vm558_vm0, %v13581_v21  ;;  %6777 = vadd.xlane.f32.xlu1 %v6776_v50 }
0x2463   :  { %10066 = vmatprep.mubr.msk.f32.mxu1 %vm558_vm0, %v6772_v51  ;;  %10105 = vmatpush3.msra.mxu0 %v7129_v8 }
0x2464   :  { %10106 = vmatprep.subr.mxu0 %v7128_v23 }
0x2465   :  { %10107 = vmatpush3.msra.mxu0 %v7128_v23 }
0x2466   :  { %6786 = vadd.xlane.f32.xlu1 %v6785_v28 }
0x246a   :  { %6783 = vadd.xlane.f32.xlu1 %v6782_v55 }
0x24e7   :  { %v6781_v52 = vpop.xlane.xlu1 %6780 }
0x24e8   :  { %10546 = vrsqrt.f32 %v6781_v52 }
0x24eb   :  { %v6778_v17 = vpop.xlane.xlu1 %6777 }
0x24ec   :  { %10548 = vrsqrt.f32 %v6778_v17 }
0x24ef   :  { %v6787_v54 = vpop.xlane.xlu1 %6786 }
0x24f0   :  { %10550 = vrsqrt.f32 %v6787_v54 }
0x24f3   :  { %v6784_v11 = vpop.xlane.xlu1 %6783 }
0x24f4   :  { %10552 = vrsqrt.f32 %v6784_v11 }
0x24f5   :  { %v13593_v22 = vpop.eup %10546 }
0x24f6   :  { %v6955_v24 = vmul.f32 %v13593_v22, %v13550_v1 }
0x24f8   :  { %10062 = vmatprep.subr.mxu1 %v6955_v24 }
0x24f9   :  { %v13597_v12 = vpop.eup %10548  ;;  %10063 = vmatpush3.msra.mxu1 %v6955_v24 }
0x24fa   :  { %v6954_v26 = vmul.f32 %v13597_v12, %v13552_v35 }
0x24fc   :  { %10064 = vmatprep.subr.mxu1 %v6954_v26 }
0x24fd   :  { %v13601_v16 = vpop.eup %10550  ;;  %10065 = vmatpush3.msra.mxu1 %v6954_v26 }
0x24fe   :  { %10067 = vmatmul.mubr.msk.f32.vlgmr.msra.gmra.mxu1 %vm558_vm0, %v13569_v33  ;;  %v6957_v14 = vmul.f32 %v13601_v16, %v13557_v59 }
0x24ff   :  { %10073 = vmatprep.mubr.msk.f32.mxu1 %vm558_vm0, %v13574_v30 }
0x2500   :  { %10069 = vmatprep.subr.mxu1 %v6957_v14 }
0x2501   :  { %v13609_v60 = vpop.eup %10552  ;;  %10070 = vmatpush3.msra.mxu1 %v6957_v14 }
0x2502   :  { %v6956_v27 = vmul.f32 %v13609_v60, %v13559_v10 }
0x2504   :  { %10071 = vmatprep.subr.mxu1 %v6956_v27 }
0x2505   :  { %10072 = vmatpush3.msra.mxu1 %v6956_v27 }
0x2506   :  { %10074 = vmatmul.mubr.msk.f32.vlgmr.msra.gmra.mxu1 %vm558_vm0, %v13581_v21  ;;  %10114 = vmatprep.subr.mxu1 %v7127_v49  ;;  %v7389_v21 = vld [vmem:[#allocation4] sm:$0xff] }
0x2507   :  { %10115 = vmatpush3.msra.mxu1 %v7127_v49 }
0x2508   :  { %10116 = vmatprep.subr.mxu1 %v7126_v18 }
0x2509   :  { %10117 = vmatpush3.msra.mxu1 %v7126_v18 }
0x250a   :  { %10118 = vmatprep.subr.mxu1 %v7125_v34 }
0x250b   :  { %10119 = vmatpush3.msra.mxu1 %v7125_v34 }
0x250c   :  { %10120 = vmatprep.subr.mxu1 %v7124_v36 }
0x250d   :  { %10121 = vmatpush3.msra.mxu1 %v7124_v36 }
0x250e   :  { %10122 = vmatprep.subr.mxu1 %v7123_v47 }
0x250f   :  { %10123 = vmatpush3.msra.mxu1 %v7123_v47 }
0x2510   :  { %10124 = vmatprep.subr.mxu1 %v7122_v32 }
0x2511   :  { %10125 = vmatpush3.msra.mxu1 %v7122_v32 }
0x2512   :  { %10126 = vmatprep.subr.mxu1 %v7121_v4 }
0x2513   :  { %10127 = vmatpush3.msra.mxu1 %v7121_v4 }
0x2514   :  { %10128 = vmatprep.subr.mxu1 %v7120_v19 }
0x2515   :  { %10129 = vmatpush3.msra.mxu1 %v7120_v19 }
0x2516   :  { %10130 = vmatprep.subr.mxu1 %v7119_v56 }
0x2517   :  { %10131 = vmatpush3.msra.mxu1 %v7119_v56 }
0x2518   :  { %10132 = vmatprep.subr.mxu1 %v7118_v40 }
0x2519   :  { %10133 = vmatpush3.msra.mxu1 %v7118_v40 }
0x251a   :  { %10134 = vmatprep.subr.mxu1 %v7117_v42 }
0x251b   :  { %10135 = vmatpush3.msra.mxu1 %v7117_v42 }
0x251c   :  { %10136 = vmatprep.subr.mxu1 %v7116_v29 }
0x251d   :  { %10137 = vmatpush3.msra.mxu1 %v7116_v29 }
0x251e   :  { %v10054_v25 = vpop.f32.mrf.mxu1  ;;  %10138 = vmatprep.subr.mxu1 %v7115_v39 }
0x251f   :  { %10139 = vmatpush3.msra.mxu1 %v7115_v39 }
0x2520   :  { %v6864_v45 = vpop.f32.mrf.mxu1  ;;  %10140 = vmatprep.subr.mxu1 %v7114_v62 }
0x2521   :  { %10141 = vmatpush3.msra.mxu1 %v7114_v62  ;;  %10146 = vmatprep.mubr.f32.mxu1 %v6864_v45 }
0x2522   :  { %v10061_v20 = vpop.f32.mrf.mxu1  ;;  %10142 = vmatprep.subr.mxu1 %v7113_v6 }
0x2523   :  { %10143 = vmatpush3.msra.mxu1 %v7113_v6 }
0x2524   :  { %10144 = vmatprep.subr.mxu1 %v7112_v3  ;;  %v6945_v5 = vpop.f32.mrf.mxu1 }
0x2525   :  { %10145 = vmatpush3.msra.mxu1 %v7112_v3 }
0x2526   :  { %10147 = vmatmul.mubr.f32.vlgmr.msra.gmra.mxu1 %v10054_v25 }
0x2527   :  { %10149 = vmatprep.mubr.f32.mxu1 %v6945_v5  ;;  %v8056_v5 = vld [vmem:[#allocation45] ss:$0 sm:$0xff] }
0x252a   :  { %10150 = vmatmul.mubr.f32.gmra.mxu1 %v10061_v20 }
0x252b   :  { %10184 = vmatprep.mubr.f32.mxu1 %v7389_v21 }
0x25be   :  { %v10068_v15 = vpop.f32.mrf.mxu1 }
0x25bf   :  { %v7109_v33 = vmul.f32 %v13593_v22, %v10068_v15 }
0x25c0   :  { %v7024_v51 = vpop.f32.mrf.mxu1 }
0x25c1   :  { %v7108_v38 = vmul.f32 %v13597_v12, %v7024_v51  ;;  %v8057_v51 = vld [vmem:[#allocation47] ss:$0 sm:$0xff] }
0x25c3   :  { %10108 = vmatprep.mubr.f32.mxu0 %v7108_v38 }
0x25c4   :  { %10109 = vmatmul.mubr.f32.vlgmr.msra.gmra.mxu0 %v7109_v33 }
0x25c6   :  { %v10075_v61 = vpop.f32.mrf.mxu1 }
0x25c7   :  { %v7111_v30 = vmul.f32 %v13601_v16, %v10075_v61 }
0x25c8   :  { %v7099_v31 = vpop.f32.mrf.mxu1 }
0x25c9   :  { %v7110_v41 = vmul.f32 %v13609_v60, %v7099_v31 }
0x25cb   :  { %10111 = vmatprep.mubr.f32.mxu0 %v7110_v41 }
0x25cc   :  { %10112 = vmatmul.mubr.f32.gmra.mxu0 %v7111_v30 }
0x25cd   :  { %10156 = vmatprep.mubr.f32.mxu0 %v7389_v21 }
0x25e6   :  { %v10148_v50 = vpop.f32.mrf.mxu1 }
0x25e8   :  { %v7295_v55 = vpop.f32.mrf.mxu1 }
0x25ea   :  { %v10151_v7 = vpop.f32.mrf.mxu1 }
0x25ec   :  { %v7305_v48 = vpop.f32.mrf.mxu1 }
0x2684   :  { %v10110_v28 = vpop.f32.mrf.mxu0 }
0x2685   :  { %v7301_v53 = vadd.f32 %v10148_v50, %v10110_v28 }
0x2686   :  { %v7210_v43 = vpop.f32.mrf.mxu0 }
0x2687   :  { %v7296_v13 = vadd.f32 %v7295_v55, %v7210_v43  ;;  %v7322_v46 = vadd.f32 %v8055_v0, %v7301_v53 }
0x2689   :  { %v7321_v57 = vadd.f32 %v8055_v0, %v7296_v13 }
0x268b   :  { %v7327_v63 = vadd.f32 %v7322_v46, %v7321_v57 }
0x268c   :  { %v10113_v9 = vpop.f32.mrf.mxu0 }
0x268d   :  { %v7311_v37 = vadd.f32 %v10151_v7, %v10113_v9 }
0x268e   :  { %v7220_v44 = vpop.f32.mrf.mxu0 }
0x268f   :  { %v7306_v2 = vadd.f32 %v7305_v48, %v7220_v44  ;;  %v7324_v17 = vadd.f32 %v8055_v0, %v7311_v37  ;;  %v7391_v48 = vld [vmem:[#allocation4 + $0x10] sm:$0xff]  ;;  %v7396_v44 = vld [vmem:[#allocation4 + $0x38] sm:$0xff]  ;;  %v7398_v37 = vld [vmem:[#allocation4 + $0x48] sm:$0xff] }
0x2691   :  { %v7323_v52 = vadd.f32 %v8055_v0, %v7306_v2  ;;  %v7399_v2 = vld [vmem:[#allocation4 + $0x50] sm:$0xff] }
0x2693   :  { %v7328_v54 = vadd.f32 %v7327_v63, %v7323_v52  ;;  %v7400_v63 = vld [vmem:[#allocation4 + $0x58] sm:$0xff] }
0x2695   :  { %v7329_v11 = vadd.f32 %v7328_v54, %v7324_v17  ;;  %v7403_v54 = vld [vmem:[#allocation4 + $0x70] sm:$0xff] }
0x2697   :  { %v7330_v22 = vrot.slane %v7329_v11, 4 }
0x2699   :  { %v7331_v24 = vadd.f32 %v7330_v22, %v7329_v11  ;;  %v7404_v11 = vld [vmem:[#allocation4 + $0x78] sm:$0xff] }
0x269b   :  { %v7332_v12 = vrot.slane %v7331_v24, 2 }
0x269d   :  { %v7333_v26 = vadd.f32 %v7332_v12, %v7331_v24 }
0x269f   :  { %v7334_v16 = vrot.slane %v7333_v26, 1 }
0x26a1   :  { %v7335_v14 = vadd.f32 %v7334_v16, %v7333_v26 }
0x26a3   :  { %v7336_v60 = vmul.f32 0.03125, %v7335_v14 }
0x26a5   :  { %v7337_v27 = vsub.f32 %v7321_v57, %v7336_v60  ;;  %v7338_v49 = vsub.f32 %v7322_v46, %v7336_v60  ;;  %v7339_v18 = vsub.f32 %v7323_v52, %v7336_v60  ;;  %v7340_v34 = vsub.f32 %v7324_v17, %v7336_v60  ;;  %v7390_v57 = vld [vmem:[#allocation4 + $0x8] sm:$0xff]  ;;  %v7397_v46 = vld [vmem:[#allocation4 + $0x40] sm:$0xff] }
0x26a6   :  { %v7401_v52 = vld [vmem:[#allocation4 + $0x60] sm:$0xff]  ;;  %v7402_v17 = vld [vmem:[#allocation4 + $0x68] sm:$0xff] }
0x26a7   :  { %v7341_v36 = vmul.f32 %v7337_v27, %v7337_v27  ;;  %v7342_v47 = vmul.f32 %v7338_v49, %v7338_v49  ;;  %v7343_v32 = vmul.f32 %v7339_v18, %v7339_v18  ;;  %v7344_v19 = vmul.f32 %v7340_v34, %v7340_v34 }
0x26a9   :  { %v7345_v4 = vadd.f32 %v7342_v47, %v7341_v36 }
0x26ab   :  { %v7346_v56 = vadd.f32 %v7345_v4, %v7343_v32 }
0x26ad   :  { %v7347_v40 = vadd.f32 %v7346_v56, %v7344_v19 }
0x26af   :  { %v7348_v42 = vrot.slane %v7347_v40, 4 }
0x26b1   :  { %v7349_v29 = vadd.f32 %v7348_v42, %v7347_v40 }
0x26b3   :  { %v7350_v39 = vrot.slane %v7349_v29, 2 }
0x26b5   :  { %v7351_v62 = vadd.f32 %v7350_v39, %v7349_v29 }
0x26b7   :  { %v7352_v25 = vrot.slane %v7351_v62, 1 }
0x26b9   :  { %v7353_v6 = vadd.f32 %v7352_v25, %v7351_v62 }
0x26bb   :  { %v7354_v45 = vmul.f32 0.03125, %v7353_v6 }
0x26bd   :  { %v7355_v3 = vadd.f32 1e-05, %v7354_v45 }
0x26bf   :  { %10554 = vrsqrt.f32 %v7355_v3 }
0x26cc   :  { %v10555_v20 = vpop.eup %10554 }
0x26cd   :  { %v7359_v58 = vmul.f32 %v10555_v20, %v7339_v18  ;;  %v7358_v8 = vmul.f32 %v10555_v20, %v7338_v49  ;;  %v7360_v23 = vmul.f32 %v10555_v20, %v7340_v34  ;;  %v7357_v15 = vmul.f32 %v10555_v20, %v7337_v27 }
0x26cf   :  { %v7368_v38 = vmul.f32 %v8056_v5, %v7358_v8  ;;  %v7370_v33 = vmul.f32 %v8056_v5, %v7360_v23  ;;  %v7367_v61 = vmul.f32 %v8056_v5, %v7357_v15  ;;  %v7369_v31 = vmul.f32 %v8056_v5, %v7359_v58 }
0x26d1   :  { %v7378_v41 = vadd.f32 %v8057_v51, %v7368_v38  ;;  %v7380_v30 = vadd.f32 %v8057_v51, %v7370_v33  ;;  %v7377_v21 = vadd.f32 %v8057_v51, %v7367_v61  ;;  %v7379_v50 = vadd.f32 %v8057_v51, %v7369_v31 }
0x26d3   :  { %v7382_v28 = vmax.f32 %v7378_v41, 0.0  ;;  %v7384_v55 = vmax.f32 %v7380_v30, 0.0  ;;  %v7381_v43 = vmax.f32 %v7377_v21, 0.0  ;;  %v7383_v13 = vmax.f32 %v7379_v50, 0.0 }
0x26d5   :  { %v7386_v7 = vadd.f32 %v7382_v28, %v13550_v1  ;;  %v7388_v53 = vadd.f32 %v7384_v55, %v13557_v59  ;;  %v7385_v0 = vadd.f32 %v7381_v43, %v13552_v35  ;;  %v7387_v9 = vadd.f32 %v7383_v13, %v13559_v10  ;;  %v7392_v1 = vld [vmem:[#allocation4 + $0x18] sm:$0xff]  ;;  %v7393_v59 = vld [vmem:[#allocation4 + $0x20] sm:$0xff]  ;;  %v7394_v35 = vld [vmem:[#allocation4 + $0x28] sm:$0xff] }
0x26d6   :  { %v7395_v10 = vld [vmem:[#allocation4 + $0x30] sm:$0xff] }
0x26d7   :  { %10152 = vmatprep.subr.mxu0 %v7386_v7  ;;  %10180 = vmatprep.subr.mxu1 %v7388_v53 }
0x26d8   :  { %10153 = vmatpush3.xpose.msra.mxu0 %v7386_v7  ;;  %10181 = vmatpush3.xpose.msra.mxu1 %v7388_v53 }
0x26d9   :  { %10154 = vmatprep.subr.mxu0 %v7385_v0  ;;  %10182 = vmatprep.subr.mxu1 %v7387_v9 }
0x26dc   :  { %10155 = vmatpush3.xpose.msra.mxu0 %v7385_v0  ;;  %10183 = vmatpush3.xpose.msra.mxu1 %v7387_v9 }
0x26df   :  { %10157 = vmatmul.mubr.f32.vlgmr.msra.gmra.mxu0 %v7390_v57  ;;  %10185 = vmatmul.mubr.f32.vlgmr.msra.gmra.mxu1 %v7390_v57 }
0x26e0   :  { %10159 = vmatprep.mubr.f32.mxu0 %v7391_v48  ;;  %10187 = vmatprep.mubr.f32.mxu1 %v7391_v48 }
0x26e3   :  { %10160 = vmatmul.mubr.f32.gmra.mxu0 %v7392_v1  ;;  %10188 = vmatmul.mubr.f32.gmra.mxu1 %v7392_v1 }
0x26e4   :  { %10162 = vmatprep.mubr.f32.mxu0 %v7393_v59  ;;  %10190 = vmatprep.mubr.f32.mxu1 %v7393_v59 }
0x26e7   :  { %10163 = vmatmul.mubr.f32.gmra.mxu0 %v7394_v35  ;;  %10191 = vmatmul.mubr.f32.gmra.mxu1 %v7394_v35 }
0x26e8   :  { %10165 = vmatprep.mubr.f32.mxu0 %v7395_v10  ;;  %10193 = vmatprep.mubr.f32.mxu1 %v7395_v10 }
0x26eb   :  { %10166 = vmatmul.mubr.f32.gmra.mxu0 %v7396_v44  ;;  %10194 = vmatmul.mubr.f32.gmra.mxu1 %v7396_v44 }
0x26ec   :  { %10168 = vmatprep.mubr.f32.mxu0 %v7397_v46  ;;  %10196 = vmatprep.mubr.f32.mxu1 %v7397_v46 }
0x26ef   :  { %10169 = vmatmul.mubr.f32.gmra.mxu0 %v7398_v37  ;;  %10197 = vmatmul.mubr.f32.gmra.mxu1 %v7398_v37 }
0x26f0   :  { %10171 = vmatprep.mubr.f32.mxu0 %v7399_v2  ;;  %10199 = vmatprep.mubr.f32.mxu1 %v7399_v2 }
0x26f3   :  { %10172 = vmatmul.mubr.f32.gmra.mxu0 %v7400_v63  ;;  %10200 = vmatmul.mubr.f32.gmra.mxu1 %v7400_v63 }
0x26f4   :  { %10174 = vmatprep.mubr.f32.mxu0 %v7401_v52  ;;  %10202 = vmatprep.mubr.f32.mxu1 %v7401_v52 }
0x26f7   :  { %10175 = vmatmul.mubr.f32.gmra.mxu0 %v7402_v17  ;;  %10203 = vmatmul.mubr.f32.gmra.mxu1 %v7402_v17 }
0x26f8   :  { %10177 = vmatprep.mubr.f32.mxu0 %v7403_v54  ;;  %10205 = vmatprep.mubr.f32.mxu1 %v7403_v54 }
0x26fb   :  { %10178 = vmatmul.mubr.f32.gmra.mxu0 %v7404_v11  ;;  %10206 = vmatmul.mubr.f32.gmra.mxu1 %v7404_v11 }
0x279f   :  { %v10158_v22 = vpop.f32.mrf.mxu0  ;;  %v10186_v24 = vpop.f32.mrf.mxu1 }
0x27a0   :  { %7551 = vst.msk [vmem:[%s11456_s13 + $0x8] sm:$0xff] %vm558_vm0, %v10158_v22  ;;  %8059 = vst.msk [vmem:[%s11456_s13 + $0x88] sm:$0xff] %vm558_vm0, %v10186_v24 }
0x27a1   :  { %v7471_v12 = vpop.f32.mrf.mxu0  ;;  %v7632_v26 = vpop.f32.mrf.mxu1 }
0x27a2   :  { %7550 = vst.msk [vmem:[%s11456_s13] sm:$0xff] %vm558_vm0, %v7471_v12  ;;  %8058 = vst.msk [vmem:[%s11456_s13 + $0x80] sm:$0xff] %vm558_vm0, %v7632_v26 }
0x27a3   :  { %v10161_v16 = vpop.f32.mrf.mxu0  ;;  %v10189_v14 = vpop.f32.mrf.mxu1 }
0x27a4   :  { %7553 = vst.msk [vmem:[%s11456_s13 + $0x18] sm:$0xff] %vm558_vm0, %v10161_v16  ;;  %8061 = vst.msk [vmem:[%s11456_s13 + $0x98] sm:$0xff] %vm558_vm0, %v10189_v14 }
0x27a5   :  { %v7481_v60 = vpop.f32.mrf.mxu0  ;;  %v7642_v27 = vpop.f32.mrf.mxu1 }
0x27a6   :  { %7552 = vst.msk [vmem:[%s11456_s13 + $0x10] sm:$0xff] %vm558_vm0, %v7481_v60  ;;  %8060 = vst.msk [vmem:[%s11456_s13 + $0x90] sm:$0xff] %vm558_vm0, %v7642_v27 }
0x27a7   :  { %v10164_v49 = vpop.f32.mrf.mxu0  ;;  %v10192_v18 = vpop.f32.mrf.mxu1 }
0x27a8   :  { %7555 = vst.msk [vmem:[%s11456_s13 + $0x28] sm:$0xff] %vm558_vm0, %v10164_v49  ;;  %8063 = vst.msk [vmem:[%s11456_s13 + $0xa8] sm:$0xff] %vm558_vm0, %v10192_v18 }
0x27a9   :  { %v7491_v34 = vpop.f32.mrf.mxu0  ;;  %v7652_v36 = vpop.f32.mrf.mxu1 }
0x27aa   :  { %7554 = vst.msk [vmem:[%s11456_s13 + $0x20] sm:$0xff] %vm558_vm0, %v7491_v34  ;;  %8062 = vst.msk [vmem:[%s11456_s13 + $0xa0] sm:$0xff] %vm558_vm0, %v7652_v36 }
0x27ab   :  { %v10167_v47 = vpop.f32.mrf.mxu0  ;;  %v10195_v32 = vpop.f32.mrf.mxu1 }
0x27ac   :  { %7557 = vst.msk [vmem:[%s11456_s13 + $0x38] sm:$0xff] %vm558_vm0, %v10167_v47  ;;  %8065 = vst.msk [vmem:[%s11456_s13 + $0xb8] sm:$0xff] %vm558_vm0, %v10195_v32 }
0x27ad   :  { %v7501_v4 = vpop.f32.mrf.mxu0  ;;  %v7662_v19 = vpop.f32.mrf.mxu1 }
0x27ae   :  { %7556 = vst.msk [vmem:[%s11456_s13 + $0x30] sm:$0xff] %vm558_vm0, %v7501_v4  ;;  %8064 = vst.msk [vmem:[%s11456_s13 + $0xb0] sm:$0xff] %vm558_vm0, %v7662_v19 }
0x27af   :  { %v10170_v56 = vpop.f32.mrf.mxu0  ;;  %v10198_v40 = vpop.f32.mrf.mxu1 }
0x27b0   :  { %7559 = vst.msk [vmem:[%s11456_s13 + $0x48] sm:$0xff] %vm558_vm0, %v10170_v56  ;;  %8067 = vst.msk [vmem:[%s11456_s13 + $0xc8] sm:$0xff] %vm558_vm0, %v10198_v40 }
0x27b1   :  { %v7511_v42 = vpop.f32.mrf.mxu0  ;;  %v7672_v29 = vpop.f32.mrf.mxu1 }
0x27b2   :  { %7558 = vst.msk [vmem:[%s11456_s13 + $0x40] sm:$0xff] %vm558_vm0, %v7511_v42  ;;  %8066 = vst.msk [vmem:[%s11456_s13 + $0xc0] sm:$0xff] %vm558_vm0, %v7672_v29 }
0x27b3   :  { %v10173_v39 = vpop.f32.mrf.mxu0  ;;  %v10201_v62 = vpop.f32.mrf.mxu1 }
0x27b4   :  { %7561 = vst.msk [vmem:[%s11456_s13 + $0x58] sm:$0xff] %vm558_vm0, %v10173_v39  ;;  %8069 = vst.msk [vmem:[%s11456_s13 + $0xd8] sm:$0xff] %vm558_vm0, %v10201_v62 }
0x27b5   :  { %v7521_v25 = vpop.f32.mrf.mxu0  ;;  %v7682_v6 = vpop.f32.mrf.mxu1 }
0x27b6   :  { %7560 = vst.msk [vmem:[%s11456_s13 + $0x50] sm:$0xff] %vm558_vm0, %v7521_v25  ;;  %8068 = vst.msk [vmem:[%s11456_s13 + $0xd0] sm:$0xff] %vm558_vm0, %v7682_v6 }
0x27b7   :  { %v10176_v45 = vpop.f32.mrf.mxu0  ;;  %v10204_v3 = vpop.f32.mrf.mxu1 }
0x27b8   :  { %7563 = vst.msk [vmem:[%s11456_s13 + $0x68] sm:$0xff] %vm558_vm0, %v10176_v45  ;;  %8071 = vst.msk [vmem:[%s11456_s13 + $0xe8] sm:$0xff] %vm558_vm0, %v10204_v3 }
0x27b9   :  { %v7531_v20 = vpop.f32.mrf.mxu0  ;;  %v7692_v5 = vpop.f32.mrf.mxu1 }
0x27ba   :  { %7562 = vst.msk [vmem:[%s11456_s13 + $0x60] sm:$0xff] %vm558_vm0, %v7531_v20  ;;  %8070 = vst.msk [vmem:[%s11456_s13 + $0xe0] sm:$0xff] %vm558_vm0, %v7692_v5 }
0x27bb   :  { %v10179_v58 = vpop.f32.mrf.mxu0  ;;  %v10207_v8 = vpop.f32.mrf.mxu1 }
0x27bc   :  { %7565 = vst.msk [vmem:[%s11456_s13 + $0x78] sm:$0xff] %vm558_vm0, %v10179_v58  ;;  %8073 = vst.msk [vmem:[%s11456_s13 + $0xf8] sm:$0xff] %vm558_vm0, %v10207_v8 }
0x27bd   :  { %v7541_v23 = vpop.f32.mrf.mxu0  ;;  %v7702_v15 = vpop.f32.mrf.mxu1 }
0x27be   :  { %7564 = vst.msk [vmem:[%s11456_s13 + $0x70] sm:$0xff] %vm558_vm0, %v7541_v23  ;;  %8072 = vst.msk [vmem:[%s11456_s13 + $0xf0] sm:$0xff] %vm558_vm0, %v7702_v15 }
0x27bf   :  { %7732 = vsyncpa [#allocation5], 1 }
0x27c0   :  { %7733 = vsyncpa [#allocation7], 1 }
0x27c1   :  { %7734 = vsyncpa [#allocation10], 1 }
0x27c2   :  { %7735 = vsyncpa [#allocation13], 1 }
0x27c3   :  { %7736 = vsyncpa [#allocation16], 1 }
0x27c4   :  { %7737 = vsyncpa [#allocation19], 1 }
0x27c5   :  { %7738 = vsyncpa [#allocation22], 1 }
0x27c6   :  { %7739 = vsyncpa [#allocation25], 1 }
0x27c7   :  { %7740 = vsyncpa [#allocation28], 1 }
0x27c8   :  { %7741 = vsyncpa [#allocation31], 1 }
0x27c9   :  { %7742 = vsyncpa [#allocation34], 1 }
0x27ca   :  { %7743 = vsyncpa [#allocation37], 1 }
0x27cb   :  { %7744 = vsyncpa [#allocation40], 1 }
0x27cc   :  { %7745 = vsyncpa [#allocation43], 1 }
0x27cd   :  { %7746 = vsyncpa [#allocation46], 1 }

</bundles_post_ra>
